<compile_context>
chip_gen: v5e
topology: v5e:2x2
jax: 0.10.0
libtpu: 0.0.40
codegen_flags: <defaults>
</compile_context>

<pallas_src>
from functools import partial

import jax
import jax.numpy as jnp
from jax import lax
from jax.experimental import pallas as pl
from jax.experimental.pallas import tpu as pltpu


def _cdiv(a, b):
    return -(-a // b)


def _solve4_sym(a00, a11, a02, a03, a12, a13, a22, a23, a33, b0, b1, b2, b3):
    """4x4 SPD solve, exploiting symmetry and the structural zero A[0][1] == 0.

    Symmetric Gaussian elimination (LDL^T-style); pivot reciprocals are cached and reused
    in back-substitution (4 divides instead of 8). Entries are (B, 1) arrays so the solve
    vectorizes over the object sublanes.
    """
    # k = 0 : A[1][0] == 0 structurally -> row 1 untouched.
    inv0 = 1.0 / a00
    f20 = a02 * inv0
    f30 = a03 * inv0
    a22 = a22 - f20 * a02
    a23 = a23 - f20 * a03          # equals A[3][2] too (symmetric elimination)
    a33 = a33 - f30 * a03
    b2 = b2 - f20 * b0
    b3 = b3 - f30 * b0
    # k = 1
    inv1 = 1.0 / a11
    f21 = a12 * inv1
    f31 = a13 * inv1
    a22 = a22 - f21 * a12
    a23 = a23 - f21 * a13
    a33 = a33 - f31 * a13
    b2 = b2 - f21 * b1
    b3 = b3 - f31 * b1
    # k = 2
    inv2 = 1.0 / a22
    f32 = a23 * inv2
    a33 = a33 - f32 * a23
    b3 = b3 - f32 * b2
    # Back substitution, reusing cached pivot reciprocals.
    inv3 = 1.0 / a33
    x3 = b3 * inv3
    x2 = (b2 - a23 * x3) * inv2
    x1 = (b1 - a12 * x2 - a13 * x3) * inv1
    x0 = (b0 - a02 * x2 - a03 * x3) * inv0     # U[0][1] == 0
    return x0, x1, x2, x3


def lm_kernel(x3d_ref, x2d_ref, w2d_ref, pose_ref, out_ref, *,
              num_iter, eps, z_min, groups_per_step):
    # Block shapes: x3d (Gb, 3, B, Np), x2d/w2d (Gb, 2, B, Np), pose/out (Gb, B, 4).
    # Objects on sublanes, padded points on lanes.

    def rsum(x):                                   # lane reduce -> (B, 1)
        return jnp.sum(x, axis=-1, keepdims=True)

    def process_group(g):
        x3d = x3d_ref[g]                           # (3, B, Np)
        x2d = x2d_ref[g]                           # (2, B, Np) normalized targets
        w2d = w2d_ref[g]                           # (2, B, Np) weights (0 in padding)
        X, Y, Z = x3d[0], x3d[1], x3d[2]
        u_t, v_t = x2d[0], x2d[1]
        w_u, w_v = w2d[0], w2d[1]

        p = pose_ref[g]                            # (B, 4)
        pose0 = (p[:, 0:1], p[:, 1:2], p[:, 2:3], p[:, 3:4])

        def body(_, pose):
            tx, ty, tz, yaw = pose                 # (B, 1) each
            c = jnp.cos(yaw)
            s = jnp.sin(yaw)

            # Rotate (about Y axis) + translate.
            Xc = c * X + s * Z + tx
            Yc = Y + ty
            Zc = -s * X + c * Z + tz
            Zcl = jnp.maximum(Zc, z_min)
            inv_z = pl.reciprocal(Zcl, approx=True)    # EUP rcp (self-correcting LM iterations)
            inv_z2 = inv_z * inv_z

            # Weighted residual (normalized camera coords).
            r_u = w_u * (Xc * inv_z - u_t)
            r_v = w_v * (Yc * inv_z - v_t)

            # d(Xc, Zc)/d(yaw)
            dXc_dyaw = Zc - tz                     # = -s*X + c*Z
            dZc_dyaw = tx - Xc                     # = -(c*X + s*Z)

            # Weighted jacobian columns; dU/dty == 0 and dV/dtx == 0 folded away.
            Ju0 = w_u * inv_z
            Ju2 = -w_u * Xc * inv_z2
            Ju3 = w_u * (dXc_dyaw * inv_z - Xc * inv_z2 * dZc_dyaw)
            Jv1 = w_v * inv_z
            Jv2 = -w_v * Yc * inv_z2
            Jv3 = Jv2 * dZc_dyaw

            # jtj (symmetric, A[0][1] == 0) + eps*I, and gradient; (B, 1) per entry.
            a00 = rsum(Ju0 * Ju0) + eps
            a02 = rsum(Ju0 * Ju2)
            a03 = rsum(Ju0 * Ju3)
            a11 = rsum(Jv1 * Jv1) + eps
            a12 = rsum(Jv1 * Jv2)
            a13 = rsum(Jv1 * Jv3)
            a22 = rsum(Ju2 * Ju2 + Jv2 * Jv2) + eps
            a23 = rsum(Ju2 * Ju3 + Jv2 * Jv3)
            a33 = rsum(Ju3 * Ju3 + Jv3 * Jv3) + eps
            g0 = rsum(Ju0 * r_u)
            g1 = rsum(Jv1 * r_v)
            g2 = rsum(Ju2 * r_u + Jv2 * r_v)
            g3 = rsum(Ju3 * r_u + Jv3 * r_v)

            s0, s1, s2, s3 = _solve4_sym(a00, a11, a02, a03, a12, a13,
                                         a22, a23, a33, g0, g1, g2, g3)
            return (tx - s0, ty - s1, tz - s2, yaw - s3)

        # Fixed short trip-count: fully unroll for the LLO scheduler.
        tx, ty, tz, yaw = lax.fori_loop(0, num_iter, body, pose0, unroll=True)
        out_ref[g] = jnp.concatenate([tx, ty, tz, yaw], axis=-1).astype(out_ref.dtype)

    if groups_per_step == 1:
        process_group(0)                           # fully static indexing
    else:
        # Rolled loop over independent object groups: amortizes per-grid-step overhead
        # while keeping per-group live ranges (and vreg pressure) bounded.
        @pl.loop(0, groups_per_step)
        def _(g):
            process_group(g)


def lm_solver_forward(x3d, x2d, w2d, cam_fxfycxcy, pose_init,
                      num_iter=10, eps=1e-5, z_min=0.1):
    """x3d: (num_obj, num_pts, 3), x2d/w2d: (num_obj, num_pts, 2) in pixels,
    cam_fxfycxcy: (num_obj, 4), pose_init: (num_obj, 4). Returns (num_obj, 4)."""
    num_obj, N, _ = x3d.shape
    out_dtype = pose_init.dtype
    if num_obj == 0:
        return jnp.zeros((0, 4), out_dtype)

    # Fold intrinsics into targets/weights (normalized camera coords). Under jax.jit this
    # fuses with the pad / reshape / transpose below into one HBM pass.
    f = cam_fxfycxcy[:, None, 0:2].astype(jnp.float32)
    ctr = cam_fxfycxcy[:, None, 2:4].astype(jnp.float32)
    x2d_n = (x2d.astype(jnp.float32) - ctr) / f
    w2d_n = w2d.astype(jnp.float32) * f

    # ----- tiling heuristics ------------------------------------------------------------
    Np = _cdiv(N, 128) * 128                    # lane-dense point axis
    lane_vregs = Np // 128
    if num_obj <= 8:
        # Fill the sublane dim with all objects; one grid step (no point splitting a tiny
        # problem across steps / TensorCores).
        B, Gb = num_obj, 1
    else:
        # Sublane groups of 8; allow B=16 when the point axis is one lane-vreg wide so the
        # unrolled LM loop's live set stays under ~60 vregs (v5e spill guard).
        B = 16 if lane_vregs <= 1 else 8
        G = _cdiv(num_obj, B)
        # Batch several B-groups per grid step to amortize the ~600-cycle step overhead,
        # but keep >= 2 grid steps so v7x's 2 TensorCores both get work.
        Gb = 1 if G == 1 else min(4, _cdiv(G, 2))
    grid = _cdiv(_cdiv(num_obj, B), Gb)
    num_obj_p = grid * Gb * B

    obj_pad = num_obj_p - num_obj
    n_pad = Np - N

    def pad_pts(a):
        return jnp.pad(a.astype(jnp.float32), ((0, obj_pad), (0, n_pad), (0, 0)))

    x3d_p = pad_pts(x3d)
    x2d_p = pad_pts(x2d_n)
    w2d_p = pad_pts(w2d_n)                      # padded points / padded objects get zero weight
    pose_p = jnp.pad(pose_init.astype(jnp.float32), ((0, obj_pad), (0, 0)))

    # Layout: (grid*Gb, channel, B, Np) — objects on sublanes, points on lanes.
    x3d_t = x3d_p.reshape(grid * Gb, B, Np, 3).transpose(0, 3, 1, 2)
    x2d_t = x2d_p.reshape(grid * Gb, B, Np, 2).transpose(0, 3, 1, 2)
    w2d_t = w2d_p.reshape(grid * Gb, B, Np, 2).transpose(0, 3, 1, 2)
    pose0 = pose_p.reshape(grid * Gb, B, 4)

    kernel = partial(lm_kernel, num_iter=num_iter, eps=eps, z_min=z_min,
                     groups_per_step=Gb)
    out = pl.pallas_call(
        kernel,
        out_shape=jax.ShapeDtypeStruct((grid * Gb, B, 4), jnp.float32),
        grid_spec=pltpu.PrefetchScalarGridSpec(
            num_scalar_prefetch=0,
            grid=(grid,),
            in_specs=[
                pl.BlockSpec((Gb, 3, B, Np), lambda i: (i, 0, 0, 0)),
                pl.BlockSpec((Gb, 2, B, Np), lambda i: (i, 0, 0, 0)),
                pl.BlockSpec((Gb, 2, B, Np), lambda i: (i, 0, 0, 0)),
                pl.BlockSpec((Gb, B, 4), lambda i: (i, 0, 0)),
            ],
            out_specs=pl.BlockSpec((Gb, B, 4), lambda i: (i, 0, 0)),
        ),
        compiler_params=pltpu.CompilerParams(
            dimension_semantics=("parallel",)),
    )(x3d_t, x2d_t, w2d_t, pose0)
    return out.reshape(num_obj_p, 4)[:num_obj].astype(out_dtype)


# ---------------- pure-JAX reference (pixel-space, mirrors torch semantics) -------------
def _project_pixels(x3d, pose, cam, z_min=0.1):
    tx, ty, tz, yaw = pose[:, 0:1], pose[:, 1:2], pose[:, 2:3], pose[:, 3:4]
    c, s = jnp.cos(yaw), jnp.sin(yaw)
    X, Y, Z = x3d[..., 0], x3d[..., 1], x3d[..., 2]
    Xc = c * X + s * Z + tx
    Yc = Y + ty
    Zc = jnp.maximum(-s * X + c * Z + tz, z_min)
    fx, fy, cx, cy = cam[:, 0:1], cam[:, 1:2], cam[:, 2:3], cam[:, 3:4]
    return jnp.stack([fx * Xc / Zc + cx, fy * Yc / Zc + cy], axis=-1)


def lm_reference(x3d, x2d, w2d, cam, pose_init, num_iter=10, eps=1e-5, z_min=0.1):
    fx, fy = cam[:, 0:1], cam[:, 1:2]
    cx, cy = cam[:, 2:3], cam[:, 3:4]
    pose = pose_init
    X, Y, Z = x3d[..., 0], x3d[..., 1], x3d[..., 2]
    wu, wv = w2d[..., 0], w2d[..., 1]
    for _ in range(num_iter):
        tx, ty, tz, yaw = pose[:, 0:1], pose[:, 1:2], pose[:, 2:3], pose[:, 3:4]
        c, s = jnp.cos(yaw), jnp.sin(yaw)
        Xc = c * X + s * Z + tx
        Yc = Y + ty
        Zc = -s * X + c * Z + tz
        Zcl = jnp.maximum(Zc, z_min)
        inv_z = 1.0 / Zcl
        inv_z2 = inv_z * inv_z
        u = fx * Xc * inv_z + cx
        v = fy * Yc * inv_z + cy
        ru = wu * (u - x2d[..., 0])
        rv = wv * (v - x2d[..., 1])
        dXdyaw = Zc - tz
        dZdyaw = -(Xc - tx)
        Ju = jnp.stack([fx * inv_z, jnp.zeros_like(inv_z), -fx * Xc * inv_z2,
                        fx * (dXdyaw * inv_z - Xc * inv_z2 * dZdyaw)], axis=-1) * wu[..., None]
        Jv = jnp.stack([jnp.zeros_like(inv_z), fy * inv_z, -fy * Yc * inv_z2,
                        -fy * Yc * inv_z2 * dZdyaw], axis=-1) * wv[..., None]
        J = jnp.concatenate([Ju, Jv], axis=1)
        r = jnp.concatenate([ru, rv], axis=1)
        jtj = jnp.einsum('bpi,bpj->bij', J, J) + eps * jnp.eye(4, dtype=J.dtype)
        g = jnp.einsum('bpi,bp->bi', J, r)
        step = jnp.linalg.solve(jtj, g[..., None])[..., 0]
        pose = pose - step
    return pose


if __name__ == "__main__":
    key = jax.random.PRNGKey(0)
    solve = jax.jit(partial(lm_solver_forward, num_iter=10, eps=1e-5, z_min=0.1))

    def make_case(case_key, num_obj, num_pts):
        ks = jax.random.split(case_key, 9)
        x3d = jax.random.uniform(ks[0], (num_obj, num_pts, 3), jnp.float32, -1.0, 1.0)
        foc = jax.random.uniform(ks[1], (num_obj, 2), jnp.float32, 450.0, 550.0)
        ctr = jax.random.uniform(ks[2], (num_obj, 2), jnp.float32, 110.0, 140.0)
        cam = jnp.concatenate([foc, ctr], axis=-1)
        gt = jnp.concatenate([
            jax.random.uniform(ks[3], (num_obj, 2), jnp.float32, -0.3, 0.3),   # tx, ty
            jax.random.uniform(ks[4], (num_obj, 1), jnp.float32, 4.5, 6.5),    # tz
            jax.random.uniform(ks[5], (num_obj, 1), jnp.float32, -0.4, 0.4),   # yaw
        ], axis=-1)
        x2d = _project_pixels(x3d, gt, cam) + \
            0.5 * jax.random.normal(ks[6], (num_obj, num_pts, 2), jnp.float32)
        w2d = jax.random.uniform(ks[7], (num_obj, num_pts, 2), jnp.float32, 0.5, 1.5) / num_pts
        pert = jnp.concatenate([
            jax.random.uniform(ks[8], (num_obj, 2), jnp.float32, -0.2, 0.2),
            jax.random.uniform(ks[0], (num_obj, 1), jnp.float32, -0.6, 0.6),
            jax.random.uniform(ks[1], (num_obj, 1), jnp.float32, -0.25, 0.25),
        ], axis=-1)
        return x3d, x2d, w2d, cam, gt + pert

    cases = (("small", 4, 200),          # single grid step, B=4 (full sublane use for 4 objs)
             ("multi_group", 40, 100))   # B=16, 2 groups per step, grid=2 (exercises pl.loop)
    for name, num_obj, num_pts in cases:
        key, sub = jax.random.split(key)
        x3d, x2d, w2d, cam, pose_init = make_case(sub, num_obj, num_pts)
        pose_opt = jax.block_until_ready(solve(x3d, x2d, w2d, cam, pose_init))
        pose_ref = lm_reference(x3d, x2d, w2d, cam, pose_init, num_iter=10, eps=1e-5)
        assert bool(jnp.all(jnp.isfinite(pose_opt))), name
        assert bool(jnp.allclose(pose_opt, pose_ref, atol=1e-3, rtol=1e-3)), \
            (name, pose_opt, pose_ref)
    print("KERNEL_OK")
</pallas_src>

<mosaic_0001>
module attributes {stable_mosaic.version = 11 : i64} {
  func.func @lm_kernel(%arg0: i32, %arg1: memref<1x3x4x256xf32, #tpu.memory_space<vmem>>, %arg2: memref<1x2x4x256xf32, #tpu.memory_space<vmem>>, %arg3: memref<1x2x4x256xf32, #tpu.memory_space<vmem>>, %arg4: memref<1x4x4xf32, #tpu.memory_space<vmem>>, %arg5: memref<1x4x4xf32, #tpu.memory_space<vmem>>) attributes {dimension_semantics = [#tpu.dimension_semantics<parallel>], iteration_bounds = array<i64: 1>, scalar_prefetch = 0 : i64, scratch_operands = 0 : i64, tpu.core_type = #tpu.core_type<tc>, window_params = [{transform_indices = @transform_0, window_bounds = array<i64: 1, 3, 4, 256>}, {transform_indices = @transform_1, window_bounds = array<i64: 1, 2, 4, 256>}, {transform_indices = @transform_2, window_bounds = array<i64: 1, 2, 4, 256>}, {transform_indices = @transform_3, window_bounds = array<i64: 1, 4, 4>}, {transform_indices = @transform_4, window_bounds = array<i64: 1, 4, 4>}]} {
    %c0 = arith.constant 0 : index
    %c0_0 = arith.constant 0 : index
    %c0_1 = arith.constant 0 : index
    %c0_2 = arith.constant 0 : index
    %0 = vector.load %arg1[%c0, %c0_0, %c0_1, %c0_2] : memref<1x3x4x256xf32, #tpu.memory_space<vmem>>, vector<1x3x4x256xf32>
    %1 = vector.shape_cast %0 : vector<1x3x4x256xf32> to vector<3x4x256xf32>
    %c0_3 = arith.constant 0 : index
    %c0_4 = arith.constant 0 : index
    %c0_5 = arith.constant 0 : index
    %c0_6 = arith.constant 0 : index
    %2 = vector.load %arg2[%c0_3, %c0_4, %c0_5, %c0_6] : memref<1x2x4x256xf32, #tpu.memory_space<vmem>>, vector<1x2x4x256xf32>
    %3 = vector.shape_cast %2 : vector<1x2x4x256xf32> to vector<2x4x256xf32>
    %c0_7 = arith.constant 0 : index
    %c0_8 = arith.constant 0 : index
    %c0_9 = arith.constant 0 : index
    %c0_10 = arith.constant 0 : index
    %4 = vector.load %arg3[%c0_7, %c0_8, %c0_9, %c0_10] : memref<1x2x4x256xf32, #tpu.memory_space<vmem>>, vector<1x2x4x256xf32>
    %5 = vector.shape_cast %4 : vector<1x2x4x256xf32> to vector<2x4x256xf32>
    %6 = vector.extract_strided_slice %1 {offsets = [0, 0, 0], sizes = [1, 4, 256], strides = [1, 1, 1]} : vector<3x4x256xf32> to vector<1x4x256xf32>
    %7 = vector.shape_cast %6 : vector<1x4x256xf32> to vector<4x256xf32>
    %8 = vector.extract_strided_slice %1 {offsets = [1, 0, 0], sizes = [1, 4, 256], strides = [1, 1, 1]} : vector<3x4x256xf32> to vector<1x4x256xf32>
    %9 = vector.shape_cast %8 : vector<1x4x256xf32> to vector<4x256xf32>
    %10 = vector.extract_strided_slice %1 {offsets = [2, 0, 0], sizes = [1, 4, 256], strides = [1, 1, 1]} : vector<3x4x256xf32> to vector<1x4x256xf32>
    %11 = vector.shape_cast %10 : vector<1x4x256xf32> to vector<4x256xf32>
    %12 = vector.extract_strided_slice %3 {offsets = [0, 0, 0], sizes = [1, 4, 256], strides = [1, 1, 1]} : vector<2x4x256xf32> to vector<1x4x256xf32>
    %13 = vector.shape_cast %12 : vector<1x4x256xf32> to vector<4x256xf32>
    %14 = vector.extract_strided_slice %3 {offsets = [1, 0, 0], sizes = [1, 4, 256], strides = [1, 1, 1]} : vector<2x4x256xf32> to vector<1x4x256xf32>
    %15 = vector.shape_cast %14 : vector<1x4x256xf32> to vector<4x256xf32>
    %16 = vector.extract_strided_slice %5 {offsets = [0, 0, 0], sizes = [1, 4, 256], strides = [1, 1, 1]} : vector<2x4x256xf32> to vector<1x4x256xf32>
    %17 = vector.shape_cast %16 : vector<1x4x256xf32> to vector<4x256xf32>
    %18 = vector.extract_strided_slice %5 {offsets = [1, 0, 0], sizes = [1, 4, 256], strides = [1, 1, 1]} : vector<2x4x256xf32> to vector<1x4x256xf32>
    %19 = vector.shape_cast %18 : vector<1x4x256xf32> to vector<4x256xf32>
    %c0_11 = arith.constant 0 : index
    %c0_12 = arith.constant 0 : index
    %c0_13 = arith.constant 0 : index
    %20 = vector.load %arg4[%c0_11, %c0_12, %c0_13] : memref<1x4x4xf32, #tpu.memory_space<vmem>>, vector<1x4x4xf32>
    %21 = vector.shape_cast %20 : vector<1x4x4xf32> to vector<4x4xf32>
    %22 = vector.extract_strided_slice %21 {offsets = [0, 0], sizes = [4, 1], strides = [1, 1]} : vector<4x4xf32> to vector<4x1xf32>
    %23 = vector.extract_strided_slice %21 {offsets = [0, 1], sizes = [4, 1], strides = [1, 1]} : vector<4x4xf32> to vector<4x1xf32>
    %24 = vector.extract_strided_slice %21 {offsets = [0, 2], sizes = [4, 1], strides = [1, 1]} : vector<4x4xf32> to vector<4x1xf32>
    %25 = vector.extract_strided_slice %21 {offsets = [0, 3], sizes = [4, 1], strides = [1, 1]} : vector<4x4xf32> to vector<4x1xf32>
    %c0_i32 = arith.constant 0 : i32
    %26 = math.cos %25 : vector<4x1xf32>
    %27 = math.sin %25 : vector<4x1xf32>
    %28 = vector.broadcast %26 : vector<4x1xf32> to vector<4x256xf32>
    %29 = arith.mulf %28, %7 : vector<4x256xf32>
    %30 = vector.broadcast %27 : vector<4x1xf32> to vector<4x256xf32>
    %31 = arith.mulf %30, %11 : vector<4x256xf32>
    %32 = arith.addf %29, %31 : vector<4x256xf32>
    %33 = vector.broadcast %22 : vector<4x1xf32> to vector<4x256xf32>
    %34 = arith.addf %32, %33 : vector<4x256xf32>
    %35 = vector.broadcast %23 : vector<4x1xf32> to vector<4x256xf32>
    %36 = arith.addf %9, %35 : vector<4x256xf32>
    %cst = arith.constant 0.000000e+00 : f32
    %37 = vector.broadcast %cst : f32 to vector<4x1xf32>
    %38 = arith.subf %37, %27 : vector<4x1xf32>
    %39 = vector.broadcast %38 : vector<4x1xf32> to vector<4x256xf32>
    %40 = arith.mulf %39, %7 : vector<4x256xf32>
    %41 = vector.broadcast %26 : vector<4x1xf32> to vector<4x256xf32>
    %42 = arith.mulf %41, %11 : vector<4x256xf32>
    %43 = arith.addf %40, %42 : vector<4x256xf32>
    %44 = vector.broadcast %24 : vector<4x1xf32> to vector<4x256xf32>
    %45 = arith.addf %43, %44 : vector<4x256xf32>
    %cst_14 = arith.constant 1.000000e-01 : f32
    %46 = vector.broadcast %cst_14 : f32 to vector<4x256xf32>
    %47 = arith.maximumf %45, %46 : vector<4x256xf32>
    %48 = tpu.reciprocal %47 {approx = true} : vector<4x256xf32> -> vector<4x256xf32>
    %49 = arith.mulf %48, %48 : vector<4x256xf32>
    %50 = arith.mulf %34, %48 : vector<4x256xf32>
    %51 = arith.subf %50, %13 : vector<4x256xf32>
    %52 = arith.mulf %17, %51 : vector<4x256xf32>
    %53 = arith.mulf %36, %48 : vector<4x256xf32>
    %54 = arith.subf %53, %15 : vector<4x256xf32>
    %55 = arith.mulf %19, %54 : vector<4x256xf32>
    %56 = vector.broadcast %24 : vector<4x1xf32> to vector<4x256xf32>
    %57 = arith.subf %45, %56 : vector<4x256xf32>
    %58 = vector.broadcast %22 : vector<4x1xf32> to vector<4x256xf32>
    %59 = arith.subf %58, %34 : vector<4x256xf32>
    %60 = arith.mulf %17, %48 : vector<4x256xf32>
    %cst_15 = arith.constant 0.000000e+00 : f32
    %61 = vector.broadcast %cst_15 : f32 to vector<4x256xf32>
    %62 = arith.subf %61, %17 : vector<4x256xf32>
    %63 = arith.mulf %62, %34 : vector<4x256xf32>
    %64 = arith.mulf %63, %49 : vector<4x256xf32>
    %65 = arith.mulf %57, %48 : vector<4x256xf32>
    %66 = arith.mulf %34, %49 : vector<4x256xf32>
    %67 = arith.mulf %66, %59 : vector<4x256xf32>
    %68 = arith.subf %65, %67 : vector<4x256xf32>
    %69 = arith.mulf %17, %68 : vector<4x256xf32>
    %70 = arith.mulf %19, %48 : vector<4x256xf32>
    %cst_16 = arith.constant 0.000000e+00 : f32
    %71 = vector.broadcast %cst_16 : f32 to vector<4x256xf32>
    %72 = arith.subf %71, %19 : vector<4x256xf32>
    %73 = arith.mulf %72, %36 : vector<4x256xf32>
    %74 = arith.mulf %73, %49 : vector<4x256xf32>
    %75 = arith.mulf %74, %59 : vector<4x256xf32>
    %76 = arith.mulf %60, %60 : vector<4x256xf32>
    %cst_17 = arith.constant dense<0.000000e+00> : vector<4xf32>
    %77 = vector.multi_reduction <add>, %76, %cst_17 [1] : vector<4x256xf32> to vector<4xf32>
    %78 = vector.shape_cast %77 : vector<4xf32> to vector<4x1xf32>
    %cst_18 = arith.constant 9.99999974E-6 : f32
    %79 = vector.broadcast %cst_18 : f32 to vector<4x1xf32>
    %80 = arith.addf %78, %79 : vector<4x1xf32>
    %81 = arith.mulf %60, %64 : vector<4x256xf32>
    %cst_19 = arith.constant dense<0.000000e+00> : vector<4xf32>
    %82 = vector.multi_reduction <add>, %81, %cst_19 [1] : vector<4x256xf32> to vector<4xf32>
    %83 = vector.shape_cast %82 : vector<4xf32> to vector<4x1xf32>
    %84 = arith.mulf %60, %69 : vector<4x256xf32>
    %cst_20 = arith.constant dense<0.000000e+00> : vector<4xf32>
    %85 = vector.multi_reduction <add>, %84, %cst_20 [1] : vector<4x256xf32> to vector<4xf32>
    %86 = vector.shape_cast %85 : vector<4xf32> to vector<4x1xf32>
    %87 = arith.mulf %70, %70 : vector<4x256xf32>
    %cst_21 = arith.constant dense<0.000000e+00> : vector<4xf32>
    %88 = vector.multi_reduction <add>, %87, %cst_21 [1] : vector<4x256xf32> to vector<4xf32>
    %89 = vector.shape_cast %88 : vector<4xf32> to vector<4x1xf32>
    %cst_22 = arith.constant 9.99999974E-6 : f32
    %90 = vector.broadcast %cst_22 : f32 to vector<4x1xf32>
    %91 = arith.addf %89, %90 : vector<4x1xf32>
    %92 = arith.mulf %70, %74 : vector<4x256xf32>
    %cst_23 = arith.constant dense<0.000000e+00> : vector<4xf32>
    %93 = vector.multi_reduction <add>, %92, %cst_23 [1] : vector<4x256xf32> to vector<4xf32>
    %94 = vector.shape_cast %93 : vector<4xf32> to vector<4x1xf32>
    %95 = arith.mulf %70, %75 : vector<4x256xf32>
    %cst_24 = arith.constant dense<0.000000e+00> : vector<4xf32>
    %96 = vector.multi_reduction <add>, %95, %cst_24 [1] : vector<4x256xf32> to vector<4xf32>
    %97 = vector.shape_cast %96 : vector<4xf32> to vector<4x1xf32>
    %98 = arith.mulf %64, %64 : vector<4x256xf32>
    %99 = arith.mulf %74, %74 : vector<4x256xf32>
    %100 = arith.addf %98, %99 : vector<4x256xf32>
    %cst_25 = arith.constant dense<0.000000e+00> : vector<4xf32>
    %101 = vector.multi_reduction <add>, %100, %cst_25 [1] : vector<4x256xf32> to vector<4xf32>
    %102 = vector.shape_cast %101 : vector<4xf32> to vector<4x1xf32>
    %cst_26 = arith.constant 9.99999974E-6 : f32
    %103 = vector.broadcast %cst_26 : f32 to vector<4x1xf32>
    %104 = arith.addf %102, %103 : vector<4x1xf32>
    %105 = arith.mulf %64, %69 : vector<4x256xf32>
    %106 = arith.mulf %74, %75 : vector<4x256xf32>
    %107 = arith.addf %105, %106 : vector<4x256xf32>
    %cst_27 = arith.constant dense<0.000000e+00> : vector<4xf32>
    %108 = vector.multi_reduction <add>, %107, %cst_27 [1] : vector<4x256xf32> to vector<4xf32>
    %109 = vector.shape_cast %108 : vector<4xf32> to vector<4x1xf32>
    %110 = arith.mulf %69, %69 : vector<4x256xf32>
    %111 = arith.mulf %75, %75 : vector<4x256xf32>
    %112 = arith.addf %110, %111 : vector<4x256xf32>
    %cst_28 = arith.constant dense<0.000000e+00> : vector<4xf32>
    %113 = vector.multi_reduction <add>, %112, %cst_28 [1] : vector<4x256xf32> to vector<4xf32>
    %114 = vector.shape_cast %113 : vector<4xf32> to vector<4x1xf32>
    %cst_29 = arith.constant 9.99999974E-6 : f32
    %115 = vector.broadcast %cst_29 : f32 to vector<4x1xf32>
    %116 = arith.addf %114, %115 : vector<4x1xf32>
    %117 = arith.mulf %60, %52 : vector<4x256xf32>
    %cst_30 = arith.constant dense<0.000000e+00> : vector<4xf32>
    %118 = vector.multi_reduction <add>, %117, %cst_30 [1] : vector<4x256xf32> to vector<4xf32>
    %119 = vector.shape_cast %118 : vector<4xf32> to vector<4x1xf32>
    %120 = arith.mulf %70, %55 : vector<4x256xf32>
    %cst_31 = arith.constant dense<0.000000e+00> : vector<4xf32>
    %121 = vector.multi_reduction <add>, %120, %cst_31 [1] : vector<4x256xf32> to vector<4xf32>
    %122 = vector.shape_cast %121 : vector<4xf32> to vector<4x1xf32>
    %123 = arith.mulf %64, %52 : vector<4x256xf32>
    %124 = arith.mulf %74, %55 : vector<4x256xf32>
    %125 = arith.addf %123, %124 : vector<4x256xf32>
    %cst_32 = arith.constant dense<0.000000e+00> : vector<4xf32>
    %126 = vector.multi_reduction <add>, %125, %cst_32 [1] : vector<4x256xf32> to vector<4xf32>
    %127 = vector.shape_cast %126 : vector<4xf32> to vector<4x1xf32>
    %128 = arith.mulf %69, %52 : vector<4x256xf32>
    %129 = arith.mulf %75, %55 : vector<4x256xf32>
    %130 = arith.addf %128, %129 : vector<4x256xf32>
    %cst_33 = arith.constant dense<0.000000e+00> : vector<4xf32>
    %131 = vector.multi_reduction <add>, %130, %cst_33 [1] : vector<4x256xf32> to vector<4xf32>
    %132 = vector.shape_cast %131 : vector<4xf32> to vector<4x1xf32>
    %cst_34 = arith.constant 1.000000e+00 : f32
    %133 = vector.broadcast %cst_34 : f32 to vector<4x1xf32>
    %134 = arith.divf %133, %80 : vector<4x1xf32>
    %135 = arith.mulf %83, %134 : vector<4x1xf32>
    %136 = arith.mulf %86, %134 : vector<4x1xf32>
    %137 = arith.mulf %135, %83 : vector<4x1xf32>
    %138 = arith.subf %104, %137 : vector<4x1xf32>
    %139 = arith.mulf %135, %86 : vector<4x1xf32>
    %140 = arith.subf %109, %139 : vector<4x1xf32>
    %141 = arith.mulf %136, %86 : vector<4x1xf32>
    %142 = arith.subf %116, %141 : vector<4x1xf32>
    %143 = arith.mulf %135, %119 : vector<4x1xf32>
    %144 = arith.subf %127, %143 : vector<4x1xf32>
    %145 = arith.mulf %136, %119 : vector<4x1xf32>
    %146 = arith.subf %132, %145 : vector<4x1xf32>
    %cst_35 = arith.constant 1.000000e+00 : f32
    %147 = vector.broadcast %cst_35 : f32 to vector<4x1xf32>
    %148 = arith.divf %147, %91 : vector<4x1xf32>
    %149 = arith.mulf %94, %148 : vector<4x1xf32>
    %150 = arith.mulf %97, %148 : vector<4x1xf32>
    %151 = arith.mulf %149, %94 : vector<4x1xf32>
    %152 = arith.subf %138, %151 : vector<4x1xf32>
    %153 = arith.mulf %149, %97 : vector<4x1xf32>
    %154 = arith.subf %140, %153 : vector<4x1xf32>
    %155 = arith.mulf %150, %97 : vector<4x1xf32>
    %156 = arith.subf %142, %155 : vector<4x1xf32>
    %157 = arith.mulf %149, %122 : vector<4x1xf32>
    %158 = arith.subf %144, %157 : vector<4x1xf32>
    %159 = arith.mulf %150, %122 : vector<4x1xf32>
    %160 = arith.subf %146, %159 : vector<4x1xf32>
    %cst_36 = arith.constant 1.000000e+00 : f32
    %161 = vector.broadcast %cst_36 : f32 to vector<4x1xf32>
    %162 = arith.divf %161, %152 : vector<4x1xf32>
    %163 = arith.mulf %154, %162 : vector<4x1xf32>
    %164 = arith.mulf %163, %154 : vector<4x1xf32>
    %165 = arith.subf %156, %164 : vector<4x1xf32>
    %166 = arith.mulf %163, %158 : vector<4x1xf32>
    %167 = arith.subf %160, %166 : vector<4x1xf32>
    %cst_37 = arith.constant 1.000000e+00 : f32
    %168 = vector.broadcast %cst_37 : f32 to vector<4x1xf32>
    %169 = arith.divf %168, %165 : vector<4x1xf32>
    %170 = arith.mulf %167, %169 : vector<4x1xf32>
    %171 = arith.mulf %154, %170 : vector<4x1xf32>
    %172 = arith.subf %158, %171 : vector<4x1xf32>
    %173 = arith.mulf %172, %162 : vector<4x1xf32>
    %174 = arith.mulf %94, %173 : vector<4x1xf32>
    %175 = arith.subf %122, %174 : vector<4x1xf32>
    %176 = arith.mulf %97, %170 : vector<4x1xf32>
    %177 = arith.subf %175, %176 : vector<4x1xf32>
    %178 = arith.mulf %177, %148 : vector<4x1xf32>
    %179 = arith.mulf %83, %173 : vector<4x1xf32>
    %180 = arith.subf %119, %179 : vector<4x1xf32>
    %181 = arith.mulf %86, %170 : vector<4x1xf32>
    %182 = arith.subf %180, %181 : vector<4x1xf32>
    %183 = arith.mulf %182, %134 : vector<4x1xf32>
    %184 = arith.subf %22, %183 : vector<4x1xf32>
    %185 = arith.subf %23, %178 : vector<4x1xf32>
    %186 = arith.subf %24, %173 : vector<4x1xf32>
    %187 = arith.subf %25, %170 : vector<4x1xf32>
    %c1_i32 = arith.constant 1 : i32
    %188 = math.cos %187 : vector<4x1xf32>
    %189 = math.sin %187 : vector<4x1xf32>
    %190 = vector.broadcast %188 : vector<4x1xf32> to vector<4x256xf32>
    %191 = arith.mulf %190, %7 : vector<4x256xf32>
    %192 = vector.broadcast %189 : vector<4x1xf32> to vector<4x256xf32>
    %193 = arith.mulf %192, %11 : vector<4x256xf32>
    %194 = arith.addf %191, %193 : vector<4x256xf32>
    %195 = vector.broadcast %184 : vector<4x1xf32> to vector<4x256xf32>
    %196 = arith.addf %194, %195 : vector<4x256xf32>
    %197 = vector.broadcast %185 : vector<4x1xf32> to vector<4x256xf32>
    %198 = arith.addf %9, %197 : vector<4x256xf32>
    %cst_38 = arith.constant 0.000000e+00 : f32
    %199 = vector.broadcast %cst_38 : f32 to vector<4x1xf32>
    %200 = arith.subf %199, %189 : vector<4x1xf32>
    %201 = vector.broadcast %200 : vector<4x1xf32> to vector<4x256xf32>
    %202 = arith.mulf %201, %7 : vector<4x256xf32>
    %203 = vector.broadcast %188 : vector<4x1xf32> to vector<4x256xf32>
    %204 = arith.mulf %203, %11 : vector<4x256xf32>
    %205 = arith.addf %202, %204 : vector<4x256xf32>
    %206 = vector.broadcast %186 : vector<4x1xf32> to vector<4x256xf32>
    %207 = arith.addf %205, %206 : vector<4x256xf32>
    %cst_39 = arith.constant 1.000000e-01 : f32
    %208 = vector.broadcast %cst_39 : f32 to vector<4x256xf32>
    %209 = arith.maximumf %207, %208 : vector<4x256xf32>
    %210 = tpu.reciprocal %209 {approx = true} : vector<4x256xf32> -> vector<4x256xf32>
    %211 = arith.mulf %210, %210 : vector<4x256xf32>
    %212 = arith.mulf %196, %210 : vector<4x256xf32>
    %213 = arith.subf %212, %13 : vector<4x256xf32>
    %214 = arith.mulf %17, %213 : vector<4x256xf32>
    %215 = arith.mulf %198, %210 : vector<4x256xf32>
    %216 = arith.subf %215, %15 : vector<4x256xf32>
    %217 = arith.mulf %19, %216 : vector<4x256xf32>
    %218 = vector.broadcast %186 : vector<4x1xf32> to vector<4x256xf32>
    %219 = arith.subf %207, %218 : vector<4x256xf32>
    %220 = vector.broadcast %184 : vector<4x1xf32> to vector<4x256xf32>
    %221 = arith.subf %220, %196 : vector<4x256xf32>
    %222 = arith.mulf %17, %210 : vector<4x256xf32>
    %cst_40 = arith.constant 0.000000e+00 : f32
    %223 = vector.broadcast %cst_40 : f32 to vector<4x256xf32>
    %224 = arith.subf %223, %17 : vector<4x256xf32>
    %225 = arith.mulf %224, %196 : vector<4x256xf32>
    %226 = arith.mulf %225, %211 : vector<4x256xf32>
    %227 = arith.mulf %219, %210 : vector<4x256xf32>
    %228 = arith.mulf %196, %211 : vector<4x256xf32>
    %229 = arith.mulf %228, %221 : vector<4x256xf32>
    %230 = arith.subf %227, %229 : vector<4x256xf32>
    %231 = arith.mulf %17, %230 : vector<4x256xf32>
    %232 = arith.mulf %19, %210 : vector<4x256xf32>
    %cst_41 = arith.constant 0.000000e+00 : f32
    %233 = vector.broadcast %cst_41 : f32 to vector<4x256xf32>
    %234 = arith.subf %233, %19 : vector<4x256xf32>
    %235 = arith.mulf %234, %198 : vector<4x256xf32>
    %236 = arith.mulf %235, %211 : vector<4x256xf32>
    %237 = arith.mulf %236, %221 : vector<4x256xf32>
    %238 = arith.mulf %222, %222 : vector<4x256xf32>
    %cst_42 = arith.constant dense<0.000000e+00> : vector<4xf32>
    %239 = vector.multi_reduction <add>, %238, %cst_42 [1] : vector<4x256xf32> to vector<4xf32>
    %240 = vector.shape_cast %239 : vector<4xf32> to vector<4x1xf32>
    %cst_43 = arith.constant 9.99999974E-6 : f32
    %241 = vector.broadcast %cst_43 : f32 to vector<4x1xf32>
    %242 = arith.addf %240, %241 : vector<4x1xf32>
    %243 = arith.mulf %222, %226 : vector<4x256xf32>
    %cst_44 = arith.constant dense<0.000000e+00> : vector<4xf32>
    %244 = vector.multi_reduction <add>, %243, %cst_44 [1] : vector<4x256xf32> to vector<4xf32>
    %245 = vector.shape_cast %244 : vector<4xf32> to vector<4x1xf32>
    %246 = arith.mulf %222, %231 : vector<4x256xf32>
    %cst_45 = arith.constant dense<0.000000e+00> : vector<4xf32>
    %247 = vector.multi_reduction <add>, %246, %cst_45 [1] : vector<4x256xf32> to vector<4xf32>
    %248 = vector.shape_cast %247 : vector<4xf32> to vector<4x1xf32>
    %249 = arith.mulf %232, %232 : vector<4x256xf32>
    %cst_46 = arith.constant dense<0.000000e+00> : vector<4xf32>
    %250 = vector.multi_reduction <add>, %249, %cst_46 [1] : vector<4x256xf32> to vector<4xf32>
    %251 = vector.shape_cast %250 : vector<4xf32> to vector<4x1xf32>
    %cst_47 = arith.constant 9.99999974E-6 : f32
    %252 = vector.broadcast %cst_47 : f32 to vector<4x1xf32>
    %253 = arith.addf %251, %252 : vector<4x1xf32>
    %254 = arith.mulf %232, %236 : vector<4x256xf32>
    %cst_48 = arith.constant dense<0.000000e+00> : vector<4xf32>
    %255 = vector.multi_reduction <add>, %254, %cst_48 [1] : vector<4x256xf32> to vector<4xf32>
    %256 = vector.shape_cast %255 : vector<4xf32> to vector<4x1xf32>
    %257 = arith.mulf %232, %237 : vector<4x256xf32>
    %cst_49 = arith.constant dense<0.000000e+00> : vector<4xf32>
    %258 = vector.multi_reduction <add>, %257, %cst_49 [1] : vector<4x256xf32> to vector<4xf32>
    %259 = vector.shape_cast %258 : vector<4xf32> to vector<4x1xf32>
    %260 = arith.mulf %226, %226 : vector<4x256xf32>
    %261 = arith.mulf %236, %236 : vector<4x256xf32>
    %262 = arith.addf %260, %261 : vector<4x256xf32>
    %cst_50 = arith.constant dense<0.000000e+00> : vector<4xf32>
    %263 = vector.multi_reduction <add>, %262, %cst_50 [1] : vector<4x256xf32> to vector<4xf32>
    %264 = vector.shape_cast %263 : vector<4xf32> to vector<4x1xf32>
    %cst_51 = arith.constant 9.99999974E-6 : f32
    %265 = vector.broadcast %cst_51 : f32 to vector<4x1xf32>
    %266 = arith.addf %264, %265 : vector<4x1xf32>
    %267 = arith.mulf %226, %231 : vector<4x256xf32>
    %268 = arith.mulf %236, %237 : vector<4x256xf32>
    %269 = arith.addf %267, %268 : vector<4x256xf32>
    %cst_52 = arith.constant dense<0.000000e+00> : vector<4xf32>
    %270 = vector.multi_reduction <add>, %269, %cst_52 [1] : vector<4x256xf32> to vector<4xf32>
    %271 = vector.shape_cast %270 : vector<4xf32> to vector<4x1xf32>
    %272 = arith.mulf %231, %231 : vector<4x256xf32>
    %273 = arith.mulf %237, %237 : vector<4x256xf32>
    %274 = arith.addf %272, %273 : vector<4x256xf32>
    %cst_53 = arith.constant dense<0.000000e+00> : vector<4xf32>
    %275 = vector.multi_reduction <add>, %274, %cst_53 [1] : vector<4x256xf32> to vector<4xf32>
    %276 = vector.shape_cast %275 : vector<4xf32> to vector<4x1xf32>
    %cst_54 = arith.constant 9.99999974E-6 : f32
    %277 = vector.broadcast %cst_54 : f32 to vector<4x1xf32>
    %278 = arith.addf %276, %277 : vector<4x1xf32>
    %279 = arith.mulf %222, %214 : vector<4x256xf32>
    %cst_55 = arith.constant dense<0.000000e+00> : vector<4xf32>
    %280 = vector.multi_reduction <add>, %279, %cst_55 [1] : vector<4x256xf32> to vector<4xf32>
    %281 = vector.shape_cast %280 : vector<4xf32> to vector<4x1xf32>
    %282 = arith.mulf %232, %217 : vector<4x256xf32>
    %cst_56 = arith.constant dense<0.000000e+00> : vector<4xf32>
    %283 = vector.multi_reduction <add>, %282, %cst_56 [1] : vector<4x256xf32> to vector<4xf32>
    %284 = vector.shape_cast %283 : vector<4xf32> to vector<4x1xf32>
    %285 = arith.mulf %226, %214 : vector<4x256xf32>
    %286 = arith.mulf %236, %217 : vector<4x256xf32>
    %287 = arith.addf %285, %286 : vector<4x256xf32>
    %cst_57 = arith.constant dense<0.000000e+00> : vector<4xf32>
    %288 = vector.multi_reduction <add>, %287, %cst_57 [1] : vector<4x256xf32> to vector<4xf32>
    %289 = vector.shape_cast %288 : vector<4xf32> to vector<4x1xf32>
    %290 = arith.mulf %231, %214 : vector<4x256xf32>
    %291 = arith.mulf %237, %217 : vector<4x256xf32>
    %292 = arith.addf %290, %291 : vector<4x256xf32>
    %cst_58 = arith.constant dense<0.000000e+00> : vector<4xf32>
    %293 = vector.multi_reduction <add>, %292, %cst_58 [1] : vector<4x256xf32> to vector<4xf32>
    %294 = vector.shape_cast %293 : vector<4xf32> to vector<4x1xf32>
    %cst_59 = arith.constant 1.000000e+00 : f32
    %295 = vector.broadcast %cst_59 : f32 to vector<4x1xf32>
    %296 = arith.divf %295, %242 : vector<4x1xf32>
    %297 = arith.mulf %245, %296 : vector<4x1xf32>
    %298 = arith.mulf %248, %296 : vector<4x1xf32>
    %299 = arith.mulf %297, %245 : vector<4x1xf32>
    %300 = arith.subf %266, %299 : vector<4x1xf32>
    %301 = arith.mulf %297, %248 : vector<4x1xf32>
    %302 = arith.subf %271, %301 : vector<4x1xf32>
    %303 = arith.mulf %298, %248 : vector<4x1xf32>
    %304 = arith.subf %278, %303 : vector<4x1xf32>
    %305 = arith.mulf %297, %281 : vector<4x1xf32>
    %306 = arith.subf %289, %305 : vector<4x1xf32>
    %307 = arith.mulf %298, %281 : vector<4x1xf32>
    %308 = arith.subf %294, %307 : vector<4x1xf32>
    %cst_60 = arith.constant 1.000000e+00 : f32
    %309 = vector.broadcast %cst_60 : f32 to vector<4x1xf32>
    %310 = arith.divf %309, %253 : vector<4x1xf32>
    %311 = arith.mulf %256, %310 : vector<4x1xf32>
    %312 = arith.mulf %259, %310 : vector<4x1xf32>
    %313 = arith.mulf %311, %256 : vector<4x1xf32>
    %314 = arith.subf %300, %313 : vector<4x1xf32>
    %315 = arith.mulf %311, %259 : vector<4x1xf32>
    %316 = arith.subf %302, %315 : vector<4x1xf32>
    %317 = arith.mulf %312, %259 : vector<4x1xf32>
    %318 = arith.subf %304, %317 : vector<4x1xf32>
    %319 = arith.mulf %311, %284 : vector<4x1xf32>
    %320 = arith.subf %306, %319 : vector<4x1xf32>
    %321 = arith.mulf %312, %284 : vector<4x1xf32>
    %322 = arith.subf %308, %321 : vector<4x1xf32>
    %cst_61 = arith.constant 1.000000e+00 : f32
    %323 = vector.broadcast %cst_61 : f32 to vector<4x1xf32>
    %324 = arith.divf %323, %314 : vector<4x1xf32>
    %325 = arith.mulf %316, %324 : vector<4x1xf32>
    %326 = arith.mulf %325, %316 : vector<4x1xf32>
    %327 = arith.subf %318, %326 : vector<4x1xf32>
    %328 = arith.mulf %325, %320 : vector<4x1xf32>
    %329 = arith.subf %322, %328 : vector<4x1xf32>
    %cst_62 = arith.constant 1.000000e+00 : f32
    %330 = vector.broadcast %cst_62 : f32 to vector<4x1xf32>
    %331 = arith.divf %330, %327 : vector<4x1xf32>
    %332 = arith.mulf %329, %331 : vector<4x1xf32>
    %333 = arith.mulf %316, %332 : vector<4x1xf32>
    %334 = arith.subf %320, %333 : vector<4x1xf32>
    %335 = arith.mulf %334, %324 : vector<4x1xf32>
    %336 = arith.mulf %256, %335 : vector<4x1xf32>
    %337 = arith.subf %284, %336 : vector<4x1xf32>
    %338 = arith.mulf %259, %332 : vector<4x1xf32>
    %339 = arith.subf %337, %338 : vector<4x1xf32>
    %340 = arith.mulf %339, %310 : vector<4x1xf32>
    %341 = arith.mulf %245, %335 : vector<4x1xf32>
    %342 = arith.subf %281, %341 : vector<4x1xf32>
    %343 = arith.mulf %248, %332 : vector<4x1xf32>
    %344 = arith.subf %342, %343 : vector<4x1xf32>
    %345 = arith.mulf %344, %296 : vector<4x1xf32>
    %346 = arith.subf %184, %345 : vector<4x1xf32>
    %347 = arith.subf %185, %340 : vector<4x1xf32>
    %348 = arith.subf %186, %335 : vector<4x1xf32>
    %349 = arith.subf %187, %332 : vector<4x1xf32>
    %c2_i32 = arith.constant 2 : i32
    %350 = math.cos %349 : vector<4x1xf32>
    %351 = math.sin %349 : vector<4x1xf32>
    %352 = vector.broadcast %350 : vector<4x1xf32> to vector<4x256xf32>
    %353 = arith.mulf %352, %7 : vector<4x256xf32>
    %354 = vector.broadcast %351 : vector<4x1xf32> to vector<4x256xf32>
    %355 = arith.mulf %354, %11 : vector<4x256xf32>
    %356 = arith.addf %353, %355 : vector<4x256xf32>
    %357 = vector.broadcast %346 : vector<4x1xf32> to vector<4x256xf32>
    %358 = arith.addf %356, %357 : vector<4x256xf32>
    %359 = vector.broadcast %347 : vector<4x1xf32> to vector<4x256xf32>
    %360 = arith.addf %9, %359 : vector<4x256xf32>
    %cst_63 = arith.constant 0.000000e+00 : f32
    %361 = vector.broadcast %cst_63 : f32 to vector<4x1xf32>
    %362 = arith.subf %361, %351 : vector<4x1xf32>
    %363 = vector.broadcast %362 : vector<4x1xf32> to vector<4x256xf32>
    %364 = arith.mulf %363, %7 : vector<4x256xf32>
    %365 = vector.broadcast %350 : vector<4x1xf32> to vector<4x256xf32>
    %366 = arith.mulf %365, %11 : vector<4x256xf32>
    %367 = arith.addf %364, %366 : vector<4x256xf32>
    %368 = vector.broadcast %348 : vector<4x1xf32> to vector<4x256xf32>
    %369 = arith.addf %367, %368 : vector<4x256xf32>
    %cst_64 = arith.constant 1.000000e-01 : f32
    %370 = vector.broadcast %cst_64 : f32 to vector<4x256xf32>
    %371 = arith.maximumf %369, %370 : vector<4x256xf32>
    %372 = tpu.reciprocal %371 {approx = true} : vector<4x256xf32> -> vector<4x256xf32>
    %373 = arith.mulf %372, %372 : vector<4x256xf32>
    %374 = arith.mulf %358, %372 : vector<4x256xf32>
    %375 = arith.subf %374, %13 : vector<4x256xf32>
    %376 = arith.mulf %17, %375 : vector<4x256xf32>
    %377 = arith.mulf %360, %372 : vector<4x256xf32>
    %378 = arith.subf %377, %15 : vector<4x256xf32>
    %379 = arith.mulf %19, %378 : vector<4x256xf32>
    %380 = vector.broadcast %348 : vector<4x1xf32> to vector<4x256xf32>
    %381 = arith.subf %369, %380 : vector<4x256xf32>
    %382 = vector.broadcast %346 : vector<4x1xf32> to vector<4x256xf32>
    %383 = arith.subf %382, %358 : vector<4x256xf32>
    %384 = arith.mulf %17, %372 : vector<4x256xf32>
    %cst_65 = arith.constant 0.000000e+00 : f32
    %385 = vector.broadcast %cst_65 : f32 to vector<4x256xf32>
    %386 = arith.subf %385, %17 : vector<4x256xf32>
    %387 = arith.mulf %386, %358 : vector<4x256xf32>
    %388 = arith.mulf %387, %373 : vector<4x256xf32>
    %389 = arith.mulf %381, %372 : vector<4x256xf32>
    %390 = arith.mulf %358, %373 : vector<4x256xf32>
    %391 = arith.mulf %390, %383 : vector<4x256xf32>
    %392 = arith.subf %389, %391 : vector<4x256xf32>
    %393 = arith.mulf %17, %392 : vector<4x256xf32>
    %394 = arith.mulf %19, %372 : vector<4x256xf32>
    %cst_66 = arith.constant 0.000000e+00 : f32
    %395 = vector.broadcast %cst_66 : f32 to vector<4x256xf32>
    %396 = arith.subf %395, %19 : vector<4x256xf32>
    %397 = arith.mulf %396, %360 : vector<4x256xf32>
    %398 = arith.mulf %397, %373 : vector<4x256xf32>
    %399 = arith.mulf %398, %383 : vector<4x256xf32>
    %400 = arith.mulf %384, %384 : vector<4x256xf32>
    %cst_67 = arith.constant dense<0.000000e+00> : vector<4xf32>
    %401 = vector.multi_reduction <add>, %400, %cst_67 [1] : vector<4x256xf32> to vector<4xf32>
    %402 = vector.shape_cast %401 : vector<4xf32> to vector<4x1xf32>
    %cst_68 = arith.constant 9.99999974E-6 : f32
    %403 = vector.broadcast %cst_68 : f32 to vector<4x1xf32>
    %404 = arith.addf %402, %403 : vector<4x1xf32>
    %405 = arith.mulf %384, %388 : vector<4x256xf32>
    %cst_69 = arith.constant dense<0.000000e+00> : vector<4xf32>
    %406 = vector.multi_reduction <add>, %405, %cst_69 [1] : vector<4x256xf32> to vector<4xf32>
    %407 = vector.shape_cast %406 : vector<4xf32> to vector<4x1xf32>
    %408 = arith.mulf %384, %393 : vector<4x256xf32>
    %cst_70 = arith.constant dense<0.000000e+00> : vector<4xf32>
    %409 = vector.multi_reduction <add>, %408, %cst_70 [1] : vector<4x256xf32> to vector<4xf32>
    %410 = vector.shape_cast %409 : vector<4xf32> to vector<4x1xf32>
    %411 = arith.mulf %394, %394 : vector<4x256xf32>
    %cst_71 = arith.constant dense<0.000000e+00> : vector<4xf32>
    %412 = vector.multi_reduction <add>, %411, %cst_71 [1] : vector<4x256xf32> to vector<4xf32>
    %413 = vector.shape_cast %412 : vector<4xf32> to vector<4x1xf32>
    %cst_72 = arith.constant 9.99999974E-6 : f32
    %414 = vector.broadcast %cst_72 : f32 to vector<4x1xf32>
    %415 = arith.addf %413, %414 : vector<4x1xf32>
    %416 = arith.mulf %394, %398 : vector<4x256xf32>
    %cst_73 = arith.constant dense<0.000000e+00> : vector<4xf32>
    %417 = vector.multi_reduction <add>, %416, %cst_73 [1] : vector<4x256xf32> to vector<4xf32>
    %418 = vector.shape_cast %417 : vector<4xf32> to vector<4x1xf32>
    %419 = arith.mulf %394, %399 : vector<4x256xf32>
    %cst_74 = arith.constant dense<0.000000e+00> : vector<4xf32>
    %420 = vector.multi_reduction <add>, %419, %cst_74 [1] : vector<4x256xf32> to vector<4xf32>
    %421 = vector.shape_cast %420 : vector<4xf32> to vector<4x1xf32>
    %422 = arith.mulf %388, %388 : vector<4x256xf32>
    %423 = arith.mulf %398, %398 : vector<4x256xf32>
    %424 = arith.addf %422, %423 : vector<4x256xf32>
    %cst_75 = arith.constant dense<0.000000e+00> : vector<4xf32>
    %425 = vector.multi_reduction <add>, %424, %cst_75 [1] : vector<4x256xf32> to vector<4xf32>
    %426 = vector.shape_cast %425 : vector<4xf32> to vector<4x1xf32>
    %cst_76 = arith.constant 9.99999974E-6 : f32
    %427 = vector.broadcast %cst_76 : f32 to vector<4x1xf32>
    %428 = arith.addf %426, %427 : vector<4x1xf32>
    %429 = arith.mulf %388, %393 : vector<4x256xf32>
    %430 = arith.mulf %398, %399 : vector<4x256xf32>
    %431 = arith.addf %429, %430 : vector<4x256xf32>
    %cst_77 = arith.constant dense<0.000000e+00> : vector<4xf32>
    %432 = vector.multi_reduction <add>, %431, %cst_77 [1] : vector<4x256xf32> to vector<4xf32>
    %433 = vector.shape_cast %432 : vector<4xf32> to vector<4x1xf32>
    %434 = arith.mulf %393, %393 : vector<4x256xf32>
    %435 = arith.mulf %399, %399 : vector<4x256xf32>
    %436 = arith.addf %434, %435 : vector<4x256xf32>
    %cst_78 = arith.constant dense<0.000000e+00> : vector<4xf32>
    %437 = vector.multi_reduction <add>, %436, %cst_78 [1] : vector<4x256xf32> to vector<4xf32>
    %438 = vector.shape_cast %437 : vector<4xf32> to vector<4x1xf32>
    %cst_79 = arith.constant 9.99999974E-6 : f32
    %439 = vector.broadcast %cst_79 : f32 to vector<4x1xf32>
    %440 = arith.addf %438, %439 : vector<4x1xf32>
    %441 = arith.mulf %384, %376 : vector<4x256xf32>
    %cst_80 = arith.constant dense<0.000000e+00> : vector<4xf32>
    %442 = vector.multi_reduction <add>, %441, %cst_80 [1] : vector<4x256xf32> to vector<4xf32>
    %443 = vector.shape_cast %442 : vector<4xf32> to vector<4x1xf32>
    %444 = arith.mulf %394, %379 : vector<4x256xf32>
    %cst_81 = arith.constant dense<0.000000e+00> : vector<4xf32>
    %445 = vector.multi_reduction <add>, %444, %cst_81 [1] : vector<4x256xf32> to vector<4xf32>
    %446 = vector.shape_cast %445 : vector<4xf32> to vector<4x1xf32>
    %447 = arith.mulf %388, %376 : vector<4x256xf32>
    %448 = arith.mulf %398, %379 : vector<4x256xf32>
    %449 = arith.addf %447, %448 : vector<4x256xf32>
    %cst_82 = arith.constant dense<0.000000e+00> : vector<4xf32>
    %450 = vector.multi_reduction <add>, %449, %cst_82 [1] : vector<4x256xf32> to vector<4xf32>
    %451 = vector.shape_cast %450 : vector<4xf32> to vector<4x1xf32>
    %452 = arith.mulf %393, %376 : vector<4x256xf32>
    %453 = arith.mulf %399, %379 : vector<4x256xf32>
    %454 = arith.addf %452, %453 : vector<4x256xf32>
    %cst_83 = arith.constant dense<0.000000e+00> : vector<4xf32>
    %455 = vector.multi_reduction <add>, %454, %cst_83 [1] : vector<4x256xf32> to vector<4xf32>
    %456 = vector.shape_cast %455 : vector<4xf32> to vector<4x1xf32>
    %cst_84 = arith.constant 1.000000e+00 : f32
    %457 = vector.broadcast %cst_84 : f32 to vector<4x1xf32>
    %458 = arith.divf %457, %404 : vector<4x1xf32>
    %459 = arith.mulf %407, %458 : vector<4x1xf32>
    %460 = arith.mulf %410, %458 : vector<4x1xf32>
    %461 = arith.mulf %459, %407 : vector<4x1xf32>
    %462 = arith.subf %428, %461 : vector<4x1xf32>
    %463 = arith.mulf %459, %410 : vector<4x1xf32>
    %464 = arith.subf %433, %463 : vector<4x1xf32>
    %465 = arith.mulf %460, %410 : vector<4x1xf32>
    %466 = arith.subf %440, %465 : vector<4x1xf32>
    %467 = arith.mulf %459, %443 : vector<4x1xf32>
    %468 = arith.subf %451, %467 : vector<4x1xf32>
    %469 = arith.mulf %460, %443 : vector<4x1xf32>
    %470 = arith.subf %456, %469 : vector<4x1xf32>
    %cst_85 = arith.constant 1.000000e+00 : f32
    %471 = vector.broadcast %cst_85 : f32 to vector<4x1xf32>
    %472 = arith.divf %471, %415 : vector<4x1xf32>
    %473 = arith.mulf %418, %472 : vector<4x1xf32>
    %474 = arith.mulf %421, %472 : vector<4x1xf32>
    %475 = arith.mulf %473, %418 : vector<4x1xf32>
    %476 = arith.subf %462, %475 : vector<4x1xf32>
    %477 = arith.mulf %473, %421 : vector<4x1xf32>
    %478 = arith.subf %464, %477 : vector<4x1xf32>
    %479 = arith.mulf %474, %421 : vector<4x1xf32>
    %480 = arith.subf %466, %479 : vector<4x1xf32>
    %481 = arith.mulf %473, %446 : vector<4x1xf32>
    %482 = arith.subf %468, %481 : vector<4x1xf32>
    %483 = arith.mulf %474, %446 : vector<4x1xf32>
    %484 = arith.subf %470, %483 : vector<4x1xf32>
    %cst_86 = arith.constant 1.000000e+00 : f32
    %485 = vector.broadcast %cst_86 : f32 to vector<4x1xf32>
    %486 = arith.divf %485, %476 : vector<4x1xf32>
    %487 = arith.mulf %478, %486 : vector<4x1xf32>
    %488 = arith.mulf %487, %478 : vector<4x1xf32>
    %489 = arith.subf %480, %488 : vector<4x1xf32>
    %490 = arith.mulf %487, %482 : vector<4x1xf32>
    %491 = arith.subf %484, %490 : vector<4x1xf32>
    %cst_87 = arith.constant 1.000000e+00 : f32
    %492 = vector.broadcast %cst_87 : f32 to vector<4x1xf32>
    %493 = arith.divf %492, %489 : vector<4x1xf32>
    %494 = arith.mulf %491, %493 : vector<4x1xf32>
    %495 = arith.mulf %478, %494 : vector<4x1xf32>
    %496 = arith.subf %482, %495 : vector<4x1xf32>
    %497 = arith.mulf %496, %486 : vector<4x1xf32>
    %498 = arith.mulf %418, %497 : vector<4x1xf32>
    %499 = arith.subf %446, %498 : vector<4x1xf32>
    %500 = arith.mulf %421, %494 : vector<4x1xf32>
    %501 = arith.subf %499, %500 : vector<4x1xf32>
    %502 = arith.mulf %501, %472 : vector<4x1xf32>
    %503 = arith.mulf %407, %497 : vector<4x1xf32>
    %504 = arith.subf %443, %503 : vector<4x1xf32>
    %505 = arith.mulf %410, %494 : vector<4x1xf32>
    %506 = arith.subf %504, %505 : vector<4x1xf32>
    %507 = arith.mulf %506, %458 : vector<4x1xf32>
    %508 = arith.subf %346, %507 : vector<4x1xf32>
    %509 = arith.subf %347, %502 : vector<4x1xf32>
    %510 = arith.subf %348, %497 : vector<4x1xf32>
    %511 = arith.subf %349, %494 : vector<4x1xf32>
    %c3_i32 = arith.constant 3 : i32
    %512 = math.cos %511 : vector<4x1xf32>
    %513 = math.sin %511 : vector<4x1xf32>
    %514 = vector.broadcast %512 : vector<4x1xf32> to vector<4x256xf32>
    %515 = arith.mulf %514, %7 : vector<4x256xf32>
    %516 = vector.broadcast %513 : vector<4x1xf32> to vector<4x256xf32>
    %517 = arith.mulf %516, %11 : vector<4x256xf32>
    %518 = arith.addf %515, %517 : vector<4x256xf32>
    %519 = vector.broadcast %508 : vector<4x1xf32> to vector<4x256xf32>
    %520 = arith.addf %518, %519 : vector<4x256xf32>
    %521 = vector.broadcast %509 : vector<4x1xf32> to vector<4x256xf32>
    %522 = arith.addf %9, %521 : vector<4x256xf32>
    %cst_88 = arith.constant 0.000000e+00 : f32
    %523 = vector.broadcast %cst_88 : f32 to vector<4x1xf32>
    %524 = arith.subf %523, %513 : vector<4x1xf32>
    %525 = vector.broadcast %524 : vector<4x1xf32> to vector<4x256xf32>
    %526 = arith.mulf %525, %7 : vector<4x256xf32>
    %527 = vector.broadcast %512 : vector<4x1xf32> to vector<4x256xf32>
    %528 = arith.mulf %527, %11 : vector<4x256xf32>
    %529 = arith.addf %526, %528 : vector<4x256xf32>
    %530 = vector.broadcast %510 : vector<4x1xf32> to vector<4x256xf32>
    %531 = arith.addf %529, %530 : vector<4x256xf32>
    %cst_89 = arith.constant 1.000000e-01 : f32
    %532 = vector.broadcast %cst_89 : f32 to vector<4x256xf32>
    %533 = arith.maximumf %531, %532 : vector<4x256xf32>
    %534 = tpu.reciprocal %533 {approx = true} : vector<4x256xf32> -> vector<4x256xf32>
    %535 = arith.mulf %534, %534 : vector<4x256xf32>
    %536 = arith.mulf %520, %534 : vector<4x256xf32>
    %537 = arith.subf %536, %13 : vector<4x256xf32>
    %538 = arith.mulf %17, %537 : vector<4x256xf32>
    %539 = arith.mulf %522, %534 : vector<4x256xf32>
    %540 = arith.subf %539, %15 : vector<4x256xf32>
    %541 = arith.mulf %19, %540 : vector<4x256xf32>
    %542 = vector.broadcast %510 : vector<4x1xf32> to vector<4x256xf32>
    %543 = arith.subf %531, %542 : vector<4x256xf32>
    %544 = vector.broadcast %508 : vector<4x1xf32> to vector<4x256xf32>
    %545 = arith.subf %544, %520 : vector<4x256xf32>
    %546 = arith.mulf %17, %534 : vector<4x256xf32>
    %cst_90 = arith.constant 0.000000e+00 : f32
    %547 = vector.broadcast %cst_90 : f32 to vector<4x256xf32>
    %548 = arith.subf %547, %17 : vector<4x256xf32>
    %549 = arith.mulf %548, %520 : vector<4x256xf32>
    %550 = arith.mulf %549, %535 : vector<4x256xf32>
    %551 = arith.mulf %543, %534 : vector<4x256xf32>
    %552 = arith.mulf %520, %535 : vector<4x256xf32>
    %553 = arith.mulf %552, %545 : vector<4x256xf32>
    %554 = arith.subf %551, %553 : vector<4x256xf32>
    %555 = arith.mulf %17, %554 : vector<4x256xf32>
    %556 = arith.mulf %19, %534 : vector<4x256xf32>
    %cst_91 = arith.constant 0.000000e+00 : f32
    %557 = vector.broadcast %cst_91 : f32 to vector<4x256xf32>
    %558 = arith.subf %557, %19 : vector<4x256xf32>
    %559 = arith.mulf %558, %522 : vector<4x256xf32>
    %560 = arith.mulf %559, %535 : vector<4x256xf32>
    %561 = arith.mulf %560, %545 : vector<4x256xf32>
    %562 = arith.mulf %546, %546 : vector<4x256xf32>
    %cst_92 = arith.constant dense<0.000000e+00> : vector<4xf32>
    %563 = vector.multi_reduction <add>, %562, %cst_92 [1] : vector<4x256xf32> to vector<4xf32>
    %564 = vector.shape_cast %563 : vector<4xf32> to vector<4x1xf32>
    %cst_93 = arith.constant 9.99999974E-6 : f32
    %565 = vector.broadcast %cst_93 : f32 to vector<4x1xf32>
    %566 = arith.addf %564, %565 : vector<4x1xf32>
    %567 = arith.mulf %546, %550 : vector<4x256xf32>
    %cst_94 = arith.constant dense<0.000000e+00> : vector<4xf32>
    %568 = vector.multi_reduction <add>, %567, %cst_94 [1] : vector<4x256xf32> to vector<4xf32>
    %569 = vector.shape_cast %568 : vector<4xf32> to vector<4x1xf32>
    %570 = arith.mulf %546, %555 : vector<4x256xf32>
    %cst_95 = arith.constant dense<0.000000e+00> : vector<4xf32>
    %571 = vector.multi_reduction <add>, %570, %cst_95 [1] : vector<4x256xf32> to vector<4xf32>
    %572 = vector.shape_cast %571 : vector<4xf32> to vector<4x1xf32>
    %573 = arith.mulf %556, %556 : vector<4x256xf32>
    %cst_96 = arith.constant dense<0.000000e+00> : vector<4xf32>
    %574 = vector.multi_reduction <add>, %573, %cst_96 [1] : vector<4x256xf32> to vector<4xf32>
    %575 = vector.shape_cast %574 : vector<4xf32> to vector<4x1xf32>
    %cst_97 = arith.constant 9.99999974E-6 : f32
    %576 = vector.broadcast %cst_97 : f32 to vector<4x1xf32>
    %577 = arith.addf %575, %576 : vector<4x1xf32>
    %578 = arith.mulf %556, %560 : vector<4x256xf32>
    %cst_98 = arith.constant dense<0.000000e+00> : vector<4xf32>
    %579 = vector.multi_reduction <add>, %578, %cst_98 [1] : vector<4x256xf32> to vector<4xf32>
    %580 = vector.shape_cast %579 : vector<4xf32> to vector<4x1xf32>
    %581 = arith.mulf %556, %561 : vector<4x256xf32>
    %cst_99 = arith.constant dense<0.000000e+00> : vector<4xf32>
    %582 = vector.multi_reduction <add>, %581, %cst_99 [1] : vector<4x256xf32> to vector<4xf32>
    %583 = vector.shape_cast %582 : vector<4xf32> to vector<4x1xf32>
    %584 = arith.mulf %550, %550 : vector<4x256xf32>
    %585 = arith.mulf %560, %560 : vector<4x256xf32>
    %586 = arith.addf %584, %585 : vector<4x256xf32>
    %cst_100 = arith.constant dense<0.000000e+00> : vector<4xf32>
    %587 = vector.multi_reduction <add>, %586, %cst_100 [1] : vector<4x256xf32> to vector<4xf32>
    %588 = vector.shape_cast %587 : vector<4xf32> to vector<4x1xf32>
    %cst_101 = arith.constant 9.99999974E-6 : f32
    %589 = vector.broadcast %cst_101 : f32 to vector<4x1xf32>
    %590 = arith.addf %588, %589 : vector<4x1xf32>
    %591 = arith.mulf %550, %555 : vector<4x256xf32>
    %592 = arith.mulf %560, %561 : vector<4x256xf32>
    %593 = arith.addf %591, %592 : vector<4x256xf32>
    %cst_102 = arith.constant dense<0.000000e+00> : vector<4xf32>
    %594 = vector.multi_reduction <add>, %593, %cst_102 [1] : vector<4x256xf32> to vector<4xf32>
    %595 = vector.shape_cast %594 : vector<4xf32> to vector<4x1xf32>
    %596 = arith.mulf %555, %555 : vector<4x256xf32>
    %597 = arith.mulf %561, %561 : vector<4x256xf32>
    %598 = arith.addf %596, %597 : vector<4x256xf32>
    %cst_103 = arith.constant dense<0.000000e+00> : vector<4xf32>
    %599 = vector.multi_reduction <add>, %598, %cst_103 [1] : vector<4x256xf32> to vector<4xf32>
    %600 = vector.shape_cast %599 : vector<4xf32> to vector<4x1xf32>
    %cst_104 = arith.constant 9.99999974E-6 : f32
    %601 = vector.broadcast %cst_104 : f32 to vector<4x1xf32>
    %602 = arith.addf %600, %601 : vector<4x1xf32>
    %603 = arith.mulf %546, %538 : vector<4x256xf32>
    %cst_105 = arith.constant dense<0.000000e+00> : vector<4xf32>
    %604 = vector.multi_reduction <add>, %603, %cst_105 [1] : vector<4x256xf32> to vector<4xf32>
    %605 = vector.shape_cast %604 : vector<4xf32> to vector<4x1xf32>
    %606 = arith.mulf %556, %541 : vector<4x256xf32>
    %cst_106 = arith.constant dense<0.000000e+00> : vector<4xf32>
    %607 = vector.multi_reduction <add>, %606, %cst_106 [1] : vector<4x256xf32> to vector<4xf32>
    %608 = vector.shape_cast %607 : vector<4xf32> to vector<4x1xf32>
    %609 = arith.mulf %550, %538 : vector<4x256xf32>
    %610 = arith.mulf %560, %541 : vector<4x256xf32>
    %611 = arith.addf %609, %610 : vector<4x256xf32>
    %cst_107 = arith.constant dense<0.000000e+00> : vector<4xf32>
    %612 = vector.multi_reduction <add>, %611, %cst_107 [1] : vector<4x256xf32> to vector<4xf32>
    %613 = vector.shape_cast %612 : vector<4xf32> to vector<4x1xf32>
    %614 = arith.mulf %555, %538 : vector<4x256xf32>
    %615 = arith.mulf %561, %541 : vector<4x256xf32>
    %616 = arith.addf %614, %615 : vector<4x256xf32>
    %cst_108 = arith.constant dense<0.000000e+00> : vector<4xf32>
    %617 = vector.multi_reduction <add>, %616, %cst_108 [1] : vector<4x256xf32> to vector<4xf32>
    %618 = vector.shape_cast %617 : vector<4xf32> to vector<4x1xf32>
    %cst_109 = arith.constant 1.000000e+00 : f32
    %619 = vector.broadcast %cst_109 : f32 to vector<4x1xf32>
    %620 = arith.divf %619, %566 : vector<4x1xf32>
    %621 = arith.mulf %569, %620 : vector<4x1xf32>
    %622 = arith.mulf %572, %620 : vector<4x1xf32>
    %623 = arith.mulf %621, %569 : vector<4x1xf32>
    %624 = arith.subf %590, %623 : vector<4x1xf32>
    %625 = arith.mulf %621, %572 : vector<4x1xf32>
    %626 = arith.subf %595, %625 : vector<4x1xf32>
    %627 = arith.mulf %622, %572 : vector<4x1xf32>
    %628 = arith.subf %602, %627 : vector<4x1xf32>
    %629 = arith.mulf %621, %605 : vector<4x1xf32>
    %630 = arith.subf %613, %629 : vector<4x1xf32>
    %631 = arith.mulf %622, %605 : vector<4x1xf32>
    %632 = arith.subf %618, %631 : vector<4x1xf32>
    %cst_110 = arith.constant 1.000000e+00 : f32
    %633 = vector.broadcast %cst_110 : f32 to vector<4x1xf32>
    %634 = arith.divf %633, %577 : vector<4x1xf32>
    %635 = arith.mulf %580, %634 : vector<4x1xf32>
    %636 = arith.mulf %583, %634 : vector<4x1xf32>
    %637 = arith.mulf %635, %580 : vector<4x1xf32>
    %638 = arith.subf %624, %637 : vector<4x1xf32>
    %639 = arith.mulf %635, %583 : vector<4x1xf32>
    %640 = arith.subf %626, %639 : vector<4x1xf32>
    %641 = arith.mulf %636, %583 : vector<4x1xf32>
    %642 = arith.subf %628, %641 : vector<4x1xf32>
    %643 = arith.mulf %635, %608 : vector<4x1xf32>
    %644 = arith.subf %630, %643 : vector<4x1xf32>
    %645 = arith.mulf %636, %608 : vector<4x1xf32>
    %646 = arith.subf %632, %645 : vector<4x1xf32>
    %cst_111 = arith.constant 1.000000e+00 : f32
    %647 = vector.broadcast %cst_111 : f32 to vector<4x1xf32>
    %648 = arith.divf %647, %638 : vector<4x1xf32>
    %649 = arith.mulf %640, %648 : vector<4x1xf32>
    %650 = arith.mulf %649, %640 : vector<4x1xf32>
    %651 = arith.subf %642, %650 : vector<4x1xf32>
    %652 = arith.mulf %649, %644 : vector<4x1xf32>
    %653 = arith.subf %646, %652 : vector<4x1xf32>
    %cst_112 = arith.constant 1.000000e+00 : f32
    %654 = vector.broadcast %cst_112 : f32 to vector<4x1xf32>
    %655 = arith.divf %654, %651 : vector<4x1xf32>
    %656 = arith.mulf %653, %655 : vector<4x1xf32>
    %657 = arith.mulf %640, %656 : vector<4x1xf32>
    %658 = arith.subf %644, %657 : vector<4x1xf32>
    %659 = arith.mulf %658, %648 : vector<4x1xf32>
    %660 = arith.mulf %580, %659 : vector<4x1xf32>
    %661 = arith.subf %608, %660 : vector<4x1xf32>
    %662 = arith.mulf %583, %656 : vector<4x1xf32>
    %663 = arith.subf %661, %662 : vector<4x1xf32>
    %664 = arith.mulf %663, %634 : vector<4x1xf32>
    %665 = arith.mulf %569, %659 : vector<4x1xf32>
    %666 = arith.subf %605, %665 : vector<4x1xf32>
    %667 = arith.mulf %572, %656 : vector<4x1xf32>
    %668 = arith.subf %666, %667 : vector<4x1xf32>
    %669 = arith.mulf %668, %620 : vector<4x1xf32>
    %670 = arith.subf %508, %669 : vector<4x1xf32>
    %671 = arith.subf %509, %664 : vector<4x1xf32>
    %672 = arith.subf %510, %659 : vector<4x1xf32>
    %673 = arith.subf %511, %656 : vector<4x1xf32>
    %c4_i32 = arith.constant 4 : i32
    %674 = math.cos %673 : vector<4x1xf32>
    %675 = math.sin %673 : vector<4x1xf32>
    %676 = vector.broadcast %674 : vector<4x1xf32> to vector<4x256xf32>
    %677 = arith.mulf %676, %7 : vector<4x256xf32>
    %678 = vector.broadcast %675 : vector<4x1xf32> to vector<4x256xf32>
    %679 = arith.mulf %678, %11 : vector<4x256xf32>
    %680 = arith.addf %677, %679 : vector<4x256xf32>
    %681 = vector.broadcast %670 : vector<4x1xf32> to vector<4x256xf32>
    %682 = arith.addf %680, %681 : vector<4x256xf32>
    %683 = vector.broadcast %671 : vector<4x1xf32> to vector<4x256xf32>
    %684 = arith.addf %9, %683 : vector<4x256xf32>
    %cst_113 = arith.constant 0.000000e+00 : f32
    %685 = vector.broadcast %cst_113 : f32 to vector<4x1xf32>
    %686 = arith.subf %685, %675 : vector<4x1xf32>
    %687 = vector.broadcast %686 : vector<4x1xf32> to vector<4x256xf32>
    %688 = arith.mulf %687, %7 : vector<4x256xf32>
    %689 = vector.broadcast %674 : vector<4x1xf32> to vector<4x256xf32>
    %690 = arith.mulf %689, %11 : vector<4x256xf32>
    %691 = arith.addf %688, %690 : vector<4x256xf32>
    %692 = vector.broadcast %672 : vector<4x1xf32> to vector<4x256xf32>
    %693 = arith.addf %691, %692 : vector<4x256xf32>
    %cst_114 = arith.constant 1.000000e-01 : f32
    %694 = vector.broadcast %cst_114 : f32 to vector<4x256xf32>
    %695 = arith.maximumf %693, %694 : vector<4x256xf32>
    %696 = tpu.reciprocal %695 {approx = true} : vector<4x256xf32> -> vector<4x256xf32>
    %697 = arith.mulf %696, %696 : vector<4x256xf32>
    %698 = arith.mulf %682, %696 : vector<4x256xf32>
    %699 = arith.subf %698, %13 : vector<4x256xf32>
    %700 = arith.mulf %17, %699 : vector<4x256xf32>
    %701 = arith.mulf %684, %696 : vector<4x256xf32>
    %702 = arith.subf %701, %15 : vector<4x256xf32>
    %703 = arith.mulf %19, %702 : vector<4x256xf32>
    %704 = vector.broadcast %672 : vector<4x1xf32> to vector<4x256xf32>
    %705 = arith.subf %693, %704 : vector<4x256xf32>
    %706 = vector.broadcast %670 : vector<4x1xf32> to vector<4x256xf32>
    %707 = arith.subf %706, %682 : vector<4x256xf32>
    %708 = arith.mulf %17, %696 : vector<4x256xf32>
    %cst_115 = arith.constant 0.000000e+00 : f32
    %709 = vector.broadcast %cst_115 : f32 to vector<4x256xf32>
    %710 = arith.subf %709, %17 : vector<4x256xf32>
    %711 = arith.mulf %710, %682 : vector<4x256xf32>
    %712 = arith.mulf %711, %697 : vector<4x256xf32>
    %713 = arith.mulf %705, %696 : vector<4x256xf32>
    %714 = arith.mulf %682, %697 : vector<4x256xf32>
    %715 = arith.mulf %714, %707 : vector<4x256xf32>
    %716 = arith.subf %713, %715 : vector<4x256xf32>
    %717 = arith.mulf %17, %716 : vector<4x256xf32>
    %718 = arith.mulf %19, %696 : vector<4x256xf32>
    %cst_116 = arith.constant 0.000000e+00 : f32
    %719 = vector.broadcast %cst_116 : f32 to vector<4x256xf32>
    %720 = arith.subf %719, %19 : vector<4x256xf32>
    %721 = arith.mulf %720, %684 : vector<4x256xf32>
    %722 = arith.mulf %721, %697 : vector<4x256xf32>
    %723 = arith.mulf %722, %707 : vector<4x256xf32>
    %724 = arith.mulf %708, %708 : vector<4x256xf32>
    %cst_117 = arith.constant dense<0.000000e+00> : vector<4xf32>
    %725 = vector.multi_reduction <add>, %724, %cst_117 [1] : vector<4x256xf32> to vector<4xf32>
    %726 = vector.shape_cast %725 : vector<4xf32> to vector<4x1xf32>
    %cst_118 = arith.constant 9.99999974E-6 : f32
    %727 = vector.broadcast %cst_118 : f32 to vector<4x1xf32>
    %728 = arith.addf %726, %727 : vector<4x1xf32>
    %729 = arith.mulf %708, %712 : vector<4x256xf32>
    %cst_119 = arith.constant dense<0.000000e+00> : vector<4xf32>
    %730 = vector.multi_reduction <add>, %729, %cst_119 [1] : vector<4x256xf32> to vector<4xf32>
    %731 = vector.shape_cast %730 : vector<4xf32> to vector<4x1xf32>
    %732 = arith.mulf %708, %717 : vector<4x256xf32>
    %cst_120 = arith.constant dense<0.000000e+00> : vector<4xf32>
    %733 = vector.multi_reduction <add>, %732, %cst_120 [1] : vector<4x256xf32> to vector<4xf32>
    %734 = vector.shape_cast %733 : vector<4xf32> to vector<4x1xf32>
    %735 = arith.mulf %718, %718 : vector<4x256xf32>
    %cst_121 = arith.constant dense<0.000000e+00> : vector<4xf32>
    %736 = vector.multi_reduction <add>, %735, %cst_121 [1] : vector<4x256xf32> to vector<4xf32>
    %737 = vector.shape_cast %736 : vector<4xf32> to vector<4x1xf32>
    %cst_122 = arith.constant 9.99999974E-6 : f32
    %738 = vector.broadcast %cst_122 : f32 to vector<4x1xf32>
    %739 = arith.addf %737, %738 : vector<4x1xf32>
    %740 = arith.mulf %718, %722 : vector<4x256xf32>
    %cst_123 = arith.constant dense<0.000000e+00> : vector<4xf32>
    %741 = vector.multi_reduction <add>, %740, %cst_123 [1] : vector<4x256xf32> to vector<4xf32>
    %742 = vector.shape_cast %741 : vector<4xf32> to vector<4x1xf32>
    %743 = arith.mulf %718, %723 : vector<4x256xf32>
    %cst_124 = arith.constant dense<0.000000e+00> : vector<4xf32>
    %744 = vector.multi_reduction <add>, %743, %cst_124 [1] : vector<4x256xf32> to vector<4xf32>
    %745 = vector.shape_cast %744 : vector<4xf32> to vector<4x1xf32>
    %746 = arith.mulf %712, %712 : vector<4x256xf32>
    %747 = arith.mulf %722, %722 : vector<4x256xf32>
    %748 = arith.addf %746, %747 : vector<4x256xf32>
    %cst_125 = arith.constant dense<0.000000e+00> : vector<4xf32>
    %749 = vector.multi_reduction <add>, %748, %cst_125 [1] : vector<4x256xf32> to vector<4xf32>
    %750 = vector.shape_cast %749 : vector<4xf32> to vector<4x1xf32>
    %cst_126 = arith.constant 9.99999974E-6 : f32
    %751 = vector.broadcast %cst_126 : f32 to vector<4x1xf32>
    %752 = arith.addf %750, %751 : vector<4x1xf32>
    %753 = arith.mulf %712, %717 : vector<4x256xf32>
    %754 = arith.mulf %722, %723 : vector<4x256xf32>
    %755 = arith.addf %753, %754 : vector<4x256xf32>
    %cst_127 = arith.constant dense<0.000000e+00> : vector<4xf32>
    %756 = vector.multi_reduction <add>, %755, %cst_127 [1] : vector<4x256xf32> to vector<4xf32>
    %757 = vector.shape_cast %756 : vector<4xf32> to vector<4x1xf32>
    %758 = arith.mulf %717, %717 : vector<4x256xf32>
    %759 = arith.mulf %723, %723 : vector<4x256xf32>
    %760 = arith.addf %758, %759 : vector<4x256xf32>
    %cst_128 = arith.constant dense<0.000000e+00> : vector<4xf32>
    %761 = vector.multi_reduction <add>, %760, %cst_128 [1] : vector<4x256xf32> to vector<4xf32>
    %762 = vector.shape_cast %761 : vector<4xf32> to vector<4x1xf32>
    %cst_129 = arith.constant 9.99999974E-6 : f32
    %763 = vector.broadcast %cst_129 : f32 to vector<4x1xf32>
    %764 = arith.addf %762, %763 : vector<4x1xf32>
    %765 = arith.mulf %708, %700 : vector<4x256xf32>
    %cst_130 = arith.constant dense<0.000000e+00> : vector<4xf32>
    %766 = vector.multi_reduction <add>, %765, %cst_130 [1] : vector<4x256xf32> to vector<4xf32>
    %767 = vector.shape_cast %766 : vector<4xf32> to vector<4x1xf32>
    %768 = arith.mulf %718, %703 : vector<4x256xf32>
    %cst_131 = arith.constant dense<0.000000e+00> : vector<4xf32>
    %769 = vector.multi_reduction <add>, %768, %cst_131 [1] : vector<4x256xf32> to vector<4xf32>
    %770 = vector.shape_cast %769 : vector<4xf32> to vector<4x1xf32>
    %771 = arith.mulf %712, %700 : vector<4x256xf32>
    %772 = arith.mulf %722, %703 : vector<4x256xf32>
    %773 = arith.addf %771, %772 : vector<4x256xf32>
    %cst_132 = arith.constant dense<0.000000e+00> : vector<4xf32>
    %774 = vector.multi_reduction <add>, %773, %cst_132 [1] : vector<4x256xf32> to vector<4xf32>
    %775 = vector.shape_cast %774 : vector<4xf32> to vector<4x1xf32>
    %776 = arith.mulf %717, %700 : vector<4x256xf32>
    %777 = arith.mulf %723, %703 : vector<4x256xf32>
    %778 = arith.addf %776, %777 : vector<4x256xf32>
    %cst_133 = arith.constant dense<0.000000e+00> : vector<4xf32>
    %779 = vector.multi_reduction <add>, %778, %cst_133 [1] : vector<4x256xf32> to vector<4xf32>
    %780 = vector.shape_cast %779 : vector<4xf32> to vector<4x1xf32>
    %cst_134 = arith.constant 1.000000e+00 : f32
    %781 = vector.broadcast %cst_134 : f32 to vector<4x1xf32>
    %782 = arith.divf %781, %728 : vector<4x1xf32>
    %783 = arith.mulf %731, %782 : vector<4x1xf32>
    %784 = arith.mulf %734, %782 : vector<4x1xf32>
    %785 = arith.mulf %783, %731 : vector<4x1xf32>
    %786 = arith.subf %752, %785 : vector<4x1xf32>
    %787 = arith.mulf %783, %734 : vector<4x1xf32>
    %788 = arith.subf %757, %787 : vector<4x1xf32>
    %789 = arith.mulf %784, %734 : vector<4x1xf32>
    %790 = arith.subf %764, %789 : vector<4x1xf32>
    %791 = arith.mulf %783, %767 : vector<4x1xf32>
    %792 = arith.subf %775, %791 : vector<4x1xf32>
    %793 = arith.mulf %784, %767 : vector<4x1xf32>
    %794 = arith.subf %780, %793 : vector<4x1xf32>
    %cst_135 = arith.constant 1.000000e+00 : f32
    %795 = vector.broadcast %cst_135 : f32 to vector<4x1xf32>
    %796 = arith.divf %795, %739 : vector<4x1xf32>
    %797 = arith.mulf %742, %796 : vector<4x1xf32>
    %798 = arith.mulf %745, %796 : vector<4x1xf32>
    %799 = arith.mulf %797, %742 : vector<4x1xf32>
    %800 = arith.subf %786, %799 : vector<4x1xf32>
    %801 = arith.mulf %797, %745 : vector<4x1xf32>
    %802 = arith.subf %788, %801 : vector<4x1xf32>
    %803 = arith.mulf %798, %745 : vector<4x1xf32>
    %804 = arith.subf %790, %803 : vector<4x1xf32>
    %805 = arith.mulf %797, %770 : vector<4x1xf32>
    %806 = arith.subf %792, %805 : vector<4x1xf32>
    %807 = arith.mulf %798, %770 : vector<4x1xf32>
    %808 = arith.subf %794, %807 : vector<4x1xf32>
    %cst_136 = arith.constant 1.000000e+00 : f32
    %809 = vector.broadcast %cst_136 : f32 to vector<4x1xf32>
    %810 = arith.divf %809, %800 : vector<4x1xf32>
    %811 = arith.mulf %802, %810 : vector<4x1xf32>
    %812 = arith.mulf %811, %802 : vector<4x1xf32>
    %813 = arith.subf %804, %812 : vector<4x1xf32>
    %814 = arith.mulf %811, %806 : vector<4x1xf32>
    %815 = arith.subf %808, %814 : vector<4x1xf32>
    %cst_137 = arith.constant 1.000000e+00 : f32
    %816 = vector.broadcast %cst_137 : f32 to vector<4x1xf32>
    %817 = arith.divf %816, %813 : vector<4x1xf32>
    %818 = arith.mulf %815, %817 : vector<4x1xf32>
    %819 = arith.mulf %802, %818 : vector<4x1xf32>
    %820 = arith.subf %806, %819 : vector<4x1xf32>
    %821 = arith.mulf %820, %810 : vector<4x1xf32>
    %822 = arith.mulf %742, %821 : vector<4x1xf32>
    %823 = arith.subf %770, %822 : vector<4x1xf32>
    %824 = arith.mulf %745, %818 : vector<4x1xf32>
    %825 = arith.subf %823, %824 : vector<4x1xf32>
    %826 = arith.mulf %825, %796 : vector<4x1xf32>
    %827 = arith.mulf %731, %821 : vector<4x1xf32>
    %828 = arith.subf %767, %827 : vector<4x1xf32>
    %829 = arith.mulf %734, %818 : vector<4x1xf32>
    %830 = arith.subf %828, %829 : vector<4x1xf32>
    %831 = arith.mulf %830, %782 : vector<4x1xf32>
    %832 = arith.subf %670, %831 : vector<4x1xf32>
    %833 = arith.subf %671, %826 : vector<4x1xf32>
    %834 = arith.subf %672, %821 : vector<4x1xf32>
    %835 = arith.subf %673, %818 : vector<4x1xf32>
    %c5_i32 = arith.constant 5 : i32
    %836 = math.cos %835 : vector<4x1xf32>
    %837 = math.sin %835 : vector<4x1xf32>
    %838 = vector.broadcast %836 : vector<4x1xf32> to vector<4x256xf32>
    %839 = arith.mulf %838, %7 : vector<4x256xf32>
    %840 = vector.broadcast %837 : vector<4x1xf32> to vector<4x256xf32>
    %841 = arith.mulf %840, %11 : vector<4x256xf32>
    %842 = arith.addf %839, %841 : vector<4x256xf32>
    %843 = vector.broadcast %832 : vector<4x1xf32> to vector<4x256xf32>
    %844 = arith.addf %842, %843 : vector<4x256xf32>
    %845 = vector.broadcast %833 : vector<4x1xf32> to vector<4x256xf32>
    %846 = arith.addf %9, %845 : vector<4x256xf32>
    %cst_138 = arith.constant 0.000000e+00 : f32
    %847 = vector.broadcast %cst_138 : f32 to vector<4x1xf32>
    %848 = arith.subf %847, %837 : vector<4x1xf32>
    %849 = vector.broadcast %848 : vector<4x1xf32> to vector<4x256xf32>
    %850 = arith.mulf %849, %7 : vector<4x256xf32>
    %851 = vector.broadcast %836 : vector<4x1xf32> to vector<4x256xf32>
    %852 = arith.mulf %851, %11 : vector<4x256xf32>
    %853 = arith.addf %850, %852 : vector<4x256xf32>
    %854 = vector.broadcast %834 : vector<4x1xf32> to vector<4x256xf32>
    %855 = arith.addf %853, %854 : vector<4x256xf32>
    %cst_139 = arith.constant 1.000000e-01 : f32
    %856 = vector.broadcast %cst_139 : f32 to vector<4x256xf32>
    %857 = arith.maximumf %855, %856 : vector<4x256xf32>
    %858 = tpu.reciprocal %857 {approx = true} : vector<4x256xf32> -> vector<4x256xf32>
    %859 = arith.mulf %858, %858 : vector<4x256xf32>
    %860 = arith.mulf %844, %858 : vector<4x256xf32>
    %861 = arith.subf %860, %13 : vector<4x256xf32>
    %862 = arith.mulf %17, %861 : vector<4x256xf32>
    %863 = arith.mulf %846, %858 : vector<4x256xf32>
    %864 = arith.subf %863, %15 : vector<4x256xf32>
    %865 = arith.mulf %19, %864 : vector<4x256xf32>
    %866 = vector.broadcast %834 : vector<4x1xf32> to vector<4x256xf32>
    %867 = arith.subf %855, %866 : vector<4x256xf32>
    %868 = vector.broadcast %832 : vector<4x1xf32> to vector<4x256xf32>
    %869 = arith.subf %868, %844 : vector<4x256xf32>
    %870 = arith.mulf %17, %858 : vector<4x256xf32>
    %cst_140 = arith.constant 0.000000e+00 : f32
    %871 = vector.broadcast %cst_140 : f32 to vector<4x256xf32>
    %872 = arith.subf %871, %17 : vector<4x256xf32>
    %873 = arith.mulf %872, %844 : vector<4x256xf32>
    %874 = arith.mulf %873, %859 : vector<4x256xf32>
    %875 = arith.mulf %867, %858 : vector<4x256xf32>
    %876 = arith.mulf %844, %859 : vector<4x256xf32>
    %877 = arith.mulf %876, %869 : vector<4x256xf32>
    %878 = arith.subf %875, %877 : vector<4x256xf32>
    %879 = arith.mulf %17, %878 : vector<4x256xf32>
    %880 = arith.mulf %19, %858 : vector<4x256xf32>
    %cst_141 = arith.constant 0.000000e+00 : f32
    %881 = vector.broadcast %cst_141 : f32 to vector<4x256xf32>
    %882 = arith.subf %881, %19 : vector<4x256xf32>
    %883 = arith.mulf %882, %846 : vector<4x256xf32>
    %884 = arith.mulf %883, %859 : vector<4x256xf32>
    %885 = arith.mulf %884, %869 : vector<4x256xf32>
    %886 = arith.mulf %870, %870 : vector<4x256xf32>
    %cst_142 = arith.constant dense<0.000000e+00> : vector<4xf32>
    %887 = vector.multi_reduction <add>, %886, %cst_142 [1] : vector<4x256xf32> to vector<4xf32>
    %888 = vector.shape_cast %887 : vector<4xf32> to vector<4x1xf32>
    %cst_143 = arith.constant 9.99999974E-6 : f32
    %889 = vector.broadcast %cst_143 : f32 to vector<4x1xf32>
    %890 = arith.addf %888, %889 : vector<4x1xf32>
    %891 = arith.mulf %870, %874 : vector<4x256xf32>
    %cst_144 = arith.constant dense<0.000000e+00> : vector<4xf32>
    %892 = vector.multi_reduction <add>, %891, %cst_144 [1] : vector<4x256xf32> to vector<4xf32>
    %893 = vector.shape_cast %892 : vector<4xf32> to vector<4x1xf32>
    %894 = arith.mulf %870, %879 : vector<4x256xf32>
    %cst_145 = arith.constant dense<0.000000e+00> : vector<4xf32>
    %895 = vector.multi_reduction <add>, %894, %cst_145 [1] : vector<4x256xf32> to vector<4xf32>
    %896 = vector.shape_cast %895 : vector<4xf32> to vector<4x1xf32>
    %897 = arith.mulf %880, %880 : vector<4x256xf32>
    %cst_146 = arith.constant dense<0.000000e+00> : vector<4xf32>
    %898 = vector.multi_reduction <add>, %897, %cst_146 [1] : vector<4x256xf32> to vector<4xf32>
    %899 = vector.shape_cast %898 : vector<4xf32> to vector<4x1xf32>
    %cst_147 = arith.constant 9.99999974E-6 : f32
    %900 = vector.broadcast %cst_147 : f32 to vector<4x1xf32>
    %901 = arith.addf %899, %900 : vector<4x1xf32>
    %902 = arith.mulf %880, %884 : vector<4x256xf32>
    %cst_148 = arith.constant dense<0.000000e+00> : vector<4xf32>
    %903 = vector.multi_reduction <add>, %902, %cst_148 [1] : vector<4x256xf32> to vector<4xf32>
    %904 = vector.shape_cast %903 : vector<4xf32> to vector<4x1xf32>
    %905 = arith.mulf %880, %885 : vector<4x256xf32>
    %cst_149 = arith.constant dense<0.000000e+00> : vector<4xf32>
    %906 = vector.multi_reduction <add>, %905, %cst_149 [1] : vector<4x256xf32> to vector<4xf32>
    %907 = vector.shape_cast %906 : vector<4xf32> to vector<4x1xf32>
    %908 = arith.mulf %874, %874 : vector<4x256xf32>
    %909 = arith.mulf %884, %884 : vector<4x256xf32>
    %910 = arith.addf %908, %909 : vector<4x256xf32>
    %cst_150 = arith.constant dense<0.000000e+00> : vector<4xf32>
    %911 = vector.multi_reduction <add>, %910, %cst_150 [1] : vector<4x256xf32> to vector<4xf32>
    %912 = vector.shape_cast %911 : vector<4xf32> to vector<4x1xf32>
    %cst_151 = arith.constant 9.99999974E-6 : f32
    %913 = vector.broadcast %cst_151 : f32 to vector<4x1xf32>
    %914 = arith.addf %912, %913 : vector<4x1xf32>
    %915 = arith.mulf %874, %879 : vector<4x256xf32>
    %916 = arith.mulf %884, %885 : vector<4x256xf32>
    %917 = arith.addf %915, %916 : vector<4x256xf32>
    %cst_152 = arith.constant dense<0.000000e+00> : vector<4xf32>
    %918 = vector.multi_reduction <add>, %917, %cst_152 [1] : vector<4x256xf32> to vector<4xf32>
    %919 = vector.shape_cast %918 : vector<4xf32> to vector<4x1xf32>
    %920 = arith.mulf %879, %879 : vector<4x256xf32>
    %921 = arith.mulf %885, %885 : vector<4x256xf32>
    %922 = arith.addf %920, %921 : vector<4x256xf32>
    %cst_153 = arith.constant dense<0.000000e+00> : vector<4xf32>
    %923 = vector.multi_reduction <add>, %922, %cst_153 [1] : vector<4x256xf32> to vector<4xf32>
    %924 = vector.shape_cast %923 : vector<4xf32> to vector<4x1xf32>
    %cst_154 = arith.constant 9.99999974E-6 : f32
    %925 = vector.broadcast %cst_154 : f32 to vector<4x1xf32>
    %926 = arith.addf %924, %925 : vector<4x1xf32>
    %927 = arith.mulf %870, %862 : vector<4x256xf32>
    %cst_155 = arith.constant dense<0.000000e+00> : vector<4xf32>
    %928 = vector.multi_reduction <add>, %927, %cst_155 [1] : vector<4x256xf32> to vector<4xf32>
    %929 = vector.shape_cast %928 : vector<4xf32> to vector<4x1xf32>
    %930 = arith.mulf %880, %865 : vector<4x256xf32>
    %cst_156 = arith.constant dense<0.000000e+00> : vector<4xf32>
    %931 = vector.multi_reduction <add>, %930, %cst_156 [1] : vector<4x256xf32> to vector<4xf32>
    %932 = vector.shape_cast %931 : vector<4xf32> to vector<4x1xf32>
    %933 = arith.mulf %874, %862 : vector<4x256xf32>
    %934 = arith.mulf %884, %865 : vector<4x256xf32>
    %935 = arith.addf %933, %934 : vector<4x256xf32>
    %cst_157 = arith.constant dense<0.000000e+00> : vector<4xf32>
    %936 = vector.multi_reduction <add>, %935, %cst_157 [1] : vector<4x256xf32> to vector<4xf32>
    %937 = vector.shape_cast %936 : vector<4xf32> to vector<4x1xf32>
    %938 = arith.mulf %879, %862 : vector<4x256xf32>
    %939 = arith.mulf %885, %865 : vector<4x256xf32>
    %940 = arith.addf %938, %939 : vector<4x256xf32>
    %cst_158 = arith.constant dense<0.000000e+00> : vector<4xf32>
    %941 = vector.multi_reduction <add>, %940, %cst_158 [1] : vector<4x256xf32> to vector<4xf32>
    %942 = vector.shape_cast %941 : vector<4xf32> to vector<4x1xf32>
    %cst_159 = arith.constant 1.000000e+00 : f32
    %943 = vector.broadcast %cst_159 : f32 to vector<4x1xf32>
    %944 = arith.divf %943, %890 : vector<4x1xf32>
    %945 = arith.mulf %893, %944 : vector<4x1xf32>
    %946 = arith.mulf %896, %944 : vector<4x1xf32>
    %947 = arith.mulf %945, %893 : vector<4x1xf32>
    %948 = arith.subf %914, %947 : vector<4x1xf32>
    %949 = arith.mulf %945, %896 : vector<4x1xf32>
    %950 = arith.subf %919, %949 : vector<4x1xf32>
    %951 = arith.mulf %946, %896 : vector<4x1xf32>
    %952 = arith.subf %926, %951 : vector<4x1xf32>
    %953 = arith.mulf %945, %929 : vector<4x1xf32>
    %954 = arith.subf %937, %953 : vector<4x1xf32>
    %955 = arith.mulf %946, %929 : vector<4x1xf32>
    %956 = arith.subf %942, %955 : vector<4x1xf32>
    %cst_160 = arith.constant 1.000000e+00 : f32
    %957 = vector.broadcast %cst_160 : f32 to vector<4x1xf32>
    %958 = arith.divf %957, %901 : vector<4x1xf32>
    %959 = arith.mulf %904, %958 : vector<4x1xf32>
    %960 = arith.mulf %907, %958 : vector<4x1xf32>
    %961 = arith.mulf %959, %904 : vector<4x1xf32>
    %962 = arith.subf %948, %961 : vector<4x1xf32>
    %963 = arith.mulf %959, %907 : vector<4x1xf32>
    %964 = arith.subf %950, %963 : vector<4x1xf32>
    %965 = arith.mulf %960, %907 : vector<4x1xf32>
    %966 = arith.subf %952, %965 : vector<4x1xf32>
    %967 = arith.mulf %959, %932 : vector<4x1xf32>
    %968 = arith.subf %954, %967 : vector<4x1xf32>
    %969 = arith.mulf %960, %932 : vector<4x1xf32>
    %970 = arith.subf %956, %969 : vector<4x1xf32>
    %cst_161 = arith.constant 1.000000e+00 : f32
    %971 = vector.broadcast %cst_161 : f32 to vector<4x1xf32>
    %972 = arith.divf %971, %962 : vector<4x1xf32>
    %973 = arith.mulf %964, %972 : vector<4x1xf32>
    %974 = arith.mulf %973, %964 : vector<4x1xf32>
    %975 = arith.subf %966, %974 : vector<4x1xf32>
    %976 = arith.mulf %973, %968 : vector<4x1xf32>
    %977 = arith.subf %970, %976 : vector<4x1xf32>
    %cst_162 = arith.constant 1.000000e+00 : f32
    %978 = vector.broadcast %cst_162 : f32 to vector<4x1xf32>
    %979 = arith.divf %978, %975 : vector<4x1xf32>
    %980 = arith.mulf %977, %979 : vector<4x1xf32>
    %981 = arith.mulf %964, %980 : vector<4x1xf32>
    %982 = arith.subf %968, %981 : vector<4x1xf32>
    %983 = arith.mulf %982, %972 : vector<4x1xf32>
    %984 = arith.mulf %904, %983 : vector<4x1xf32>
    %985 = arith.subf %932, %984 : vector<4x1xf32>
    %986 = arith.mulf %907, %980 : vector<4x1xf32>
    %987 = arith.subf %985, %986 : vector<4x1xf32>
    %988 = arith.mulf %987, %958 : vector<4x1xf32>
    %989 = arith.mulf %893, %983 : vector<4x1xf32>
    %990 = arith.subf %929, %989 : vector<4x1xf32>
    %991 = arith.mulf %896, %980 : vector<4x1xf32>
    %992 = arith.subf %990, %991 : vector<4x1xf32>
    %993 = arith.mulf %992, %944 : vector<4x1xf32>
    %994 = arith.subf %832, %993 : vector<4x1xf32>
    %995 = arith.subf %833, %988 : vector<4x1xf32>
    %996 = arith.subf %834, %983 : vector<4x1xf32>
    %997 = arith.subf %835, %980 : vector<4x1xf32>
    %c6_i32 = arith.constant 6 : i32
    %998 = math.cos %997 : vector<4x1xf32>
    %999 = math.sin %997 : vector<4x1xf32>
    %1000 = vector.broadcast %998 : vector<4x1xf32> to vector<4x256xf32>
    %1001 = arith.mulf %1000, %7 : vector<4x256xf32>
    %1002 = vector.broadcast %999 : vector<4x1xf32> to vector<4x256xf32>
    %1003 = arith.mulf %1002, %11 : vector<4x256xf32>
    %1004 = arith.addf %1001, %1003 : vector<4x256xf32>
    %1005 = vector.broadcast %994 : vector<4x1xf32> to vector<4x256xf32>
    %1006 = arith.addf %1004, %1005 : vector<4x256xf32>
    %1007 = vector.broadcast %995 : vector<4x1xf32> to vector<4x256xf32>
    %1008 = arith.addf %9, %1007 : vector<4x256xf32>
    %cst_163 = arith.constant 0.000000e+00 : f32
    %1009 = vector.broadcast %cst_163 : f32 to vector<4x1xf32>
    %1010 = arith.subf %1009, %999 : vector<4x1xf32>
    %1011 = vector.broadcast %1010 : vector<4x1xf32> to vector<4x256xf32>
    %1012 = arith.mulf %1011, %7 : vector<4x256xf32>
    %1013 = vector.broadcast %998 : vector<4x1xf32> to vector<4x256xf32>
    %1014 = arith.mulf %1013, %11 : vector<4x256xf32>
    %1015 = arith.addf %1012, %1014 : vector<4x256xf32>
    %1016 = vector.broadcast %996 : vector<4x1xf32> to vector<4x256xf32>
    %1017 = arith.addf %1015, %1016 : vector<4x256xf32>
    %cst_164 = arith.constant 1.000000e-01 : f32
    %1018 = vector.broadcast %cst_164 : f32 to vector<4x256xf32>
    %1019 = arith.maximumf %1017, %1018 : vector<4x256xf32>
    %1020 = tpu.reciprocal %1019 {approx = true} : vector<4x256xf32> -> vector<4x256xf32>
    %1021 = arith.mulf %1020, %1020 : vector<4x256xf32>
    %1022 = arith.mulf %1006, %1020 : vector<4x256xf32>
    %1023 = arith.subf %1022, %13 : vector<4x256xf32>
    %1024 = arith.mulf %17, %1023 : vector<4x256xf32>
    %1025 = arith.mulf %1008, %1020 : vector<4x256xf32>
    %1026 = arith.subf %1025, %15 : vector<4x256xf32>
    %1027 = arith.mulf %19, %1026 : vector<4x256xf32>
    %1028 = vector.broadcast %996 : vector<4x1xf32> to vector<4x256xf32>
    %1029 = arith.subf %1017, %1028 : vector<4x256xf32>
    %1030 = vector.broadcast %994 : vector<4x1xf32> to vector<4x256xf32>
    %1031 = arith.subf %1030, %1006 : vector<4x256xf32>
    %1032 = arith.mulf %17, %1020 : vector<4x256xf32>
    %cst_165 = arith.constant 0.000000e+00 : f32
    %1033 = vector.broadcast %cst_165 : f32 to vector<4x256xf32>
    %1034 = arith.subf %1033, %17 : vector<4x256xf32>
    %1035 = arith.mulf %1034, %1006 : vector<4x256xf32>
    %1036 = arith.mulf %1035, %1021 : vector<4x256xf32>
    %1037 = arith.mulf %1029, %1020 : vector<4x256xf32>
    %1038 = arith.mulf %1006, %1021 : vector<4x256xf32>
    %1039 = arith.mulf %1038, %1031 : vector<4x256xf32>
    %1040 = arith.subf %1037, %1039 : vector<4x256xf32>
    %1041 = arith.mulf %17, %1040 : vector<4x256xf32>
    %1042 = arith.mulf %19, %1020 : vector<4x256xf32>
    %cst_166 = arith.constant 0.000000e+00 : f32
    %1043 = vector.broadcast %cst_166 : f32 to vector<4x256xf32>
    %1044 = arith.subf %1043, %19 : vector<4x256xf32>
    %1045 = arith.mulf %1044, %1008 : vector<4x256xf32>
    %1046 = arith.mulf %1045, %1021 : vector<4x256xf32>
    %1047 = arith.mulf %1046, %1031 : vector<4x256xf32>
    %1048 = arith.mulf %1032, %1032 : vector<4x256xf32>
    %cst_167 = arith.constant dense<0.000000e+00> : vector<4xf32>
    %1049 = vector.multi_reduction <add>, %1048, %cst_167 [1] : vector<4x256xf32> to vector<4xf32>
    %1050 = vector.shape_cast %1049 : vector<4xf32> to vector<4x1xf32>
    %cst_168 = arith.constant 9.99999974E-6 : f32
    %1051 = vector.broadcast %cst_168 : f32 to vector<4x1xf32>
    %1052 = arith.addf %1050, %1051 : vector<4x1xf32>
    %1053 = arith.mulf %1032, %1036 : vector<4x256xf32>
    %cst_169 = arith.constant dense<0.000000e+00> : vector<4xf32>
    %1054 = vector.multi_reduction <add>, %1053, %cst_169 [1] : vector<4x256xf32> to vector<4xf32>
    %1055 = vector.shape_cast %1054 : vector<4xf32> to vector<4x1xf32>
    %1056 = arith.mulf %1032, %1041 : vector<4x256xf32>
    %cst_170 = arith.constant dense<0.000000e+00> : vector<4xf32>
    %1057 = vector.multi_reduction <add>, %1056, %cst_170 [1] : vector<4x256xf32> to vector<4xf32>
    %1058 = vector.shape_cast %1057 : vector<4xf32> to vector<4x1xf32>
    %1059 = arith.mulf %1042, %1042 : vector<4x256xf32>
    %cst_171 = arith.constant dense<0.000000e+00> : vector<4xf32>
    %1060 = vector.multi_reduction <add>, %1059, %cst_171 [1] : vector<4x256xf32> to vector<4xf32>
    %1061 = vector.shape_cast %1060 : vector<4xf32> to vector<4x1xf32>
    %cst_172 = arith.constant 9.99999974E-6 : f32
    %1062 = vector.broadcast %cst_172 : f32 to vector<4x1xf32>
    %1063 = arith.addf %1061, %1062 : vector<4x1xf32>
    %1064 = arith.mulf %1042, %1046 : vector<4x256xf32>
    %cst_173 = arith.constant dense<0.000000e+00> : vector<4xf32>
    %1065 = vector.multi_reduction <add>, %1064, %cst_173 [1] : vector<4x256xf32> to vector<4xf32>
    %1066 = vector.shape_cast %1065 : vector<4xf32> to vector<4x1xf32>
    %1067 = arith.mulf %1042, %1047 : vector<4x256xf32>
    %cst_174 = arith.constant dense<0.000000e+00> : vector<4xf32>
    %1068 = vector.multi_reduction <add>, %1067, %cst_174 [1] : vector<4x256xf32> to vector<4xf32>
    %1069 = vector.shape_cast %1068 : vector<4xf32> to vector<4x1xf32>
    %1070 = arith.mulf %1036, %1036 : vector<4x256xf32>
    %1071 = arith.mulf %1046, %1046 : vector<4x256xf32>
    %1072 = arith.addf %1070, %1071 : vector<4x256xf32>
    %cst_175 = arith.constant dense<0.000000e+00> : vector<4xf32>
    %1073 = vector.multi_reduction <add>, %1072, %cst_175 [1] : vector<4x256xf32> to vector<4xf32>
    %1074 = vector.shape_cast %1073 : vector<4xf32> to vector<4x1xf32>
    %cst_176 = arith.constant 9.99999974E-6 : f32
    %1075 = vector.broadcast %cst_176 : f32 to vector<4x1xf32>
    %1076 = arith.addf %1074, %1075 : vector<4x1xf32>
    %1077 = arith.mulf %1036, %1041 : vector<4x256xf32>
    %1078 = arith.mulf %1046, %1047 : vector<4x256xf32>
    %1079 = arith.addf %1077, %1078 : vector<4x256xf32>
    %cst_177 = arith.constant dense<0.000000e+00> : vector<4xf32>
    %1080 = vector.multi_reduction <add>, %1079, %cst_177 [1] : vector<4x256xf32> to vector<4xf32>
    %1081 = vector.shape_cast %1080 : vector<4xf32> to vector<4x1xf32>
    %1082 = arith.mulf %1041, %1041 : vector<4x256xf32>
    %1083 = arith.mulf %1047, %1047 : vector<4x256xf32>
    %1084 = arith.addf %1082, %1083 : vector<4x256xf32>
    %cst_178 = arith.constant dense<0.000000e+00> : vector<4xf32>
    %1085 = vector.multi_reduction <add>, %1084, %cst_178 [1] : vector<4x256xf32> to vector<4xf32>
    %1086 = vector.shape_cast %1085 : vector<4xf32> to vector<4x1xf32>
    %cst_179 = arith.constant 9.99999974E-6 : f32
    %1087 = vector.broadcast %cst_179 : f32 to vector<4x1xf32>
    %1088 = arith.addf %1086, %1087 : vector<4x1xf32>
    %1089 = arith.mulf %1032, %1024 : vector<4x256xf32>
    %cst_180 = arith.constant dense<0.000000e+00> : vector<4xf32>
    %1090 = vector.multi_reduction <add>, %1089, %cst_180 [1] : vector<4x256xf32> to vector<4xf32>
    %1091 = vector.shape_cast %1090 : vector<4xf32> to vector<4x1xf32>
    %1092 = arith.mulf %1042, %1027 : vector<4x256xf32>
    %cst_181 = arith.constant dense<0.000000e+00> : vector<4xf32>
    %1093 = vector.multi_reduction <add>, %1092, %cst_181 [1] : vector<4x256xf32> to vector<4xf32>
    %1094 = vector.shape_cast %1093 : vector<4xf32> to vector<4x1xf32>
    %1095 = arith.mulf %1036, %1024 : vector<4x256xf32>
    %1096 = arith.mulf %1046, %1027 : vector<4x256xf32>
    %1097 = arith.addf %1095, %1096 : vector<4x256xf32>
    %cst_182 = arith.constant dense<0.000000e+00> : vector<4xf32>
    %1098 = vector.multi_reduction <add>, %1097, %cst_182 [1] : vector<4x256xf32> to vector<4xf32>
    %1099 = vector.shape_cast %1098 : vector<4xf32> to vector<4x1xf32>
    %1100 = arith.mulf %1041, %1024 : vector<4x256xf32>
    %1101 = arith.mulf %1047, %1027 : vector<4x256xf32>
    %1102 = arith.addf %1100, %1101 : vector<4x256xf32>
    %cst_183 = arith.constant dense<0.000000e+00> : vector<4xf32>
    %1103 = vector.multi_reduction <add>, %1102, %cst_183 [1] : vector<4x256xf32> to vector<4xf32>
    %1104 = vector.shape_cast %1103 : vector<4xf32> to vector<4x1xf32>
    %cst_184 = arith.constant 1.000000e+00 : f32
    %1105 = vector.broadcast %cst_184 : f32 to vector<4x1xf32>
    %1106 = arith.divf %1105, %1052 : vector<4x1xf32>
    %1107 = arith.mulf %1055, %1106 : vector<4x1xf32>
    %1108 = arith.mulf %1058, %1106 : vector<4x1xf32>
    %1109 = arith.mulf %1107, %1055 : vector<4x1xf32>
    %1110 = arith.subf %1076, %1109 : vector<4x1xf32>
    %1111 = arith.mulf %1107, %1058 : vector<4x1xf32>
    %1112 = arith.subf %1081, %1111 : vector<4x1xf32>
    %1113 = arith.mulf %1108, %1058 : vector<4x1xf32>
    %1114 = arith.subf %1088, %1113 : vector<4x1xf32>
    %1115 = arith.mulf %1107, %1091 : vector<4x1xf32>
    %1116 = arith.subf %1099, %1115 : vector<4x1xf32>
    %1117 = arith.mulf %1108, %1091 : vector<4x1xf32>
    %1118 = arith.subf %1104, %1117 : vector<4x1xf32>
    %cst_185 = arith.constant 1.000000e+00 : f32
    %1119 = vector.broadcast %cst_185 : f32 to vector<4x1xf32>
    %1120 = arith.divf %1119, %1063 : vector<4x1xf32>
    %1121 = arith.mulf %1066, %1120 : vector<4x1xf32>
    %1122 = arith.mulf %1069, %1120 : vector<4x1xf32>
    %1123 = arith.mulf %1121, %1066 : vector<4x1xf32>
    %1124 = arith.subf %1110, %1123 : vector<4x1xf32>
    %1125 = arith.mulf %1121, %1069 : vector<4x1xf32>
    %1126 = arith.subf %1112, %1125 : vector<4x1xf32>
    %1127 = arith.mulf %1122, %1069 : vector<4x1xf32>
    %1128 = arith.subf %1114, %1127 : vector<4x1xf32>
    %1129 = arith.mulf %1121, %1094 : vector<4x1xf32>
    %1130 = arith.subf %1116, %1129 : vector<4x1xf32>
    %1131 = arith.mulf %1122, %1094 : vector<4x1xf32>
    %1132 = arith.subf %1118, %1131 : vector<4x1xf32>
    %cst_186 = arith.constant 1.000000e+00 : f32
    %1133 = vector.broadcast %cst_186 : f32 to vector<4x1xf32>
    %1134 = arith.divf %1133, %1124 : vector<4x1xf32>
    %1135 = arith.mulf %1126, %1134 : vector<4x1xf32>
    %1136 = arith.mulf %1135, %1126 : vector<4x1xf32>
    %1137 = arith.subf %1128, %1136 : vector<4x1xf32>
    %1138 = arith.mulf %1135, %1130 : vector<4x1xf32>
    %1139 = arith.subf %1132, %1138 : vector<4x1xf32>
    %cst_187 = arith.constant 1.000000e+00 : f32
    %1140 = vector.broadcast %cst_187 : f32 to vector<4x1xf32>
    %1141 = arith.divf %1140, %1137 : vector<4x1xf32>
    %1142 = arith.mulf %1139, %1141 : vector<4x1xf32>
    %1143 = arith.mulf %1126, %1142 : vector<4x1xf32>
    %1144 = arith.subf %1130, %1143 : vector<4x1xf32>
    %1145 = arith.mulf %1144, %1134 : vector<4x1xf32>
    %1146 = arith.mulf %1066, %1145 : vector<4x1xf32>
    %1147 = arith.subf %1094, %1146 : vector<4x1xf32>
    %1148 = arith.mulf %1069, %1142 : vector<4x1xf32>
    %1149 = arith.subf %1147, %1148 : vector<4x1xf32>
    %1150 = arith.mulf %1149, %1120 : vector<4x1xf32>
    %1151 = arith.mulf %1055, %1145 : vector<4x1xf32>
    %1152 = arith.subf %1091, %1151 : vector<4x1xf32>
    %1153 = arith.mulf %1058, %1142 : vector<4x1xf32>
    %1154 = arith.subf %1152, %1153 : vector<4x1xf32>
    %1155 = arith.mulf %1154, %1106 : vector<4x1xf32>
    %1156 = arith.subf %994, %1155 : vector<4x1xf32>
    %1157 = arith.subf %995, %1150 : vector<4x1xf32>
    %1158 = arith.subf %996, %1145 : vector<4x1xf32>
    %1159 = arith.subf %997, %1142 : vector<4x1xf32>
    %c7_i32 = arith.constant 7 : i32
    %1160 = math.cos %1159 : vector<4x1xf32>
    %1161 = math.sin %1159 : vector<4x1xf32>
    %1162 = vector.broadcast %1160 : vector<4x1xf32> to vector<4x256xf32>
    %1163 = arith.mulf %1162, %7 : vector<4x256xf32>
    %1164 = vector.broadcast %1161 : vector<4x1xf32> to vector<4x256xf32>
    %1165 = arith.mulf %1164, %11 : vector<4x256xf32>
    %1166 = arith.addf %1163, %1165 : vector<4x256xf32>
    %1167 = vector.broadcast %1156 : vector<4x1xf32> to vector<4x256xf32>
    %1168 = arith.addf %1166, %1167 : vector<4x256xf32>
    %1169 = vector.broadcast %1157 : vector<4x1xf32> to vector<4x256xf32>
    %1170 = arith.addf %9, %1169 : vector<4x256xf32>
    %cst_188 = arith.constant 0.000000e+00 : f32
    %1171 = vector.broadcast %cst_188 : f32 to vector<4x1xf32>
    %1172 = arith.subf %1171, %1161 : vector<4x1xf32>
    %1173 = vector.broadcast %1172 : vector<4x1xf32> to vector<4x256xf32>
    %1174 = arith.mulf %1173, %7 : vector<4x256xf32>
    %1175 = vector.broadcast %1160 : vector<4x1xf32> to vector<4x256xf32>
    %1176 = arith.mulf %1175, %11 : vector<4x256xf32>
    %1177 = arith.addf %1174, %1176 : vector<4x256xf32>
    %1178 = vector.broadcast %1158 : vector<4x1xf32> to vector<4x256xf32>
    %1179 = arith.addf %1177, %1178 : vector<4x256xf32>
    %cst_189 = arith.constant 1.000000e-01 : f32
    %1180 = vector.broadcast %cst_189 : f32 to vector<4x256xf32>
    %1181 = arith.maximumf %1179, %1180 : vector<4x256xf32>
    %1182 = tpu.reciprocal %1181 {approx = true} : vector<4x256xf32> -> vector<4x256xf32>
    %1183 = arith.mulf %1182, %1182 : vector<4x256xf32>
    %1184 = arith.mulf %1168, %1182 : vector<4x256xf32>
    %1185 = arith.subf %1184, %13 : vector<4x256xf32>
    %1186 = arith.mulf %17, %1185 : vector<4x256xf32>
    %1187 = arith.mulf %1170, %1182 : vector<4x256xf32>
    %1188 = arith.subf %1187, %15 : vector<4x256xf32>
    %1189 = arith.mulf %19, %1188 : vector<4x256xf32>
    %1190 = vector.broadcast %1158 : vector<4x1xf32> to vector<4x256xf32>
    %1191 = arith.subf %1179, %1190 : vector<4x256xf32>
    %1192 = vector.broadcast %1156 : vector<4x1xf32> to vector<4x256xf32>
    %1193 = arith.subf %1192, %1168 : vector<4x256xf32>
    %1194 = arith.mulf %17, %1182 : vector<4x256xf32>
    %cst_190 = arith.constant 0.000000e+00 : f32
    %1195 = vector.broadcast %cst_190 : f32 to vector<4x256xf32>
    %1196 = arith.subf %1195, %17 : vector<4x256xf32>
    %1197 = arith.mulf %1196, %1168 : vector<4x256xf32>
    %1198 = arith.mulf %1197, %1183 : vector<4x256xf32>
    %1199 = arith.mulf %1191, %1182 : vector<4x256xf32>
    %1200 = arith.mulf %1168, %1183 : vector<4x256xf32>
    %1201 = arith.mulf %1200, %1193 : vector<4x256xf32>
    %1202 = arith.subf %1199, %1201 : vector<4x256xf32>
    %1203 = arith.mulf %17, %1202 : vector<4x256xf32>
    %1204 = arith.mulf %19, %1182 : vector<4x256xf32>
    %cst_191 = arith.constant 0.000000e+00 : f32
    %1205 = vector.broadcast %cst_191 : f32 to vector<4x256xf32>
    %1206 = arith.subf %1205, %19 : vector<4x256xf32>
    %1207 = arith.mulf %1206, %1170 : vector<4x256xf32>
    %1208 = arith.mulf %1207, %1183 : vector<4x256xf32>
    %1209 = arith.mulf %1208, %1193 : vector<4x256xf32>
    %1210 = arith.mulf %1194, %1194 : vector<4x256xf32>
    %cst_192 = arith.constant dense<0.000000e+00> : vector<4xf32>
    %1211 = vector.multi_reduction <add>, %1210, %cst_192 [1] : vector<4x256xf32> to vector<4xf32>
    %1212 = vector.shape_cast %1211 : vector<4xf32> to vector<4x1xf32>
    %cst_193 = arith.constant 9.99999974E-6 : f32
    %1213 = vector.broadcast %cst_193 : f32 to vector<4x1xf32>
    %1214 = arith.addf %1212, %1213 : vector<4x1xf32>
    %1215 = arith.mulf %1194, %1198 : vector<4x256xf32>
    %cst_194 = arith.constant dense<0.000000e+00> : vector<4xf32>
    %1216 = vector.multi_reduction <add>, %1215, %cst_194 [1] : vector<4x256xf32> to vector<4xf32>
    %1217 = vector.shape_cast %1216 : vector<4xf32> to vector<4x1xf32>
    %1218 = arith.mulf %1194, %1203 : vector<4x256xf32>
    %cst_195 = arith.constant dense<0.000000e+00> : vector<4xf32>
    %1219 = vector.multi_reduction <add>, %1218, %cst_195 [1] : vector<4x256xf32> to vector<4xf32>
    %1220 = vector.shape_cast %1219 : vector<4xf32> to vector<4x1xf32>
    %1221 = arith.mulf %1204, %1204 : vector<4x256xf32>
    %cst_196 = arith.constant dense<0.000000e+00> : vector<4xf32>
    %1222 = vector.multi_reduction <add>, %1221, %cst_196 [1] : vector<4x256xf32> to vector<4xf32>
    %1223 = vector.shape_cast %1222 : vector<4xf32> to vector<4x1xf32>
    %cst_197 = arith.constant 9.99999974E-6 : f32
    %1224 = vector.broadcast %cst_197 : f32 to vector<4x1xf32>
    %1225 = arith.addf %1223, %1224 : vector<4x1xf32>
    %1226 = arith.mulf %1204, %1208 : vector<4x256xf32>
    %cst_198 = arith.constant dense<0.000000e+00> : vector<4xf32>
    %1227 = vector.multi_reduction <add>, %1226, %cst_198 [1] : vector<4x256xf32> to vector<4xf32>
    %1228 = vector.shape_cast %1227 : vector<4xf32> to vector<4x1xf32>
    %1229 = arith.mulf %1204, %1209 : vector<4x256xf32>
    %cst_199 = arith.constant dense<0.000000e+00> : vector<4xf32>
    %1230 = vector.multi_reduction <add>, %1229, %cst_199 [1] : vector<4x256xf32> to vector<4xf32>
    %1231 = vector.shape_cast %1230 : vector<4xf32> to vector<4x1xf32>
    %1232 = arith.mulf %1198, %1198 : vector<4x256xf32>
    %1233 = arith.mulf %1208, %1208 : vector<4x256xf32>
    %1234 = arith.addf %1232, %1233 : vector<4x256xf32>
    %cst_200 = arith.constant dense<0.000000e+00> : vector<4xf32>
    %1235 = vector.multi_reduction <add>, %1234, %cst_200 [1] : vector<4x256xf32> to vector<4xf32>
    %1236 = vector.shape_cast %1235 : vector<4xf32> to vector<4x1xf32>
    %cst_201 = arith.constant 9.99999974E-6 : f32
    %1237 = vector.broadcast %cst_201 : f32 to vector<4x1xf32>
    %1238 = arith.addf %1236, %1237 : vector<4x1xf32>
    %1239 = arith.mulf %1198, %1203 : vector<4x256xf32>
    %1240 = arith.mulf %1208, %1209 : vector<4x256xf32>
    %1241 = arith.addf %1239, %1240 : vector<4x256xf32>
    %cst_202 = arith.constant dense<0.000000e+00> : vector<4xf32>
    %1242 = vector.multi_reduction <add>, %1241, %cst_202 [1] : vector<4x256xf32> to vector<4xf32>
    %1243 = vector.shape_cast %1242 : vector<4xf32> to vector<4x1xf32>
    %1244 = arith.mulf %1203, %1203 : vector<4x256xf32>
    %1245 = arith.mulf %1209, %1209 : vector<4x256xf32>
    %1246 = arith.addf %1244, %1245 : vector<4x256xf32>
    %cst_203 = arith.constant dense<0.000000e+00> : vector<4xf32>
    %1247 = vector.multi_reduction <add>, %1246, %cst_203 [1] : vector<4x256xf32> to vector<4xf32>
    %1248 = vector.shape_cast %1247 : vector<4xf32> to vector<4x1xf32>
    %cst_204 = arith.constant 9.99999974E-6 : f32
    %1249 = vector.broadcast %cst_204 : f32 to vector<4x1xf32>
    %1250 = arith.addf %1248, %1249 : vector<4x1xf32>
    %1251 = arith.mulf %1194, %1186 : vector<4x256xf32>
    %cst_205 = arith.constant dense<0.000000e+00> : vector<4xf32>
    %1252 = vector.multi_reduction <add>, %1251, %cst_205 [1] : vector<4x256xf32> to vector<4xf32>
    %1253 = vector.shape_cast %1252 : vector<4xf32> to vector<4x1xf32>
    %1254 = arith.mulf %1204, %1189 : vector<4x256xf32>
    %cst_206 = arith.constant dense<0.000000e+00> : vector<4xf32>
    %1255 = vector.multi_reduction <add>, %1254, %cst_206 [1] : vector<4x256xf32> to vector<4xf32>
    %1256 = vector.shape_cast %1255 : vector<4xf32> to vector<4x1xf32>
    %1257 = arith.mulf %1198, %1186 : vector<4x256xf32>
    %1258 = arith.mulf %1208, %1189 : vector<4x256xf32>
    %1259 = arith.addf %1257, %1258 : vector<4x256xf32>
    %cst_207 = arith.constant dense<0.000000e+00> : vector<4xf32>
    %1260 = vector.multi_reduction <add>, %1259, %cst_207 [1] : vector<4x256xf32> to vector<4xf32>
    %1261 = vector.shape_cast %1260 : vector<4xf32> to vector<4x1xf32>
    %1262 = arith.mulf %1203, %1186 : vector<4x256xf32>
    %1263 = arith.mulf %1209, %1189 : vector<4x256xf32>
    %1264 = arith.addf %1262, %1263 : vector<4x256xf32>
    %cst_208 = arith.constant dense<0.000000e+00> : vector<4xf32>
    %1265 = vector.multi_reduction <add>, %1264, %cst_208 [1] : vector<4x256xf32> to vector<4xf32>
    %1266 = vector.shape_cast %1265 : vector<4xf32> to vector<4x1xf32>
    %cst_209 = arith.constant 1.000000e+00 : f32
    %1267 = vector.broadcast %cst_209 : f32 to vector<4x1xf32>
    %1268 = arith.divf %1267, %1214 : vector<4x1xf32>
    %1269 = arith.mulf %1217, %1268 : vector<4x1xf32>
    %1270 = arith.mulf %1220, %1268 : vector<4x1xf32>
    %1271 = arith.mulf %1269, %1217 : vector<4x1xf32>
    %1272 = arith.subf %1238, %1271 : vector<4x1xf32>
    %1273 = arith.mulf %1269, %1220 : vector<4x1xf32>
    %1274 = arith.subf %1243, %1273 : vector<4x1xf32>
    %1275 = arith.mulf %1270, %1220 : vector<4x1xf32>
    %1276 = arith.subf %1250, %1275 : vector<4x1xf32>
    %1277 = arith.mulf %1269, %1253 : vector<4x1xf32>
    %1278 = arith.subf %1261, %1277 : vector<4x1xf32>
    %1279 = arith.mulf %1270, %1253 : vector<4x1xf32>
    %1280 = arith.subf %1266, %1279 : vector<4x1xf32>
    %cst_210 = arith.constant 1.000000e+00 : f32
    %1281 = vector.broadcast %cst_210 : f32 to vector<4x1xf32>
    %1282 = arith.divf %1281, %1225 : vector<4x1xf32>
    %1283 = arith.mulf %1228, %1282 : vector<4x1xf32>
    %1284 = arith.mulf %1231, %1282 : vector<4x1xf32>
    %1285 = arith.mulf %1283, %1228 : vector<4x1xf32>
    %1286 = arith.subf %1272, %1285 : vector<4x1xf32>
    %1287 = arith.mulf %1283, %1231 : vector<4x1xf32>
    %1288 = arith.subf %1274, %1287 : vector<4x1xf32>
    %1289 = arith.mulf %1284, %1231 : vector<4x1xf32>
    %1290 = arith.subf %1276, %1289 : vector<4x1xf32>
    %1291 = arith.mulf %1283, %1256 : vector<4x1xf32>
    %1292 = arith.subf %1278, %1291 : vector<4x1xf32>
    %1293 = arith.mulf %1284, %1256 : vector<4x1xf32>
    %1294 = arith.subf %1280, %1293 : vector<4x1xf32>
    %cst_211 = arith.constant 1.000000e+00 : f32
    %1295 = vector.broadcast %cst_211 : f32 to vector<4x1xf32>
    %1296 = arith.divf %1295, %1286 : vector<4x1xf32>
    %1297 = arith.mulf %1288, %1296 : vector<4x1xf32>
    %1298 = arith.mulf %1297, %1288 : vector<4x1xf32>
    %1299 = arith.subf %1290, %1298 : vector<4x1xf32>
    %1300 = arith.mulf %1297, %1292 : vector<4x1xf32>
    %1301 = arith.subf %1294, %1300 : vector<4x1xf32>
    %cst_212 = arith.constant 1.000000e+00 : f32
    %1302 = vector.broadcast %cst_212 : f32 to vector<4x1xf32>
    %1303 = arith.divf %1302, %1299 : vector<4x1xf32>
    %1304 = arith.mulf %1301, %1303 : vector<4x1xf32>
    %1305 = arith.mulf %1288, %1304 : vector<4x1xf32>
    %1306 = arith.subf %1292, %1305 : vector<4x1xf32>
    %1307 = arith.mulf %1306, %1296 : vector<4x1xf32>
    %1308 = arith.mulf %1228, %1307 : vector<4x1xf32>
    %1309 = arith.subf %1256, %1308 : vector<4x1xf32>
    %1310 = arith.mulf %1231, %1304 : vector<4x1xf32>
    %1311 = arith.subf %1309, %1310 : vector<4x1xf32>
    %1312 = arith.mulf %1311, %1282 : vector<4x1xf32>
    %1313 = arith.mulf %1217, %1307 : vector<4x1xf32>
    %1314 = arith.subf %1253, %1313 : vector<4x1xf32>
    %1315 = arith.mulf %1220, %1304 : vector<4x1xf32>
    %1316 = arith.subf %1314, %1315 : vector<4x1xf32>
    %1317 = arith.mulf %1316, %1268 : vector<4x1xf32>
    %1318 = arith.subf %1156, %1317 : vector<4x1xf32>
    %1319 = arith.subf %1157, %1312 : vector<4x1xf32>
    %1320 = arith.subf %1158, %1307 : vector<4x1xf32>
    %1321 = arith.subf %1159, %1304 : vector<4x1xf32>
    %c8_i32 = arith.constant 8 : i32
    %1322 = math.cos %1321 : vector<4x1xf32>
    %1323 = math.sin %1321 : vector<4x1xf32>
    %1324 = vector.broadcast %1322 : vector<4x1xf32> to vector<4x256xf32>
    %1325 = arith.mulf %1324, %7 : vector<4x256xf32>
    %1326 = vector.broadcast %1323 : vector<4x1xf32> to vector<4x256xf32>
    %1327 = arith.mulf %1326, %11 : vector<4x256xf32>
    %1328 = arith.addf %1325, %1327 : vector<4x256xf32>
    %1329 = vector.broadcast %1318 : vector<4x1xf32> to vector<4x256xf32>
    %1330 = arith.addf %1328, %1329 : vector<4x256xf32>
    %1331 = vector.broadcast %1319 : vector<4x1xf32> to vector<4x256xf32>
    %1332 = arith.addf %9, %1331 : vector<4x256xf32>
    %cst_213 = arith.constant 0.000000e+00 : f32
    %1333 = vector.broadcast %cst_213 : f32 to vector<4x1xf32>
    %1334 = arith.subf %1333, %1323 : vector<4x1xf32>
    %1335 = vector.broadcast %1334 : vector<4x1xf32> to vector<4x256xf32>
    %1336 = arith.mulf %1335, %7 : vector<4x256xf32>
    %1337 = vector.broadcast %1322 : vector<4x1xf32> to vector<4x256xf32>
    %1338 = arith.mulf %1337, %11 : vector<4x256xf32>
    %1339 = arith.addf %1336, %1338 : vector<4x256xf32>
    %1340 = vector.broadcast %1320 : vector<4x1xf32> to vector<4x256xf32>
    %1341 = arith.addf %1339, %1340 : vector<4x256xf32>
    %cst_214 = arith.constant 1.000000e-01 : f32
    %1342 = vector.broadcast %cst_214 : f32 to vector<4x256xf32>
    %1343 = arith.maximumf %1341, %1342 : vector<4x256xf32>
    %1344 = tpu.reciprocal %1343 {approx = true} : vector<4x256xf32> -> vector<4x256xf32>
    %1345 = arith.mulf %1344, %1344 : vector<4x256xf32>
    %1346 = arith.mulf %1330, %1344 : vector<4x256xf32>
    %1347 = arith.subf %1346, %13 : vector<4x256xf32>
    %1348 = arith.mulf %17, %1347 : vector<4x256xf32>
    %1349 = arith.mulf %1332, %1344 : vector<4x256xf32>
    %1350 = arith.subf %1349, %15 : vector<4x256xf32>
    %1351 = arith.mulf %19, %1350 : vector<4x256xf32>
    %1352 = vector.broadcast %1320 : vector<4x1xf32> to vector<4x256xf32>
    %1353 = arith.subf %1341, %1352 : vector<4x256xf32>
    %1354 = vector.broadcast %1318 : vector<4x1xf32> to vector<4x256xf32>
    %1355 = arith.subf %1354, %1330 : vector<4x256xf32>
    %1356 = arith.mulf %17, %1344 : vector<4x256xf32>
    %cst_215 = arith.constant 0.000000e+00 : f32
    %1357 = vector.broadcast %cst_215 : f32 to vector<4x256xf32>
    %1358 = arith.subf %1357, %17 : vector<4x256xf32>
    %1359 = arith.mulf %1358, %1330 : vector<4x256xf32>
    %1360 = arith.mulf %1359, %1345 : vector<4x256xf32>
    %1361 = arith.mulf %1353, %1344 : vector<4x256xf32>
    %1362 = arith.mulf %1330, %1345 : vector<4x256xf32>
    %1363 = arith.mulf %1362, %1355 : vector<4x256xf32>
    %1364 = arith.subf %1361, %1363 : vector<4x256xf32>
    %1365 = arith.mulf %17, %1364 : vector<4x256xf32>
    %1366 = arith.mulf %19, %1344 : vector<4x256xf32>
    %cst_216 = arith.constant 0.000000e+00 : f32
    %1367 = vector.broadcast %cst_216 : f32 to vector<4x256xf32>
    %1368 = arith.subf %1367, %19 : vector<4x256xf32>
    %1369 = arith.mulf %1368, %1332 : vector<4x256xf32>
    %1370 = arith.mulf %1369, %1345 : vector<4x256xf32>
    %1371 = arith.mulf %1370, %1355 : vector<4x256xf32>
    %1372 = arith.mulf %1356, %1356 : vector<4x256xf32>
    %cst_217 = arith.constant dense<0.000000e+00> : vector<4xf32>
    %1373 = vector.multi_reduction <add>, %1372, %cst_217 [1] : vector<4x256xf32> to vector<4xf32>
    %1374 = vector.shape_cast %1373 : vector<4xf32> to vector<4x1xf32>
    %cst_218 = arith.constant 9.99999974E-6 : f32
    %1375 = vector.broadcast %cst_218 : f32 to vector<4x1xf32>
    %1376 = arith.addf %1374, %1375 : vector<4x1xf32>
    %1377 = arith.mulf %1356, %1360 : vector<4x256xf32>
    %cst_219 = arith.constant dense<0.000000e+00> : vector<4xf32>
    %1378 = vector.multi_reduction <add>, %1377, %cst_219 [1] : vector<4x256xf32> to vector<4xf32>
    %1379 = vector.shape_cast %1378 : vector<4xf32> to vector<4x1xf32>
    %1380 = arith.mulf %1356, %1365 : vector<4x256xf32>
    %cst_220 = arith.constant dense<0.000000e+00> : vector<4xf32>
    %1381 = vector.multi_reduction <add>, %1380, %cst_220 [1] : vector<4x256xf32> to vector<4xf32>
    %1382 = vector.shape_cast %1381 : vector<4xf32> to vector<4x1xf32>
    %1383 = arith.mulf %1366, %1366 : vector<4x256xf32>
    %cst_221 = arith.constant dense<0.000000e+00> : vector<4xf32>
    %1384 = vector.multi_reduction <add>, %1383, %cst_221 [1] : vector<4x256xf32> to vector<4xf32>
    %1385 = vector.shape_cast %1384 : vector<4xf32> to vector<4x1xf32>
    %cst_222 = arith.constant 9.99999974E-6 : f32
    %1386 = vector.broadcast %cst_222 : f32 to vector<4x1xf32>
    %1387 = arith.addf %1385, %1386 : vector<4x1xf32>
    %1388 = arith.mulf %1366, %1370 : vector<4x256xf32>
    %cst_223 = arith.constant dense<0.000000e+00> : vector<4xf32>
    %1389 = vector.multi_reduction <add>, %1388, %cst_223 [1] : vector<4x256xf32> to vector<4xf32>
    %1390 = vector.shape_cast %1389 : vector<4xf32> to vector<4x1xf32>
    %1391 = arith.mulf %1366, %1371 : vector<4x256xf32>
    %cst_224 = arith.constant dense<0.000000e+00> : vector<4xf32>
    %1392 = vector.multi_reduction <add>, %1391, %cst_224 [1] : vector<4x256xf32> to vector<4xf32>
    %1393 = vector.shape_cast %1392 : vector<4xf32> to vector<4x1xf32>
    %1394 = arith.mulf %1360, %1360 : vector<4x256xf32>
    %1395 = arith.mulf %1370, %1370 : vector<4x256xf32>
    %1396 = arith.addf %1394, %1395 : vector<4x256xf32>
    %cst_225 = arith.constant dense<0.000000e+00> : vector<4xf32>
    %1397 = vector.multi_reduction <add>, %1396, %cst_225 [1] : vector<4x256xf32> to vector<4xf32>
    %1398 = vector.shape_cast %1397 : vector<4xf32> to vector<4x1xf32>
    %cst_226 = arith.constant 9.99999974E-6 : f32
    %1399 = vector.broadcast %cst_226 : f32 to vector<4x1xf32>
    %1400 = arith.addf %1398, %1399 : vector<4x1xf32>
    %1401 = arith.mulf %1360, %1365 : vector<4x256xf32>
    %1402 = arith.mulf %1370, %1371 : vector<4x256xf32>
    %1403 = arith.addf %1401, %1402 : vector<4x256xf32>
    %cst_227 = arith.constant dense<0.000000e+00> : vector<4xf32>
    %1404 = vector.multi_reduction <add>, %1403, %cst_227 [1] : vector<4x256xf32> to vector<4xf32>
    %1405 = vector.shape_cast %1404 : vector<4xf32> to vector<4x1xf32>
    %1406 = arith.mulf %1365, %1365 : vector<4x256xf32>
    %1407 = arith.mulf %1371, %1371 : vector<4x256xf32>
    %1408 = arith.addf %1406, %1407 : vector<4x256xf32>
    %cst_228 = arith.constant dense<0.000000e+00> : vector<4xf32>
    %1409 = vector.multi_reduction <add>, %1408, %cst_228 [1] : vector<4x256xf32> to vector<4xf32>
    %1410 = vector.shape_cast %1409 : vector<4xf32> to vector<4x1xf32>
    %cst_229 = arith.constant 9.99999974E-6 : f32
    %1411 = vector.broadcast %cst_229 : f32 to vector<4x1xf32>
    %1412 = arith.addf %1410, %1411 : vector<4x1xf32>
    %1413 = arith.mulf %1356, %1348 : vector<4x256xf32>
    %cst_230 = arith.constant dense<0.000000e+00> : vector<4xf32>
    %1414 = vector.multi_reduction <add>, %1413, %cst_230 [1] : vector<4x256xf32> to vector<4xf32>
    %1415 = vector.shape_cast %1414 : vector<4xf32> to vector<4x1xf32>
    %1416 = arith.mulf %1366, %1351 : vector<4x256xf32>
    %cst_231 = arith.constant dense<0.000000e+00> : vector<4xf32>
    %1417 = vector.multi_reduction <add>, %1416, %cst_231 [1] : vector<4x256xf32> to vector<4xf32>
    %1418 = vector.shape_cast %1417 : vector<4xf32> to vector<4x1xf32>
    %1419 = arith.mulf %1360, %1348 : vector<4x256xf32>
    %1420 = arith.mulf %1370, %1351 : vector<4x256xf32>
    %1421 = arith.addf %1419, %1420 : vector<4x256xf32>
    %cst_232 = arith.constant dense<0.000000e+00> : vector<4xf32>
    %1422 = vector.multi_reduction <add>, %1421, %cst_232 [1] : vector<4x256xf32> to vector<4xf32>
    %1423 = vector.shape_cast %1422 : vector<4xf32> to vector<4x1xf32>
    %1424 = arith.mulf %1365, %1348 : vector<4x256xf32>
    %1425 = arith.mulf %1371, %1351 : vector<4x256xf32>
    %1426 = arith.addf %1424, %1425 : vector<4x256xf32>
    %cst_233 = arith.constant dense<0.000000e+00> : vector<4xf32>
    %1427 = vector.multi_reduction <add>, %1426, %cst_233 [1] : vector<4x256xf32> to vector<4xf32>
    %1428 = vector.shape_cast %1427 : vector<4xf32> to vector<4x1xf32>
    %cst_234 = arith.constant 1.000000e+00 : f32
    %1429 = vector.broadcast %cst_234 : f32 to vector<4x1xf32>
    %1430 = arith.divf %1429, %1376 : vector<4x1xf32>
    %1431 = arith.mulf %1379, %1430 : vector<4x1xf32>
    %1432 = arith.mulf %1382, %1430 : vector<4x1xf32>
    %1433 = arith.mulf %1431, %1379 : vector<4x1xf32>
    %1434 = arith.subf %1400, %1433 : vector<4x1xf32>
    %1435 = arith.mulf %1431, %1382 : vector<4x1xf32>
    %1436 = arith.subf %1405, %1435 : vector<4x1xf32>
    %1437 = arith.mulf %1432, %1382 : vector<4x1xf32>
    %1438 = arith.subf %1412, %1437 : vector<4x1xf32>
    %1439 = arith.mulf %1431, %1415 : vector<4x1xf32>
    %1440 = arith.subf %1423, %1439 : vector<4x1xf32>
    %1441 = arith.mulf %1432, %1415 : vector<4x1xf32>
    %1442 = arith.subf %1428, %1441 : vector<4x1xf32>
    %cst_235 = arith.constant 1.000000e+00 : f32
    %1443 = vector.broadcast %cst_235 : f32 to vector<4x1xf32>
    %1444 = arith.divf %1443, %1387 : vector<4x1xf32>
    %1445 = arith.mulf %1390, %1444 : vector<4x1xf32>
    %1446 = arith.mulf %1393, %1444 : vector<4x1xf32>
    %1447 = arith.mulf %1445, %1390 : vector<4x1xf32>
    %1448 = arith.subf %1434, %1447 : vector<4x1xf32>
    %1449 = arith.mulf %1445, %1393 : vector<4x1xf32>
    %1450 = arith.subf %1436, %1449 : vector<4x1xf32>
    %1451 = arith.mulf %1446, %1393 : vector<4x1xf32>
    %1452 = arith.subf %1438, %1451 : vector<4x1xf32>
    %1453 = arith.mulf %1445, %1418 : vector<4x1xf32>
    %1454 = arith.subf %1440, %1453 : vector<4x1xf32>
    %1455 = arith.mulf %1446, %1418 : vector<4x1xf32>
    %1456 = arith.subf %1442, %1455 : vector<4x1xf32>
    %cst_236 = arith.constant 1.000000e+00 : f32
    %1457 = vector.broadcast %cst_236 : f32 to vector<4x1xf32>
    %1458 = arith.divf %1457, %1448 : vector<4x1xf32>
    %1459 = arith.mulf %1450, %1458 : vector<4x1xf32>
    %1460 = arith.mulf %1459, %1450 : vector<4x1xf32>
    %1461 = arith.subf %1452, %1460 : vector<4x1xf32>
    %1462 = arith.mulf %1459, %1454 : vector<4x1xf32>
    %1463 = arith.subf %1456, %1462 : vector<4x1xf32>
    %cst_237 = arith.constant 1.000000e+00 : f32
    %1464 = vector.broadcast %cst_237 : f32 to vector<4x1xf32>
    %1465 = arith.divf %1464, %1461 : vector<4x1xf32>
    %1466 = arith.mulf %1463, %1465 : vector<4x1xf32>
    %1467 = arith.mulf %1450, %1466 : vector<4x1xf32>
    %1468 = arith.subf %1454, %1467 : vector<4x1xf32>
    %1469 = arith.mulf %1468, %1458 : vector<4x1xf32>
    %1470 = arith.mulf %1390, %1469 : vector<4x1xf32>
    %1471 = arith.subf %1418, %1470 : vector<4x1xf32>
    %1472 = arith.mulf %1393, %1466 : vector<4x1xf32>
    %1473 = arith.subf %1471, %1472 : vector<4x1xf32>
    %1474 = arith.mulf %1473, %1444 : vector<4x1xf32>
    %1475 = arith.mulf %1379, %1469 : vector<4x1xf32>
    %1476 = arith.subf %1415, %1475 : vector<4x1xf32>
    %1477 = arith.mulf %1382, %1466 : vector<4x1xf32>
    %1478 = arith.subf %1476, %1477 : vector<4x1xf32>
    %1479 = arith.mulf %1478, %1430 : vector<4x1xf32>
    %1480 = arith.subf %1318, %1479 : vector<4x1xf32>
    %1481 = arith.subf %1319, %1474 : vector<4x1xf32>
    %1482 = arith.subf %1320, %1469 : vector<4x1xf32>
    %1483 = arith.subf %1321, %1466 : vector<4x1xf32>
    %c9_i32 = arith.constant 9 : i32
    %1484 = math.cos %1483 : vector<4x1xf32>
    %1485 = math.sin %1483 : vector<4x1xf32>
    %1486 = vector.broadcast %1484 : vector<4x1xf32> to vector<4x256xf32>
    %1487 = arith.mulf %1486, %7 : vector<4x256xf32>
    %1488 = vector.broadcast %1485 : vector<4x1xf32> to vector<4x256xf32>
    %1489 = arith.mulf %1488, %11 : vector<4x256xf32>
    %1490 = arith.addf %1487, %1489 : vector<4x256xf32>
    %1491 = vector.broadcast %1480 : vector<4x1xf32> to vector<4x256xf32>
    %1492 = arith.addf %1490, %1491 : vector<4x256xf32>
    %1493 = vector.broadcast %1481 : vector<4x1xf32> to vector<4x256xf32>
    %1494 = arith.addf %9, %1493 : vector<4x256xf32>
    %cst_238 = arith.constant 0.000000e+00 : f32
    %1495 = vector.broadcast %cst_238 : f32 to vector<4x1xf32>
    %1496 = arith.subf %1495, %1485 : vector<4x1xf32>
    %1497 = vector.broadcast %1496 : vector<4x1xf32> to vector<4x256xf32>
    %1498 = arith.mulf %1497, %7 : vector<4x256xf32>
    %1499 = vector.broadcast %1484 : vector<4x1xf32> to vector<4x256xf32>
    %1500 = arith.mulf %1499, %11 : vector<4x256xf32>
    %1501 = arith.addf %1498, %1500 : vector<4x256xf32>
    %1502 = vector.broadcast %1482 : vector<4x1xf32> to vector<4x256xf32>
    %1503 = arith.addf %1501, %1502 : vector<4x256xf32>
    %cst_239 = arith.constant 1.000000e-01 : f32
    %1504 = vector.broadcast %cst_239 : f32 to vector<4x256xf32>
    %1505 = arith.maximumf %1503, %1504 : vector<4x256xf32>
    %1506 = tpu.reciprocal %1505 {approx = true} : vector<4x256xf32> -> vector<4x256xf32>
    %1507 = arith.mulf %1506, %1506 : vector<4x256xf32>
    %1508 = arith.mulf %1492, %1506 : vector<4x256xf32>
    %1509 = arith.subf %1508, %13 : vector<4x256xf32>
    %1510 = arith.mulf %17, %1509 : vector<4x256xf32>
    %1511 = arith.mulf %1494, %1506 : vector<4x256xf32>
    %1512 = arith.subf %1511, %15 : vector<4x256xf32>
    %1513 = arith.mulf %19, %1512 : vector<4x256xf32>
    %1514 = vector.broadcast %1482 : vector<4x1xf32> to vector<4x256xf32>
    %1515 = arith.subf %1503, %1514 : vector<4x256xf32>
    %1516 = vector.broadcast %1480 : vector<4x1xf32> to vector<4x256xf32>
    %1517 = arith.subf %1516, %1492 : vector<4x256xf32>
    %1518 = arith.mulf %17, %1506 : vector<4x256xf32>
    %cst_240 = arith.constant 0.000000e+00 : f32
    %1519 = vector.broadcast %cst_240 : f32 to vector<4x256xf32>
    %1520 = arith.subf %1519, %17 : vector<4x256xf32>
    %1521 = arith.mulf %1520, %1492 : vector<4x256xf32>
    %1522 = arith.mulf %1521, %1507 : vector<4x256xf32>
    %1523 = arith.mulf %1515, %1506 : vector<4x256xf32>
    %1524 = arith.mulf %1492, %1507 : vector<4x256xf32>
    %1525 = arith.mulf %1524, %1517 : vector<4x256xf32>
    %1526 = arith.subf %1523, %1525 : vector<4x256xf32>
    %1527 = arith.mulf %17, %1526 : vector<4x256xf32>
    %1528 = arith.mulf %19, %1506 : vector<4x256xf32>
    %cst_241 = arith.constant 0.000000e+00 : f32
    %1529 = vector.broadcast %cst_241 : f32 to vector<4x256xf32>
    %1530 = arith.subf %1529, %19 : vector<4x256xf32>
    %1531 = arith.mulf %1530, %1494 : vector<4x256xf32>
    %1532 = arith.mulf %1531, %1507 : vector<4x256xf32>
    %1533 = arith.mulf %1532, %1517 : vector<4x256xf32>
    %1534 = arith.mulf %1518, %1518 : vector<4x256xf32>
    %cst_242 = arith.constant dense<0.000000e+00> : vector<4xf32>
    %1535 = vector.multi_reduction <add>, %1534, %cst_242 [1] : vector<4x256xf32> to vector<4xf32>
    %1536 = vector.shape_cast %1535 : vector<4xf32> to vector<4x1xf32>
    %cst_243 = arith.constant 9.99999974E-6 : f32
    %1537 = vector.broadcast %cst_243 : f32 to vector<4x1xf32>
    %1538 = arith.addf %1536, %1537 : vector<4x1xf32>
    %1539 = arith.mulf %1518, %1522 : vector<4x256xf32>
    %cst_244 = arith.constant dense<0.000000e+00> : vector<4xf32>
    %1540 = vector.multi_reduction <add>, %1539, %cst_244 [1] : vector<4x256xf32> to vector<4xf32>
    %1541 = vector.shape_cast %1540 : vector<4xf32> to vector<4x1xf32>
    %1542 = arith.mulf %1518, %1527 : vector<4x256xf32>
    %cst_245 = arith.constant dense<0.000000e+00> : vector<4xf32>
    %1543 = vector.multi_reduction <add>, %1542, %cst_245 [1] : vector<4x256xf32> to vector<4xf32>
    %1544 = vector.shape_cast %1543 : vector<4xf32> to vector<4x1xf32>
    %1545 = arith.mulf %1528, %1528 : vector<4x256xf32>
    %cst_246 = arith.constant dense<0.000000e+00> : vector<4xf32>
    %1546 = vector.multi_reduction <add>, %1545, %cst_246 [1] : vector<4x256xf32> to vector<4xf32>
    %1547 = vector.shape_cast %1546 : vector<4xf32> to vector<4x1xf32>
    %cst_247 = arith.constant 9.99999974E-6 : f32
    %1548 = vector.broadcast %cst_247 : f32 to vector<4x1xf32>
    %1549 = arith.addf %1547, %1548 : vector<4x1xf32>
    %1550 = arith.mulf %1528, %1532 : vector<4x256xf32>
    %cst_248 = arith.constant dense<0.000000e+00> : vector<4xf32>
    %1551 = vector.multi_reduction <add>, %1550, %cst_248 [1] : vector<4x256xf32> to vector<4xf32>
    %1552 = vector.shape_cast %1551 : vector<4xf32> to vector<4x1xf32>
    %1553 = arith.mulf %1528, %1533 : vector<4x256xf32>
    %cst_249 = arith.constant dense<0.000000e+00> : vector<4xf32>
    %1554 = vector.multi_reduction <add>, %1553, %cst_249 [1] : vector<4x256xf32> to vector<4xf32>
    %1555 = vector.shape_cast %1554 : vector<4xf32> to vector<4x1xf32>
    %1556 = arith.mulf %1522, %1522 : vector<4x256xf32>
    %1557 = arith.mulf %1532, %1532 : vector<4x256xf32>
    %1558 = arith.addf %1556, %1557 : vector<4x256xf32>
    %cst_250 = arith.constant dense<0.000000e+00> : vector<4xf32>
    %1559 = vector.multi_reduction <add>, %1558, %cst_250 [1] : vector<4x256xf32> to vector<4xf32>
    %1560 = vector.shape_cast %1559 : vector<4xf32> to vector<4x1xf32>
    %cst_251 = arith.constant 9.99999974E-6 : f32
    %1561 = vector.broadcast %cst_251 : f32 to vector<4x1xf32>
    %1562 = arith.addf %1560, %1561 : vector<4x1xf32>
    %1563 = arith.mulf %1522, %1527 : vector<4x256xf32>
    %1564 = arith.mulf %1532, %1533 : vector<4x256xf32>
    %1565 = arith.addf %1563, %1564 : vector<4x256xf32>
    %cst_252 = arith.constant dense<0.000000e+00> : vector<4xf32>
    %1566 = vector.multi_reduction <add>, %1565, %cst_252 [1] : vector<4x256xf32> to vector<4xf32>
    %1567 = vector.shape_cast %1566 : vector<4xf32> to vector<4x1xf32>
    %1568 = arith.mulf %1527, %1527 : vector<4x256xf32>
    %1569 = arith.mulf %1533, %1533 : vector<4x256xf32>
    %1570 = arith.addf %1568, %1569 : vector<4x256xf32>
    %cst_253 = arith.constant dense<0.000000e+00> : vector<4xf32>
    %1571 = vector.multi_reduction <add>, %1570, %cst_253 [1] : vector<4x256xf32> to vector<4xf32>
    %1572 = vector.shape_cast %1571 : vector<4xf32> to vector<4x1xf32>
    %cst_254 = arith.constant 9.99999974E-6 : f32
    %1573 = vector.broadcast %cst_254 : f32 to vector<4x1xf32>
    %1574 = arith.addf %1572, %1573 : vector<4x1xf32>
    %1575 = arith.mulf %1518, %1510 : vector<4x256xf32>
    %cst_255 = arith.constant dense<0.000000e+00> : vector<4xf32>
    %1576 = vector.multi_reduction <add>, %1575, %cst_255 [1] : vector<4x256xf32> to vector<4xf32>
    %1577 = vector.shape_cast %1576 : vector<4xf32> to vector<4x1xf32>
    %1578 = arith.mulf %1528, %1513 : vector<4x256xf32>
    %cst_256 = arith.constant dense<0.000000e+00> : vector<4xf32>
    %1579 = vector.multi_reduction <add>, %1578, %cst_256 [1] : vector<4x256xf32> to vector<4xf32>
    %1580 = vector.shape_cast %1579 : vector<4xf32> to vector<4x1xf32>
    %1581 = arith.mulf %1522, %1510 : vector<4x256xf32>
    %1582 = arith.mulf %1532, %1513 : vector<4x256xf32>
    %1583 = arith.addf %1581, %1582 : vector<4x256xf32>
    %cst_257 = arith.constant dense<0.000000e+00> : vector<4xf32>
    %1584 = vector.multi_reduction <add>, %1583, %cst_257 [1] : vector<4x256xf32> to vector<4xf32>
    %1585 = vector.shape_cast %1584 : vector<4xf32> to vector<4x1xf32>
    %1586 = arith.mulf %1527, %1510 : vector<4x256xf32>
    %1587 = arith.mulf %1533, %1513 : vector<4x256xf32>
    %1588 = arith.addf %1586, %1587 : vector<4x256xf32>
    %cst_258 = arith.constant dense<0.000000e+00> : vector<4xf32>
    %1589 = vector.multi_reduction <add>, %1588, %cst_258 [1] : vector<4x256xf32> to vector<4xf32>
    %1590 = vector.shape_cast %1589 : vector<4xf32> to vector<4x1xf32>
    %cst_259 = arith.constant 1.000000e+00 : f32
    %1591 = vector.broadcast %cst_259 : f32 to vector<4x1xf32>
    %1592 = arith.divf %1591, %1538 : vector<4x1xf32>
    %1593 = arith.mulf %1541, %1592 : vector<4x1xf32>
    %1594 = arith.mulf %1544, %1592 : vector<4x1xf32>
    %1595 = arith.mulf %1593, %1541 : vector<4x1xf32>
    %1596 = arith.subf %1562, %1595 : vector<4x1xf32>
    %1597 = arith.mulf %1593, %1544 : vector<4x1xf32>
    %1598 = arith.subf %1567, %1597 : vector<4x1xf32>
    %1599 = arith.mulf %1594, %1544 : vector<4x1xf32>
    %1600 = arith.subf %1574, %1599 : vector<4x1xf32>
    %1601 = arith.mulf %1593, %1577 : vector<4x1xf32>
    %1602 = arith.subf %1585, %1601 : vector<4x1xf32>
    %1603 = arith.mulf %1594, %1577 : vector<4x1xf32>
    %1604 = arith.subf %1590, %1603 : vector<4x1xf32>
    %cst_260 = arith.constant 1.000000e+00 : f32
    %1605 = vector.broadcast %cst_260 : f32 to vector<4x1xf32>
    %1606 = arith.divf %1605, %1549 : vector<4x1xf32>
    %1607 = arith.mulf %1552, %1606 : vector<4x1xf32>
    %1608 = arith.mulf %1555, %1606 : vector<4x1xf32>
    %1609 = arith.mulf %1607, %1552 : vector<4x1xf32>
    %1610 = arith.subf %1596, %1609 : vector<4x1xf32>
    %1611 = arith.mulf %1607, %1555 : vector<4x1xf32>
    %1612 = arith.subf %1598, %1611 : vector<4x1xf32>
    %1613 = arith.mulf %1608, %1555 : vector<4x1xf32>
    %1614 = arith.subf %1600, %1613 : vector<4x1xf32>
    %1615 = arith.mulf %1607, %1580 : vector<4x1xf32>
    %1616 = arith.subf %1602, %1615 : vector<4x1xf32>
    %1617 = arith.mulf %1608, %1580 : vector<4x1xf32>
    %1618 = arith.subf %1604, %1617 : vector<4x1xf32>
    %cst_261 = arith.constant 1.000000e+00 : f32
    %1619 = vector.broadcast %cst_261 : f32 to vector<4x1xf32>
    %1620 = arith.divf %1619, %1610 : vector<4x1xf32>
    %1621 = arith.mulf %1612, %1620 : vector<4x1xf32>
    %1622 = arith.mulf %1621, %1612 : vector<4x1xf32>
    %1623 = arith.subf %1614, %1622 : vector<4x1xf32>
    %1624 = arith.mulf %1621, %1616 : vector<4x1xf32>
    %1625 = arith.subf %1618, %1624 : vector<4x1xf32>
    %cst_262 = arith.constant 1.000000e+00 : f32
    %1626 = vector.broadcast %cst_262 : f32 to vector<4x1xf32>
    %1627 = arith.divf %1626, %1623 : vector<4x1xf32>
    %1628 = arith.mulf %1625, %1627 : vector<4x1xf32>
    %1629 = arith.mulf %1612, %1628 : vector<4x1xf32>
    %1630 = arith.subf %1616, %1629 : vector<4x1xf32>
    %1631 = arith.mulf %1630, %1620 : vector<4x1xf32>
    %1632 = arith.mulf %1552, %1631 : vector<4x1xf32>
    %1633 = arith.subf %1580, %1632 : vector<4x1xf32>
    %1634 = arith.mulf %1555, %1628 : vector<4x1xf32>
    %1635 = arith.subf %1633, %1634 : vector<4x1xf32>
    %1636 = arith.mulf %1635, %1606 : vector<4x1xf32>
    %1637 = arith.mulf %1541, %1631 : vector<4x1xf32>
    %1638 = arith.subf %1577, %1637 : vector<4x1xf32>
    %1639 = arith.mulf %1544, %1628 : vector<4x1xf32>
    %1640 = arith.subf %1638, %1639 : vector<4x1xf32>
    %1641 = arith.mulf %1640, %1592 : vector<4x1xf32>
    %1642 = arith.subf %1480, %1641 : vector<4x1xf32>
    %1643 = arith.subf %1481, %1636 : vector<4x1xf32>
    %1644 = arith.subf %1482, %1631 : vector<4x1xf32>
    %1645 = arith.subf %1483, %1628 : vector<4x1xf32>
    %1646 = tpu.concatenate %1642, %1643, %1644, %1645 in 1 : vector<4x1xf32>, vector<4x1xf32>, vector<4x1xf32>, vector<4x1xf32> -> vector<4x4xf32>
    %c0_263 = arith.constant 0 : index
    %c0_264 = arith.constant 0 : index
    %c0_265 = arith.constant 0 : index
    %1647 = vector.load %arg5[%c0_263, %c0_264, %c0_265] : memref<1x4x4xf32, #tpu.memory_space<vmem>>, vector<1x4x4xf32>
    %1648 = vector.shape_cast %1647 : vector<1x4x4xf32> to vector<4x4xf32>
    %1649 = vector.shape_cast %1646 : vector<4x4xf32> to vector<1x4x4xf32>
    tpu.vector_store %arg5[%c0_263, %c0_264, %c0_265], %1649 {strides = array<i32>} : memref<1x4x4xf32, #tpu.memory_space<vmem>>, vector<1x4x4xf32>,
    return
  }
  func.func @transform_0(%arg0: i32) -> (i32, i32, i32, i32) {
    %c0_i32 = arith.constant 0 : i32
    %c0_i32_0 = arith.constant 0 : i32
    %c0_i32_1 = arith.constant 0 : i32
    %c0_i32_2 = arith.constant 0 : i32
    return %arg0, %c0_i32, %c0_i32_0, %c0_i32_1 : i32, i32, i32, i32
  }
  func.func @transform_1(%arg0: i32) -> (i32, i32, i32, i32) {
    %c0_i32 = arith.constant 0 : i32
    %c0_i32_0 = arith.constant 0 : i32
    %c0_i32_1 = arith.constant 0 : i32
    %c0_i32_2 = arith.constant 0 : i32
    return %arg0, %c0_i32, %c0_i32_0, %c0_i32_1 : i32, i32, i32, i32
  }
  func.func @transform_2(%arg0: i32) -> (i32, i32, i32, i32) {
    %c0_i32 = arith.constant 0 : i32
    %c0_i32_0 = arith.constant 0 : i32
    %c0_i32_1 = arith.constant 0 : i32
    %c0_i32_2 = arith.constant 0 : i32
    return %arg0, %c0_i32, %c0_i32_0, %c0_i32_1 : i32, i32, i32, i32
  }
  func.func @transform_3(%arg0: i32) -> (i32, i32, i32) {
    %c0_i32 = arith.constant 0 : i32
    %c0_i32_0 = arith.constant 0 : i32
    %c0_i32_1 = arith.constant 0 : i32
    return %arg0, %c0_i32, %c0_i32_0 : i32, i32, i32
  }
  func.func @transform_4(%arg0: i32) -> (i32, i32, i32) {
    %c0_i32 = arith.constant 0 : i32
    %c0_i32_0 = arith.constant 0 : i32
    %c0_i32_1 = arith.constant 0 : i32
    return %arg0, %c0_i32, %c0_i32_0 : i32, i32, i32
  }
}

</mosaic_0001>

<bundles_post_ra>
// kernel: lm_solver_forward.1
= control target key start
LH: loop header
LB: loop body
LE: loop exit
PB: predicated region body
PF: predicated region fallthrough
CT: control target
= control target key end

     0   :  { %v7610_v1 = vmov 2   ;;  %v7611_v2 = vmov 3   ;;  %v7612_v6 = vmov 0   ;;  %s9865_s0 = inlined_call_operand.vmem [shape: f32[1,3,4,256], index: 0, kind: input, shape index: {}]   ;;  %s9866_s1 = inlined_call_operand.vmem [shape: f32[1,2,4,256], index: 1, kind: input, shape index: {}]   ;;  %s9867_s2 = inlined_call_operand.vmem [shape: f32[1,2,4,256], index: 2, kind: input, shape index: {}]   ;;  %s9868_s3 = inlined_call_operand.vmem [shape: f32[1,4,4], index: 3, kind: input, shape index: {}]   ;;  %s9869_s4 = inlined_call_operand.hbm [shape: f32[1,4,4], index: 4, kind: output, shape index: {}]  }
   0x1   :  { %v7650_v0 = vld [vmem:[%s9868_s3] sm:$0xf]  ;;  %7397 = vset.pattern.permute.xlu1 %v7610_v1  ;;  %7396 = vset.pattern.permute.xlu0 %v7611_v2 }
   0x2   :  { %v29_v3 = vand.u32 2139095040, %v7650_v0  ;;  %402 = vperm.xlu1 %7397, %v7650_v0   ;;  %v26_v5 = vand.u32 2147483647, %v7650_v0  ;;  %7399 = vset.pattern.permute.xlu2 %v7612_v6 }
   0x4   :  { %v30_v4 = vshrl.u32 %v29_v3, 23 }
   0x5   :  { %9 = vsyncpa [#allocation3], 0  ;;  %365 = vperm.xlu2 %7399, %v7650_v0   ;;  %v33_v9 = vand.u32 8388607, %v26_v5  ;;  %v7613_v15 = vmov 683565275  }
   0x6   :  { %v7324_v7 = vadd.s32 4294967169, %v30_v4  ;;  %v7614_v17 = vmov 2475754826   ;;  %v7615_v19 = vmov 2131351028   ;;  %vm28_vm12 = vcmp.lt.s32.totalorder %v7650_v0, 0 }
   0x7   :  { %v34_v12 = vor.u32 8388608, %v33_v9  ;;  %v7616_v21 = vmov 2102212464   ;;  %v7617_v23 = vmov 920167782   ;;  %s7315_s24 = sshll.u32 %s9869_s4, 4  ;;  %s7316_s24 = int_to_ptr.hbm [resolvable:$true] %s7315_s24 }
   0x8   :  { %v36_v8 = vadd.s32 1, %v7324_v7  ;;  %v7618_v29 = vmov 1326507024   ;;  %vm27_vm13 = vcmp.le.f32.partialorder %v26_v5, 0.7853982 }
   0x9   :  { %v7675_v31 = vshll.u32 %v34_v12, 8 }
   0xa   :  { %vm37_vm0 = vcmp.gt.s32.totalorder %v36_v8, 0  ;;  %7398 = vset.pattern.permute.xlu1 %v7611_v2 }
   0xb   :  { %v38_v10 = vsel %vm37_vm0, %v36_v8, 0  ;;  %v75_v43 = vand.u32 65535, %v7675_v31  ;;  %v76_v44 = vshrl.u32 %v7675_v31, 16 }
   0xc   :  { %v40_v11 = vand.u32 31, %v38_v10  ;;  %v7662_v13 = vshrl.u32 %v38_v10, 5 }
   0xe   :  { %v41_v14 = vsub.s32 32, %v40_v11  ;;  %v43_v16 = vshll.u32 %v7613_v15, %v40_v11  ;;  %v46_v18 = vshll.u32 %v7614_v17, %v40_v11  ;;  %v49_v20 = vshll.u32 %v7615_v19, %v40_v11 }
   0xf   :  { %v52_v22 = vshll.u32 %v7616_v21, %v40_v11  ;;  %v55_v24 = vshll.u32 %v7617_v23, %v40_v11  ;;  %vm58_vm1 = vcmp.lt.s32.totalorder %v7662_v13, 1  ;;  %vm61_vm2 = vcmp.lt.s32.totalorder %v7662_v13, 4 }
  0x10   :  { %v44_v25 = vshrl.u32 %v7614_v17, %v41_v14  ;;  %v47_v26 = vshrl.u32 %v7615_v19, %v41_v14  ;;  %v50_v27 = vshrl.u32 %v7616_v21, %v41_v14  ;;  %v53_v28 = vshrl.u32 %v7617_v23, %v41_v14 }
  0x11   :  { %v56_v30 = vshrl.u32 %v7618_v29, %v41_v14  ;;  %vm60_vm3 = vcmp.lt.s32.totalorder %v7662_v13, 3  ;;  %vm59_vm4 = vcmp.lt.s32.totalorder %v7662_v13, 2  ;;  %v42_v51 = vshrl.u32 %v7613_v15, %v41_v14 }
  0x12   :  { %v45_v32 = vor.u32 %v44_v25, %v43_v16  ;;  %v48_v33 = vor.u32 %v47_v26, %v46_v18  ;;  %v51_v34 = vor.u32 %v50_v27, %v49_v20  ;;  %v54_v35 = vor.u32 %v53_v28, %v52_v22 }
  0x13   :  { %v57_v36 = vor.u32 %v56_v30, %v55_v24 }
  0x14   :  { %v66_v37 = vsel %vm58_vm1, %v45_v32, %v48_v33  ;;  %v70_v38 = vsel %vm58_vm1, %v48_v33, %v51_v34  ;;  %v67_v39 = vsel %vm61_vm2, %v54_v35, 920167782  ;;  %v62_v3 = vsel %vm58_vm1, %v42_v51, %v45_v32 }
  0x15   :  { %v71_v40 = vsel %vm61_vm2, %v57_v36, 1326507024  ;;  %v68_v41 = vsel %vm60_vm3, %v51_v34, %v67_v39  ;;  %v63_v7 = vsel %vm61_vm2, %v51_v34, 2102212464 }
  0x16   :  { %v72_v42 = vsel %vm60_vm3, %v54_v35, %v71_v40  ;;  %v69_v45 = vsel %vm59_vm4, %v66_v37, %v68_v41  ;;  %v64_v20 = vsel %vm60_vm3, %v48_v33, %v63_v7 }
  0x17   :  { %v73_v46 = vsel %vm59_vm4, %v70_v38, %v72_v42  ;;  %v99_v49 = vand.u32 65535, %v69_v45  ;;  %v100_v50 = vshrl.u32 %v69_v45, 16  ;;  %v65_v32 = vsel %vm59_vm4, %v62_v3, %v64_v20 }
  0x18   :  { %v77_v47 = vand.u32 65535, %v73_v46  ;;  %v78_v48 = vshrl.u32 %v73_v46, 16  ;;  %v119_v37 = vmul.u32 %v7675_v31, %v65_v32  ;;  %vm169_vm4 = vweird.f32 %v7650_v0 }
  0x19   :  { %v101_v55 = vmul.u32 %v99_v49, %v75_v43  ;;  %v102_v56 = vmul.u32 %v100_v50, %v75_v43  ;;  %v103_v57 = vmul.u32 %v99_v49, %v76_v44  ;;  %v104_v61 = vmul.u32 %v100_v50, %v76_v44 }
  0x1a   :  { %v79_v52 = vmul.u32 %v77_v47, %v75_v43  ;;  %v80_v53 = vmul.u32 %v78_v48, %v75_v43  ;;  %v81_v54 = vmul.u32 %v77_v47, %v76_v44  ;;  %v82_v58 = vmul.u32 %v78_v48, %v76_v44 }
  0x1b   :  { %v105_v62 = vshll.u32 %v102_v56, 16  ;;  %v107_v63 = vshll.u32 %v103_v57, 16  ;;  %v106_v16 = vshrl.u32 %v102_v56, 16  ;;  %v108_v26 = vshrl.u32 %v103_v57, 16 }
  0x1c   :  { %v83_v59 = vshll.u32 %v80_v53, 16  ;;  %v85_v60 = vshll.u32 %v81_v54, 16  ;;  %v84_v10 = vshrl.u32 %v80_v53, 16  ;;  %v86_v22 = vshrl.u32 %v81_v54, 16 }
  0x1d   :  { %vm109_vm6 = vc.u32 %v101_v55, %v105_v62  ;;  %v111_v9 = vadd.s32 %v105_v62, %v101_v55  ;;  %v7619_v62 = vmov 1  }
  0x1e   :  { %vm87_vm5 = vc.u32 %v79_v52, %v83_v59  ;;  %v89_v4 = vadd.s32 %v83_v59, %v79_v52  ;;  %v110_v12 = vsel %vm109_vm6, 1, %v7612_v6  ;;  %7400 = vset.pattern.permute.xlu2 %v7619_v62 }
  0x1f   :  { %v88_v8 = vsel %vm87_vm5, 1, %v7612_v6  ;;  %v112_v18 = vadd.s32 %v110_v12, %v104_v61  ;;  %vm113_vm8 = vc.u32 %v111_v9, %v107_v63  ;;  %v115_v30 = vadd.s32 %v111_v9, %v107_v63  ;;  %371 = vperm.xlu2 %7400, %v7650_v0  }
  0x20   :  { %v90_v11 = vadd.s32 %v88_v8, %v82_v58  ;;  %vm91_vm7 = vc.u32 %v89_v4, %v85_v60  ;;  %v114_v25 = vsel %vm113_vm8, 1, %v7612_v6  ;;  %vm426_vm5 = vcmask 1043456  }
  0x21   :  { %v92_v14 = vsel %vm91_vm7, 1, %v7612_v6  ;;  %v116_v27 = vadd.s32 %v114_v25, %v112_v18 }
  0x22   :  { %v94_v24 = vadd.s32 %v92_v14, %v90_v11 }
  0x23   :  { %v117_v34 = vadd.s32 %v116_v27, %v106_v16 }
  0x24   :  { %v95_v28 = vadd.s32 %v94_v24, %v84_v10 }
  0x25   :  { %v118_v36 = vadd.s32 %v117_v34, %v108_v26 }
  0x26   :  { %v96_v35 = vadd.s32 %v95_v28, %v86_v22 }
  0x27   :  { %v122_v38 = vadd.s32 1, %v118_v36  ;;  %7401 = vset.pattern.permute.xlu2 %v7610_v1 }
  0x28   :  { %vm121_vm9 = vc.u32 %v96_v35, %v115_v30  ;;  %v120_v13 = vadd.s32 %v115_v30, %v96_v35 }
  0x29   :  { %v123_v39 = vsel %vm121_vm9, %v122_v38, %v118_v36 }
  0x2a   :  { %v124_v33 = vadd.s32 %v123_v39, %v119_v37 }
  0x2c   :  { %v125_v40 = vadd.s32 536870912, %v124_v33 }
  0x2e   :  { %v126_v41 = vshrl.u32 %v125_v40, 30 }
  0x30   :  { %v127_v42 = vshll.u32 %v126_v41, 30  ;;  %v150_v59 = vsub.s32 4, %v126_v41 }
  0x32   :  { %v128_v43 = vsub.s32 %v124_v33, %v127_v42  ;;  %v151_v63 = vsel %vm28_vm12, %v150_v59, %v126_v41  ;;  %v7723_v42 = vld [vmem:[%s9865_s0] sm:$0xff] }
  0x33   :  { %v153_v7 = vsel %vm27_vm13, 0, %v151_v63  ;;  %341 = vst [vmem:[#allocation1] ss:$2 sm:$0xff] %v7723_v42 }
  0x34   :  { %vm129_vm10 = vcmp.lt.s32.totalorder %v128_v43, 0  ;;  %v130_v44 = vsub.s32 0, %v128_v43  ;;  %v324_v12 = vadd.s32 3, %v153_v7  ;;  %v170_v22 = vand.u32 3, %v153_v7 }
  0x36   :  { %v131_v45 = vsel %vm129_vm10, %v130_v44, %v128_v43  ;;  %v325_v20 = vand.u32 3, %v324_v12  ;;  %vm175_vm15 = vcmp.eq.s32.totalorder %v170_v22, 2  ;;  %vm172_vm2 = vcmp.eq.s32.totalorder %v170_v22, 0 }
  0x37   :  { %v132_v46 = vclz %v131_v45  ;;  %vm171_vm3 = vcmp.lt.s32.totalorder %v170_v22, 2  ;;  %v19_v22 = vld [vmem:[%s9865_s0 + $0x8] sm:$0xff] }
  0x38   :  { %vm330_vm14 = vcmp.eq.s32.totalorder %v325_v20, 2  ;;  %vm326_vm0 = vcmp.lt.s32.totalorder %v325_v20, 2  ;;  %vm327_vm1 = vcmp.eq.s32.totalorder %v325_v20, 0 }
  0x39   :  { %v7325_v47 = vadd.s32 4294967294, %v132_v46 }
  0x3a   :  { %v343_v44 = vld.sshfl [vmem:[#allocation1 + $0x8] sm:$0xff pattern:$0x75316420] }
  0x3b   :  { %vm7326_vm11 = vcmp.lt.s32.totalorder %v7325_v47, 0 }
  0x3c   :  { %v135_v48 = vsel %vm7326_vm11, 0, %v7325_v47 }
  0x3d   :  { %v136_v49 = vsub.s32 32, %v135_v48  ;;  %v137_v50 = vshll.u32 %v128_v43, %v135_v48  ;;  %v140_v51 = vsub.s32 4294967266, %v135_v48  ;;  %v342_v43 = vld.sshfl [vmem:[#allocation1] sm:$0xff pattern:$0x75316420] }
  0x3f   :  { %v138_v31 = vshrl.u32 %v120_v13, %v136_v49  ;;  %v141_v52 = vadd.s32 127, %v140_v51 }
  0x41   :  { %v139_v53 = vor.u32 %v138_v31, %v137_v50  ;;  %v142_v54 = vshll.u32 %v141_v52, 23  ;;  %v7737_v50 = vld [vmem:[%s9866_s1] sm:$0xff] }
  0x43   :  { %v143_v55 = vor.u32 4788187, %v142_v54  ;;  %v146_v56 = vcvt.s32.f32 %v139_v53 }
  0x45   :  { %v144_v57 = vand.u32 2147483647, %v143_v55  ;;  %v7620_v55 = vmov 839922192  }
  0x47   :  { %v147_v58 = vmul.f32 %v146_v56, %v144_v57  ;;  %v374_v56 = vunpack.c.l.s4 %v7620_v55 }
  0x49   :  { %v148_v60 = vxor.u32 2147483648, %v147_v58 }
  0x4b   :  { %v149_v61 = vsel %vm28_vm12, %v148_v60, %v147_v58 }
  0x4c   :  { %v152_v3 = vsel %vm27_vm13, %v7650_v0, %v149_v61  ;;  %v7729_v0 = vld [vmem:[%s9865_s0 + $0x10] sm:$0xff] }
  0x4d   :  { %v154_v4 = vmul.f32 %v152_v3, %v152_v3  ;;  %354 = vst [vmem:[#allocation1] ss:$2 sm:$0xff] %v7729_v0 }
  0x4f   :  { %v155_v8 = vmul.f32 -0.001358992, %v154_v4  ;;  %v162_v9 = vmul.f32 -0.00019511016, %v154_v4 }
  0x51   :  { %v156_v10 = vadd.f32 0.041655596, %v155_v8  ;;  %v163_v11 = vadd.f32 0.008332121, %v162_v9  ;;  %v7742_v9 = vunpack.c.0.s8 %v374_v56 }
  0x53   :  { %v157_v14 = vmul.f32 %v156_v10, %v154_v4  ;;  %v164_v16 = vmul.f32 %v163_v11, %v154_v4 }
  0x54   :  { %v355_v45 = vld.sshfl [vmem:[#allocation1] sm:$0xff pattern:$0x75316420]  ;;  %v356_v46 = vld.sshfl [vmem:[#allocation1 + $0x8] sm:$0xff pattern:$0x75316420] }
  0x55   :  { %v158_v5 = vadd.f32 -0.4999988, %v157_v14  ;;  %v165_v18 = vadd.f32 -0.16666654, %v164_v16  ;;  %385 = vst [vmem:[#allocation1] ss:$2 sm:$0xff] %v7723_v42 }
  0x57   :  { %v159_v24 = vmul.f32 %v158_v5, %v154_v4  ;;  %v166_v25 = vmul.f32 %v165_v18, %v154_v4 }
  0x59   :  { %v160_v26 = vadd.f32 1.0, %v159_v24  ;;  %v167_v27 = vadd.f32 1.0, %v166_v25  ;;  %v7753_v24 = vld [vmem:[%s9867_s2 + $0x8] sm:$0xff] }
  0x5b   :  { %v168_v28 = vmul.f32 %v167_v27, %v152_v3  ;;  %v176_v30 = vxor.u32 2147483648, %v160_v26  ;;  %v23_v27 = vld [vmem:[%s9867_s2] sm:$0xff] }
  0x5c   :  { %v386_v47 = vld.sshfl [vmem:[#allocation1] sm:$0xff pattern:$0x75316420]  ;;  %v387_v13 = vld.sshfl [vmem:[#allocation1 + $0x8] sm:$0xff pattern:$0x75316420] }
  0x5d   :  { %v173_v32 = vxor.u32 2147483648, %v168_v28  ;;  %v332_v34 = vsel %vm330_vm14, %v176_v30, %v168_v28  ;;  %v177_v35 = vsel %vm175_vm15, %v176_v30, %v168_v28  ;;  %392 = vst [vmem:[#allocation1] ss:$2 sm:$0xff] %v7729_v0  ;;  %v7759_v30 = vsub.f32 0.0, %v7753_v24 }
  0x5f   :  { %v329_v36 = vsel %vm327_vm1, %v160_v26, %v173_v32  ;;  %v174_v37 = vsel %vm172_vm2, %v160_v26, %v173_v32  ;;  %v366_v52 = vpop.permute.xlu2 %365 }
  0x60   :  { %v333_v38 = vsel %vm326_vm0, %v329_v36, %v332_v34  ;;  %v178_v39 = vsel %vm171_vm3, %v174_v37, %v177_v35  ;;  %v7761_v35 = vsub.f32 0.0, %v23_v27 }
  0x61   :  { %v334_v33 = vsel %vm169_vm4, nan, %v333_v38  ;;  %v179_v40 = vsel %vm169_vm4, nan, %v178_v39 }
  0x62   :  { %350 = vperm.xlu1 %7398, %v334_v33   ;;  %337 = vperm.xlu0 %7396, %v179_v40   ;;  %v379_v41 = vsub.f32 0.0, %v334_v33 }
  0x64   :  { %v393_v48 = vld.sshfl [vmem:[#allocation1] sm:$0xff pattern:$0x75316420]  ;;  %v394_v49 = vld.sshfl [vmem:[#allocation1 + $0x8] sm:$0xff pattern:$0x75316420] }
  0x65   :  { %416 = vst [vmem:[#allocation1] ss:$2 sm:$0xff] %v7737_v50 }
  0x6a   :  { %382 = vperm.xlu0 %7396, %v379_v41  }
  0x6c   :  { %v418_v33 = vld.sshfl [vmem:[#allocation1 + $0x8] sm:$0xff pattern:$0x75316420] }
  0x74   :  { %v7740_v51 = vpop.permute.xlu1 %402 }
  0x79   :  { %v372_v12 = vpop.permute.xlu2 %371 }
  0x7a   :  { %v376_v20 = vperm.slane %v372_v12, %v7742_v9 }
  0x7c   :  { %v378_v28 = vadd.f32 %v376_v20, %v19_v22 }
  0x7e   :  { %v472_v40 = vmul.f32 %v7759_v30, %v378_v28 }
  0xd4   :  { %v338_v31 = vpop.permute.xlu0 %337  ;;  %v351_v53 = vpop.permute.xlu1 %350 }
  0xd5   :  { %v397_v59 = vmul.f32 %v393_v48, %v338_v31  ;;  %v398_v60 = vmul.f32 %v394_v49, %v338_v31  ;;  %v360_v61 = vmul.f32 %v356_v46, %v351_v53  ;;  %v347_v63 = vmul.f32 %v343_v44, %v338_v31 }
  0xd6   :  { %v359_v7 = vmul.f32 %v355_v45, %v351_v53  ;;  %v346_v8 = vmul.f32 %v342_v43, %v338_v31  ;;  %v417_v45 = vld.sshfl [vmem:[#allocation1] sm:$0xff pattern:$0x75316420]  ;;  %v22_v53 = vld [vmem:[%s9866_s1 + $0x8] sm:$0xff] }
  0xd7   :  { %v362_v14 = vadd.f32 %v360_v61, %v347_v63 }
  0xd8   :  { %v361_v18 = vadd.f32 %v359_v7, %v346_v8 }
  0xd9   :  { %v369_v25 = vadd.f32 %v366_v52, %v362_v14 }
  0xda   :  { %v368_v26 = vadd.f32 %v366_v52, %v361_v18 }
  0xdb   :  { %v446_v32 = vrot.slane %v369_v25, 4  ;;  %v441_v41 = vsub.f32 %v366_v52, %v369_v25 }
  0xdc   :  { %v383_v54 = vpop.permute.xlu0 %382  ;;  %v440_v37 = vsub.f32 %v366_v52, %v368_v26 }
  0xdd   :  { %v390_v57 = vmul.f32 %v386_v47, %v383_v54  ;;  %v391_v58 = vmul.f32 %v387_v13, %v383_v54  ;;  %v447_v48 = vsel %vm426_vm5, %v368_v26, %v446_v32 }
  0xde   :  { %v449_v8 = vmul.f32 %v447_v48, %v7761_v35 }
  0xdf   :  { %v399_v3 = vadd.f32 %v397_v59, %v390_v57  ;;  %v400_v4 = vadd.f32 %v398_v60, %v391_v58 }
  0xe1   :  { %v405_v10 = vadd.f32 %v7740_v51, %v399_v3  ;;  %v406_v11 = vadd.f32 %v7740_v51, %v400_v4  ;;  %v476_v3 = vrot.slane %v441_v41, 4 }
  0xe3   :  { %v407_v16 = vmax.f32 %v405_v10, 0.1  ;;  %v408_v5 = vmax.f32 %v406_v11, 0.1  ;;  %v438_v47 = vsub.f32 %v405_v10, %v7740_v51  ;;  %v439_v13 = vsub.f32 %v406_v11, %v7740_v51 }
  0xe5   :  { %7441 = vrcp.f32 %v407_v16 }
  0xe6   :  { %7443 = vrcp.f32 %v408_v5 }
  0xeb   :  { %v7442_v34 = vpop.eup %7441 }
  0xec   :  { %v7444_v36 = vpop.eup %7443  ;;  %v411_v38 = vmul.f32 %v7442_v34, %v7442_v34  ;;  %v413_v39 = vmul.f32 %v7442_v34, %v368_v26  ;;  %v456_v4 = vmul.f32 %v7442_v34, %v438_v47 }
  0xed   :  { %v412_v43 = vmul.f32 %v7444_v36, %v7444_v36  ;;  %v414_v44 = vmul.f32 %v7444_v36, %v369_v25  ;;  %v432_v46 = vrot.slane %v7444_v36, 4  ;;  %v457_v56 = vmul.f32 %v7444_v36, %v439_v13 }
  0xee   :  { %v458_v49 = vmul.f32 %v411_v38, %v368_v26  ;;  %v421_v57 = vsub.f32 %v413_v39, %v417_v45 }
  0xef   :  { %v459_v31 = vmul.f32 %v412_v43, %v369_v25  ;;  %v422_v54 = vsub.f32 %v414_v44, %v418_v33  ;;  %v433_v55 = vsel %vm426_vm5, %v7442_v34, %v432_v46  ;;  %v452_v52 = vrot.slane %v412_v43, 4 }
  0xf0   :  { %v435_v58 = vmul.f32 %v433_v55, %v378_v28  ;;  %v442_v59 = vmul.f32 %v433_v55, %v23_v27  ;;  %v460_v63 = vmul.f32 %v458_v49, %v440_v37  ;;  %v477_v25 = vsel %vm426_vm5, %v440_v37, %v476_v3 }
  0xf1   :  { %v461_v60 = vmul.f32 %v459_v31, %v441_v41  ;;  %v425_v61 = vrot.slane %v422_v54, 4  ;;  %v453_v51 = vsel %vm426_vm5, %v411_v38, %v452_v52  ;;  %v7807_v54 = vmul.f32 %v433_v55, %v7753_v24 }
  0xf2   :  { %v436_v7 = vsub.f32 %v435_v58, %v22_v53  ;;  %v7774_v12 = vmul.f32 %v472_v40, %v453_v51  ;;  %v480_v14 = vmul.f32 %v442_v59, %v442_v59  ;;  %v7779_v20 = vmul.f32 %v453_v51, %v449_v8 }
  0xf3   :  { %v463_v10 = vsub.f32 %v457_v56, %v461_v60  ;;  %v427_v11 = vsel %vm426_vm5, %v421_v57, %v425_v61  ;;  %v462_v22 = vsub.f32 %v456_v4, %v460_v63  ;;  %v517_v52 = vmul.f32 %v7807_v54, %v7807_v54 }
  0xf4   :  { %v429_v16 = vmul.f32 %v427_v11, %v23_v27  ;;  %v7777_v5 = vmul.f32 %v436_v7, %v7753_v24  ;;  %482 = vst [vmem:[#allocation1] ss:$2 sm:$0xff] %v480_v14  ;;  %v7786_v32 = vmul.f32 %v477_v25, %v7774_v12  ;;  %v493_v33 = vmul.f32 %v7779_v20, %v442_v59 }
  0xf5   :  { %v466_v18 = vrot.slane %v463_v10, 4  ;;  %v530_v58 = vmul.f32 %v7774_v12, %v7807_v54 }
  0xf6   :  { %v7782_v26 = vmul.f32 %v442_v59, %v429_v16  ;;  %v622_v34 = vmul.f32 %v7779_v20, %v429_v16  ;;  %v623_v38 = vmul.f32 %v7774_v12, %v7777_v5  ;;  %v637_v40 = vmul.f32 %v7786_v32, %v7777_v5 }
  0xf7   :  { %v467_v28 = vsel %vm426_vm5, %v462_v22, %v466_v18  ;;  %v542_v24 = vmul.f32 %v7786_v32, %v7807_v54  ;;  %v555_v18 = vmul.f32 %v7774_v12, %v7774_v12 }
  0xf8   :  { %v7789_v36 = vmul.f32 %v467_v28, %v23_v27  ;;  %v7793_v39 = vadd.f32 %v623_v38, %v622_v34 }
  0xfa   :  { %v636_v37 = vmul.f32 %v7789_v36, %v429_v16  ;;  %v505_v47 = vmul.f32 %v7789_v36, %v442_v59  ;;  %v554_v16 = vmul.f32 %v7779_v20, %v7779_v20 }
  0xfb   :  { %v483_v41 = vld.sshfl [vmem:[#allocation1] sm:$0xff pattern:$0x75316420]  ;;  %v484_v43 = vld.sshfl [vmem:[#allocation1 + $0x8] sm:$0xff pattern:$0x75316420] }
  0xfc   :  { %495 = vst [vmem:[#allocation1] ss:$2 sm:$0xff] %v493_v33  ;;  %v7799_v44 = vadd.f32 %v637_v40, %v636_v37  ;;  %v487_v27 = vsel %vm426_vm5, %v483_v41, 0.0  ;;  %v488_v45 = vsel %vm426_vm5, %v484_v43, 0.0  ;;  %v556_v22 = vadd.f32 %v555_v18, %v554_v16 }
  0xfd   :  { %v489_v46 = vadd.f32 %v488_v45, %v487_v27  ;;  %v569_v37 = vmul.f32 %v7789_v36, %v7779_v20  ;;  %v570_v40 = vmul.f32 %v7786_v32, %v7774_v12  ;;  %v584_v20 = vmul.f32 %v7786_v32, %v7786_v32 }
  0xfe   :  { %v610_v32 = vmul.f32 %v7807_v54, %v7777_v5 }
  0xff   :  { %490 = vadd.xlane.f32.xlu0 %v489_v46  ;;  %v571_v41 = vadd.f32 %v570_v40, %v569_v37 }
 0x103   :  { %v496_v13 = vld.sshfl [vmem:[#allocation1] sm:$0xff pattern:$0x75316420]  ;;  %v497_v48 = vld.sshfl [vmem:[#allocation1 + $0x8] sm:$0xff pattern:$0x75316420] }
 0x104   :  { %507 = vst [vmem:[#allocation1] ss:$2 sm:$0xff] %v505_v47  ;;  %v500_v49 = vsel %vm426_vm5, %v496_v13, 0.0  ;;  %v501_v31 = vsel %vm426_vm5, %v497_v48, 0.0  ;;  %v583_v13 = vmul.f32 %v7789_v36, %v7789_v36 }
 0x105   :  { %v502_v53 = vadd.f32 %v501_v31, %v500_v49 }
 0x106   :  { %v585_v48 = vadd.f32 %v584_v20, %v583_v13 }
 0x107   :  { %503 = vadd.xlane.f32.xlu2 %v502_v53 }
 0x10b   :  { %v508_v56 = vld.sshfl [vmem:[#allocation1] sm:$0xff pattern:$0x75316420]  ;;  %v509_v57 = vld.sshfl [vmem:[#allocation1 + $0x8] sm:$0xff pattern:$0x75316420] }
 0x10c   :  { %519 = vst [vmem:[#allocation1] ss:$2 sm:$0xff] %v517_v52  ;;  %v512_v55 = vsel %vm426_vm5, %v508_v56, 0.0  ;;  %v513_v3 = vsel %vm426_vm5, %v509_v57, 0.0 }
 0x10d   :  { %v514_v14 = vadd.f32 %v513_v3, %v512_v55 }
 0x113   :  { %v520_v59 = vld.sshfl [vmem:[#allocation1] sm:$0xff pattern:$0x75316420]  ;;  %v521_v60 = vld.sshfl [vmem:[#allocation1 + $0x8] sm:$0xff pattern:$0x75316420] }
 0x114   :  { %532 = vst [vmem:[#allocation1] ss:$2 sm:$0xff] %v530_v58  ;;  %v524_v61 = vsel %vm426_vm5, %v520_v59, 0.0  ;;  %v525_v51 = vsel %vm426_vm5, %v521_v60, 0.0 }
 0x115   :  { %v526_v63 = vadd.f32 %v525_v51, %v524_v61 }
 0x117   :  { %527 = vadd.xlane.f32.xlu1 %v526_v63 }
 0x11b   :  { %v533_v4 = vld.sshfl [vmem:[#allocation1] sm:$0xff pattern:$0x75316420]  ;;  %v534_v7 = vld.sshfl [vmem:[#allocation1 + $0x8] sm:$0xff pattern:$0x75316420] }
 0x11c   :  { %544 = vst [vmem:[#allocation1] ss:$2 sm:$0xff] %v542_v24  ;;  %v537_v8 = vsel %vm426_vm5, %v533_v4, 0.0  ;;  %v538_v10 = vsel %vm426_vm5, %v534_v7, 0.0 }
 0x11d   :  { %v539_v11 = vadd.f32 %v538_v10, %v537_v8 }
 0x11f   :  { %540 = vadd.xlane.f32.xlu2 %v539_v11  ;;  %515 = vadd.xlane.f32.xlu1 %v514_v14 }
 0x123   :  { %v545_v25 = vld.sshfl [vmem:[#allocation1] sm:$0xff pattern:$0x75316420]  ;;  %v546_v28 = vld.sshfl [vmem:[#allocation1 + $0x8] sm:$0xff pattern:$0x75316420] }
 0x124   :  { %558 = vst [vmem:[#allocation1] ss:$2 sm:$0xff] %v556_v22  ;;  %v549_v34 = vsel %vm426_vm5, %v545_v25, 0.0  ;;  %v550_v38 = vsel %vm426_vm5, %v546_v28, 0.0 }
 0x125   :  { %v551_v33 = vadd.f32 %v550_v38, %v549_v34 }
 0x127   :  { %552 = vadd.xlane.f32.xlu2 %v551_v33 }
 0x12b   :  { %v559_v43 = vld.sshfl [vmem:[#allocation1] sm:$0xff pattern:$0x75316420]  ;;  %v560_v27 = vld.sshfl [vmem:[#allocation1 + $0x8] sm:$0xff pattern:$0x75316420] }
 0x12c   :  { %573 = vst [vmem:[#allocation1] ss:$2 sm:$0xff] %v571_v41  ;;  %v563_v45 = vsel %vm426_vm5, %v559_v43, 0.0  ;;  %v564_v46 = vsel %vm426_vm5, %v560_v27, 0.0 }
 0x12d   :  { %v565_v47 = vadd.f32 %v564_v46, %v563_v45 }
 0x12f   :  { %566 = vadd.xlane.f32.xlu0 %v565_v47 }
 0x133   :  { %v574_v49 = vld.sshfl [vmem:[#allocation1] sm:$0xff pattern:$0x75316420]  ;;  %v575_v31 = vld.sshfl [vmem:[#allocation1 + $0x8] sm:$0xff pattern:$0x75316420] }
 0x134   :  { %587 = vst [vmem:[#allocation1] ss:$2 sm:$0xff] %v585_v48  ;;  %v578_v12 = vsel %vm426_vm5, %v574_v49, 0.0  ;;  %v579_v53 = vsel %vm426_vm5, %v575_v31, 0.0 }
 0x135   :  { %v580_v52 = vadd.f32 %v579_v53, %v578_v12 }
 0x137   :  { %581 = vadd.xlane.f32.xlu0 %v580_v52 }
 0x13b   :  { %v588_v56 = vld.sshfl [vmem:[#allocation1] sm:$0xff pattern:$0x75316420]  ;;  %v589_v57 = vld.sshfl [vmem:[#allocation1 + $0x8] sm:$0xff pattern:$0x75316420] }
 0x13c   :  { %600 = vst [vmem:[#allocation1] ss:$2 sm:$0xff] %v7782_v26  ;;  %v592_v36 = vsel %vm426_vm5, %v588_v56, 0.0  ;;  %v593_v58 = vsel %vm426_vm5, %v589_v57, 0.0 }
 0x13d   :  { %v594_v59 = vadd.f32 %v593_v58, %v592_v36 }
 0x13f   :  { %595 = vadd.xlane.f32.xlu1 %v594_v59 }
 0x143   :  { %v601_v60 = vld.sshfl [vmem:[#allocation1] sm:$0xff pattern:$0x75316420]  ;;  %v602_v61 = vld.sshfl [vmem:[#allocation1 + $0x8] sm:$0xff pattern:$0x75316420] }
 0x144   :  { %612 = vst [vmem:[#allocation1] ss:$2 sm:$0xff] %v610_v32  ;;  %v605_v51 = vsel %vm426_vm5, %v601_v60, 0.0  ;;  %v606_v63 = vsel %vm426_vm5, %v602_v61, 0.0 }
 0x145   :  { %v607_v24 = vadd.f32 %v606_v63, %v605_v51 }
 0x147   :  { %608 = vadd.xlane.f32.xlu2 %v607_v24 }
 0x14b   :  { %v613_v55 = vld.sshfl [vmem:[#allocation1] sm:$0xff pattern:$0x75316420]  ;;  %v614_v26 = vld.sshfl [vmem:[#allocation1 + $0x8] sm:$0xff pattern:$0x75316420] }
 0x14c   :  { %626 = vst [vmem:[#allocation1] ss:$2 sm:$0xff] %v7793_v39  ;;  %v617_v3 = vsel %vm426_vm5, %v613_v55, 0.0  ;;  %v618_v4 = vsel %vm426_vm5, %v614_v26, 0.0 }
 0x14d   :  { %v619_v7 = vadd.f32 %v618_v4, %v617_v3 }
 0x14f   :  { %620 = vadd.xlane.f32.xlu0 %v619_v7 }
 0x153   :  { %v627_v5 = vld.sshfl [vmem:[#allocation1] sm:$0xff pattern:$0x75316420]  ;;  %v628_v54 = vld.sshfl [vmem:[#allocation1 + $0x8] sm:$0xff pattern:$0x75316420] }
 0x154   :  { %640 = vst [vmem:[#allocation1] ss:$2 sm:$0xff] %v7799_v44  ;;  %v631_v8 = vsel %vm426_vm5, %v627_v5, 0.0  ;;  %v632_v10 = vsel %vm426_vm5, %v628_v54, 0.0 }
 0x155   :  { %v633_v11 = vadd.f32 %v632_v10, %v631_v8 }
 0x157   :  { %634 = vadd.xlane.f32.xlu1 %v633_v11 }
 0x15b   :  { %v641_v14 = vld.sshfl [vmem:[#allocation1] sm:$0xff pattern:$0x75316420]  ;;  %v642_v16 = vld.sshfl [vmem:[#allocation1 + $0x8] sm:$0xff pattern:$0x75316420] }
 0x15c   :  { %1071 = vst [vmem:[#allocation1] ss:$2 sm:$0xff] %v7723_v42  ;;  %v645_v39 = vsel %vm426_vm5, %v641_v14, 0.0  ;;  %v646_v18 = vsel %vm426_vm5, %v642_v16, 0.0 }
 0x15d   :  { %v647_v22 = vadd.f32 %v646_v18, %v645_v39 }
 0x15f   :  { %648 = vadd.xlane.f32.xlu2 %v647_v22 }
 0x163   :  { %v7855_v25 = vld.sshfl [vmem:[#allocation1] sm:$0xff pattern:$0x75316420]  ;;  %v7857_v28 = vld.sshfl [vmem:[#allocation1 + $0x8] sm:$0xff pattern:$0x75316420] }
 0x164   :  { %1083 = vst [vmem:[#allocation1] ss:$2 sm:$0xff] %v7729_v0 }
 0x16b   :  { %v7860_v44 = vld.sshfl [vmem:[#allocation1] sm:$0xff pattern:$0x75316420]  ;;  %v7862_v34 = vld.sshfl [vmem:[#allocation1 + $0x8] sm:$0xff pattern:$0x75316420] }
 0x16c   :  { %1115 = vst [vmem:[#allocation1] ss:$2 sm:$0xff] %v7723_v42 }
 0x172   :  { %v491_v37 = vpop.xlane.xlu0 %490 }
 0x173   :  { %v7865_v38 = vld.sshfl [vmem:[#allocation1] sm:$0xff pattern:$0x75316420]  ;;  %v7867_v33 = vld.sshfl [vmem:[#allocation1 + $0x8] sm:$0xff pattern:$0x75316420] }
 0x174   :  { %1122 = vst [vmem:[#allocation1] ss:$2 sm:$0xff] %v7729_v0  ;;  %v492_v43 = vadd.f32 1e-05, %v491_v37 }
 0x176   :  { %7445 = vrcp.f32 %v492_v43  ;;  %v661_v12 = vand.u32 2147483648, %v492_v43  ;;  %vm655_vm7 = vweird.f32 %v492_v43  ;;  %v659_v52 = vand.u32 2147483647, %v492_v43 }
 0x178   :  { %v662_v32 = vor.u32 1.1754944e-38, %v661_v12  ;;  %vm660_vm11 = vcmp.eq.f32.partialorder %v659_v52, 8.507059e+37 }
 0x17a   :  { %v7875_v56 = vpop.xlane.xlu2 %503 }
 0x17b   :  { %v7870_v40 = vld.sshfl [vmem:[#allocation1] sm:$0xff pattern:$0x75316420]  ;;  %v7872_v41 = vld.sshfl [vmem:[#allocation1 + $0x8] sm:$0xff pattern:$0x75316420] }
 0x17c   :  { %1146 = vst [vmem:[#allocation1] ss:$2 sm:$0xff] %v7737_v50  ;;  %v7446_v27 = vpop.eup %7445 }
 0x17d   :  { %v651_v45 = vmul.f32 %v7446_v27, %v492_v43  ;;  %vm656_vm6 = vweird.f32 %v7446_v27 }
 0x17e   :  { %vm657_vm8 = vmor %vm655_vm7, %vm656_vm6 }
 0x17f   :  { %v652_v13 = vsub.f32 1.0, %v651_v45 }
 0x181   :  { %v653_v20 = vmul.f32 %v7446_v27, %v652_v13 }
 0x183   :  { %v654_v31 = vadd.f32 %v7446_v27, %v653_v20 }
 0x185   :  { %v658_v58 = vsel %vm657_vm8, %v7446_v27, %v654_v31 }
 0x186   :  { %v7877_v61 = vsel %vm660_vm11, %v662_v32, %v658_v58 }
 0x187   :  { %v665_v55 = vmul.f32 %v7877_v61, %v7875_v56 }
 0x189   :  { %v667_v7 = vmul.f32 %v665_v55, %v7875_v56 }
 0x18a   :  { %v528_v46 = vpop.xlane.xlu1 %527 }
 0x18b   :  { %v529_v47 = vadd.f32 1e-05, %v528_v46 }
 0x18d   :  { %7447 = vrcp.f32 %v529_v47  ;;  %v688_v36 = vand.u32 2147483648, %v529_v47  ;;  %v686_v59 = vand.u32 2147483647, %v529_v47  ;;  %vm682_vm10 = vweird.f32 %v529_v47 }
 0x18f   :  { %v689_v63 = vor.u32 1.1754944e-38, %v688_v36  ;;  %vm687_vm13 = vcmp.eq.f32.partialorder %v686_v59, 8.507059e+37 }
 0x192   :  { %v7883_v26 = vpop.xlane.xlu2 %540  ;;  %v7889_v11 = vpop.xlane.xlu1 %515 }
 0x193   :  { %v7448_v48 = vpop.eup %7447  ;;  %v666_v18 = vmul.f32 %v7877_v61, %v7889_v11  ;;  %v669_v37 = vmul.f32 %v665_v55, %v7889_v11 }
 0x194   :  { %v678_v49 = vmul.f32 %v7448_v48, %v529_v47  ;;  %vm683_vm9 = vweird.f32 %v7448_v48 }
 0x195   :  { %vm684_vm12 = vmor %vm682_vm10, %vm683_vm9 }
 0x196   :  { %v679_v53 = vsub.f32 1.0, %v678_v49 }
 0x198   :  { %v680_v57 = vmul.f32 %v7448_v48, %v679_v53 }
 0x19a   :  { %v681_v60 = vadd.f32 %v7448_v48, %v680_v57  ;;  %v7894_v20 = vpop.xlane.xlu2 %552 }
 0x19c   :  { %v685_v51 = vsel %vm684_vm12, %v7448_v48, %v681_v60  ;;  %v671_v48 = vmul.f32 %v666_v18, %v7889_v11 }
 0x19d   :  { %v7879_v24 = vsel %vm687_vm13, %v689_v63, %v685_v51 }
 0x19e   :  { %v692_v3 = vmul.f32 %v7879_v24, %v7883_v26  ;;  %v693_v49 = vmul.f32 %v7879_v24, %v7894_v20 }
 0x1a0   :  { %v694_v54 = vmul.f32 %v692_v3, %v7883_v26  ;;  %v696_v31 = vmul.f32 %v692_v3, %v7894_v20  ;;  %v698_v32 = vmul.f32 %v693_v49, %v7894_v20 }
 0x1a2   :  { %v567_v4 = vpop.xlane.xlu0 %566 }
 0x1a3   :  { %v568_v5 = vadd.f32 1e-05, %v567_v4 }
 0x1a5   :  { %v668_v8 = vsub.f32 %v568_v5, %v667_v7 }
 0x1a7   :  { %v695_v10 = vsub.f32 %v668_v8, %v694_v54 }
 0x1a9   :  { %7449 = vrcp.f32 %v695_v10  ;;  %v713_v27 = vand.u32 2147483647, %v695_v10  ;;  %v715_v45 = vand.u32 2147483648, %v695_v10  ;;  %vm709_vm15 = vweird.f32 %v695_v10 }
 0x1aa   :  { %v582_v39 = vpop.xlane.xlu0 %581 }
 0x1ab   :  { %v670_v46 = vsub.f32 %v582_v39, %v669_v37  ;;  %v716_v53 = vor.u32 1.1754944e-38, %v715_v45  ;;  %vm714_vm1 = vcmp.eq.f32.partialorder %v713_v27, 8.507059e+37 }
 0x1ad   :  { %v697_v52 = vsub.f32 %v670_v46, %v696_v31 }
 0x1af   :  { %v7450_v14 = vpop.eup %7449 }
 0x1b0   :  { %v705_v16 = vmul.f32 %v7450_v14, %v695_v10  ;;  %vm710_vm14 = vweird.f32 %v7450_v14 }
 0x1b1   :  { %vm711_vm0 = vmor %vm709_vm15, %vm710_vm14 }
 0x1b2   :  { %v706_v22 = vsub.f32 1.0, %v705_v16  ;;  %v596_v43 = vpop.xlane.xlu1 %595 }
 0x1b3   :  { %v597_v13 = vadd.f32 1e-05, %v596_v43 }
 0x1b4   :  { %v707_v47 = vmul.f32 %v7450_v14, %v706_v22 }
 0x1b5   :  { %v672_v36 = vsub.f32 %v597_v13, %v671_v48 }
 0x1b6   :  { %v708_v12 = vadd.f32 %v7450_v14, %v707_v47 }
 0x1b7   :  { %v699_v51 = vsub.f32 %v672_v36, %v698_v32 }
 0x1b8   :  { %v712_v57 = vsel %vm711_vm0, %v7450_v14, %v708_v12 }
 0x1b9   :  { %v717_v58 = vsel %vm714_vm1, %v716_v53, %v712_v57 }
 0x1ba   :  { %v719_v59 = vmul.f32 %v717_v58, %v697_v52  ;;  %v609_v5 = vpop.xlane.xlu2 %608 }
 0x1bb   :  { %v673_v10 = vmul.f32 %v665_v55, %v609_v5  ;;  %v675_v43 = vmul.f32 %v666_v18, %v609_v5 }
 0x1bc   :  { %v720_v60 = vmul.f32 %v719_v59, %v697_v52 }
 0x1be   :  { %v721_v63 = vsub.f32 %v699_v51, %v720_v60 }
 0x1c0   :  { %7451 = vrcp.f32 %v721_v63  ;;  %v735_v45 = vand.u32 2147483648, %v721_v63  ;;  %vm729_vm3 = vweird.f32 %v721_v63  ;;  %v733_v13 = vand.u32 2147483647, %v721_v63 }
 0x1c2   :  { %v621_v16 = vpop.xlane.xlu0 %620  ;;  %v736_v57 = vor.u32 1.1754944e-38, %v735_v45  ;;  %vm734_vm6 = vcmp.eq.f32.partialorder %v733_v13, 8.507059e+37 }
 0x1c3   :  { %v700_v14 = vmul.f32 %v692_v3, %v621_v16  ;;  %v702_v47 = vmul.f32 %v693_v49, %v621_v16  ;;  %v7904_v3 = vld [vmem:[%s9868_s3] sm:$0xf] }
 0x1c6   :  { %v7452_v4 = vpop.eup %7451 }
 0x1c7   :  { %v725_v7 = vmul.f32 %v7452_v4, %v721_v63  ;;  %vm730_vm2 = vweird.f32 %v7452_v4 }
 0x1c8   :  { %vm731_vm4 = vmor %vm729_vm3, %vm730_vm2 }
 0x1c9   :  { %v726_v54 = vsub.f32 1.0, %v725_v7 }
 0x1ca   :  { %v635_v8 = vpop.xlane.xlu1 %634 }
 0x1cb   :  { %v674_v39 = vsub.f32 %v635_v8, %v673_v10  ;;  %v727_v22 = vmul.f32 %v7452_v4, %v726_v54 }
 0x1cd   :  { %v701_v37 = vsub.f32 %v674_v39, %v700_v14  ;;  %v728_v27 = vadd.f32 %v7452_v4, %v727_v22 }
 0x1cf   :  { %v722_v31 = vmul.f32 %v719_v59, %v701_v37  ;;  %v732_v12 = vsel %vm731_vm4, %v7452_v4, %v728_v27 }
 0x1d0   :  { %v737_v36 = vsel %vm734_vm6, %v736_v57, %v732_v12 }
 0x1d2   :  { %v649_v46 = vpop.xlane.xlu2 %648 }
 0x1d3   :  { %v676_v48 = vsub.f32 %v649_v46, %v675_v43 }
 0x1d5   :  { %v703_v53 = vsub.f32 %v676_v48, %v702_v47 }
 0x1d7   :  { %v723_v55 = vsub.f32 %v703_v53, %v722_v31 }
 0x1d9   :  { %v739_v32 = vmul.f32 %v737_v36, %v723_v55 }
 0x1db   :  { %v7907_v18 = vsub.f32 %v7904_v3, %v739_v32  ;;  %v740_v49 = vmul.f32 %v739_v32, %v697_v52  ;;  %v750_v52 = vmul.f32 %v739_v32, %v7889_v11 }
 0x1dd   :  { %v760_v60 = vand.u32 2139095040, %v7907_v18  ;;  %v741_v51 = vsub.f32 %v701_v37, %v740_v49  ;;  %v757_v8 = vand.u32 2147483647, %v7907_v18  ;;  %v745_v37 = vmul.f32 %v739_v32, %v7894_v20 }
 0x1de   :  { %vm759_vm3 = vcmp.lt.s32.totalorder %v7907_v18, 0 }
 0x1df   :  { %v761_v59 = vshrl.u32 %v760_v60, 23  ;;  %v742_v63 = vmul.f32 %v741_v51, %v717_v58  ;;  %v764_v43 = vand.u32 8388607, %v757_v8  ;;  %vm758_vm4 = vcmp.le.f32.partialorder %v757_v8, 0.7853982 }
 0x1e1   :  { %v7330_v4 = vadd.s32 4294967169, %v761_v59  ;;  %v7911_v7 = vsub.f32 %v7904_v3, %v742_v63  ;;  %v748_v54 = vmul.f32 %v742_v63, %v7875_v56  ;;  %v743_v10 = vmul.f32 %v742_v63, %v7883_v26 }
 0x1e2   :  { %v765_v46 = vor.u32 8388608, %v764_v43 }
 0x1e3   :  { %1133 = vperm.xlu2 %7401, %v7911_v7   ;;  %v767_v39 = vadd.s32 1, %v7330_v4  ;;  %v749_v22 = vsub.f32 %v609_v5, %v748_v54  ;;  %v744_v14 = vsub.f32 %v621_v16, %v743_v10 }
 0x1e4   :  { %v7939_v51 = vshll.u32 %v765_v46, 8 }
 0x1e5   :  { %vm768_vm7 = vcmp.gt.s32.totalorder %v767_v39, 0  ;;  %v7919_v58 = vsub.f32 %v749_v22, %v750_v52  ;;  %v7923_v27 = vsub.f32 %v744_v14, %v745_v37 }
 0x1e6   :  { %v769_v56 = vsel %vm768_vm7, %v767_v39, 0  ;;  %v806_v14 = vand.u32 65535, %v7939_v51  ;;  %v807_v37 = vshrl.u32 %v7939_v51, 16 }
 0x1e7   :  { %v771_v45 = vand.u32 31, %v769_v56  ;;  %v7925_v47 = vshrl.u32 %v769_v56, 5 }
 0x1e9   :  { %v772_v26 = vsub.s32 32, %v771_v45  ;;  %v774_v5 = vshll.u32 %v7613_v15, %v771_v45  ;;  %v777_v11 = vshll.u32 %v7614_v17, %v771_v45  ;;  %v780_v13 = vshll.u32 %v7615_v19, %v771_v45 }
 0x1ea   :  { %v783_v31 = vshll.u32 %v7616_v21, %v771_v45  ;;  %v786_v53 = vshll.u32 %v7617_v23, %v771_v45  ;;  %vm789_vm8 = vcmp.lt.s32.totalorder %v7925_v47, 1  ;;  %vm792_vm9 = vcmp.lt.s32.totalorder %v7925_v47, 4 }
 0x1eb   :  { %v775_v20 = vshrl.u32 %v7614_v17, %v772_v26  ;;  %v778_v16 = vshrl.u32 %v7615_v19, %v772_v26  ;;  %v781_v48 = vshrl.u32 %v7616_v21, %v772_v26  ;;  %7405 = vset.pattern.permute.xlu2 %v7611_v2  ;;  %v784_v12 = vshrl.u32 %v7617_v23, %v772_v26 }
 0x1ec   :  { %v787_v57 = vshrl.u32 %v7618_v29, %v772_v26  ;;  %vm791_vm10 = vcmp.lt.s32.totalorder %v7925_v47, 3  ;;  %vm790_vm11 = vcmp.lt.s32.totalorder %v7925_v47, 2 }
 0x1ed   :  { %v776_v55 = vor.u32 %v775_v20, %v774_v5  ;;  %v779_v36 = vor.u32 %v778_v16, %v777_v11  ;;  %v782_v32 = vor.u32 %v781_v48, %v780_v13  ;;  %v785_v49 = vor.u32 %v784_v12, %v783_v31 }
 0x1ee   :  { %v788_v60 = vor.u32 %v787_v57, %v786_v53 }
 0x1ef   :  { %v797_v59 = vsel %vm789_vm8, %v776_v55, %v779_v36  ;;  %v801_v63 = vsel %vm789_vm8, %v779_v36, %v782_v32  ;;  %v798_v4 = vsel %vm792_vm9, %v785_v49, 920167782 }
 0x1f0   :  { %v802_v54 = vsel %vm792_vm9, %v788_v60, 1326507024  ;;  %v799_v10 = vsel %vm791_vm10, %v782_v32, %v798_v4 }
 0x1f1   :  { %v803_v39 = vsel %vm791_vm10, %v785_v49, %v802_v54  ;;  %v800_v22 = vsel %vm790_vm11, %v797_v59, %v799_v10 }
 0x1f2   :  { %v804_v52 = vsel %vm790_vm11, %v801_v63, %v803_v39  ;;  %v830_v45 = vand.u32 65535, %v800_v22  ;;  %v831_v46 = vshrl.u32 %v800_v22, 16  ;;  %v794_v39 = vsel %vm792_vm9, %v782_v32, 2102212464 }
 0x1f3   :  { %v808_v43 = vand.u32 65535, %v804_v52  ;;  %v809_v56 = vshrl.u32 %v804_v52, 16 }
 0x1f4   :  { %v833_v20 = vmul.u32 %v831_v46, %v806_v14  ;;  %v834_v16 = vmul.u32 %v830_v45, %v807_v37  ;;  %v832_v12 = vmul.u32 %v830_v45, %v806_v14  ;;  %v835_v60 = vmul.u32 %v831_v46, %v807_v37 }
 0x1f5   :  { %v811_v5 = vmul.u32 %v809_v56, %v806_v14  ;;  %v812_v11 = vmul.u32 %v808_v43, %v807_v37  ;;  %v810_v13 = vmul.u32 %v808_v43, %v806_v14  ;;  %v813_v31 = vmul.u32 %v809_v56, %v807_v37 }
 0x1f6   :  { %v836_v53 = vshll.u32 %v833_v20, 16  ;;  %v838_v63 = vshll.u32 %v834_v16, 16  ;;  %v773_v14 = vshrl.u32 %v7613_v15, %v772_v26  ;;  %v837_v45 = vshrl.u32 %v833_v20, 16 }
 0x1f7   :  { %v814_v48 = vshll.u32 %v811_v5, 16  ;;  %v816_v57 = vshll.u32 %v812_v11, 16  ;;  %v815_v43 = vshrl.u32 %v811_v5, 16 }
 0x1f8   :  { %vm840_vm13 = vc.u32 %v832_v12, %v836_v53  ;;  %v842_v4 = vadd.s32 %v836_v53, %v832_v12  ;;  %v839_v12 = vshrl.u32 %v834_v16, 16 }
 0x1f9   :  { %vm818_vm12 = vc.u32 %v810_v13, %v814_v48  ;;  %v820_v49 = vadd.s32 %v814_v48, %v810_v13  ;;  %v841_v10 = vsel %vm840_vm13, 1, %v7612_v6  ;;  %v793_v13 = vsel %vm789_vm8, %v773_v14, %v776_v55 }
 0x1fa   :  { %v819_v59 = vsel %vm818_vm12, 1, %v7612_v6  ;;  %v843_v52 = vadd.s32 %v841_v10, %v835_v60  ;;  %vm844_vm15 = vc.u32 %v842_v4, %v838_v63  ;;  %v795_v48 = vsel %vm791_vm10, %v779_v36, %v794_v39 }
 0x1fb   :  { %v821_v54 = vadd.s32 %v819_v59, %v813_v31  ;;  %vm822_vm14 = vc.u32 %v820_v49, %v816_v57  ;;  %v845_v56 = vsel %vm844_vm15, 1, %v7612_v6  ;;  %v817_v31 = vshrl.u32 %v812_v11, 16 }
 0x1fc   :  { %v823_v22 = vsel %vm822_vm14, 1, %v7612_v6  ;;  %v847_v46 = vadd.s32 %v845_v56, %v843_v52  ;;  %v846_v49 = vadd.s32 %v842_v4, %v838_v63  ;;  %v796_v26 = vsel %vm790_vm11, %v793_v13, %v795_v48 }
 0x1fd   :  { %v825_v37 = vadd.s32 %v823_v22, %v821_v54  ;;  %v850_v20 = vmul.u32 %v7939_v51, %v796_v26  ;;  %vm900_vm12 = vweird.f32 %v7907_v18 }
 0x1fe   :  { %v848_v53 = vadd.s32 %v847_v46, %v837_v45 }
 0x1ff   :  { %v826_v32 = vadd.s32 %v825_v37, %v815_v43 }
 0x200   :  { %v849_v5 = vadd.s32 %v848_v53, %v839_v12 }
 0x201   :  { %v827_v57 = vadd.s32 %v826_v32, %v817_v31 }
 0x202   :  { %v853_v60 = vadd.s32 1, %v849_v5 }
 0x203   :  { %vm852_vm0 = vc.u32 %v827_v57, %v846_v49  ;;  %v851_v47 = vadd.s32 %v846_v49, %v827_v57 }
 0x204   :  { %v854_v59 = vsel %vm852_vm0, %v853_v60, %v849_v5 }
 0x205   :  { %v855_v54 = vadd.s32 %v854_v59, %v850_v20 }
 0x207   :  { %v856_v55 = vadd.s32 536870912, %v855_v54 }
 0x209   :  { %v857_v10 = vshrl.u32 %v856_v55, 30 }
 0x20b   :  { %v858_v22 = vshll.u32 %v857_v10, 30  ;;  %v881_v53 = vsub.s32 4, %v857_v10 }
 0x20d   :  { %v859_v36 = vsub.s32 %v855_v54, %v858_v22  ;;  %v882_v60 = vsel %vm759_vm3, %v881_v53, %v857_v10 }
 0x20e   :  { %v884_v54 = vsel %vm758_vm4, 0, %v882_v60 }
 0x20f   :  { %vm860_vm1 = vcmp.lt.s32.totalorder %v859_v36, 0  ;;  %v861_v11 = vsub.s32 0, %v859_v36 }
 0x211   :  { %v862_v16 = vsel %vm860_vm1, %v861_v11, %v859_v36 }
 0x212   :  { %v863_v39 = vclz %v862_v16  ;;  %v1055_v16 = vadd.s32 3, %v884_v54 }
 0x214   :  { %v7331_v52 = vadd.s32 4294967294, %v863_v39 }
 0x216   :  { %vm7332_vm2 = vcmp.lt.s32.totalorder %v7331_v52, 0 }
 0x217   :  { %v866_v63 = vsel %vm7332_vm2, 0, %v7331_v52 }
 0x218   :  { %v867_v4 = vsub.s32 32, %v866_v63  ;;  %v871_v14 = vsub.s32 4294967266, %v866_v63  ;;  %v868_v43 = vshll.u32 %v859_v36, %v866_v63 }
 0x21a   :  { %v869_v37 = vshrl.u32 %v851_v47, %v867_v4  ;;  %v872_v56 = vadd.s32 127, %v871_v14  ;;  %v901_v47 = vand.u32 3, %v884_v54  ;;  %v1056_v4 = vand.u32 3, %v1055_v16 }
 0x21c   :  { %v870_v51 = vor.u32 %v869_v37, %v868_v43  ;;  %v873_v45 = vshll.u32 %v872_v56, 23  ;;  %vm902_vm6 = vcmp.lt.s32.totalorder %v901_v47, 2  ;;  %vm903_vm7 = vcmp.eq.s32.totalorder %v901_v47, 0 }
 0x21d   :  { %vm906_vm8 = vcmp.eq.s32.totalorder %v901_v47, 2  ;;  %vm1057_vm9 = vcmp.lt.s32.totalorder %v1056_v4, 2  ;;  %vm1058_vm10 = vcmp.eq.s32.totalorder %v1056_v4, 0  ;;  %vm1061_vm11 = vcmp.eq.s32.totalorder %v1056_v4, 2 }
 0x21e   :  { %v874_v46 = vor.u32 4788187, %v873_v45  ;;  %v877_v48 = vcvt.s32.f32 %v870_v51 }
 0x220   :  { %v875_v13 = vand.u32 2147483647, %v874_v46 }
 0x222   :  { %v878_v31 = vmul.f32 %v877_v48, %v875_v13 }
 0x224   :  { %v879_v32 = vxor.u32 2147483648, %v878_v31 }
 0x226   :  { %v880_v12 = vsel %vm759_vm3, %v879_v32, %v878_v31 }
 0x227   :  { %v883_v57 = vsel %vm758_vm4, %v7907_v18, %v880_v12  ;;  %v752_v12 = vmul.f32 %v7919_v58, %v7877_v61 }
 0x228   :  { %v885_v49 = vmul.f32 %v883_v57, %v883_v57 }
 0x229   :  { %v7984_v53 = vsub.f32 %v7904_v3, %v752_v12 }
 0x22a   :  { %v886_v26 = vmul.f32 -0.001358992, %v885_v49  ;;  %v893_v5 = vmul.f32 -0.00019511016, %v885_v49 }
 0x22c   :  { %v887_v20 = vadd.f32 0.041655596, %v886_v26  ;;  %v894_v59 = vadd.f32 0.008332121, %v893_v5 }
 0x22e   :  { %v888_v55 = vmul.f32 %v887_v20, %v885_v49  ;;  %v895_v22 = vmul.f32 %v894_v59, %v885_v49 }
 0x230   :  { %v889_v36 = vadd.f32 -0.4999988, %v888_v55  ;;  %v896_v11 = vadd.f32 -0.16666654, %v895_v22 }
 0x232   :  { %v890_v39 = vmul.f32 %v889_v36, %v885_v49  ;;  %v897_v52 = vmul.f32 %v896_v11, %v885_v49 }
 0x234   :  { %v891_v63 = vadd.f32 1.0, %v890_v39  ;;  %v898_v8 = vadd.f32 1.0, %v897_v52 }
 0x236   :  { %v899_v14 = vmul.f32 %v898_v8, %v883_v57  ;;  %v907_v43 = vxor.u32 2147483648, %v891_v63  ;;  %v747_v57 = vmul.f32 %v7923_v27, %v7879_v24 }
 0x238   :  { %v904_v37 = vxor.u32 2147483648, %v899_v14  ;;  %v908_v56 = vsel %vm906_vm8, %v907_v43, %v899_v14  ;;  %v1063_v45 = vsel %vm1061_vm11, %v907_v43, %v899_v14  ;;  %v7991_v49 = vsub.f32 %v7904_v3, %v747_v57  ;;  %v1148_v14 = vld.sshfl [vmem:[#allocation1 + $0x8] sm:$0xff pattern:$0x75316420] }
 0x23a   :  { %v905_v10 = vsel %vm903_vm7, %v891_v63, %v904_v37  ;;  %v1060_v51 = vsel %vm1058_vm10, %v891_v63, %v904_v37 }
 0x23b   :  { %v909_v46 = vsel %vm902_vm6, %v905_v10, %v908_v56  ;;  %v1064_v13 = vsel %vm1057_vm9, %v1060_v51, %v1063_v45 }
 0x23c   :  { %v910_v48 = vsel %vm900_vm12, nan, %v909_v46  ;;  %v1065_v31 = vsel %vm900_vm12, nan, %v1064_v13 }
 0x23d   :  { %1068 = vperm.xlu0 %7396, %v910_v48   ;;  %v1109_v32 = vsub.f32 0.0, %v1065_v31  ;;  %v1134_v20 = vpop.permute.xlu2 %1133 }
 0x23f   :  { %1112 = vperm.xlu1 %7398, %v1109_v32  }
 0x245   :  { %1080 = vperm.xlu0 %7396, %v1065_v31  }
 0x247   :  { %7402 = vset.pattern.permute.xlu1 %v7612_v6 }
 0x248   :  { %1094 = vperm.xlu1 %7402, %v7984_v53  }
 0x24d   :  { %7403 = vset.pattern.permute.xlu0 %v7619_v62 }
 0x24e   :  { %1101 = vperm.xlu0 %7403, %v7991_v49  }
 0x250   :  { %7406 = vset.pattern.permute.xlu1 %v7610_v1 }
 0x256   :  { %7404 = vset.pattern.permute.xlu0 %v7611_v2 }
 0x2af   :  { %v1069_v61 = vpop.permute.xlu0 %1068 }
 0x2b0   :  { %v1127_v60 = vmul.f32 %v7870_v40, %v1069_v61  ;;  %v1128_v24 = vmul.f32 %v7872_v41, %v1069_v61  ;;  %v1076_v11 = vmul.f32 %v7855_v25, %v1069_v61  ;;  %v1077_v16 = vmul.f32 %v7857_v28, %v1069_v61  ;;  %v1147_v25 = vld.sshfl [vmem:[#allocation1] sm:$0xff pattern:$0x75316420] }
 0x2b1   :  { %v1113_v58 = vpop.permute.xlu1 %1112 }
 0x2b2   :  { %v1120_v26 = vmul.f32 %v7865_v38, %v1113_v58  ;;  %v1121_v5 = vmul.f32 %v7867_v33, %v1113_v58  ;;  %v8010_v58 = vld [vmem:[%s9867_s2] sm:$0xff] }
 0x2b4   :  { %v1129_v3 = vadd.f32 %v1127_v60, %v1120_v26  ;;  %v1130_v27 = vadd.f32 %v1128_v24, %v1121_v5 }
 0x2b6   :  { %v1136_v59 = vadd.f32 %v1134_v20, %v1129_v3  ;;  %v1137_v54 = vadd.f32 %v1134_v20, %v1130_v27 }
 0x2b7   :  { %v1081_v55 = vpop.permute.xlu0 %1080 }
 0x2b8   :  { %v1138_v22 = vmax.f32 %v1136_v59, 0.1  ;;  %v1139_v36 = vmax.f32 %v1137_v54, 0.1  ;;  %v1088_v38 = vmul.f32 %v7860_v44, %v1081_v55  ;;  %v1089_v33 = vmul.f32 %v7862_v34, %v1081_v55 }
 0x2b9   :  { %v1167_v10 = vsub.f32 %v1136_v59, %v1134_v20  ;;  %v1168_v51 = vsub.f32 %v1137_v54, %v1134_v20 }
 0x2ba   :  { %7453 = vrcp.f32 %v1138_v22  ;;  %v1095_v40 = vpop.permute.xlu1 %1094  ;;  %v1090_v41 = vadd.f32 %v1088_v38, %v1076_v11  ;;  %v1091_v39 = vadd.f32 %v1089_v33, %v1077_v16  ;;  %v8020_v11 = vld [vmem:[%s9865_s0 + $0x8] sm:$0xff] }
 0x2bb   :  { %7455 = vrcp.f32 %v1139_v36 }
 0x2bc   :  { %v1098_v52 = vadd.f32 %v1095_v40, %v1091_v39  ;;  %v1097_v63 = vadd.f32 %v1095_v40, %v1090_v41 }
 0x2be   :  { %v1174_v47 = vrot.slane %v1098_v52, 4  ;;  %v1169_v34 = vsub.f32 %v1095_v40, %v1097_v63  ;;  %v1170_v45 = vsub.f32 %v1095_v40, %v1098_v52 }
 0x2c0   :  { %v7454_v8 = vpop.eup %7453  ;;  %v1102_v13 = vpop.permute.xlu0 %1101  ;;  %v1175_v12 = vsel %vm426_vm5, %v1097_v63, %v1174_v47 }
 0x2c1   :  { %v7456_v4 = vpop.eup %7455  ;;  %v1142_v43 = vmul.f32 %v7454_v8, %v7454_v8  ;;  %v1144_v37 = vmul.f32 %v7454_v8, %v1097_v63  ;;  %v1106_v27 = vperm.slane %v1102_v13, %v7742_v9  ;;  %v1177_v20 = vmul.f32 %v1175_v12, %v7761_v35 }
 0x2c2   :  { %v1143_v28 = vmul.f32 %v7456_v4, %v7456_v4  ;;  %v1145_v56 = vmul.f32 %v7456_v4, %v1098_v52  ;;  %v1161_v44 = vrot.slane %v7456_v4, 4  ;;  %v1185_v57 = vmul.f32 %v7456_v4, %v1168_v51 }
 0x2c3   :  { %v1186_v46 = vmul.f32 %v1142_v43, %v1097_v63  ;;  %v1151_v61 = vsub.f32 %v1144_v37, %v1147_v25  ;;  %v1184_v55 = vmul.f32 %v7454_v8, %v1167_v10  ;;  %v1108_v16 = vadd.f32 %v8020_v11, %v1106_v27  ;;  %v8043_v10 = vld [vmem:[%s9867_s2 + $0x8] sm:$0xff] }
 0x2c4   :  { %v1152_v48 = vsub.f32 %v1145_v56, %v1148_v14  ;;  %v1187_v31 = vmul.f32 %v1143_v28, %v1098_v52  ;;  %v1162_v32 = vsel %vm426_vm5, %v7454_v8, %v1161_v44  ;;  %v1180_v5 = vrot.slane %v1143_v28, 4  ;;  %v8034_v14 = vld [vmem:[%s9866_s1 + $0x8] sm:$0xff] }
 0x2c5   :  { %v1171_v26 = vmul.f32 %v8010_v58, %v1162_v32  ;;  %v1188_v24 = vmul.f32 %v1186_v46, %v1169_v34  ;;  %v1164_v39 = vmul.f32 %v1162_v32, %v1108_v16  ;;  %v1203_v52 = vrot.slane %v1170_v45, 4 }
 0x2c6   :  { %v1155_v60 = vrot.slane %v1152_v48, 4  ;;  %v1189_v3 = vmul.f32 %v1187_v31, %v1170_v45  ;;  %v1181_v59 = vsel %vm426_vm5, %v1142_v43, %v1180_v5  ;;  %v1199_v47 = vmul.f32 %v1108_v16, %v7759_v30 }
 0x2c7   :  { %v1207_v54 = vmul.f32 %v1171_v26, %v1171_v26  ;;  %v8024_v33 = vmul.f32 %v1181_v59, %v1177_v20  ;;  %v1190_v40 = vsub.f32 %v1184_v55, %v1188_v24  ;;  %v1165_v43 = vsub.f32 %v1164_v39, %v8034_v14 }
 0x2c8   :  { %v1191_v22 = vsub.f32 %v1185_v57, %v1189_v3  ;;  %v1156_v36 = vsel %vm426_vm5, %v1151_v61, %v1155_v60  ;;  %v1200_v25 = vmul.f32 %v1199_v47, %v1181_v59  ;;  %v1204_v56 = vsel %vm426_vm5, %v1169_v34, %v1203_v52 }
 0x2c9   :  { %v1158_v38 = vmul.f32 %v8010_v58, %v1156_v36  ;;  %1209 = vst [vmem:[#allocation1] ss:$2 sm:$0xff] %v1207_v54  ;;  %v8046_v28 = vmul.f32 %v8043_v10, %v1165_v43  ;;  %v1220_v44 = vmul.f32 %v8024_v33, %v1171_v26  ;;  %v8063_v54 = vmul.f32 %v8043_v10, %v1162_v32 }
 0x2ca   :  { %v1194_v41 = vrot.slane %v1191_v22, 4  ;;  %v1206_v13 = vmul.f32 %v1204_v56, %v1200_v25  ;;  %v1281_v56 = vmul.f32 %v8024_v33, %v8024_v33 }
 0x2cb   :  { %v8026_v63 = vmul.f32 %v1171_v26, %v1158_v38  ;;  %v1349_v8 = vmul.f32 %v8024_v33, %v1158_v38  ;;  %v1350_v48 = vmul.f32 %v1200_v25, %v8046_v28  ;;  %v1244_v55 = vmul.f32 %v8063_v54, %v8063_v54 }
 0x2cc   :  { %v1195_v4 = vsel %vm426_vm5, %v1190_v40, %v1194_v41  ;;  %v1364_v61 = vmul.f32 %v1206_v13, %v8046_v28  ;;  %v1269_v32 = vmul.f32 %v1206_v13, %v8063_v54 }
 0x2cd   :  { %v8038_v37 = vmul.f32 %v8010_v58, %v1195_v4  ;;  %v8054_v57 = vadd.f32 %v1350_v48, %v1349_v8 }
 0x2cf   :  { %v1363_v51 = vmul.f32 %v8038_v37, %v1158_v38  ;;  %v1232_v60 = vmul.f32 %v8038_v37, %v1171_v26  ;;  %v1257_v26 = vmul.f32 %v1200_v25, %v8063_v54 }
 0x2d0   :  { %v1210_v45 = vld.sshfl [vmem:[#allocation1] sm:$0xff pattern:$0x75316420]  ;;  %v1211_v46 = vld.sshfl [vmem:[#allocation1 + $0x8] sm:$0xff pattern:$0x75316420] }
 0x2d1   :  { %1222 = vst [vmem:[#allocation1] ss:$2 sm:$0xff] %v1220_v44  ;;  %v1214_v31 = vsel %vm426_vm5, %v1210_v45, 0.0  ;;  %v1215_v12 = vsel %vm426_vm5, %v1211_v46, 0.0  ;;  %v8057_v34 = vadd.f32 %v1364_v61, %v1363_v51  ;;  %v1282_v44 = vmul.f32 %v1200_v25, %v1200_v25 }
 0x2d2   :  { %v1216_v5 = vadd.f32 %v1215_v12, %v1214_v31  ;;  %v1296_v61 = vmul.f32 %v8038_v37, %v8024_v33 }
 0x2d3   :  { %v1283_v51 = vadd.f32 %v1282_v44, %v1281_v56 }
 0x2d4   :  { %1217 = vadd.xlane.f32.xlu2 %v1216_v5  ;;  %v1297_v5 = vmul.f32 %v1206_v13, %v1200_v25 }
 0x2d8   :  { %v1223_v24 = vld.sshfl [vmem:[#allocation1] sm:$0xff pattern:$0x75316420]  ;;  %v1224_v3 = vld.sshfl [vmem:[#allocation1 + $0x8] sm:$0xff pattern:$0x75316420] }
 0x2d9   :  { %1234 = vst [vmem:[#allocation1] ss:$2 sm:$0xff] %v1232_v60  ;;  %v1227_v27 = vsel %vm426_vm5, %v1223_v24, 0.0  ;;  %v1228_v20 = vsel %vm426_vm5, %v1224_v3, 0.0  ;;  %v1298_v60 = vadd.f32 %v1297_v5, %v1296_v61 }
 0x2da   :  { %v1229_v59 = vadd.f32 %v1228_v20, %v1227_v27 }
 0x2dc   :  { %1230 = vadd.xlane.f32.xlu0 %v1229_v59 }
 0x2e0   :  { %v1235_v22 = vld.sshfl [vmem:[#allocation1] sm:$0xff pattern:$0x75316420]  ;;  %v1236_v36 = vld.sshfl [vmem:[#allocation1 + $0x8] sm:$0xff pattern:$0x75316420] }
 0x2e1   :  { %1246 = vst [vmem:[#allocation1] ss:$2 sm:$0xff] %v1244_v55  ;;  %v1239_v45 = vsel %vm426_vm5, %v1235_v22, 0.0  ;;  %v1240_v46 = vsel %vm426_vm5, %v1236_v36, 0.0  ;;  %v1310_v55 = vmul.f32 %v8038_v37, %v8038_v37  ;;  %v1311_v22 = vmul.f32 %v1206_v13, %v1206_v13 }
 0x2e2   :  { %v1241_v12 = vadd.f32 %v1240_v46, %v1239_v45 }
 0x2e3   :  { %v1312_v36 = vadd.f32 %v1311_v22, %v1310_v55 }
 0x2e8   :  { %v1247_v16 = vld.sshfl [vmem:[#allocation1] sm:$0xff pattern:$0x75316420]  ;;  %v1248_v38 = vld.sshfl [vmem:[#allocation1 + $0x8] sm:$0xff pattern:$0x75316420] }
 0x2e9   :  { %1259 = vst [vmem:[#allocation1] ss:$2 sm:$0xff] %v1257_v26  ;;  %v1251_v40 = vsel %vm426_vm5, %v1247_v16, 0.0  ;;  %v1252_v41 = vsel %vm426_vm5, %v1248_v38, 0.0 }
 0x2ea   :  { %v1253_v39 = vadd.f32 %v1252_v41, %v1251_v40 }
 0x2ec   :  { %1254 = vadd.xlane.f32.xlu1 %v1253_v39 }
 0x2f0   :  { %v1260_v52 = vld.sshfl [vmem:[#allocation1] sm:$0xff pattern:$0x75316420]  ;;  %v1261_v8 = vld.sshfl [vmem:[#allocation1 + $0x8] sm:$0xff pattern:$0x75316420] }
 0x2f1   :  { %1271 = vst [vmem:[#allocation1] ss:$2 sm:$0xff] %v1269_v32  ;;  %v1264_v47 = vsel %vm426_vm5, %v1260_v52, 0.0  ;;  %v1265_v4 = vsel %vm426_vm5, %v1261_v8, 0.0 }
 0x2f2   :  { %v1266_v43 = vadd.f32 %v1265_v4, %v1264_v47  ;;  %v1337_v47 = vmul.f32 %v8063_v54, %v8046_v28 }
 0x2f4   :  { %1267 = vadd.xlane.f32.xlu2 %v1266_v43 }
 0x2f8   :  { %v1272_v48 = vld.sshfl [vmem:[#allocation1] sm:$0xff pattern:$0x75316420]  ;;  %v1273_v31 = vld.sshfl [vmem:[#allocation1 + $0x8] sm:$0xff pattern:$0x75316420] }
 0x2f9   :  { %1285 = vst [vmem:[#allocation1] ss:$2 sm:$0xff] %v1283_v51  ;;  %v1276_v26 = vsel %vm426_vm5, %v1272_v48, 0.0  ;;  %v1277_v33 = vsel %vm426_vm5, %v1273_v31, 0.0 }
 0x2fa   :  { %v1278_v39 = vadd.f32 %v1277_v33, %v1276_v26 }
 0x2fc   :  { %1242 = vadd.xlane.f32.xlu2 %v1241_v12 }
 0x300   :  { %v1286_v24 = vld.sshfl [vmem:[#allocation1] sm:$0xff pattern:$0x75316420]  ;;  %v1287_v3 = vld.sshfl [vmem:[#allocation1 + $0x8] sm:$0xff pattern:$0x75316420] }
 0x301   :  { %1300 = vst [vmem:[#allocation1] ss:$2 sm:$0xff] %v1298_v60  ;;  %v1290_v27 = vsel %vm426_vm5, %v1286_v24, 0.0  ;;  %v1291_v20 = vsel %vm426_vm5, %v1287_v3, 0.0 }
 0x302   :  { %v1292_v59 = vadd.f32 %v1291_v20, %v1290_v27 }
 0x304   :  { %1293 = vadd.xlane.f32.xlu1 %v1292_v59 }
 0x308   :  { %v1301_v25 = vld.sshfl [vmem:[#allocation1] sm:$0xff pattern:$0x75316420]  ;;  %v1302_v16 = vld.sshfl [vmem:[#allocation1 + $0x8] sm:$0xff pattern:$0x75316420] }
 0x309   :  { %1314 = vst [vmem:[#allocation1] ss:$2 sm:$0xff] %v1312_v36  ;;  %v1305_v38 = vsel %vm426_vm5, %v1301_v25, 0.0  ;;  %v1306_v40 = vsel %vm426_vm5, %v1302_v16, 0.0 }
 0x30a   :  { %v1307_v41 = vadd.f32 %v1306_v40, %v1305_v38 }
 0x30c   :  { %1308 = vadd.xlane.f32.xlu0 %v1307_v41  ;;  %1279 = vadd.xlane.f32.xlu1 %v1278_v39 }
 0x310   :  { %v1315_v32 = vld.sshfl [vmem:[#allocation1] sm:$0xff pattern:$0x75316420]  ;;  %v1316_v37 = vld.sshfl [vmem:[#allocation1 + $0x8] sm:$0xff pattern:$0x75316420] }
 0x311   :  { %1327 = vst [vmem:[#allocation1] ss:$2 sm:$0xff] %v8026_v63  ;;  %v1319_v13 = vsel %vm426_vm5, %v1315_v32, 0.0  ;;  %v1320_v52 = vsel %vm426_vm5, %v1316_v37, 0.0 }
 0x312   :  { %v1321_v8 = vadd.f32 %v1320_v52, %v1319_v13 }
 0x314   :  { %1322 = vadd.xlane.f32.xlu2 %v1321_v8 }
 0x318   :  { %v1328_v4 = vld.sshfl [vmem:[#allocation1] sm:$0xff pattern:$0x75316420]  ;;  %v1329_v43 = vld.sshfl [vmem:[#allocation1 + $0x8] sm:$0xff pattern:$0x75316420] }
 0x319   :  { %1339 = vst [vmem:[#allocation1] ss:$2 sm:$0xff] %v1337_v47  ;;  %v1332_v56 = vsel %vm426_vm5, %v1328_v4, 0.0  ;;  %v1333_v44 = vsel %vm426_vm5, %v1329_v43, 0.0 }
 0x31a   :  { %v1334_v51 = vadd.f32 %v1333_v44, %v1332_v56 }
 0x31c   :  { %1335 = vadd.xlane.f32.xlu1 %v1334_v51 }
 0x320   :  { %v1340_v45 = vld.sshfl [vmem:[#allocation1] sm:$0xff pattern:$0x75316420]  ;;  %v1341_v63 = vld.sshfl [vmem:[#allocation1 + $0x8] sm:$0xff pattern:$0x75316420] }
 0x321   :  { %1353 = vst [vmem:[#allocation1] ss:$2 sm:$0xff] %v8054_v57  ;;  %v1344_v46 = vsel %vm426_vm5, %v1340_v45, 0.0  ;;  %v1345_v48 = vsel %vm426_vm5, %v1341_v63, 0.0 }
 0x322   :  { %v1346_v31 = vadd.f32 %v1345_v48, %v1344_v46 }
 0x324   :  { %1347 = vadd.xlane.f32.xlu0 %v1346_v31 }
 0x328   :  { %v1354_v28 = vld.sshfl [vmem:[#allocation1] sm:$0xff pattern:$0x75316420]  ;;  %v1355_v54 = vld.sshfl [vmem:[#allocation1 + $0x8] sm:$0xff pattern:$0x75316420] }
 0x329   :  { %1367 = vst [vmem:[#allocation1] ss:$2 sm:$0xff] %v8057_v34  ;;  %v1358_v12 = vsel %vm426_vm5, %v1354_v28, 0.0  ;;  %v1359_v61 = vsel %vm426_vm5, %v1355_v54, 0.0 }
 0x32a   :  { %v1360_v5 = vadd.f32 %v1359_v61, %v1358_v12 }
 0x32c   :  { %1361 = vadd.xlane.f32.xlu2 %v1360_v5 }
 0x330   :  { %v1368_v60 = vld.sshfl [vmem:[#allocation1] sm:$0xff pattern:$0x75316420]  ;;  %v1369_v24 = vld.sshfl [vmem:[#allocation1 + $0x8] sm:$0xff pattern:$0x75316420] }
 0x331   :  { %1798 = vst [vmem:[#allocation1] ss:$2 sm:$0xff] %v7723_v42  ;;  %v1372_v57 = vsel %vm426_vm5, %v1368_v60, 0.0  ;;  %v1373_v3 = vsel %vm426_vm5, %v1369_v24, 0.0 }
 0x332   :  { %v1374_v27 = vadd.f32 %v1373_v3, %v1372_v57 }
 0x334   :  { %1375 = vadd.xlane.f32.xlu1 %v1374_v27 }
 0x338   :  { %v8103_v20 = vld.sshfl [vmem:[#allocation1] sm:$0xff pattern:$0x75316420]  ;;  %v8105_v59 = vld.sshfl [vmem:[#allocation1 + $0x8] sm:$0xff pattern:$0x75316420] }
 0x339   :  { %1810 = vst [vmem:[#allocation1] ss:$2 sm:$0xff] %v7729_v0 }
 0x340   :  { %v8108_v34 = vld.sshfl [vmem:[#allocation1] sm:$0xff pattern:$0x75316420]  ;;  %v8110_v55 = vld.sshfl [vmem:[#allocation1 + $0x8] sm:$0xff pattern:$0x75316420] }
 0x341   :  { %1842 = vst [vmem:[#allocation1] ss:$2 sm:$0xff] %v7723_v42 }
 0x347   :  { %v1218_v22 = vpop.xlane.xlu2 %1217 }
 0x348   :  { %v1219_v36 = vadd.f32 1e-05, %v1218_v22 }
 0x34a   :  { %7457 = vrcp.f32 %v1219_v36  ;;  %v1388_v37 = vand.u32 2147483648, %v1219_v36  ;;  %vm1382_vm14 = vweird.f32 %v1219_v36  ;;  %v1386_v52 = vand.u32 2147483647, %v1219_v36 }
 0x34c   :  { %v1389_v56 = vor.u32 1.1754944e-38, %v1388_v37  ;;  %vm1387_vm2 = vcmp.eq.f32.partialorder %v1386_v52, 8.507059e+37 }
 0x34f   :  { %v8115_v46 = vpop.xlane.xlu0 %1230 }
 0x350   :  { %v7458_v26 = vpop.eup %7457 }
 0x351   :  { %v1378_v33 = vmul.f32 %v7458_v26, %v1219_v36  ;;  %vm1383_vm13 = vweird.f32 %v7458_v26 }
 0x352   :  { %vm1384_vm15 = vmor %vm1382_vm14, %vm1383_vm13 }
 0x353   :  { %v1379_v38 = vsub.f32 1.0, %v1378_v33 }
 0x355   :  { %v1380_v40 = vmul.f32 %v7458_v26, %v1379_v38 }
 0x357   :  { %v1381_v32 = vadd.f32 %v7458_v26, %v1380_v40 }
 0x359   :  { %v1385_v4 = vsel %vm1384_vm15, %v7458_v26, %v1381_v32 }
 0x35a   :  { %v8113_v51 = vsel %vm1387_vm2, %v1389_v56, %v1385_v4 }
 0x35b   :  { %v1392_v31 = vmul.f32 %v8113_v51, %v8115_v46 }
 0x35d   :  { %v1394_v61 = vmul.f32 %v1392_v31, %v8115_v46 }
 0x35f   :  { %v1255_v25 = vpop.xlane.xlu1 %1254 }
 0x360   :  { %v1256_v16 = vadd.f32 1e-05, %v1255_v25 }
 0x362   :  { %7459 = vrcp.f32 %v1256_v16  ;;  %v1415_v47 = vand.u32 2147483648, %v1256_v16  ;;  %v1413_v43 = vand.u32 2147483647, %v1256_v16  ;;  %vm1409_vm1 = vweird.f32 %v1256_v16 }
 0x364   :  { %v1416_v63 = vor.u32 1.1754944e-38, %v1415_v47  ;;  %vm1414_vm4 = vcmp.eq.f32.partialorder %v1413_v43, 8.507059e+37 }
 0x367   :  { %v8121_v28 = vpop.xlane.xlu2 %1267 }
 0x368   :  { %v7460_v41 = vpop.eup %7459 }
 0x369   :  { %v1405_v39 = vmul.f32 %v7460_v41, %v1256_v16  ;;  %vm1410_vm0 = vweird.f32 %v7460_v41 }
 0x36a   :  { %vm1411_vm3 = vmor %vm1409_vm1, %vm1410_vm0 }
 0x36b   :  { %v1406_v13 = vsub.f32 1.0, %v1405_v39 }
 0x36d   :  { %v1407_v8 = vmul.f32 %v7460_v41, %v1406_v13 }
 0x36f   :  { %v1408_v44 = vadd.f32 %v7460_v41, %v1407_v8  ;;  %v8127_v3 = vpop.xlane.xlu2 %1242 }
 0x370   :  { %v1396_v33 = vmul.f32 %v1392_v31, %v8127_v3  ;;  %v1393_v16 = vmul.f32 %v8113_v51, %v8127_v3 }
 0x371   :  { %v1412_v45 = vsel %vm1411_vm3, %v7460_v41, %v1408_v44 }
 0x372   :  { %v8117_v48 = vsel %vm1414_vm4, %v1416_v63, %v1412_v45  ;;  %v1398_v8 = vmul.f32 %v1393_v16, %v8127_v3 }
 0x373   :  { %v1419_v54 = vmul.f32 %v8117_v48, %v8121_v28 }
 0x375   :  { %v1421_v60 = vmul.f32 %v1419_v54, %v8121_v28 }
 0x377   :  { %v1294_v12 = vpop.xlane.xlu1 %1293 }
 0x378   :  { %v1295_v5 = vadd.f32 1e-05, %v1294_v12 }
 0x37a   :  { %v1395_v24 = vsub.f32 %v1295_v5, %v1394_v61 }
 0x37c   :  { %v1422_v57 = vsub.f32 %v1395_v24, %v1421_v60 }
 0x37e   :  { %7461 = vrcp.f32 %v1422_v57  ;;  %v1440_v41 = vand.u32 2147483647, %v1422_v57  ;;  %v1442_v39 = vand.u32 2147483648, %v1422_v57  ;;  %vm1436_vm7 = vweird.f32 %v1422_v57 }
 0x37f   :  { %v8129_v36 = vpop.xlane.xlu1 %1279  ;;  %v1309_v26 = vpop.xlane.xlu0 %1308 }
 0x380   :  { %v1423_v40 = vmul.f32 %v1419_v54, %v8129_v36  ;;  %v1397_v37 = vsub.f32 %v1309_v26, %v1396_v33  ;;  %v1420_v47 = vmul.f32 %v8117_v48, %v8129_v36  ;;  %v1443_v4 = vor.u32 1.1754944e-38, %v1442_v39 }
 0x381   :  { %vm1441_vm9 = vcmp.eq.f32.partialorder %v1440_v41, 8.507059e+37 }
 0x382   :  { %v1424_v56 = vsub.f32 %v1397_v37, %v1423_v40  ;;  %v1425_v12 = vmul.f32 %v1420_v47, %v8129_v36 }
 0x384   :  { %v7462_v27 = vpop.eup %7461 }
 0x385   :  { %v1432_v22 = vmul.f32 %v7462_v27, %v1422_v57  ;;  %vm1437_vm6 = vweird.f32 %v7462_v27 }
 0x386   :  { %vm1438_vm8 = vmor %vm1436_vm7, %vm1437_vm6 }
 0x387   :  { %v1433_v25 = vsub.f32 1.0, %v1432_v22  ;;  %v1323_v38 = vpop.xlane.xlu2 %1322 }
 0x388   :  { %v1324_v13 = vadd.f32 1e-05, %v1323_v38 }
 0x389   :  { %v1434_v32 = vmul.f32 %v7462_v27, %v1433_v25 }
 0x38a   :  { %v1399_v44 = vsub.f32 %v1324_v13, %v1398_v8 }
 0x38b   :  { %v1435_v52 = vadd.f32 %v7462_v27, %v1434_v32 }
 0x38c   :  { %v1426_v5 = vsub.f32 %v1399_v44, %v1425_v12 }
 0x38d   :  { %v1439_v43 = vsel %vm1438_vm8, %v7462_v27, %v1435_v52 }
 0x38e   :  { %v1444_v45 = vsel %vm1441_vm9, %v1443_v4, %v1439_v43 }
 0x38f   :  { %v1446_v63 = vmul.f32 %v1444_v45, %v1424_v56  ;;  %v1336_v22 = vpop.xlane.xlu1 %1335 }
 0x390   :  { %v1400_v25 = vmul.f32 %v1392_v31, %v1336_v22  ;;  %v1402_v32 = vmul.f32 %v1393_v16, %v1336_v22 }
 0x391   :  { %v1447_v61 = vmul.f32 %v1446_v63, %v1424_v56 }
 0x393   :  { %v1448_v60 = vsub.f32 %v1426_v5, %v1447_v61 }
 0x395   :  { %7463 = vrcp.f32 %v1448_v60  ;;  %v1462_v52 = vand.u32 2147483648, %v1448_v60  ;;  %vm1456_vm11 = vweird.f32 %v1448_v60  ;;  %v1460_v43 = vand.u32 2147483647, %v1448_v60 }
 0x397   :  { %v1348_v38 = vpop.xlane.xlu0 %1347  ;;  %v1463_v5 = vor.u32 1.1754944e-38, %v1462_v52  ;;  %vm1461_vm13 = vcmp.eq.f32.partialorder %v1460_v43, 8.507059e+37 }
 0x398   :  { %v1427_v41 = vmul.f32 %v1419_v54, %v1348_v38  ;;  %v1429_v8 = vmul.f32 %v1420_v47, %v1348_v38 }
 0x39b   :  { %v7464_v24 = vpop.eup %7463 }
 0x39c   :  { %v1452_v57 = vmul.f32 %v7464_v24, %v1448_v60  ;;  %vm1457_vm10 = vweird.f32 %v7464_v24 }
 0x39d   :  { %vm1458_vm12 = vmor %vm1456_vm11, %vm1457_vm10 }
 0x39e   :  { %v1453_v26 = vsub.f32 1.0, %v1452_v57 }
 0x39f   :  { %v1362_v33 = vpop.xlane.xlu2 %1361 }
 0x3a0   :  { %v1401_v39 = vsub.f32 %v1362_v33, %v1400_v25  ;;  %v1454_v27 = vmul.f32 %v7464_v24, %v1453_v26 }
 0x3a2   :  { %v1428_v40 = vsub.f32 %v1401_v39, %v1427_v41  ;;  %v1455_v37 = vadd.f32 %v7464_v24, %v1454_v27 }
 0x3a4   :  { %v1449_v44 = vmul.f32 %v1446_v63, %v1428_v40  ;;  %v1459_v61 = vsel %vm1458_vm12, %v7464_v24, %v1455_v37 }
 0x3a5   :  { %v1464_v57 = vsel %vm1461_vm13, %v1463_v5, %v1459_v61 }
 0x3a7   :  { %v1376_v13 = vpop.xlane.xlu1 %1375 }
 0x3a8   :  { %v1403_v4 = vsub.f32 %v1376_v13, %v1402_v32 }
 0x3aa   :  { %v1430_v12 = vsub.f32 %v1403_v4, %v1429_v8 }
 0x3ac   :  { %v1450_v31 = vsub.f32 %v1430_v12, %v1449_v44 }
 0x3ae   :  { %v1466_v26 = vmul.f32 %v1464_v57, %v1450_v31 }
 0x3b0   :  { %v8140_v54 = vsub.f32 %v7907_v18, %v1466_v26  ;;  %v1467_v16 = vmul.f32 %v1466_v26, %v1424_v56  ;;  %v1477_v56 = vmul.f32 %v1466_v26, %v8127_v3 }
 0x3b2   :  { %v1487_v33 = vand.u32 2139095040, %v8140_v54  ;;  %v1468_v25 = vsub.f32 %v1428_v40, %v1467_v16  ;;  %v1484_v24 = vand.u32 2147483647, %v8140_v54  ;;  %v1472_v40 = vmul.f32 %v1466_v26, %v8129_v36 }
 0x3b3   :  { %vm1486_vm11 = vcmp.lt.s32.totalorder %v8140_v54, 0 }
 0x3b4   :  { %v1488_v47 = vshrl.u32 %v1487_v33, 23  ;;  %v1469_v39 = vmul.f32 %v1468_v25, %v1444_v45  ;;  %vm1485_vm12 = vcmp.le.f32.partialorder %v1484_v24, 0.7853982 }
 0x3b6   :  { %v7336_v27 = vadd.s32 4294967169, %v1488_v47  ;;  %v8144_v60 = vsub.f32 %v7911_v7, %v1469_v39  ;;  %v1475_v63 = vmul.f32 %v1469_v39, %v8115_v46  ;;  %v1470_v41 = vmul.f32 %v1469_v39, %v8121_v28 }
 0x3b7   :  { %v1491_v7 = vand.u32 8388607, %v1484_v24 }
 0x3b8   :  { %1860 = vperm.xlu1 %7406, %v8144_v60   ;;  %v1476_v18 = vsub.f32 %v1336_v22, %v1475_v63  ;;  %v1494_v32 = vadd.s32 1, %v7336_v27  ;;  %v1471_v37 = vsub.f32 %v1348_v38, %v1470_v41 }
 0x3b9   :  { %v1492_v3 = vor.u32 8388608, %v1491_v7 }
 0x3ba   :  { %v1478_v45 = vsub.f32 %v1476_v18, %v1477_v56  ;;  %vm1495_vm14 = vcmp.gt.s32.totalorder %v1494_v32, 0  ;;  %v8154_v46 = vsub.f32 %v1471_v37, %v1472_v40 }
 0x3bb   :  { %v1496_v13 = vsel %vm1495_vm14, %v1494_v32, 0  ;;  %v8182_v47 = vshll.u32 %v1492_v3, 8 }
 0x3bc   :  { %v1479_v52 = vmul.f32 %v1478_v45, %v8113_v51  ;;  %v1498_v28 = vand.u32 31, %v1496_v13  ;;  %v8162_v38 = vshrl.u32 %v1496_v13, 5 }
 0x3bd   :  { %v1533_v40 = vand.u32 65535, %v8182_v47  ;;  %v1534_v45 = vshrl.u32 %v8182_v47, 16 }
 0x3be   :  { %v8158_v8 = vsub.f32 %v7984_v53, %v1479_v52  ;;  %v8160_v22 = vsub.s32 32, %v1498_v28  ;;  %v1501_v36 = vshll.u32 %v7613_v15, %v1498_v28  ;;  %v1504_v4 = vshll.u32 %v7614_v17, %v1498_v28 }
 0x3bf   :  { %v1507_v53 = vshll.u32 %v7615_v19, %v1498_v28  ;;  %v1510_v12 = vshll.u32 %v7616_v21, %v1498_v28  ;;  %v1513_v5 = vshll.u32 %v7617_v23, %v1498_v28  ;;  %vm1516_vm15 = vcmp.lt.s32.totalorder %v8162_v38, 1 }
 0x3c0   :  { %7407 = vset.pattern.permute.xlu1 %v7612_v6  ;;  %v1502_v43 = vshrl.u32 %v7614_v17, %v8160_v22  ;;  %v1505_v51 = vshrl.u32 %v7615_v19, %v8160_v22  ;;  %v1508_v44 = vshrl.u32 %v7616_v21, %v8160_v22  ;;  %v1511_v61 = vshrl.u32 %v7617_v23, %v8160_v22 }
 0x3c1   :  { %1821 = vperm.xlu1 %7407, %v8158_v8   ;;  %v1514_v31 = vshrl.u32 %v7618_v29, %v8160_v22  ;;  %vm1519_vm0 = vcmp.lt.s32.totalorder %v8162_v38, 4  ;;  %vm1518_vm1 = vcmp.lt.s32.totalorder %v8162_v38, 3  ;;  %vm1517_vm2 = vcmp.lt.s32.totalorder %v8162_v38, 2 }
 0x3c2   :  { %v1503_v57 = vor.u32 %v1502_v43, %v1501_v36  ;;  %v1506_v26 = vor.u32 %v1505_v51, %v1504_v4  ;;  %v1509_v16 = vor.u32 %v1508_v44, %v1507_v53  ;;  %v1512_v33 = vor.u32 %v1511_v61, %v1510_v12 }
 0x3c3   :  { %v1515_v25 = vor.u32 %v1514_v31, %v1513_v5 }
 0x3c4   :  { %v1524_v39 = vsel %vm1516_vm15, %v1503_v57, %v1506_v26  ;;  %v1528_v27 = vsel %vm1516_vm15, %v1506_v26, %v1509_v16  ;;  %v1525_v63 = vsel %vm1519_vm0, %v1512_v33, 920167782 }
 0x3c5   :  { %v1529_v41 = vsel %vm1519_vm0, %v1515_v25, 1326507024  ;;  %v1526_v18 = vsel %vm1518_vm1, %v1509_v16, %v1525_v63 }
 0x3c6   :  { %v1530_v56 = vsel %vm1518_vm1, %v1512_v33, %v1529_v41  ;;  %v1527_v32 = vsel %vm1517_vm2, %v1524_v39, %v1526_v18  ;;  %v1521_v18 = vsel %vm1519_vm0, %v1509_v16, 2102212464 }
 0x3c7   :  { %v1531_v37 = vsel %vm1517_vm2, %v1528_v27, %v1530_v56  ;;  %v1557_v52 = vand.u32 65535, %v1527_v32  ;;  %v1558_v28 = vshrl.u32 %v1527_v32, 16 }
 0x3c8   :  { %v1535_v7 = vand.u32 65535, %v1531_v37  ;;  %v1536_v13 = vshrl.u32 %v1531_v37, 16  ;;  %v1500_v37 = vshrl.u32 %v7613_v15, %v8160_v22 }
 0x3c9   :  { %7410 = vset.pattern.permute.xlu1 %v7610_v1  ;;  %v1560_v4 = vmul.u32 %v1558_v28, %v1533_v40  ;;  %v1561_v43 = vmul.u32 %v1557_v52, %v1534_v45  ;;  %v1559_v12 = vmul.u32 %v1557_v52, %v1533_v40  ;;  %v1562_v33 = vmul.u32 %v1558_v28, %v1534_v45 }
 0x3ca   :  { %v1538_v3 = vmul.u32 %v1536_v13, %v1533_v40  ;;  %v1539_v36 = vmul.u32 %v1535_v7, %v1534_v45  ;;  %v1537_v51 = vmul.u32 %v1535_v7, %v1533_v40  ;;  %v1540_v44 = vmul.u32 %v1536_v13, %v1534_v45 }
 0x3cb   :  { %v1563_v61 = vshll.u32 %v1560_v4, 16  ;;  %v1565_v39 = vshll.u32 %v1561_v43, 16  ;;  %v1564_v13 = vshrl.u32 %v1560_v4, 16  ;;  %v1520_v28 = vsel %vm1516_vm15, %v1500_v37, %v1503_v57 }
 0x3cc   :  { %v1541_v53 = vshll.u32 %v1538_v3, 16  ;;  %v1543_v5 = vshll.u32 %v1539_v36, 16  ;;  %v1542_v40 = vshrl.u32 %v1538_v3, 16  ;;  %v1544_v16 = vshrl.u32 %v1539_v36, 16 }
 0x3cd   :  { %vm1567_vm4 = vc.u32 %v1559_v12, %v1563_v61  ;;  %v1569_v27 = vadd.s32 %v1563_v61, %v1559_v12 }
 0x3ce   :  { %vm1545_vm3 = vc.u32 %v1537_v51, %v1541_v53  ;;  %v1547_v31 = vadd.s32 %v1541_v53, %v1537_v51  ;;  %v1568_v41 = vsel %vm1567_vm4, 1, %v7612_v6  ;;  %v1522_v51 = vsel %vm1518_vm1, %v1506_v26, %v1521_v18 }
 0x3cf   :  { %v1546_v25 = vsel %vm1545_vm3, 1, %v7612_v6  ;;  %v1570_v32 = vadd.s32 %v1568_v41, %v1562_v33  ;;  %vm1571_vm7 = vc.u32 %v1569_v27, %v1565_v39  ;;  %v1523_v22 = vsel %vm1517_vm2, %v1520_v28, %v1522_v51 }
 0x3d0   :  { %v1548_v63 = vadd.s32 %v1546_v25, %v1540_v44  ;;  %vm1549_vm6 = vc.u32 %v1547_v31, %v1543_v5  ;;  %v1572_v7 = vsel %vm1571_vm7, 1, %v7612_v6  ;;  %v1566_v44 = vshrl.u32 %v1561_v43, 16 }
 0x3d1   :  { %v1550_v56 = vsel %vm1549_vm6, 1, %v7612_v6  ;;  %v1574_v52 = vadd.s32 %v1572_v7, %v1570_v32  ;;  %v1573_v5 = vadd.s32 %v1569_v27, %v1565_v39  ;;  %v1577_v4 = vmul.u32 %v8182_v47, %v1523_v22 }
 0x3d2   :  { %v1552_v45 = vadd.s32 %v1550_v56, %v1548_v63  ;;  %vm1627_vm3 = vweird.f32 %v8140_v54 }
 0x3d3   :  { %v1575_v12 = vadd.s32 %v1574_v52, %v1564_v13 }
 0x3d4   :  { %v1553_v53 = vadd.s32 %v1552_v45, %v1542_v40 }
 0x3d5   :  { %v1576_v3 = vadd.s32 %v1575_v12, %v1566_v44 }
 0x3d6   :  { %v1554_v61 = vadd.s32 %v1553_v53, %v1544_v16 }
 0x3d7   :  { %v1580_v31 = vadd.s32 1, %v1576_v3 }
 0x3d8   :  { %vm1579_vm8 = vc.u32 %v1554_v61, %v1573_v5  ;;  %v1578_v38 = vadd.s32 %v1573_v5, %v1554_v61 }
 0x3d9   :  { %v1581_v33 = vsel %vm1579_vm8, %v1580_v31, %v1576_v3 }
 0x3da   :  { %v1582_v25 = vadd.s32 %v1581_v33, %v1577_v4 }
 0x3dc   :  { %v1583_v57 = vadd.s32 536870912, %v1582_v25 }
 0x3de   :  { %v1584_v63 = vshrl.u32 %v1583_v57, 30 }
 0x3e0   :  { %v1585_v41 = vshll.u32 %v1584_v63, 30  ;;  %v1608_v44 = vsub.s32 4, %v1584_v63 }
 0x3e2   :  { %v1586_v26 = vsub.s32 %v1582_v25, %v1585_v41  ;;  %v1609_v3 = vsel %vm1486_vm11, %v1608_v44, %v1584_v63  ;;  %v1474_v44 = vmul.f32 %v8154_v46, %v8117_v48 }
 0x3e3   :  { %v1611_v33 = vsel %vm1485_vm12, 0, %v1609_v3 }
 0x3e4   :  { %vm1587_vm9 = vcmp.lt.s32.totalorder %v1586_v26, 0  ;;  %v1588_v36 = vsub.s32 0, %v1586_v26 }
 0x3e6   :  { %v1589_v43 = vsel %vm1587_vm9, %v1588_v36, %v1586_v26  ;;  %v1782_v36 = vadd.s32 3, %v1611_v33 }
 0x3e7   :  { %v1590_v18 = vclz %v1589_v43 }
 0x3e9   :  { %v7337_v56 = vadd.s32 4294967294, %v1590_v18 }
 0x3eb   :  { %vm7338_vm10 = vcmp.lt.s32.totalorder %v7337_v56, 0 }
 0x3ec   :  { %v1593_v39 = vsel %vm7338_vm10, 0, %v7337_v56 }
 0x3ed   :  { %v1594_v27 = vsub.s32 32, %v1593_v39  ;;  %v1598_v32 = vsub.s32 4294967266, %v1593_v39  ;;  %v1595_v37 = vshll.u32 %v1586_v26, %v1593_v39  ;;  %v1628_v39 = vand.u32 3, %v1611_v33 }
 0x3ef   :  { %v1596_v40 = vshrl.u32 %v1578_v38, %v1594_v27  ;;  %v1599_v45 = vadd.s32 127, %v1598_v32  ;;  %v1783_v38 = vand.u32 3, %v1782_v36  ;;  %vm1629_vm13 = vcmp.lt.s32.totalorder %v1628_v39, 2 }
 0x3f0   :  { %vm1630_vm14 = vcmp.eq.s32.totalorder %v1628_v39, 0  ;;  %vm1633_vm15 = vcmp.eq.s32.totalorder %v1628_v39, 2 }
 0x3f1   :  { %v1597_v47 = vor.u32 %v1596_v40, %v1595_v37  ;;  %v1600_v7 = vshll.u32 %v1599_v45, 23  ;;  %vm1784_vm0 = vcmp.lt.s32.totalorder %v1783_v38, 2  ;;  %vm1785_vm1 = vcmp.eq.s32.totalorder %v1783_v38, 0 }
 0x3f2   :  { %vm1788_vm2 = vcmp.eq.s32.totalorder %v1783_v38, 2 }
 0x3f3   :  { %v1601_v13 = vor.u32 4788187, %v1600_v7  ;;  %v1604_v28 = vcvt.s32.f32 %v1597_v47 }
 0x3f5   :  { %v1602_v52 = vand.u32 2147483647, %v1601_v13 }
 0x3f7   :  { %v1605_v51 = vmul.f32 %v1604_v28, %v1602_v52 }
 0x3f9   :  { %v1606_v16 = vxor.u32 2147483648, %v1605_v51 }
 0x3fb   :  { %v1607_v53 = vsel %vm1486_vm11, %v1606_v16, %v1605_v51  ;;  %v1843_v51 = vld.sshfl [vmem:[#allocation1] sm:$0xff pattern:$0x75316420] }
 0x3fc   :  { %v1610_v12 = vsel %vm1485_vm12, %v8140_v54, %v1607_v53  ;;  %v1844_v53 = vld.sshfl [vmem:[#allocation1 + $0x8] sm:$0xff pattern:$0x75316420] }
 0x3fd   :  { %v1612_v61 = vmul.f32 %v1610_v12, %v1610_v12  ;;  %1849 = vst [vmem:[#allocation1] ss:$2 sm:$0xff] %v7729_v0 }
 0x3ff   :  { %v1613_v5 = vmul.f32 -0.001358992, %v1612_v61  ;;  %v1620_v22 = vmul.f32 -0.00019511016, %v1612_v61 }
 0x401   :  { %v1614_v31 = vadd.f32 0.041655596, %v1613_v5  ;;  %v1621_v4 = vadd.f32 0.008332121, %v1620_v22 }
 0x403   :  { %v1615_v25 = vmul.f32 %v1614_v31, %v1612_v61  ;;  %v1622_v57 = vmul.f32 %v1621_v4, %v1612_v61 }
 0x404   :  { %v1851_v5 = vld.sshfl [vmem:[#allocation1 + $0x8] sm:$0xff pattern:$0x75316420] }
 0x405   :  { %v1616_v41 = vadd.f32 -0.4999988, %v1615_v25  ;;  %v1623_v26 = vadd.f32 -0.16666654, %v1622_v57 }
 0x407   :  { %v1617_v43 = vmul.f32 %v1616_v41, %v1612_v61  ;;  %v1624_v18 = vmul.f32 %v1623_v26, %v1612_v61  ;;  %v1850_v61 = vld.sshfl [vmem:[#allocation1] sm:$0xff pattern:$0x75316420] }
 0x408   :  { %1873 = vst [vmem:[#allocation1] ss:$2 sm:$0xff] %v7737_v50 }
 0x409   :  { %v1618_v56 = vadd.f32 1.0, %v1617_v43  ;;  %v1625_v24 = vadd.f32 1.0, %v1624_v18 }
 0x40b   :  { %v1626_v27 = vmul.f32 %v1625_v24, %v1610_v12  ;;  %v1634_v32 = vxor.u32 2147483648, %v1618_v56  ;;  %v8230_v12 = vsub.f32 %v7991_v49, %v1474_v44 }
 0x40d   :  { %v1631_v37 = vxor.u32 2147483648, %v1626_v27  ;;  %v1635_v40 = vsel %vm1633_vm15, %v1634_v32, %v1626_v27  ;;  %v1790_v47 = vsel %vm1788_vm2, %v1634_v32, %v1626_v27 }
 0x40f   :  { %v1632_v63 = vsel %vm1630_vm14, %v1618_v56, %v1631_v37  ;;  %v1787_v45 = vsel %vm1785_vm1, %v1618_v56, %v1631_v37 }
 0x410   :  { %v1636_v7 = vsel %vm1629_vm13, %v1632_v63, %v1635_v40  ;;  %v1791_v13 = vsel %vm1784_vm0, %v1787_v45, %v1790_v47 }
 0x411   :  { %v1637_v52 = vsel %vm1627_vm3, nan, %v1636_v7  ;;  %v1792_v28 = vsel %vm1627_vm3, nan, %v1791_v13  ;;  %v1875_v13 = vld.sshfl [vmem:[#allocation1 + $0x8] sm:$0xff pattern:$0x75316420] }
 0x412   :  { %1795 = vperm.xlu0 %7404, %v1637_v52   ;;  %v1836_v16 = vsub.f32 0.0, %v1792_v28 }
 0x414   :  { %1839 = vperm.xlu2 %7405, %v1836_v16  }
 0x41c   :  { %1807 = vperm.xlu2 %7405, %v1792_v28  }
 0x424   :  { %7408 = vset.pattern.permute.xlu2 %v7619_v62 }
 0x425   :  { %1828 = vperm.xlu2 %7408, %v8230_v12  }
 0x42a   :  { %v1861_v31 = vpop.permute.xlu1 %1860 }
 0x42d   :  { %7409 = vset.pattern.permute.xlu2 %v7611_v2 }
 0x433   :  { %v1822_v37 = vpop.permute.xlu1 %1821 }
 0x46e   :  { %v1840_v22 = vpop.permute.xlu2 %1839 }
 0x46f   :  { %v1847_v33 = vmul.f32 %v1843_v51, %v1840_v22  ;;  %v1848_v25 = vmul.f32 %v1844_v53, %v1840_v22 }
 0x476   :  { %v1808_v3 = vpop.permute.xlu2 %1807 }
 0x477   :  { %v1816_v26 = vmul.f32 %v8110_v55, %v1808_v3  ;;  %v1815_v27 = vmul.f32 %v8108_v34, %v1808_v3  ;;  %v1874_v34 = vld.sshfl [vmem:[#allocation1] sm:$0xff pattern:$0x75316420] }
 0x47f   :  { %v1829_v36 = vpop.permute.xlu2 %1828 }
 0x480   :  { %v1833_v32 = vperm.slane %v1829_v36, %v7742_v9 }
 0x482   :  { %v1835_v40 = vadd.f32 %v8020_v11, %v1833_v32 }
 0x484   :  { %v1796_v4 = vpop.permute.xlu0 %1795 }
 0x485   :  { %v1854_v48 = vmul.f32 %v1850_v61, %v1796_v4  ;;  %v1855_v46 = vmul.f32 %v1851_v5, %v1796_v4  ;;  %v1804_v49 = vmul.f32 %v8105_v59, %v1796_v4  ;;  %v1803_v56 = vmul.f32 %v8103_v20, %v1796_v4 }
 0x486   :  { %v1926_v20 = vmul.f32 %v1835_v40, %v7759_v30 }
 0x487   :  { %v1856_v57 = vadd.f32 %v1854_v48, %v1847_v33  ;;  %v1857_v41 = vadd.f32 %v1855_v46, %v1848_v25  ;;  %v1818_v24 = vadd.f32 %v1816_v26, %v1804_v49  ;;  %v1817_v63 = vadd.f32 %v1815_v27, %v1803_v56 }
 0x489   :  { %v1863_v43 = vadd.f32 %v1861_v31, %v1856_v57  ;;  %v1864_v18 = vadd.f32 %v1861_v31, %v1857_v41  ;;  %v1825_v59 = vadd.f32 %v1822_v37, %v1818_v24  ;;  %v1824_v55 = vadd.f32 %v1822_v37, %v1817_v63 }
 0x48b   :  { %v1865_v39 = vmax.f32 %v1863_v43, 0.1  ;;  %v1866_v38 = vmax.f32 %v1864_v18, 0.1  ;;  %v1901_v45 = vrot.slane %v1825_v59, 4  ;;  %v1894_v51 = vsub.f32 %v1863_v43, %v1861_v31 }
 0x48c   :  { %v1895_v61 = vsub.f32 %v1864_v18, %v1861_v31  ;;  %v1896_v5 = vsub.f32 %v1822_v37, %v1824_v55  ;;  %v1897_v22 = vsub.f32 %v1822_v37, %v1825_v59 }
 0x48d   :  { %7465 = vrcp.f32 %v1865_v39  ;;  %v1902_v3 = vsel %vm426_vm5, %v1824_v55, %v1901_v45 }
 0x48e   :  { %7467 = vrcp.f32 %v1866_v38  ;;  %v1904_v56 = vmul.f32 %v1902_v3, %v7761_v35  ;;  %v1930_v39 = vrot.slane %v1897_v22, 4 }
 0x493   :  { %v7466_v47 = vpop.eup %7465 }
 0x494   :  { %v7468_v7 = vpop.eup %7467  ;;  %v1869_v52 = vmul.f32 %v7466_v47, %v7466_v47  ;;  %v1871_v28 = vmul.f32 %v7466_v47, %v1824_v55  ;;  %v1911_v24 = vmul.f32 %v7466_v47, %v1894_v51 }
 0x495   :  { %v1870_v16 = vmul.f32 %v7468_v7, %v7468_v7  ;;  %v1872_v53 = vmul.f32 %v7468_v7, %v1825_v59  ;;  %v1888_v44 = vrot.slane %v7468_v7, 4  ;;  %v1912_v41 = vmul.f32 %v7468_v7, %v1895_v61 }
 0x496   :  { %v1913_v11 = vmul.f32 %v1869_v52, %v1824_v55  ;;  %v1878_v46 = vsub.f32 %v1871_v28, %v1874_v34 }
 0x497   :  { %v1879_v4 = vsub.f32 %v1872_v53, %v1875_v13  ;;  %v1889_v33 = vsel %vm426_vm5, %v7466_v47, %v1888_v44  ;;  %v1907_v25 = vrot.slane %v1870_v16, 4  ;;  %v1914_v48 = vmul.f32 %v1870_v16, %v1825_v59 }
 0x498   :  { %v1891_v49 = vmul.f32 %v1889_v33, %v1835_v40  ;;  %v1898_v57 = vmul.f32 %v8010_v58, %v1889_v33  ;;  %v1915_v43 = vmul.f32 %v1913_v11, %v1896_v5 }
 0x499   :  { %v1882_v26 = vrot.slane %v1879_v4, 4  ;;  %v1908_v36 = vsel %vm426_vm5, %v1869_v52, %v1907_v25  ;;  %v1916_v31 = vmul.f32 %v1914_v48, %v1897_v22 }
 0x49a   :  { %v1892_v18 = vsub.f32 %v1891_v49, %v8034_v14  ;;  %v8250_v32 = vmul.f32 %v1926_v20, %v1908_v36  ;;  %v1934_v37 = vmul.f32 %v1898_v57, %v1898_v57  ;;  %v8256_v40 = vmul.f32 %v1908_v36, %v1904_v56 }
 0x49b   :  { %v1883_v38 = vsel %vm426_vm5, %v1878_v46, %v1882_v26  ;;  %v1918_v27 = vsub.f32 %v1912_v41, %v1916_v31  ;;  %v1917_v55 = vsub.f32 %v1911_v24, %v1915_v43  ;;  %v1931_v14 = vsel %vm426_vm5, %v1896_v5, %v1930_v39  ;;  %v8292_v41 = vld [vmem:[%s9867_s2 + $0x8] sm:$0xff] }
 0x49c   :  { %v1885_v63 = vmul.f32 %v8010_v58, %v1883_v38  ;;  %v8254_v59 = vmul.f32 %v8043_v10, %v1892_v18  ;;  %1936 = vst [vmem:[#allocation1] ss:$2 sm:$0xff] %v1934_v37  ;;  %v8263_v20 = vmul.f32 %v1931_v14, %v8250_v32  ;;  %v8269_v58 = vld [vmem:[%s9867_s2] sm:$0xff]  ;;  %v1947_v51 = vmul.f32 %v8256_v40, %v1898_v57 }
 0x49d   :  { %v1921_v45 = vrot.slane %v1918_v27, 4  ;;  %v8295_v26 = vmul.f32 %v8292_v41, %v1889_v33 }
 0x49e   :  { %v8259_v47 = vmul.f32 %v1898_v57, %v1885_v63  ;;  %v2076_v13 = vmul.f32 %v8256_v40, %v1885_v63  ;;  %v2077_v52 = vmul.f32 %v8250_v32, %v8254_v59  ;;  %v2091_v16 = vmul.f32 %v8263_v20, %v8254_v59 }
 0x49f   :  { %v1922_v7 = vsel %vm426_vm5, %v1917_v55, %v1921_v45  ;;  %v1984_v24 = vmul.f32 %v8250_v32, %v8295_v26 }
 0x4a0   :  { %v8272_v10 = vmul.f32 %v8269_v58, %v1922_v7  ;;  %v8276_v28 = vadd.f32 %v2077_v52, %v2076_v13  ;;  %v2008_v52 = vmul.f32 %v8256_v40, %v8256_v40 }
 0x4a2   :  { %v2090_v34 = vmul.f32 %v8272_v10, %v1885_v63  ;;  %v1959_v11 = vmul.f32 %v8272_v10, %v1898_v57  ;;  %v1971_v57 = vmul.f32 %v8295_v26, %v8295_v26  ;;  %v1996_v63 = vmul.f32 %v8263_v20, %v8295_v26 }
 0x4a3   :  { %v1937_v53 = vld.sshfl [vmem:[#allocation1] sm:$0xff pattern:$0x75316420]  ;;  %v1938_v44 = vld.sshfl [vmem:[#allocation1 + $0x8] sm:$0xff pattern:$0x75316420] }
 0x4a4   :  { %1949 = vst [vmem:[#allocation1] ss:$2 sm:$0xff] %v1947_v51  ;;  %v8282_v61 = vadd.f32 %v2091_v16, %v2090_v34  ;;  %v1941_v5 = vsel %vm426_vm5, %v1937_v53, 0.0  ;;  %v1942_v22 = vsel %vm426_vm5, %v1938_v44, 0.0  ;;  %v2009_v51 = vmul.f32 %v8250_v32, %v8250_v32 }
 0x4a5   :  { %v1943_v3 = vadd.f32 %v1942_v22, %v1941_v5 }
 0x4a6   :  { %v2010_v34 = vadd.f32 %v2009_v51, %v2008_v52 }
 0x4a7   :  { %1944 = vadd.xlane.f32.xlu1 %v1943_v3  ;;  %v2023_v3 = vmul.f32 %v8272_v10, %v8256_v40  ;;  %v2038_v40 = vmul.f32 %v8263_v20, %v8263_v20 }
 0x4ab   :  { %v1950_v4 = vld.sshfl [vmem:[#allocation1] sm:$0xff pattern:$0x75316420]  ;;  %v1951_v25 = vld.sshfl [vmem:[#allocation1 + $0x8] sm:$0xff pattern:$0x75316420] }
 0x4ac   :  { %1961 = vst [vmem:[#allocation1] ss:$2 sm:$0xff] %v1959_v11  ;;  %v1954_v48 = vsel %vm426_vm5, %v1950_v4, 0.0  ;;  %v1955_v46 = vsel %vm426_vm5, %v1951_v25, 0.0  ;;  %v2024_v11 = vmul.f32 %v8263_v20, %v8250_v32  ;;  %v2064_v20 = vmul.f32 %v8295_v26, %v8254_v59 }
 0x4ad   :  { %v1956_v49 = vadd.f32 %v1955_v46, %v1954_v48 }
 0x4ae   :  { %v2025_v4 = vadd.f32 %v2024_v11, %v2023_v3 }
 0x4af   :  { %1957 = vadd.xlane.f32.xlu2 %v1956_v49 }
 0x4b3   :  { %v1962_v36 = vld.sshfl [vmem:[#allocation1] sm:$0xff pattern:$0x75316420]  ;;  %v1963_v43 = vld.sshfl [vmem:[#allocation1 + $0x8] sm:$0xff pattern:$0x75316420] }
 0x4b4   :  { %1973 = vst [vmem:[#allocation1] ss:$2 sm:$0xff] %v1971_v57  ;;  %v1966_v31 = vsel %vm426_vm5, %v1962_v36, 0.0  ;;  %v1967_v18 = vsel %vm426_vm5, %v1963_v43, 0.0  ;;  %v2037_v36 = vmul.f32 %v8272_v10, %v8272_v10 }
 0x4b5   :  { %v1968_v56 = vadd.f32 %v1967_v18, %v1966_v31 }
 0x4b6   :  { %v2039_v43 = vadd.f32 %v2038_v40, %v2037_v36 }
 0x4b7   :  { %1969 = vadd.xlane.f32.xlu2 %v1968_v56 }
 0x4bb   :  { %v1974_v39 = vld.sshfl [vmem:[#allocation1] sm:$0xff pattern:$0x75316420]  ;;  %v1975_v38 = vld.sshfl [vmem:[#allocation1 + $0x8] sm:$0xff pattern:$0x75316420] }
 0x4bc   :  { %1986 = vst [vmem:[#allocation1] ss:$2 sm:$0xff] %v1984_v24  ;;  %v1978_v33 = vsel %vm426_vm5, %v1974_v39, 0.0  ;;  %v1979_v27 = vsel %vm426_vm5, %v1975_v38, 0.0 }
 0x4bd   :  { %v1980_v37 = vadd.f32 %v1979_v27, %v1978_v33 }
 0x4bf   :  { %1981 = vadd.xlane.f32.xlu0 %v1980_v37 }
 0x4c3   :  { %v1987_v55 = vld.sshfl [vmem:[#allocation1] sm:$0xff pattern:$0x75316420]  ;;  %v1988_v45 = vld.sshfl [vmem:[#allocation1 + $0x8] sm:$0xff pattern:$0x75316420] }
 0x4c4   :  { %1998 = vst [vmem:[#allocation1] ss:$2 sm:$0xff] %v1996_v63  ;;  %v1991_v14 = vsel %vm426_vm5, %v1987_v55, 0.0  ;;  %v1992_v7 = vsel %vm426_vm5, %v1988_v45, 0.0 }
 0x4c5   :  { %v1993_v13 = vadd.f32 %v1992_v7, %v1991_v14 }
 0x4c7   :  { %1994 = vadd.xlane.f32.xlu1 %v1993_v13 }
 0x4cb   :  { %v1999_v16 = vld.sshfl [vmem:[#allocation1] sm:$0xff pattern:$0x75316420]  ;;  %v2000_v53 = vld.sshfl [vmem:[#allocation1 + $0x8] sm:$0xff pattern:$0x75316420] }
 0x4cc   :  { %2012 = vst [vmem:[#allocation1] ss:$2 sm:$0xff] %v2010_v34  ;;  %v2003_v44 = vsel %vm426_vm5, %v1999_v16, 0.0  ;;  %v2004_v5 = vsel %vm426_vm5, %v2000_v53, 0.0 }
 0x4cd   :  { %v2005_v22 = vadd.f32 %v2004_v5, %v2003_v44 }
 0x4cf   :  { %2006 = vadd.xlane.f32.xlu1 %v2005_v22 }
 0x4d3   :  { %v2013_v25 = vld.sshfl [vmem:[#allocation1] sm:$0xff pattern:$0x75316420]  ;;  %v2014_v48 = vld.sshfl [vmem:[#allocation1 + $0x8] sm:$0xff pattern:$0x75316420] }
 0x4d4   :  { %v2017_v46 = vsel %vm426_vm5, %v2013_v25, 0.0  ;;  %v2018_v49 = vsel %vm426_vm5, %v2014_v48, 0.0  ;;  %2027 = vst [vmem:[#allocation1] ss:$2 sm:$0xff] %v2025_v4 }
 0x4d5   :  { %v2019_v57 = vadd.f32 %v2018_v49, %v2017_v46 }
 0x4d7   :  { %2020 = vadd.xlane.f32.xlu0 %v2019_v57 }
 0x4db   :  { %v2028_v31 = vld.sshfl [vmem:[#allocation1] sm:$0xff pattern:$0x75316420]  ;;  %v2029_v18 = vld.sshfl [vmem:[#allocation1 + $0x8] sm:$0xff pattern:$0x75316420] }
 0x4dc   :  { %v2032_v32 = vsel %vm426_vm5, %v2028_v31, 0.0  ;;  %v2033_v56 = vsel %vm426_vm5, %v2029_v18, 0.0  ;;  %2041 = vst [vmem:[#allocation1] ss:$2 sm:$0xff] %v2039_v43 }
 0x4dd   :  { %v2034_v24 = vadd.f32 %v2033_v56, %v2032_v32 }
 0x4df   :  { %2035 = vadd.xlane.f32.xlu0 %v2034_v24 }
 0x4e3   :  { %v2042_v39 = vld.sshfl [vmem:[#allocation1] sm:$0xff pattern:$0x75316420]  ;;  %v2043_v38 = vld.sshfl [vmem:[#allocation1 + $0x8] sm:$0xff pattern:$0x75316420] }
 0x4e4   :  { %v2046_v33 = vsel %vm426_vm5, %v2042_v39, 0.0  ;;  %v2047_v10 = vsel %vm426_vm5, %v2043_v38, 0.0  ;;  %2054 = vst [vmem:[#allocation1] ss:$2 sm:$0xff] %v8259_v47 }
 0x4e5   :  { %v2048_v27 = vadd.f32 %v2047_v10, %v2046_v33 }
 0x4e7   :  { %2049 = vadd.xlane.f32.xlu2 %v2048_v27 }
 0x4eb   :  { %v2055_v37 = vld.sshfl [vmem:[#allocation1] sm:$0xff pattern:$0x75316420]  ;;  %v2056_v63 = vld.sshfl [vmem:[#allocation1 + $0x8] sm:$0xff pattern:$0x75316420] }
 0x4ec   :  { %v2059_v55 = vsel %vm426_vm5, %v2055_v37, 0.0  ;;  %v2060_v45 = vsel %vm426_vm5, %v2056_v63, 0.0  ;;  %2066 = vst [vmem:[#allocation1] ss:$2 sm:$0xff] %v2064_v20 }
 0x4ed   :  { %v2061_v14 = vadd.f32 %v2060_v45, %v2059_v55 }
 0x4ef   :  { %2062 = vadd.xlane.f32.xlu1 %v2061_v14 }
 0x4f3   :  { %v2067_v7 = vld.sshfl [vmem:[#allocation1] sm:$0xff pattern:$0x75316420]  ;;  %v2068_v13 = vld.sshfl [vmem:[#allocation1 + $0x8] sm:$0xff pattern:$0x75316420] }
 0x4f4   :  { %v2071_v52 = vsel %vm426_vm5, %v2067_v7, 0.0  ;;  %v2072_v47 = vsel %vm426_vm5, %v2068_v13, 0.0  ;;  %2080 = vst [vmem:[#allocation1] ss:$2 sm:$0xff] %v8276_v28 }
 0x4f5   :  { %v2073_v51 = vadd.f32 %v2072_v47, %v2071_v52 }
 0x4f7   :  { %2074 = vadd.xlane.f32.xlu0 %v2073_v51 }
 0x4fb   :  { %v2081_v59 = vld.sshfl [vmem:[#allocation1] sm:$0xff pattern:$0x75316420]  ;;  %v2082_v26 = vld.sshfl [vmem:[#allocation1 + $0x8] sm:$0xff pattern:$0x75316420] }
 0x4fc   :  { %v2085_v34 = vsel %vm426_vm5, %v2081_v59, 0.0  ;;  %v2086_v16 = vsel %vm426_vm5, %v2082_v26, 0.0  ;;  %2094 = vst [vmem:[#allocation1] ss:$2 sm:$0xff] %v8282_v61 }
 0x4fd   :  { %v2087_v53 = vadd.f32 %v2086_v16, %v2085_v34 }
 0x4ff   :  { %2088 = vadd.xlane.f32.xlu2 %v2087_v53 }
 0x503   :  { %v2095_v44 = vld.sshfl [vmem:[#allocation1] sm:$0xff pattern:$0x75316420]  ;;  %v2096_v5 = vld.sshfl [vmem:[#allocation1 + $0x8] sm:$0xff pattern:$0x75316420] }
 0x504   :  { %v2099_v22 = vsel %vm426_vm5, %v2095_v44, 0.0  ;;  %v2100_v3 = vsel %vm426_vm5, %v2096_v5, 0.0  ;;  %2525 = vst [vmem:[#allocation1] ss:$2 sm:$0xff] %v7723_v42 }
 0x505   :  { %v2101_v28 = vadd.f32 %v2100_v3, %v2099_v22 }
 0x507   :  { %2102 = vadd.xlane.f32.xlu1 %v2101_v28 }
 0x51a   :  { %v1945_v11 = vpop.xlane.xlu1 %1944 }
 0x51b   :  { %v1946_v4 = vadd.f32 1e-05, %v1945_v11 }
 0x51d   :  { %7469 = vrcp.f32 %v1946_v4  ;;  %v2115_v31 = vand.u32 2147483648, %v1946_v4  ;;  %vm2109_vm6 = vweird.f32 %v1946_v4  ;;  %v2113_v32 = vand.u32 2147483647, %v1946_v4 }
 0x51f   :  { %v2116_v33 = vor.u32 1.1754944e-38, %v2115_v31  ;;  %vm2114_vm10 = vcmp.eq.f32.partialorder %v2113_v32, 8.507059e+37 }
 0x522   :  { %v8345_v63 = vpop.xlane.xlu2 %1957 }
 0x523   :  { %v7470_v25 = vpop.eup %7469 }
 0x524   :  { %v2105_v48 = vmul.f32 %v7470_v25, %v1946_v4  ;;  %vm2110_vm4 = vweird.f32 %v7470_v25 }
 0x525   :  { %vm2111_vm7 = vmor %vm2109_vm6, %vm2110_vm4 }
 0x526   :  { %v2106_v61 = vsub.f32 1.0, %v2105_v48 }
 0x528   :  { %v2107_v57 = vmul.f32 %v7470_v25, %v2106_v61 }
 0x52a   :  { %v2108_v43 = vadd.f32 %v7470_v25, %v2107_v57  ;;  %v8357_v34 = vpop.xlane.xlu2 %1969 }
 0x52c   :  { %v2112_v39 = vsel %vm2111_vm7, %v7470_v25, %v2108_v43 }
 0x52d   :  { %v8343_v27 = vsel %vm2114_vm10, %v2116_v33, %v2112_v39 }
 0x52e   :  { %v2119_v45 = vmul.f32 %v8343_v27, %v8345_v63  ;;  %v2120_v5 = vmul.f32 %v8343_v27, %v8357_v34 }
 0x530   :  { %v2121_v47 = vmul.f32 %v2119_v45, %v8345_v63  ;;  %v2123_v3 = vmul.f32 %v2119_v45, %v8357_v34  ;;  %v2125_v61 = vmul.f32 %v2120_v5, %v8357_v34 }
 0x532   :  { %v1982_v46 = vpop.xlane.xlu0 %1981 }
 0x533   :  { %v1983_v49 = vadd.f32 1e-05, %v1982_v46 }
 0x535   :  { %7471 = vrcp.f32 %v1983_v49  ;;  %v2142_v24 = vand.u32 2147483648, %v1983_v49  ;;  %v2140_v38 = vand.u32 2147483647, %v1983_v49  ;;  %vm2136_vm9 = vweird.f32 %v1983_v49 }
 0x537   :  { %v2143_v37 = vor.u32 1.1754944e-38, %v2142_v24  ;;  %vm2141_vm12 = vcmp.eq.f32.partialorder %v2140_v38, 8.507059e+37 }
 0x53a   :  { %v8351_v14 = vpop.xlane.xlu1 %1994 }
 0x53b   :  { %v7472_v36 = vpop.eup %7471 }
 0x53c   :  { %v2132_v40 = vmul.f32 %v7472_v36, %v1983_v49  ;;  %vm2137_vm8 = vweird.f32 %v7472_v36 }
 0x53d   :  { %vm2138_vm11 = vmor %vm2136_vm9, %vm2137_vm8 }
 0x53e   :  { %v2133_v18 = vsub.f32 1.0, %v2132_v40 }
 0x540   :  { %v2134_v56 = vmul.f32 %v7472_v36, %v2133_v18 }
 0x542   :  { %v2135_v10 = vadd.f32 %v7472_v36, %v2134_v56  ;;  %v2007_v49 = vpop.xlane.xlu1 %2006 }
 0x544   :  { %v2139_v20 = vsel %vm2138_vm11, %v7472_v36, %v2135_v10 }
 0x545   :  { %v8347_v55 = vsel %vm2141_vm12, %v2143_v37, %v2139_v20 }
 0x546   :  { %v2146_v7 = vmul.f32 %v8347_v55, %v8351_v14  ;;  %v2147_v36 = vmul.f32 %v8347_v55, %v2007_v49 }
 0x548   :  { %v2148_v51 = vmul.f32 %v2146_v7, %v8351_v14  ;;  %v2150_v57 = vmul.f32 %v2146_v7, %v2007_v49  ;;  %v2152_v24 = vmul.f32 %v2147_v36, %v2007_v49 }
 0x54a   :  { %v2021_v13 = vpop.xlane.xlu0 %2020 }
 0x54b   :  { %v2022_v52 = vadd.f32 1e-05, %v2021_v13 }
 0x54d   :  { %v2122_v59 = vsub.f32 %v2022_v52, %v2121_v47 }
 0x54f   :  { %v2149_v26 = vsub.f32 %v2122_v59, %v2148_v51 }
 0x551   :  { %7473 = vrcp.f32 %v2149_v26  ;;  %v2167_v11 = vand.u32 2147483647, %v2149_v26  ;;  %v2169_v4 = vand.u32 2147483648, %v2149_v26  ;;  %vm2163_vm14 = vweird.f32 %v2149_v26 }
 0x552   :  { %v2036_v44 = vpop.xlane.xlu0 %2035 }
 0x553   :  { %v2124_v25 = vsub.f32 %v2036_v44, %v2123_v3  ;;  %v2170_v43 = vor.u32 1.1754944e-38, %v2169_v4  ;;  %vm2168_vm0 = vcmp.eq.f32.partialorder %v2167_v11, 8.507059e+37 }
 0x555   :  { %v2151_v31 = vsub.f32 %v2124_v25, %v2150_v57 }
 0x557   :  { %v7474_v16 = vpop.eup %7473 }
 0x558   :  { %v2159_v53 = vmul.f32 %v7474_v16, %v2149_v26  ;;  %vm2164_vm13 = vweird.f32 %v7474_v16 }
 0x559   :  { %vm2165_vm15 = vmor %vm2163_vm14, %vm2164_vm13 }
 0x55a   :  { %v2160_v22 = vsub.f32 1.0, %v2159_v53  ;;  %v2050_v28 = vpop.xlane.xlu2 %2049 }
 0x55b   :  { %v2051_v48 = vadd.f32 1e-05, %v2050_v28 }
 0x55c   :  { %v2161_v46 = vmul.f32 %v7474_v16, %v2160_v22 }
 0x55d   :  { %v2126_v18 = vsub.f32 %v2051_v48, %v2125_v61 }
 0x55e   :  { %v2162_v40 = vadd.f32 %v7474_v16, %v2161_v46 }
 0x55f   :  { %v2153_v38 = vsub.f32 %v2126_v18, %v2152_v24 }
 0x560   :  { %v2166_v32 = vsel %vm2165_vm15, %v7474_v16, %v2162_v40 }
 0x561   :  { %v2171_v56 = vsel %vm2168_vm0, %v2170_v43, %v2166_v32 }
 0x562   :  { %v2173_v39 = vmul.f32 %v2171_v56, %v2151_v31  ;;  %v2063_v13 = vpop.xlane.xlu1 %2062 }
 0x563   :  { %v2127_v51 = vmul.f32 %v2119_v45, %v2063_v13  ;;  %v2129_v16 = vmul.f32 %v2120_v5, %v2063_v13 }
 0x564   :  { %v2174_v33 = vmul.f32 %v2173_v39, %v2151_v31 }
 0x566   :  { %v2175_v10 = vsub.f32 %v2153_v38, %v2174_v33 }
 0x568   :  { %7475 = vrcp.f32 %v2175_v10  ;;  %v2189_v11 = vand.u32 2147483648, %v2175_v10  ;;  %vm2183_vm2 = vweird.f32 %v2175_v10  ;;  %v2187_v48 = vand.u32 2147483647, %v2175_v10 }
 0x56a   :  { %v2075_v59 = vpop.xlane.xlu0 %2074  ;;  %v2190_v40 = vor.u32 1.1754944e-38, %v2189_v11  ;;  %vm2188_vm4 = vcmp.eq.f32.partialorder %v2187_v48, 8.507059e+37 }
 0x56b   :  { %v2154_v44 = vmul.f32 %v2146_v7, %v2075_v59  ;;  %v2156_v4 = vmul.f32 %v2147_v36, %v2075_v59 }
 0x56e   :  { %v7476_v20 = vpop.eup %7475 }
 0x56f   :  { %v2179_v37 = vmul.f32 %v7476_v20, %v2175_v10  ;;  %vm2184_vm1 = vweird.f32 %v7476_v20 }
 0x570   :  { %vm2185_vm3 = vmor %vm2183_vm2, %vm2184_vm1 }
 0x571   :  { %v2180_v52 = vsub.f32 1.0, %v2179_v37 }
 0x572   :  { %v2089_v47 = vpop.xlane.xlu2 %2088 }
 0x573   :  { %v2128_v26 = vsub.f32 %v2089_v47, %v2127_v51  ;;  %v2181_v53 = vmul.f32 %v7476_v20, %v2180_v52 }
 0x575   :  { %v2155_v22 = vsub.f32 %v2128_v26, %v2154_v44  ;;  %v2182_v3 = vadd.f32 %v7476_v20, %v2181_v53 }
 0x577   :  { %v2176_v46 = vmul.f32 %v2173_v39, %v2155_v22  ;;  %v2186_v57 = vsel %vm2185_vm3, %v7476_v20, %v2182_v3 }
 0x578   :  { %v2191_v43 = vsel %vm2188_vm4, %v2190_v40, %v2186_v57 }
 0x57a   :  { %v2103_v28 = vpop.xlane.xlu1 %2102 }
 0x57b   :  { %v2130_v25 = vsub.f32 %v2103_v28, %v2129_v16 }
 0x57d   :  { %v2157_v61 = vsub.f32 %v2130_v25, %v2156_v4 }
 0x57f   :  { %v2177_v45 = vsub.f32 %v2157_v61, %v2176_v46 }
 0x581   :  { %v2193_v18 = vmul.f32 %v2191_v43, %v2177_v45 }
 0x583   :  { %v8365_v7 = vsub.f32 %v8140_v54, %v2193_v18  ;;  %v2194_v5 = vmul.f32 %v2193_v18, %v2151_v31  ;;  %v2199_v32 = vmul.f32 %v2193_v18, %v2007_v49  ;;  %v2204_v49 = vmul.f32 %v2193_v18, %v8357_v34 }
 0x585   :  { %v2214_v24 = vand.u32 2139095040, %v8365_v7  ;;  %v2195_v36 = vsub.f32 %v2155_v22, %v2194_v5  ;;  %v2211_v37 = vand.u32 2147483647, %v8365_v7  ;;  %vm2213_vm2 = vcmp.lt.s32.totalorder %v8365_v7, 0 }
 0x587   :  { %v2215_v38 = vshrl.u32 %v2214_v24, 23  ;;  %v2196_v33 = vmul.f32 %v2195_v36, %v2171_v56  ;;  %vm2212_vm3 = vcmp.le.f32.partialorder %v2211_v37, 0.7853982 }
 0x589   :  { %v7342_v10 = vadd.s32 4294967169, %v2215_v38  ;;  %v8369_v39 = vsub.f32 %v8144_v60, %v2196_v33  ;;  %v2202_v20 = vmul.f32 %v2196_v33, %v8345_v63  ;;  %v2197_v52 = vmul.f32 %v2196_v33, %v8351_v14 }
 0x58a   :  { %v2218_v60 = vand.u32 8388607, %v2211_v37  ;;  %v8437_v37 = vld.sshfl [vmem:[#allocation1 + $0x8] sm:$0xff pattern:$0x75316420] }
 0x58b   :  { %v2221_v47 = vadd.s32 1, %v7342_v10  ;;  %2587 = vperm.xlu1 %7410, %v8369_v39   ;;  %v2203_v54 = vsub.f32 %v2063_v13, %v2202_v20  ;;  %v2198_v31 = vsub.f32 %v2075_v59, %v2197_v52 }
 0x58c   :  { %v2219_v44 = vor.u32 8388608, %v2218_v60 }
 0x58d   :  { %vm2222_vm6 = vcmp.gt.s32.totalorder %v2221_v47, 0  ;;  %v8376_v51 = vsub.f32 %v2203_v54, %v2204_v49  ;;  %v8380_v26 = vsub.f32 %v2198_v31, %v2199_v32 }
 0x58e   :  { %v2223_v56 = vsel %vm2222_vm6, %v2221_v47, 0  ;;  %v8396_v45 = vshll.u32 %v2219_v44, 8 }
 0x58f   :  { %v2225_v63 = vand.u32 31, %v2223_v56  ;;  %v8382_v14 = vshrl.u32 %v2223_v56, 5 }
 0x590   :  { %v2260_v10 = vand.u32 65535, %v8396_v45  ;;  %v2261_v20 = vshrl.u32 %v8396_v45, 16 }
 0x591   :  { %v2226_v53 = vsub.s32 32, %v2225_v63  ;;  %v2228_v22 = vshll.u32 %v7613_v15, %v2225_v63  ;;  %v2231_v13 = vshll.u32 %v7614_v17, %v2225_v63  ;;  %v2234_v16 = vshll.u32 %v7615_v19, %v2225_v63 }
 0x592   :  { %v2237_v28 = vshll.u32 %v7616_v21, %v2225_v63  ;;  %v2240_v4 = vshll.u32 %v7617_v23, %v2225_v63  ;;  %vm2243_vm7 = vcmp.lt.s32.totalorder %v8382_v14, 1  ;;  %vm2246_vm8 = vcmp.lt.s32.totalorder %v8382_v14, 4 }
 0x593   :  { %v2229_v34 = vshrl.u32 %v7614_v17, %v2226_v53  ;;  %v2232_v59 = vshrl.u32 %v7615_v19, %v2226_v53  ;;  %v2235_v3 = vshrl.u32 %v7616_v21, %v2226_v53  ;;  %7414 = vset.pattern.permute.xlu1 %v7611_v2  ;;  %v2238_v11 = vshrl.u32 %v7617_v23, %v2226_v53 }
 0x594   :  { %v2241_v25 = vshrl.u32 %v7618_v29, %v2226_v53  ;;  %vm2245_vm9 = vcmp.lt.s32.totalorder %v8382_v14, 3  ;;  %vm2244_vm10 = vcmp.lt.s32.totalorder %v8382_v14, 2 }
 0x595   :  { %v2230_v48 = vor.u32 %v2229_v34, %v2228_v22  ;;  %v2233_v46 = vor.u32 %v2232_v59, %v2231_v13  ;;  %v2236_v61 = vor.u32 %v2235_v3, %v2234_v16  ;;  %v2239_v57 = vor.u32 %v2238_v11, %v2237_v28 }
 0x596   :  { %v2242_v40 = vor.u32 %v2241_v25, %v2240_v4 }
 0x597   :  { %v2251_v43 = vsel %vm2243_vm7, %v2230_v48, %v2233_v46  ;;  %v2255_v18 = vsel %vm2243_vm7, %v2233_v46, %v2236_v61  ;;  %v2252_v5 = vsel %vm2246_vm8, %v2239_v57, 920167782 }
 0x598   :  { %v2256_v32 = vsel %vm2246_vm8, %v2242_v40, 1326507024  ;;  %v2253_v24 = vsel %vm2245_vm9, %v2236_v61, %v2252_v5 }
 0x599   :  { %v2257_v36 = vsel %vm2245_vm9, %v2239_v57, %v2256_v32  ;;  %v2254_v38 = vsel %vm2244_vm10, %v2251_v43, %v2253_v24  ;;  %v2248_v43 = vsel %vm2246_vm8, %v2236_v61, 2102212464  ;;  %v2227_v32 = vshrl.u32 %v7613_v15, %v2226_v53 }
 0x59a   :  { %v2258_v33 = vsel %vm2244_vm10, %v2255_v18, %v2257_v36  ;;  %v2284_v54 = vand.u32 65535, %v2254_v38  ;;  %v2285_v49 = vshrl.u32 %v2254_v38, 16 }
 0x59b   :  { %v2262_v52 = vand.u32 65535, %v2258_v33  ;;  %v2263_v47 = vshrl.u32 %v2258_v33, 16 }
 0x59c   :  { %v2287_v56 = vmul.u32 %v2285_v49, %v2260_v10  ;;  %v2288_v63 = vmul.u32 %v2284_v54, %v2261_v20  ;;  %v2286_v34 = vmul.u32 %v2284_v54, %v2260_v10  ;;  %v2289_v28 = vmul.u32 %v2285_v49, %v2261_v20 }
 0x59d   :  { %v2265_v31 = vmul.u32 %v2263_v47, %v2260_v10  ;;  %v2266_v60 = vmul.u32 %v2262_v52, %v2261_v20  ;;  %v2264_v44 = vmul.u32 %v2262_v52, %v2260_v10  ;;  %v2267_v13 = vmul.u32 %v2263_v47, %v2261_v20 }
 0x59e   :  { %v2290_v59 = vshll.u32 %v2287_v56, 16  ;;  %v2292_v4 = vshll.u32 %v2288_v63, 16  ;;  %v2291_v33 = vshrl.u32 %v2287_v56, 16  ;;  %v2247_v20 = vsel %vm2243_vm7, %v2227_v32, %v2230_v48 }
 0x59f   :  { %v2268_v22 = vshll.u32 %v2265_v31, 16  ;;  %v2270_v16 = vshll.u32 %v2266_v60, 16  ;;  %v2269_v24 = vshrl.u32 %v2265_v31, 16  ;;  %v2249_v52 = vsel %vm2245_vm9, %v2233_v46, %v2248_v43 }
 0x5a0   :  { %vm2294_vm12 = vc.u32 %v2286_v34, %v2290_v59  ;;  %v2296_v25 = vadd.s32 %v2290_v59, %v2286_v34  ;;  %v2271_v47 = vshrl.u32 %v2266_v60, 16  ;;  %v2293_v54 = vshrl.u32 %v2288_v63, 16 }
 0x5a1   :  { %vm2272_vm11 = vc.u32 %v2264_v44, %v2268_v22  ;;  %v2274_v3 = vadd.s32 %v2268_v22, %v2264_v44  ;;  %v2295_v40 = vsel %vm2294_vm12, 1, %v7612_v6  ;;  %v2250_v53 = vsel %vm2244_vm10, %v2247_v20, %v2249_v52 }
 0x5a2   :  { %v2273_v11 = vsel %vm2272_vm11, 1, %v7612_v6  ;;  %v2297_v5 = vadd.s32 %v2295_v40, %v2289_v28  ;;  %vm2298_vm14 = vc.u32 %v2296_v25, %v2292_v4  ;;  %v2300_v22 = vadd.s32 %v2296_v25, %v2292_v4 }
 0x5a3   :  { %v2275_v57 = vadd.s32 %v2273_v11, %v2267_v13  ;;  %vm2276_vm13 = vc.u32 %v2274_v3, %v2270_v16  ;;  %v2299_v38 = vsel %vm2298_vm14, 1, %v7612_v6  ;;  %v2304_v56 = vmul.u32 %v8396_v45, %v2250_v53 }
 0x5a4   :  { %v2277_v18 = vsel %vm2276_vm13, 1, %v7612_v6  ;;  %v2301_v10 = vadd.s32 %v2299_v38, %v2297_v5  ;;  %vm2354_vm11 = vweird.f32 %v8365_v7 }
 0x5a5   :  { %v2279_v36 = vadd.s32 %v2277_v18, %v2275_v57 }
 0x5a6   :  { %v2302_v49 = vadd.s32 %v2301_v10, %v2291_v33 }
 0x5a7   :  { %v2280_v61 = vadd.s32 %v2279_v36, %v2269_v24 }
 0x5a8   :  { %v2303_v31 = vadd.s32 %v2302_v49, %v2293_v54 }
 0x5a9   :  { %v2281_v44 = vadd.s32 %v2280_v61, %v2271_v47 }
 0x5aa   :  { %v2307_v13 = vadd.s32 1, %v2303_v31 }
 0x5ab   :  { %vm2306_vm15 = vc.u32 %v2281_v44, %v2300_v22  ;;  %v2305_v14 = vadd.s32 %v2300_v22, %v2281_v44 }
 0x5ac   :  { %v2308_v34 = vsel %vm2306_vm15, %v2307_v13, %v2303_v31 }
 0x5ad   :  { %v2309_v59 = vadd.s32 %v2308_v34, %v2304_v56 }
 0x5af   :  { %v2310_v48 = vadd.s32 536870912, %v2309_v59 }
 0x5b1   :  { %v2311_v16 = vshrl.u32 %v2310_v48, 30 }
 0x5b3   :  { %v2312_v3 = vshll.u32 %v2311_v16, 30  ;;  %v2335_v20 = vsub.s32 4, %v2311_v16 }
 0x5b5   :  { %v2313_v46 = vsub.s32 %v2309_v59, %v2312_v3  ;;  %v2336_v49 = vsel %vm2213_vm2, %v2335_v20, %v2311_v16 }
 0x5b6   :  { %v2338_v53 = vsel %vm2212_vm3, 0, %v2336_v49 }
 0x5b7   :  { %vm2314_vm0 = vcmp.lt.s32.totalorder %v2313_v46, 0  ;;  %v2315_v60 = vsub.s32 0, %v2313_v46  ;;  %v2509_v59 = vadd.s32 3, %v2338_v53 }
 0x5b9   :  { %v2316_v63 = vsel %vm2314_vm0, %v2315_v60, %v2313_v46 }
 0x5ba   :  { %v2317_v28 = vclz %v2316_v63 }
 0x5bc   :  { %v7343_v11 = vadd.s32 4294967294, %v2317_v28  ;;  %v2355_v28 = vand.u32 3, %v2338_v53 }
 0x5be   :  { %vm7344_vm1 = vcmp.lt.s32.totalorder %v7343_v11, 0  ;;  %vm2356_vm4 = vcmp.lt.s32.totalorder %v2355_v28, 2  ;;  %vm2357_vm6 = vcmp.eq.s32.totalorder %v2355_v28, 0  ;;  %vm2360_vm7 = vcmp.eq.s32.totalorder %v2355_v28, 2 }
 0x5bf   :  { %v2320_v4 = vsel %vm7344_vm1, 0, %v7343_v11  ;;  %v2510_v11 = vand.u32 3, %v2509_v59 }
 0x5c0   :  { %v2321_v25 = vsub.s32 32, %v2320_v4  ;;  %v2325_v57 = vsub.s32 4294967266, %v2320_v4  ;;  %v2322_v40 = vshll.u32 %v2313_v46, %v2320_v4  ;;  %v2526_v46 = vld.sshfl [vmem:[#allocation1] sm:$0xff pattern:$0x75316420] }
 0x5c1   :  { %2537 = vst [vmem:[#allocation1] ss:$2 sm:$0xff] %v7729_v0  ;;  %vm2511_vm8 = vcmp.lt.s32.totalorder %v2510_v11, 2  ;;  %vm2512_vm9 = vcmp.eq.s32.totalorder %v2510_v11, 0  ;;  %vm2515_vm10 = vcmp.eq.s32.totalorder %v2510_v11, 2 }
 0x5c2   :  { %v2323_v43 = vshrl.u32 %v2305_v14, %v2321_v25  ;;  %v2326_v18 = vadd.s32 127, %v2325_v57 }
 0x5c4   :  { %v2324_v45 = vor.u32 %v2323_v43, %v2322_v40  ;;  %v2327_v5 = vshll.u32 %v2326_v18, 23 }
 0x5c6   :  { %v2328_v32 = vor.u32 4788187, %v2327_v5  ;;  %v2331_v36 = vcvt.s32.f32 %v2324_v45 }
 0x5c8   :  { %v2329_v24 = vand.u32 2147483647, %v2328_v32  ;;  %v2538_v5 = vld.sshfl [vmem:[#allocation1] sm:$0xff pattern:$0x75316420] }
 0x5c9   :  { %v2539_v32 = vld.sshfl [vmem:[#allocation1 + $0x8] sm:$0xff pattern:$0x75316420] }
 0x5ca   :  { %v2332_v38 = vmul.f32 %v2331_v36, %v2329_v24  ;;  %2569 = vst [vmem:[#allocation1] ss:$2 sm:$0xff] %v7723_v42 }
 0x5cc   :  { %v2333_v33 = vxor.u32 2147483648, %v2332_v38 }
 0x5ce   :  { %v2334_v10 = vsel %vm2213_vm2, %v2333_v33, %v2332_v38  ;;  %v2206_v33 = vmul.f32 %v8376_v51, %v8343_v27 }
 0x5cf   :  { %v2337_v52 = vsel %vm2212_vm3, %v8365_v7, %v2334_v10 }
 0x5d0   :  { %v2339_v47 = vmul.f32 %v2337_v52, %v2337_v52 }
 0x5d1   :  { %v2570_v10 = vld.sshfl [vmem:[#allocation1] sm:$0xff pattern:$0x75316420]  ;;  %v2571_v20 = vld.sshfl [vmem:[#allocation1 + $0x8] sm:$0xff pattern:$0x75316420] }
 0x5d2   :  { %v2340_v61 = vmul.f32 -0.001358992, %v2339_v47  ;;  %v2347_v54 = vmul.f32 -0.00019511016, %v2339_v47  ;;  %2576 = vst [vmem:[#allocation1] ss:$2 sm:$0xff] %v7729_v0 }
 0x5d4   :  { %v2341_v44 = vadd.f32 0.041655596, %v2340_v61  ;;  %v2348_v22 = vadd.f32 0.008332121, %v2347_v54 }
 0x5d6   :  { %v2342_v31 = vmul.f32 %v2341_v44, %v2339_v47  ;;  %v2349_v13 = vmul.f32 %v2348_v22, %v2339_v47 }
 0x5d8   :  { %v2343_v56 = vadd.f32 -0.4999988, %v2342_v31  ;;  %v2350_v34 = vadd.f32 -0.16666654, %v2349_v13 }
 0x5d9   :  { %v2578_v27 = vld.sshfl [vmem:[#allocation1 + $0x8] sm:$0xff pattern:$0x75316420] }
 0x5da   :  { %v2344_v48 = vmul.f32 %v2343_v56, %v2339_v47  ;;  %v2351_v3 = vmul.f32 %v2350_v34, %v2339_v47  ;;  %v2201_v47 = vmul.f32 %v8380_v26, %v8347_v55 }
 0x5dc   :  { %v2345_v60 = vadd.f32 1.0, %v2344_v48  ;;  %v2352_v63 = vadd.f32 1.0, %v2351_v3  ;;  %v8453_v61 = vsub.f32 %v8230_v12, %v2201_v47 }
 0x5de   :  { %v2353_v16 = vmul.f32 %v2352_v63, %v2337_v52  ;;  %v2361_v4 = vxor.u32 2147483648, %v2345_v60  ;;  %v8446_v52 = vsub.f32 %v8158_v8, %v2206_v33  ;;  %v2577_v8 = vld.sshfl [vmem:[#allocation1] sm:$0xff pattern:$0x75316420] }
 0x5df   :  { %2600 = vst [vmem:[#allocation1] ss:$2 sm:$0xff] %v7737_v50 }
 0x5e0   :  { %v2358_v14 = vxor.u32 2147483648, %v2353_v16  ;;  %v2362_v57 = vsel %vm2360_vm7, %v2361_v4, %v2353_v16  ;;  %v2517_v43 = vsel %vm2515_vm10, %v2361_v4, %v2353_v16 }
 0x5e2   :  { %v2359_v25 = vsel %vm2357_vm6, %v2345_v60, %v2358_v14  ;;  %v2514_v40 = vsel %vm2512_vm9, %v2345_v60, %v2358_v14 }
 0x5e3   :  { %v2363_v18 = vsel %vm2356_vm4, %v2359_v25, %v2362_v57  ;;  %v2518_v45 = vsel %vm2511_vm8, %v2514_v40, %v2517_v43 }
 0x5e4   :  { %v2364_v24 = vsel %vm2354_vm11, nan, %v2363_v18  ;;  %v2519_v36 = vsel %vm2354_vm11, nan, %v2518_v45 }
 0x5e5   :  { %2522 = vperm.xlu0 %7404, %v2364_v24   ;;  %v2563_v38 = vsub.f32 0.0, %v2519_v36 }
 0x5e6   :  { %v2601_v18 = vld.sshfl [vmem:[#allocation1] sm:$0xff pattern:$0x75316420]  ;;  %v2602_v45 = vld.sshfl [vmem:[#allocation1 + $0x8] sm:$0xff pattern:$0x75316420] }
 0x5e7   :  { %2566 = vperm.xlu2 %7409, %v2563_v38  }
 0x5ed   :  { %2534 = vperm.xlu0 %7404, %v2519_v36  }
 0x5ef   :  { %7411 = vset.pattern.permute.xlu2 %v7612_v6 }
 0x5f0   :  { %2548 = vperm.xlu2 %7411, %v8446_v52  }
 0x5f5   :  { %7412 = vset.pattern.permute.xlu0 %v7619_v62 }
 0x5f6   :  { %2555 = vperm.xlu0 %7412, %v8453_v61  }
 0x5f8   :  { %7415 = vset.pattern.permute.xlu2 %v7610_v1 }
 0x5fd   :  { %v2588_v53 = vpop.permute.xlu1 %2587 }
 0x5fe   :  { %7413 = vset.pattern.permute.xlu0 %v7611_v2 }
 0x641   :  { %v2567_v51 = vpop.permute.xlu2 %2566 }
 0x642   :  { %v2574_v49 = vmul.f32 %v2570_v10, %v2567_v51  ;;  %v2575_v44 = vmul.f32 %v2571_v20, %v2567_v51 }
 0x64a   :  { %v2549_v16 = vpop.permute.xlu2 %2548 }
 0x657   :  { %v2523_v54 = vpop.permute.xlu0 %2522 }
 0x658   :  { %v2581_v55 = vmul.f32 %v2577_v8, %v2523_v54  ;;  %v2582_v26 = vmul.f32 %v2578_v27, %v2523_v54  ;;  %v2530_v59 = vmul.f32 %v2526_v46, %v2523_v54  ;;  %v2531_v3 = vmul.f32 %v8437_v37, %v2523_v54 }
 0x65a   :  { %v2583_v12 = vadd.f32 %v2581_v55, %v2574_v49  ;;  %v2584_v22 = vadd.f32 %v2582_v26, %v2575_v44 }
 0x65c   :  { %v2590_v31 = vadd.f32 %v2588_v53, %v2583_v12  ;;  %v2591_v13 = vadd.f32 %v2588_v53, %v2584_v22 }
 0x65e   :  { %v2592_v56 = vmax.f32 %v2590_v31, 0.1  ;;  %v2593_v34 = vmax.f32 %v2591_v13, 0.1  ;;  %v2621_v43 = vsub.f32 %v2590_v31, %v2588_v53  ;;  %v2622_v36 = vsub.f32 %v2591_v13, %v2588_v53 }
 0x65f   :  { %v2535_v48 = vpop.permute.xlu0 %2534 }
 0x660   :  { %7477 = vrcp.f32 %v2592_v56  ;;  %v2542_v60 = vmul.f32 %v2538_v5, %v2535_v48  ;;  %v2543_v63 = vmul.f32 %v2539_v32, %v2535_v48 }
 0x661   :  { %7479 = vrcp.f32 %v2593_v34  ;;  %v8470_v34 = vld [vmem:[%s9865_s0 + $0x8] sm:$0xff] }
 0x662   :  { %v2544_v28 = vadd.f32 %v2542_v60, %v2530_v59  ;;  %v2545_v11 = vadd.f32 %v2543_v63, %v2531_v3 }
 0x664   :  { %v2551_v4 = vadd.f32 %v2549_v16, %v2544_v28  ;;  %v2552_v14 = vadd.f32 %v2549_v16, %v2545_v11 }
 0x666   :  { %v7478_v25 = vpop.eup %7477  ;;  %v2628_v57 = vrot.slane %v2552_v14, 4  ;;  %v2623_v37 = vsub.f32 %v2549_v16, %v2551_v4  ;;  %v2624_v32 = vsub.f32 %v2549_v16, %v2552_v14 }
 0x667   :  { %v7480_v40 = vpop.eup %7479  ;;  %v2598_v24 = vmul.f32 %v7478_v25, %v2551_v4  ;;  %v2596_v46 = vmul.f32 %v7478_v25, %v7478_v25  ;;  %v2638_v13 = vmul.f32 %v7478_v25, %v2621_v43  ;;  %v8484_v43 = vld [vmem:[%s9866_s1 + $0x8] sm:$0xff] }
 0x668   :  { %v2597_v38 = vmul.f32 %v7480_v40, %v7480_v40  ;;  %v2599_v33 = vmul.f32 %v7480_v40, %v2552_v14  ;;  %v2556_v5 = vpop.permute.xlu0 %2555  ;;  %v2615_v10 = vrot.slane %v7480_v40, 4  ;;  %v2629_v20 = vsel %vm426_vm5, %v2551_v4, %v2628_v57 }
 0x669   :  { %v2640_v47 = vmul.f32 %v2596_v46, %v2551_v4  ;;  %v2639_v8 = vmul.f32 %v7480_v40, %v2622_v36  ;;  %v2605_v27 = vsub.f32 %v2598_v24, %v2601_v18  ;;  %v2631_v44 = vmul.f32 %v2629_v20, %v7761_v35 }
 0x66a   :  { %v2606_v51 = vsub.f32 %v2599_v33, %v2602_v45  ;;  %v2641_v54 = vmul.f32 %v2597_v38, %v2552_v14  ;;  %v2616_v49 = vsel %vm426_vm5, %v7478_v25, %v2615_v10  ;;  %v2634_v55 = vrot.slane %v2597_v38, 4 }
 0x66b   :  { %v2560_v26 = vperm.slane %v2556_v5, %v7742_v9  ;;  %v2625_v53 = vmul.f32 %v8269_v58, %v2616_v49  ;;  %v2642_v31 = vmul.f32 %v2640_v47, %v2623_v37  ;;  %v2657_v60 = vrot.slane %v2624_v32, 4 }
 0x66c   :  { %v2609_v12 = vrot.slane %v2606_v51, 4  ;;  %v2643_v22 = vmul.f32 %v2641_v54, %v2624_v32  ;;  %v2635_v56 = vsel %vm426_vm5, %v2596_v46, %v2634_v55 }
 0x66d   :  { %v2562_v59 = vadd.f32 %v8470_v34, %v2560_v26  ;;  %v2661_v63 = vmul.f32 %v2625_v53, %v2625_v53  ;;  %v8475_v11 = vmul.f32 %v2635_v56, %v2631_v44  ;;  %v2644_v25 = vsub.f32 %v2638_v13, %v2642_v31 }
 0x66e   :  { %v2610_v48 = vsel %vm426_vm5, %v2605_v27, %v2609_v12  ;;  %v2645_v3 = vsub.f32 %v2639_v8, %v2643_v22  ;;  %v2658_v24 = vsel %vm426_vm5, %v2623_v37, %v2657_v60  ;;  %v8512_v13 = vmul.f32 %v8292_v41, %v2616_v49 }
 0x66f   :  { %v2612_v28 = vmul.f32 %v8269_v58, %v2610_v48  ;;  %v2618_v16 = vmul.f32 %v2616_v49, %v2562_v59  ;;  %v2653_v4 = vmul.f32 %v2562_v59, %v7759_v30  ;;  %2663 = vst [vmem:[#allocation1] ss:$2 sm:$0xff] %v2661_v63  ;;  %v2674_v32 = vmul.f32 %v8475_v11, %v2625_v53 }
 0x670   :  { %v2648_v14 = vrot.slane %v2645_v3, 4 }
 0x671   :  { %v8478_v57 = vmul.f32 %v2625_v53, %v2612_v28  ;;  %v2803_v40 = vmul.f32 %v8475_v11, %v2612_v28  ;;  %v2619_v18 = vsub.f32 %v2618_v16, %v8484_v43  ;;  %v2654_v45 = vmul.f32 %v2653_v4, %v2635_v56 }
 0x672   :  { %v2649_v46 = vsel %vm426_vm5, %v2644_v25, %v2648_v14  ;;  %v2698_v56 = vmul.f32 %v8512_v13, %v8512_v13 }
 0x673   :  { %v8490_v36 = vmul.f32 %v8269_v58, %v2649_v46  ;;  %v8493_v38 = vmul.f32 %v8292_v41, %v2619_v18  ;;  %v8495_v33 = vmul.f32 %v2658_v24, %v2654_v45  ;;  %v2736_v18 = vmul.f32 %v2654_v45, %v2654_v45 }
 0x674   :  { %v2735_v24 = vmul.f32 %v8475_v11, %v8475_v11 }
 0x675   :  { %v2817_v5 = vmul.f32 %v8490_v36, %v2612_v28  ;;  %v2804_v10 = vmul.f32 %v2654_v45, %v8493_v38  ;;  %v2818_v20 = vmul.f32 %v8495_v33, %v8493_v38  ;;  %v2686_v44 = vmul.f32 %v8490_v36, %v2625_v53 }
 0x676   :  { %v2664_v37 = vld.sshfl [vmem:[#allocation1] sm:$0xff pattern:$0x75316420]  ;;  %v2665_v47 = vld.sshfl [vmem:[#allocation1 + $0x8] sm:$0xff pattern:$0x75316420]  ;;  %v2711_v53 = vmul.f32 %v2654_v45, %v8512_v13  ;;  %v2723_v41 = vmul.f32 %v8495_v33, %v8512_v13  ;;  %v2737_v46 = vadd.f32 %v2736_v18, %v2735_v24 }
 0x677   :  { %v2668_v8 = vsel %vm426_vm5, %v2664_v37, 0.0  ;;  %v2669_v58 = vsel %vm426_vm5, %v2665_v47, 0.0  ;;  %2676 = vst [vmem:[#allocation1] ss:$2 sm:$0xff] %v2674_v32  ;;  %v8504_v27 = vadd.f32 %v2804_v10, %v2803_v40  ;;  %v8506_v51 = vadd.f32 %v2818_v20, %v2817_v5 }
 0x678   :  { %v2670_v54 = vadd.f32 %v2669_v58, %v2668_v8  ;;  %v2750_v47 = vmul.f32 %v8490_v36, %v8475_v11  ;;  %v2751_v8 = vmul.f32 %v8495_v33, %v2654_v45 }
 0x67a   :  { %2671 = vadd.xlane.f32.xlu1 %v2670_v54  ;;  %v2752_v58 = vadd.f32 %v2751_v8, %v2750_v47 }
 0x67e   :  { %v2677_v55 = vld.sshfl [vmem:[#allocation1] sm:$0xff pattern:$0x75316420]  ;;  %v2678_v26 = vld.sshfl [vmem:[#allocation1 + $0x8] sm:$0xff pattern:$0x75316420] }
 0x67f   :  { %v2681_v12 = vsel %vm426_vm5, %v2677_v55, 0.0  ;;  %v2682_v22 = vsel %vm426_vm5, %v2678_v26, 0.0  ;;  %2688 = vst [vmem:[#allocation1] ss:$2 sm:$0xff] %v2686_v44 }
 0x680   :  { %v2683_v31 = vadd.f32 %v2682_v22, %v2681_v12  ;;  %v2764_v22 = vmul.f32 %v8490_v36, %v8490_v36 }
 0x682   :  { %2684 = vadd.xlane.f32.xlu0 %v2683_v31  ;;  %v2765_v31 = vmul.f32 %v8495_v33, %v8495_v33 }
 0x684   :  { %v2766_v11 = vadd.f32 %v2765_v31, %v2764_v22 }
 0x686   :  { %v2689_v59 = vld.sshfl [vmem:[#allocation1] sm:$0xff pattern:$0x75316420]  ;;  %v2690_v48 = vld.sshfl [vmem:[#allocation1 + $0x8] sm:$0xff pattern:$0x75316420] }
 0x687   :  { %2700 = vst [vmem:[#allocation1] ss:$2 sm:$0xff] %v2698_v56  ;;  %v2693_v5 = vsel %vm426_vm5, %v2689_v59, 0.0  ;;  %v2694_v32 = vsel %vm426_vm5, %v2690_v48, 0.0 }
 0x688   :  { %v2695_v37 = vadd.f32 %v2694_v32, %v2693_v5 }
 0x68e   :  { %v2701_v3 = vld.sshfl [vmem:[#allocation1] sm:$0xff pattern:$0x75316420]  ;;  %v2702_v60 = vld.sshfl [vmem:[#allocation1 + $0x8] sm:$0xff pattern:$0x75316420] }
 0x68f   :  { %v2705_v63 = vsel %vm426_vm5, %v2701_v3, 0.0  ;;  %v2706_v28 = vsel %vm426_vm5, %v2702_v60, 0.0  ;;  %2713 = vst [vmem:[#allocation1] ss:$2 sm:$0xff] %v2711_v53 }
 0x690   :  { %v2707_v16 = vadd.f32 %v2706_v28, %v2705_v63 }
 0x692   :  { %2708 = vadd.xlane.f32.xlu2 %v2707_v16 }
 0x696   :  { %v2714_v49 = vld.sshfl [vmem:[#allocation1] sm:$0xff pattern:$0x75316420]  ;;  %v2715_v4 = vld.sshfl [vmem:[#allocation1 + $0x8] sm:$0xff pattern:$0x75316420] }
 0x697   :  { %v2718_v14 = vsel %vm426_vm5, %v2714_v49, 0.0  ;;  %v2719_v25 = vsel %vm426_vm5, %v2715_v4, 0.0  ;;  %2725 = vst [vmem:[#allocation1] ss:$2 sm:$0xff] %v2723_v41  ;;  %v2791_v49 = vmul.f32 %v8512_v13, %v8493_v38 }
 0x698   :  { %v2720_v40 = vadd.f32 %v2719_v25, %v2718_v14 }
 0x69a   :  { %2721 = vadd.xlane.f32.xlu1 %v2720_v40 }
 0x69e   :  { %v2726_v10 = vld.sshfl [vmem:[#allocation1] sm:$0xff pattern:$0x75316420]  ;;  %v2727_v20 = vld.sshfl [vmem:[#allocation1 + $0x8] sm:$0xff pattern:$0x75316420] }
 0x69f   :  { %2739 = vst [vmem:[#allocation1] ss:$2 sm:$0xff] %v2737_v46  ;;  %v2730_v45 = vsel %vm426_vm5, %v2726_v10, 0.0  ;;  %v2731_v56 = vsel %vm426_vm5, %v2727_v20, 0.0 }
 0x6a0   :  { %v2732_v63 = vadd.f32 %v2731_v56, %v2730_v45 }
 0x6a2   :  { %2696 = vadd.xlane.f32.xlu1 %v2695_v37 }
 0x6a6   :  { %v2740_v54 = vld.sshfl [vmem:[#allocation1] sm:$0xff pattern:$0x75316420]  ;;  %v2741_v44 = vld.sshfl [vmem:[#allocation1 + $0x8] sm:$0xff pattern:$0x75316420] }
 0x6a7   :  { %v2744_v55 = vsel %vm426_vm5, %v2740_v54, 0.0  ;;  %v2745_v26 = vsel %vm426_vm5, %v2741_v44, 0.0  ;;  %2754 = vst [vmem:[#allocation1] ss:$2 sm:$0xff] %v2752_v58 }
 0x6a8   :  { %v2746_v12 = vadd.f32 %v2745_v26, %v2744_v55 }
 0x6aa   :  { %2747 = vadd.xlane.f32.xlu2 %v2746_v12 }
 0x6ae   :  { %v2755_v59 = vld.sshfl [vmem:[#allocation1] sm:$0xff pattern:$0x75316420]  ;;  %v2756_v48 = vld.sshfl [vmem:[#allocation1 + $0x8] sm:$0xff pattern:$0x75316420] }
 0x6af   :  { %v2759_v53 = vsel %vm426_vm5, %v2755_v59, 0.0  ;;  %v2760_v3 = vsel %vm426_vm5, %v2756_v48, 0.0  ;;  %2768 = vst [vmem:[#allocation1] ss:$2 sm:$0xff] %v2766_v11 }
 0x6b0   :  { %v2761_v60 = vadd.f32 %v2760_v3, %v2759_v53 }
 0x6b2   :  { %2762 = vadd.xlane.f32.xlu0 %v2761_v60  ;;  %2733 = vadd.xlane.f32.xlu2 %v2732_v63 }
 0x6b6   :  { %v2769_v36 = vld.sshfl [vmem:[#allocation1] sm:$0xff pattern:$0x75316420]  ;;  %v2770_v28 = vld.sshfl [vmem:[#allocation1 + $0x8] sm:$0xff pattern:$0x75316420] }
 0x6b7   :  { %v2773_v33 = vsel %vm426_vm5, %v2769_v36, 0.0  ;;  %v2774_v16 = vsel %vm426_vm5, %v2770_v28, 0.0  ;;  %2781 = vst [vmem:[#allocation1] ss:$2 sm:$0xff] %v8478_v57 }
 0x6b8   :  { %v2775_v41 = vadd.f32 %v2774_v16, %v2773_v33 }
 0x6ba   :  { %2776 = vadd.xlane.f32.xlu1 %v2775_v41 }
 0x6be   :  { %v2782_v4 = vld.sshfl [vmem:[#allocation1] sm:$0xff pattern:$0x75316420]  ;;  %v2783_v14 = vld.sshfl [vmem:[#allocation1 + $0x8] sm:$0xff pattern:$0x75316420] }
 0x6bf   :  { %v2786_v25 = vsel %vm426_vm5, %v2782_v4, 0.0  ;;  %v2787_v40 = vsel %vm426_vm5, %v2783_v14, 0.0  ;;  %2793 = vst [vmem:[#allocation1] ss:$2 sm:$0xff] %v2791_v49 }
 0x6c0   :  { %v2788_v18 = vadd.f32 %v2787_v40, %v2786_v25 }
 0x6c2   :  { %2789 = vadd.xlane.f32.xlu2 %v2788_v18 }
 0x6c6   :  { %v2794_v24 = vld.sshfl [vmem:[#allocation1] sm:$0xff pattern:$0x75316420]  ;;  %v2795_v46 = vld.sshfl [vmem:[#allocation1 + $0x8] sm:$0xff pattern:$0x75316420] }
 0x6c7   :  { %v2798_v5 = vsel %vm426_vm5, %v2794_v24, 0.0  ;;  %v2799_v57 = vsel %vm426_vm5, %v2795_v46, 0.0  ;;  %2807 = vst [vmem:[#allocation1] ss:$2 sm:$0xff] %v8504_v27 }
 0x6c8   :  { %v2800_v32 = vadd.f32 %v2799_v57, %v2798_v5 }
 0x6ca   :  { %2801 = vadd.xlane.f32.xlu0 %v2800_v32 }
 0x6ce   :  { %v2808_v38 = vld.sshfl [vmem:[#allocation1] sm:$0xff pattern:$0x75316420]  ;;  %v2809_v13 = vld.sshfl [vmem:[#allocation1 + $0x8] sm:$0xff pattern:$0x75316420] }
 0x6cf   :  { %v2812_v10 = vsel %vm426_vm5, %v2808_v38, 0.0  ;;  %v2813_v20 = vsel %vm426_vm5, %v2809_v13, 0.0  ;;  %2821 = vst [vmem:[#allocation1] ss:$2 sm:$0xff] %v8506_v51 }
 0x6d0   :  { %v2814_v37 = vadd.f32 %v2813_v20, %v2812_v10 }
 0x6d2   :  { %2815 = vadd.xlane.f32.xlu1 %v2814_v37 }
 0x6d6   :  { %v2822_v47 = vld.sshfl [vmem:[#allocation1] sm:$0xff pattern:$0x75316420]  ;;  %v2823_v8 = vld.sshfl [vmem:[#allocation1 + $0x8] sm:$0xff pattern:$0x75316420] }
 0x6d7   :  { %v2826_v58 = vsel %vm426_vm5, %v2822_v47, 0.0  ;;  %v2827_v54 = vsel %vm426_vm5, %v2823_v8, 0.0  ;;  %3252 = vst [vmem:[#allocation1] ss:$2 sm:$0xff] %v7723_v42 }
 0x6d8   :  { %v2828_v27 = vadd.f32 %v2827_v54, %v2826_v58 }
 0x6da   :  { %2829 = vadd.xlane.f32.xlu2 %v2828_v27 }
 0x6ed   :  { %v2672_v44 = vpop.xlane.xlu1 %2671 }
 0x6ee   :  { %v2673_v55 = vadd.f32 1e-05, %v2672_v44 }
 0x6f0   :  { %7481 = vrcp.f32 %v2673_v55  ;;  %v2842_v48 = vand.u32 2147483648, %v2673_v55  ;;  %vm2836_vm13 = vweird.f32 %v2673_v55  ;;  %v2840_v3 = vand.u32 2147483647, %v2673_v55 }
 0x6f2   :  { %v2843_v33 = vor.u32 1.1754944e-38, %v2842_v48  ;;  %vm2841_vm1 = vcmp.eq.f32.partialorder %v2840_v3, 8.507059e+37 }
 0x6f5   :  { %v8558_v14 = vpop.xlane.xlu0 %2684 }
 0x6f6   :  { %v7482_v26 = vpop.eup %7481 }
 0x6f7   :  { %v2832_v12 = vmul.f32 %v7482_v26, %v2673_v55  ;;  %vm2837_vm12 = vweird.f32 %v7482_v26 }
 0x6f8   :  { %vm2838_vm14 = vmor %vm2836_vm13, %vm2837_vm12 }
 0x6f9   :  { %v2833_v51 = vsub.f32 1.0, %v2832_v12 }
 0x6fb   :  { %v2834_v11 = vmul.f32 %v7482_v26, %v2833_v51 }
 0x6fd   :  { %v2835_v59 = vadd.f32 %v7482_v26, %v2834_v11 }
 0x6ff   :  { %v2839_v36 = vsel %vm2838_vm14, %v7482_v26, %v2835_v59 }
 0x700   :  { %v8556_v41 = vsel %vm2841_vm1, %v2843_v33, %v2839_v36 }
 0x701   :  { %v2846_v40 = vmul.f32 %v8556_v41, %v8558_v14 }
 0x703   :  { %v2848_v5 = vmul.f32 %v2846_v40, %v8558_v14 }
 0x705   :  { %v2709_v22 = vpop.xlane.xlu2 %2708 }
 0x706   :  { %v2710_v31 = vadd.f32 1e-05, %v2709_v22 }
 0x708   :  { %7483 = vrcp.f32 %v2710_v31  ;;  %v2869_v63 = vand.u32 2147483648, %v2710_v31  ;;  %v2867_v28 = vand.u32 2147483647, %v2710_v31  ;;  %vm2863_vm0 = vweird.f32 %v2710_v31 }
 0x70a   :  { %v2870_v4 = vor.u32 1.1754944e-38, %v2869_v63  ;;  %vm2868_vm3 = vcmp.eq.f32.partialorder %v2867_v28, 8.507059e+37 }
 0x70d   :  { %v8564_v18 = vpop.xlane.xlu1 %2721 }
 0x70e   :  { %v7484_v45 = vpop.eup %7483 }
 0x70f   :  { %v2859_v56 = vmul.f32 %v7484_v45, %v2710_v31  ;;  %vm2864_vm15 = vweird.f32 %v7484_v45 }
 0x710   :  { %vm2865_vm2 = vmor %vm2863_vm0, %vm2864_vm15 }
 0x711   :  { %v2860_v53 = vsub.f32 1.0, %v2859_v56 }
 0x713   :  { %v2861_v60 = vmul.f32 %v7484_v45, %v2860_v53 }
 0x715   :  { %v2862_v16 = vadd.f32 %v7484_v45, %v2861_v60  ;;  %v8570_v10 = vpop.xlane.xlu1 %2696 }
 0x716   :  { %v2847_v58 = vmul.f32 %v8556_v41, %v8570_v10  ;;  %v2850_v27 = vmul.f32 %v2846_v40, %v8570_v10 }
 0x717   :  { %v2866_v49 = vsel %vm2865_vm2, %v7484_v45, %v2862_v16 }
 0x718   :  { %v8560_v25 = vsel %vm2868_vm3, %v2870_v4, %v2866_v49  ;;  %v2852_v56 = vmul.f32 %v2847_v58, %v8570_v10 }
 0x719   :  { %v2873_v24 = vmul.f32 %v8560_v25, %v8564_v18 }
 0x71b   :  { %v2875_v32 = vmul.f32 %v2873_v24, %v8564_v18 }
 0x71d   :  { %v2748_v46 = vpop.xlane.xlu2 %2747 }
 0x71e   :  { %v2749_v57 = vadd.f32 1e-05, %v2748_v46 }
 0x720   :  { %v2849_v38 = vsub.f32 %v2749_v57, %v2848_v5 }
 0x722   :  { %v2876_v13 = vsub.f32 %v2849_v38, %v2875_v32 }
 0x724   :  { %7485 = vrcp.f32 %v2876_v13  ;;  %v2894_v26 = vand.u32 2147483647, %v2876_v13  ;;  %v2896_v12 = vand.u32 2147483648, %v2876_v13  ;;  %vm2890_vm6 = vweird.f32 %v2876_v13 }
 0x725   :  { %v2734_v47 = vpop.xlane.xlu2 %2733  ;;  %v2763_v8 = vpop.xlane.xlu0 %2762 }
 0x726   :  { %v2877_v55 = vmul.f32 %v2873_v24, %v2734_v47  ;;  %v2851_v31 = vsub.f32 %v2763_v8, %v2850_v27  ;;  %v2874_v11 = vmul.f32 %v8560_v25, %v2734_v47  ;;  %v2897_v59 = vor.u32 1.1754944e-38, %v2896_v12 }
 0x727   :  { %vm2895_vm8 = vcmp.eq.f32.partialorder %v2894_v26, 8.507059e+37 }
 0x728   :  { %v2878_v53 = vsub.f32 %v2851_v31, %v2877_v55  ;;  %v2879_v63 = vmul.f32 %v2874_v11, %v2734_v47 }
 0x72a   :  { %v7486_v20 = vpop.eup %7485 }
 0x72b   :  { %v2886_v37 = vmul.f32 %v7486_v20, %v2876_v13  ;;  %vm2891_vm4 = vweird.f32 %v7486_v20 }
 0x72c   :  { %vm2892_vm7 = vmor %vm2890_vm6, %vm2891_vm4 }
 0x72d   :  { %v2887_v54 = vsub.f32 1.0, %v2886_v37  ;;  %v2777_v44 = vpop.xlane.xlu1 %2776 }
 0x72e   :  { %v2778_v51 = vadd.f32 1e-05, %v2777_v44 }
 0x72f   :  { %v2888_v22 = vmul.f32 %v7486_v20, %v2887_v54 }
 0x730   :  { %v2853_v3 = vsub.f32 %v2778_v51, %v2852_v56 }
 0x731   :  { %v2889_v45 = vadd.f32 %v7486_v20, %v2888_v22 }
 0x732   :  { %v2880_v33 = vsub.f32 %v2853_v3, %v2879_v63 }
 0x733   :  { %v2893_v48 = vsel %vm2892_vm7, %v7486_v20, %v2889_v45 }
 0x734   :  { %v2898_v60 = vsel %vm2895_vm8, %v2897_v59, %v2893_v48 }
 0x735   :  { %v2900_v36 = vmul.f32 %v2898_v60, %v2878_v53  ;;  %v2790_v46 = vpop.xlane.xlu2 %2789 }
 0x736   :  { %v2854_v32 = vmul.f32 %v2846_v40, %v2790_v46  ;;  %v2856_v54 = vmul.f32 %v2847_v58, %v2790_v46 }
 0x737   :  { %v2901_v28 = vmul.f32 %v2900_v36, %v2878_v53 }
 0x739   :  { %v2902_v16 = vsub.f32 %v2880_v33, %v2901_v28 }
 0x73b   :  { %7487 = vrcp.f32 %v2902_v16  ;;  %v2916_v55 = vand.u32 2147483648, %v2902_v16  ;;  %vm2910_vm10 = vweird.f32 %v2902_v16  ;;  %v2914_v22 = vand.u32 2147483647, %v2902_v16 }
 0x73d   :  { %v2802_v38 = vpop.xlane.xlu0 %2801  ;;  %v2917_v56 = vor.u32 1.1754944e-38, %v2916_v55  ;;  %vm2915_vm12 = vcmp.eq.f32.partialorder %v2914_v22, 8.507059e+37 }
 0x73e   :  { %v2881_v20 = vmul.f32 %v2873_v24, %v2802_v38  ;;  %v2883_v26 = vmul.f32 %v2874_v11, %v2802_v38 }
 0x741   :  { %v7488_v49 = vpop.eup %7487 }
 0x742   :  { %v2906_v4 = vmul.f32 %v7488_v49, %v2902_v16  ;;  %vm2911_vm9 = vweird.f32 %v7488_v49 }
 0x743   :  { %vm2912_vm11 = vmor %vm2910_vm10, %vm2911_vm9 }
 0x744   :  { %v2907_v5 = vsub.f32 1.0, %v2906_v4 }
 0x745   :  { %v2816_v57 = vpop.xlane.xlu1 %2815 }
 0x746   :  { %v2855_v13 = vsub.f32 %v2816_v57, %v2854_v32  ;;  %v2908_v37 = vmul.f32 %v7488_v49, %v2907_v5 }
 0x748   :  { %v2882_v8 = vsub.f32 %v2855_v13, %v2881_v20  ;;  %v2909_v27 = vadd.f32 %v7488_v49, %v2908_v37 }
 0x74a   :  { %v2903_v31 = vmul.f32 %v2900_v36, %v2882_v8  ;;  %v2913_v45 = vsel %vm2912_vm11, %v7488_v49, %v2909_v27 }
 0x74b   :  { %v2918_v59 = vsel %vm2915_vm12, %v2917_v56, %v2913_v45 }
 0x74d   :  { %v2830_v44 = vpop.xlane.xlu2 %2829 }
 0x74e   :  { %v2857_v12 = vsub.f32 %v2830_v44, %v2856_v54 }
 0x750   :  { %v2884_v51 = vsub.f32 %v2857_v12, %v2883_v26 }
 0x752   :  { %v2904_v40 = vsub.f32 %v2884_v51, %v2903_v31 }
 0x754   :  { %v2920_v48 = vmul.f32 %v2918_v59, %v2904_v40 }
 0x756   :  { %v8578_v24 = vsub.f32 %v8365_v7, %v2920_v48  ;;  %v2921_v58 = vmul.f32 %v2920_v48, %v2878_v53  ;;  %v2926_v3 = vmul.f32 %v2920_v48, %v2734_v47  ;;  %v2931_v47 = vmul.f32 %v2920_v48, %v8570_v10 }
 0x758   :  { %v2941_v63 = vand.u32 2139095040, %v8578_v24  ;;  %v2922_v11 = vsub.f32 %v2882_v8, %v2921_v58  ;;  %v2938_v4 = vand.u32 2147483647, %v8578_v24  ;;  %vm2940_vm10 = vcmp.lt.s32.totalorder %v8578_v24, 0 }
 0x75a   :  { %v2942_v28 = vshrl.u32 %v2941_v63, 23  ;;  %v2923_v33 = vmul.f32 %v2922_v11, %v2898_v60  ;;  %v2945_v60 = vand.u32 8388607, %v2938_v4  ;;  %vm2939_vm11 = vcmp.le.f32.partialorder %v2938_v4, 0.7853982 }
 0x75c   :  { %v7348_v16 = vadd.s32 4294967169, %v2942_v28  ;;  %v8582_v36 = vsub.f32 %v8369_v39, %v2923_v33  ;;  %v2929_v49 = vmul.f32 %v2923_v33, %v8558_v14  ;;  %v2924_v5 = vmul.f32 %v2923_v33, %v8564_v18 }
 0x75e   :  { %v2948_v57 = vadd.s32 1, %v7348_v16  ;;  %3314 = vperm.xlu2 %7415, %v8582_v36   ;;  %v2930_v7 = vsub.f32 %v2790_v46, %v2929_v49  ;;  %v2925_v53 = vsub.f32 %v2802_v38, %v2924_v5  ;;  %v2946_v46 = vor.u32 8388608, %v2945_v60 }
 0x760   :  { %v2932_v32 = vsub.f32 %v2930_v7, %v2931_v47  ;;  %vm2949_vm13 = vcmp.gt.s32.totalorder %v2948_v57, 0  ;;  %v8591_v13 = vsub.f32 %v2925_v53, %v2926_v3  ;;  %v8619_v40 = vshll.u32 %v2946_v46, 8 }
 0x761   :  { %v2950_v39 = vsel %vm2949_vm13, %v2948_v57, 0 }
 0x762   :  { %v2933_v14 = vmul.f32 %v2932_v32, %v8556_v41  ;;  %v2952_v37 = vand.u32 31, %v2950_v39  ;;  %v8599_v8 = vshrl.u32 %v2950_v39, 5  ;;  %v2987_v16 = vand.u32 65535, %v8619_v40 }
 0x763   :  { %v2988_v49 = vshrl.u32 %v8619_v40, 16 }
 0x764   :  { %v8595_v18 = vsub.f32 %v8446_v52, %v2933_v14  ;;  %v8597_v20 = vsub.s32 32, %v2952_v37  ;;  %v2955_v10 = vshll.u32 %v7613_v15, %v2952_v37  ;;  %v2958_v38 = vshll.u32 %v7614_v17, %v2952_v37 }
 0x765   :  { %v2961_v52 = vshll.u32 %v7615_v19, %v2952_v37  ;;  %v2964_v44 = vshll.u32 %v7616_v21, %v2952_v37  ;;  %v2967_v26 = vshll.u32 %v7617_v23, %v2952_v37  ;;  %vm2970_vm14 = vcmp.lt.s32.totalorder %v8599_v8, 1 }
 0x766   :  { %7416 = vset.pattern.permute.xlu2 %v7612_v6  ;;  %v2956_v54 = vshrl.u32 %v7614_v17, %v8597_v20  ;;  %v2959_v41 = vshrl.u32 %v7615_v19, %v8597_v20  ;;  %v2962_v27 = vshrl.u32 %v7616_v21, %v8597_v20  ;;  %v2965_v55 = vshrl.u32 %v7617_v23, %v8597_v20 }
 0x767   :  { %3275 = vperm.xlu2 %7416, %v8595_v18   ;;  %v2968_v12 = vshrl.u32 %v7618_v29, %v8597_v20  ;;  %vm2973_vm15 = vcmp.lt.s32.totalorder %v8599_v8, 4  ;;  %vm2972_vm0 = vcmp.lt.s32.totalorder %v8599_v8, 3  ;;  %vm2971_vm1 = vcmp.lt.s32.totalorder %v8599_v8, 2 }
 0x768   :  { %v2957_v22 = vor.u32 %v2956_v54, %v2955_v10  ;;  %v2960_v31 = vor.u32 %v2959_v41, %v2958_v38  ;;  %v2963_v51 = vor.u32 %v2962_v27, %v2961_v52  ;;  %v2966_v45 = vor.u32 %v2965_v55, %v2964_v44 }
 0x769   :  { %v2969_v56 = vor.u32 %v2968_v12, %v2967_v26 }
 0x76a   :  { %v2978_v59 = vsel %vm2970_vm14, %v2957_v22, %v2960_v31  ;;  %v2982_v48 = vsel %vm2970_vm14, %v2960_v31, %v2963_v51  ;;  %v2979_v58 = vsel %vm2973_vm15, %v2966_v45, 920167782 }
 0x76b   :  { %v2983_v3 = vsel %vm2973_vm15, %v2969_v56, 1326507024  ;;  %v2980_v63 = vsel %vm2972_vm0, %v2963_v51, %v2979_v58 }
 0x76c   :  { %v2984_v11 = vsel %vm2972_vm0, %v2966_v45, %v2983_v3  ;;  %v2981_v28 = vsel %vm2971_vm1, %v2978_v59, %v2980_v63  ;;  %v2975_v45 = vsel %vm2973_vm15, %v2963_v51, 2102212464 }
 0x76d   :  { %v2985_v33 = vsel %vm2971_vm1, %v2982_v48, %v2984_v11  ;;  %v3011_v7 = vand.u32 65535, %v2981_v28  ;;  %v3012_v47 = vshrl.u32 %v2981_v28, 16  ;;  %v2954_v48 = vshrl.u32 %v7613_v15, %v8597_v20 }
 0x76e   :  { %v2989_v5 = vand.u32 65535, %v2985_v33  ;;  %v2990_v57 = vshrl.u32 %v2985_v33, 16 }
 0x76f   :  { %7418 = vset.pattern.permute.xlu2 %v7611_v2  ;;  %v3014_v60 = vmul.u32 %v3012_v47, %v2987_v16  ;;  %v3015_v39 = vmul.u32 %v3011_v7, %v2988_v49  ;;  %v3013_v10 = vmul.u32 %v3011_v7, %v2987_v16  ;;  %v3016_v52 = vmul.u32 %v3012_v47, %v2988_v49 }
 0x770   :  { %v2992_v53 = vmul.u32 %v2990_v57, %v2987_v16  ;;  %v2993_v32 = vmul.u32 %v2989_v5, %v2988_v49  ;;  %v2991_v14 = vmul.u32 %v2989_v5, %v2987_v16  ;;  %v2994_v46 = vmul.u32 %v2990_v57, %v2988_v49 }
 0x771   :  { %v3017_v38 = vshll.u32 %v3014_v60, 16  ;;  %v3019_v44 = vshll.u32 %v3015_v39, 16  ;;  %v3018_v11 = vshrl.u32 %v3014_v60, 16  ;;  %v2974_v33 = vsel %vm2970_vm14, %v2954_v48, %v2957_v22 }
 0x772   :  { %v2995_v37 = vshll.u32 %v2992_v53, 16  ;;  %v2997_v54 = vshll.u32 %v2993_v32, 16  ;;  %v2996_v58 = vshrl.u32 %v2992_v53, 16  ;;  %v2976_v16 = vsel %vm2972_vm0, %v2960_v31, %v2975_v45 }
 0x773   :  { %vm3021_vm3 = vc.u32 %v3013_v10, %v3017_v38  ;;  %v3023_v55 = vadd.s32 %v3017_v38, %v3013_v10  ;;  %v2998_v51 = vshrl.u32 %v2993_v32, 16  ;;  %v3020_v5 = vshrl.u32 %v3015_v39, 16 }
 0x774   :  { %vm2999_vm2 = vc.u32 %v2991_v14, %v2995_v37  ;;  %v3001_v41 = vadd.s32 %v2995_v37, %v2991_v14  ;;  %v3022_v12 = vsel %vm3021_vm3, 1, %v7612_v6  ;;  %v2977_v20 = vsel %vm2971_vm1, %v2974_v33, %v2976_v16 }
 0x775   :  { %v3000_v27 = vsel %vm2999_vm2, 1, %v7612_v6  ;;  %v3024_v59 = vadd.s32 %v3022_v12, %v3016_v52  ;;  %vm3025_vm6 = vc.u32 %v3023_v55, %v3019_v44  ;;  %v3027_v47 = vadd.s32 %v3023_v55, %v3019_v44 }
 0x776   :  { %v3002_v26 = vadd.s32 %v3000_v27, %v2994_v46  ;;  %vm3003_vm4 = vc.u32 %v3001_v41, %v2997_v54  ;;  %v3026_v63 = vsel %vm3025_vm6, 1, %v7612_v6  ;;  %v3031_v60 = vmul.u32 %v8619_v40, %v2977_v20 }
 0x777   :  { %v3004_v56 = vsel %vm3003_vm4, 1, %v7612_v6  ;;  %v3028_v28 = vadd.s32 %v3026_v63, %v3024_v59  ;;  %vm3081_vm2 = vweird.f32 %v8578_v24 }
 0x778   :  { %v3006_v3 = vadd.s32 %v3004_v56, %v3002_v26 }
 0x779   :  { %v3029_v57 = vadd.s32 %v3028_v28, %v3018_v11 }
 0x77a   :  { %v3007_v49 = vadd.s32 %v3006_v3, %v2996_v58 }
 0x77b   :  { %v3030_v53 = vadd.s32 %v3029_v57, %v3020_v5 }
 0x77c   :  { %v3008_v7 = vadd.s32 %v3007_v49, %v2998_v51 }
 0x77d   :  { %v3034_v14 = vadd.s32 1, %v3030_v53 }
 0x77e   :  { %vm3033_vm7 = vc.u32 %v3008_v7, %v3027_v47  ;;  %v3032_v8 = vadd.s32 %v3027_v47, %v3008_v7 }
 0x77f   :  { %v3035_v37 = vsel %vm3033_vm7, %v3034_v14, %v3030_v53 }
 0x780   :  { %v3036_v46 = vadd.s32 %v3035_v37, %v3031_v60 }
 0x782   :  { %v3037_v22 = vadd.s32 536870912, %v3036_v46 }
 0x784   :  { %v3038_v10 = vshrl.u32 %v3037_v22, 30 }
 0x786   :  { %v3039_v38 = vshll.u32 %v3038_v10, 30  ;;  %v3062_v11 = vsub.s32 4, %v3038_v10 }
 0x788   :  { %v3040_v31 = vsub.s32 %v3036_v46, %v3039_v38  ;;  %v3063_v49 = vsel %vm2940_vm10, %v3062_v11, %v3038_v10 }
 0x789   :  { %v3065_v7 = vsel %vm2939_vm11, 0, %v3063_v49 }
 0x78a   :  { %vm3041_vm8 = vcmp.lt.s32.totalorder %v3040_v31, 0  ;;  %v3042_v32 = vsub.s32 0, %v3040_v31  ;;  %v3236_v60 = vadd.s32 3, %v3065_v7  ;;  %v3082_v38 = vand.u32 3, %v3065_v7 }
 0x78c   :  { %v3043_v39 = vsel %vm3041_vm8, %v3042_v32, %v3040_v31  ;;  %vm3083_vm12 = vcmp.lt.s32.totalorder %v3082_v38, 2  ;;  %vm3084_vm13 = vcmp.eq.s32.totalorder %v3082_v38, 0  ;;  %vm3087_vm14 = vcmp.eq.s32.totalorder %v3082_v38, 2 }
 0x78d   :  { %v3044_v54 = vclz %v3043_v39 }
 0x78f   :  { %v7349_v41 = vadd.s32 4294967294, %v3044_v54 }
 0x791   :  { %vm7350_vm9 = vcmp.lt.s32.totalorder %v7349_v41, 0 }
 0x792   :  { %v3047_v52 = vsel %vm7350_vm9, 0, %v7349_v41 }
 0x793   :  { %v3048_v27 = vsub.s32 32, %v3047_v52  ;;  %v3052_v44 = vsub.s32 4294967266, %v3047_v52  ;;  %v3049_v55 = vshll.u32 %v3040_v31, %v3047_v52  ;;  %v3237_v31 = vand.u32 3, %v3236_v60 }
 0x795   :  { %v3050_v26 = vshrl.u32 %v3032_v8, %v3048_v27  ;;  %v3053_v12 = vadd.s32 127, %v3052_v44  ;;  %vm3238_vm15 = vcmp.lt.s32.totalorder %v3237_v31, 2  ;;  %vm3239_vm0 = vcmp.eq.s32.totalorder %v3237_v31, 0 }
 0x796   :  { %vm3242_vm1 = vcmp.eq.s32.totalorder %v3237_v31, 2 }
 0x797   :  { %v3051_v40 = vor.u32 %v3050_v26, %v3049_v55  ;;  %v3054_v45 = vshll.u32 %v3053_v12, 23 }
 0x799   :  { %v3055_v56 = vor.u32 4788187, %v3054_v45  ;;  %v3058_v48 = vcvt.s32.f32 %v3051_v40  ;;  %v2928_v40 = vmul.f32 %v8591_v13, %v8560_v25 }
 0x79b   :  { %v3056_v59 = vand.u32 2147483647, %v3055_v56  ;;  %v8666_v45 = vsub.f32 %v8453_v61, %v2928_v40  ;;  %v3253_v56 = vld.sshfl [vmem:[#allocation1] sm:$0xff pattern:$0x75316420] }
 0x79d   :  { %v3059_v58 = vmul.f32 %v3058_v48, %v3056_v59  ;;  %v3254_v59 = vld.sshfl [vmem:[#allocation1 + $0x8] sm:$0xff pattern:$0x75316420] }
 0x79e   :  { %3264 = vst [vmem:[#allocation1] ss:$2 sm:$0xff] %v7729_v0 }
 0x79f   :  { %v3060_v3 = vxor.u32 2147483648, %v3059_v58 }
 0x7a1   :  { %v3061_v63 = vsel %vm2940_vm10, %v3060_v3, %v3059_v58 }
 0x7a2   :  { %v3064_v28 = vsel %vm2939_vm11, %v8578_v24, %v3061_v63 }
 0x7a3   :  { %v3066_v33 = vmul.f32 %v3064_v28, %v3064_v28 }
 0x7a5   :  { %v3067_v16 = vmul.f32 -0.001358992, %v3066_v33  ;;  %v3074_v51 = vmul.f32 -0.00019511016, %v3066_v33 }
 0x7a6   :  { %v3265_v48 = vld.sshfl [vmem:[#allocation1] sm:$0xff pattern:$0x75316420]  ;;  %v3266_v58 = vld.sshfl [vmem:[#allocation1 + $0x8] sm:$0xff pattern:$0x75316420] }
 0x7a7   :  { %v3068_v5 = vadd.f32 0.041655596, %v3067_v16  ;;  %v3075_v57 = vadd.f32 0.008332121, %v3074_v51  ;;  %3296 = vst [vmem:[#allocation1] ss:$2 sm:$0xff] %v7723_v42 }
 0x7a9   :  { %v3069_v47 = vmul.f32 %v3068_v5, %v3066_v33  ;;  %v3076_v20 = vmul.f32 %v3075_v57, %v3066_v33 }
 0x7ab   :  { %v3070_v53 = vadd.f32 -0.4999988, %v3069_v47  ;;  %v3077_v14 = vadd.f32 -0.16666654, %v3076_v20 }
 0x7ad   :  { %v3071_v37 = vmul.f32 %v3070_v53, %v3066_v33  ;;  %v3078_v46 = vmul.f32 %v3077_v14, %v3066_v33 }
 0x7ae   :  { %v3297_v3 = vld.sshfl [vmem:[#allocation1] sm:$0xff pattern:$0x75316420]  ;;  %v3298_v63 = vld.sshfl [vmem:[#allocation1 + $0x8] sm:$0xff pattern:$0x75316420] }
 0x7af   :  { %v3072_v22 = vadd.f32 1.0, %v3071_v37  ;;  %v3079_v4 = vadd.f32 1.0, %v3078_v46  ;;  %3303 = vst [vmem:[#allocation1] ss:$2 sm:$0xff] %v7729_v0 }
 0x7b1   :  { %v3080_v32 = vmul.f32 %v3079_v4, %v3064_v28  ;;  %v3088_v39 = vxor.u32 2147483648, %v3072_v22 }
 0x7b3   :  { %v3085_v54 = vxor.u32 2147483648, %v3080_v32  ;;  %v3089_v41 = vsel %vm3087_vm14, %v3088_v39, %v3080_v32  ;;  %v3244_v8 = vsel %vm3242_vm1, %v3088_v39, %v3080_v32 }
 0x7b5   :  { %v3086_v10 = vsel %vm3084_vm13, %v3072_v22, %v3085_v54  ;;  %v3241_v52 = vsel %vm3239_vm0, %v3072_v22, %v3085_v54 }
 0x7b6   :  { %v3090_v27 = vsel %vm3083_vm12, %v3086_v10, %v3089_v41  ;;  %v3245_v44 = vsel %vm3238_vm15, %v3241_v52, %v3244_v8  ;;  %v3304_v61 = vld.sshfl [vmem:[#allocation1] sm:$0xff pattern:$0x75316420]  ;;  %v3305_v25 = vld.sshfl [vmem:[#allocation1 + $0x8] sm:$0xff pattern:$0x75316420] }
 0x7b7   :  { %v3091_v55 = vsel %vm3081_vm2, nan, %v3090_v27  ;;  %v3246_v26 = vsel %vm3081_vm2, nan, %v3245_v44  ;;  %3327 = vst [vmem:[#allocation1] ss:$2 sm:$0xff] %v7737_v50 }
 0x7b8   :  { %3249 = vperm.xlu0 %7413, %v3091_v55   ;;  %v3290_v12 = vsub.f32 0.0, %v3246_v26  ;;  %v3315_v49 = vpop.permute.xlu2 %3314 }
 0x7ba   :  { %3293 = vperm.xlu1 %7414, %v3290_v12  }
 0x7be   :  { %v3328_v8 = vld.sshfl [vmem:[#allocation1] sm:$0xff pattern:$0x75316420]  ;;  %v3329_v27 = vld.sshfl [vmem:[#allocation1 + $0x8] sm:$0xff pattern:$0x75316420] }
 0x7c1   :  { %v3276_v31 = vpop.permute.xlu2 %3275 }
 0x7c2   :  { %3261 = vperm.xlu1 %7414, %v3246_v26  }
 0x7ca   :  { %7417 = vset.pattern.permute.xlu1 %v7619_v62 }
 0x7cb   :  { %3282 = vperm.xlu1 %7417, %v8666_v45  }
 0x7d3   :  { %7419 = vset.pattern.permute.xlu1 %v7610_v1 }
 0x82a   :  { %v3250_v13 = vpop.permute.xlu0 %3249 }
 0x82b   :  { %v3308_v16 = vmul.f32 %v3304_v61, %v3250_v13  ;;  %v3309_v51 = vmul.f32 %v3305_v25, %v3250_v13  ;;  %v3257_v60 = vmul.f32 %v3253_v56, %v3250_v13  ;;  %v3258_v37 = vmul.f32 %v3254_v59, %v3250_v13 }
 0x82c   :  { %v3294_v11 = vpop.permute.xlu1 %3293 }
 0x82d   :  { %v3301_v28 = vmul.f32 %v3297_v3, %v3294_v11  ;;  %v3302_v33 = vmul.f32 %v3298_v63, %v3294_v11 }
 0x82f   :  { %v3310_v5 = vadd.f32 %v3308_v16, %v3301_v28  ;;  %v3311_v57 = vadd.f32 %v3309_v51, %v3302_v33 }
 0x831   :  { %v3317_v7 = vadd.f32 %v3315_v49, %v3310_v5  ;;  %v3318_v47 = vadd.f32 %v3315_v49, %v3311_v57  ;;  %v8682_v57 = vld [vmem:[%s9867_s2] sm:$0xff] }
 0x833   :  { %v3319_v20 = vmax.f32 %v3317_v7, 0.1  ;;  %v3320_v53 = vmax.f32 %v3318_v47, 0.1  ;;  %v3348_v52 = vsub.f32 %v3317_v7, %v3315_v49  ;;  %v3349_v26 = vsub.f32 %v3318_v47, %v3315_v49 }
 0x834   :  { %v3262_v14 = vpop.permute.xlu1 %3261 }
 0x835   :  { %7489 = vrcp.f32 %v3319_v20  ;;  %v3269_v46 = vmul.f32 %v3265_v48, %v3262_v14  ;;  %v3270_v22 = vmul.f32 %v3266_v58, %v3262_v14 }
 0x836   :  { %7491 = vrcp.f32 %v3320_v53 }
 0x837   :  { %v3271_v4 = vadd.f32 %v3269_v46, %v3257_v60  ;;  %v3272_v38 = vadd.f32 %v3270_v22, %v3258_v37 }
 0x839   :  { %v3278_v32 = vadd.f32 %v3276_v31, %v3271_v4  ;;  %v3279_v39 = vadd.f32 %v3276_v31, %v3272_v38 }
 0x83b   :  { %v7490_v54 = vpop.eup %7489  ;;  %v3355_v10 = vrot.slane %v3279_v39, 4  ;;  %v3350_v56 = vsub.f32 %v3276_v31, %v3278_v32  ;;  %v3351_v48 = vsub.f32 %v3276_v31, %v3279_v39 }
 0x83c   :  { %v7492_v41 = vpop.eup %7491  ;;  %v3325_v44 = vmul.f32 %v7490_v54, %v3278_v32  ;;  %v3323_v55 = vmul.f32 %v7490_v54, %v7490_v54  ;;  %v3365_v20 = vmul.f32 %v7490_v54, %v3348_v52 }
 0x83d   :  { %v3324_v12 = vmul.f32 %v7492_v41, %v7492_v41  ;;  %v3326_v40 = vmul.f32 %v7492_v41, %v3279_v39  ;;  %v3283_v59 = vpop.permute.xlu1 %3282  ;;  %v3342_v58 = vrot.slane %v7492_v41, 4  ;;  %v3356_v3 = vsel %vm426_vm5, %v3278_v32, %v3355_v10 }
 0x83e   :  { %v3367_v63 = vmul.f32 %v3323_v55, %v3278_v32  ;;  %v3366_v61 = vmul.f32 %v7492_v41, %v3349_v26  ;;  %v3332_v25 = vsub.f32 %v3325_v44, %v3328_v8  ;;  %v3358_v33 = vmul.f32 %v3356_v3, %v7761_v35 }
 0x83f   :  { %v3333_v13 = vsub.f32 %v3326_v40, %v3329_v27  ;;  %v3368_v11 = vmul.f32 %v3324_v12, %v3279_v39  ;;  %v3343_v28 = vsel %vm426_vm5, %v7490_v54, %v3342_v58  ;;  %v3361_v16 = vrot.slane %v3324_v12, 4 }
 0x840   :  { %v3287_v51 = vperm.slane %v3283_v59, %v7742_v9  ;;  %v3352_v7 = vmul.f32 %v8682_v57, %v3343_v28  ;;  %v3369_v47 = vmul.f32 %v3367_v63, %v3350_v56  ;;  %v3384_v46 = vrot.slane %v3351_v48, 4 }
 0x841   :  { %v3336_v49 = vrot.slane %v3333_v13, 4  ;;  %v3370_v5 = vmul.f32 %v3368_v11, %v3351_v48  ;;  %v3362_v53 = vsel %vm426_vm5, %v3323_v55, %v3361_v16  ;;  %v8704_v55 = vld [vmem:[%s9867_s2 + $0x8] sm:$0xff] }
 0x842   :  { %v3289_v14 = vadd.f32 %v8470_v34, %v3287_v51  ;;  %v3388_v22 = vmul.f32 %v3352_v7, %v3352_v7  ;;  %v8689_v38 = vmul.f32 %v3362_v53, %v3358_v33  ;;  %v3371_v10 = vsub.f32 %v3365_v20, %v3369_v47 }
 0x843   :  { %v3337_v60 = vsel %vm426_vm5, %v3332_v25, %v3336_v49  ;;  %v3372_v37 = vsub.f32 %v3366_v61, %v3370_v5  ;;  %v3385_v8 = vsel %vm426_vm5, %v3350_v56, %v3384_v46  ;;  %v8726_v47 = vmul.f32 %v8704_v55, %v3343_v28 }
 0x844   :  { %v3339_v4 = vmul.f32 %v8682_v57, %v3337_v60  ;;  %v3345_v31 = vmul.f32 %v3343_v28, %v3289_v14  ;;  %v3380_v32 = vmul.f32 %v3289_v14, %v7759_v30  ;;  %3390 = vst [vmem:[#allocation1] ss:$2 sm:$0xff] %v3388_v22  ;;  %v3401_v40 = vmul.f32 %v8689_v38, %v3352_v7 }
 0x845   :  { %v3375_v39 = vrot.slane %v3372_v37, 4  ;;  %v3425_v20 = vmul.f32 %v8726_v47, %v8726_v47 }
 0x846   :  { %v8692_v54 = vmul.f32 %v3352_v7, %v3339_v4  ;;  %v3530_v41 = vmul.f32 %v8689_v38, %v3339_v4  ;;  %v3346_v34 = vsub.f32 %v3345_v31, %v8484_v43  ;;  %v3381_v52 = vmul.f32 %v3380_v32, %v3362_v53 }
 0x847   :  { %v3376_v27 = vsel %vm426_vm5, %v3371_v10, %v3375_v39 }
 0x848   :  { %v8699_v44 = vmul.f32 %v8682_v57, %v3376_v27  ;;  %v8707_v26 = vmul.f32 %v8704_v55, %v3346_v34  ;;  %v8709_v12 = vmul.f32 %v3385_v8, %v3381_v52  ;;  %v3463_v34 = vmul.f32 %v3381_v52, %v3381_v52 }
 0x849   :  { %v3462_v8 = vmul.f32 %v8689_v38, %v8689_v38 }
 0x84a   :  { %v3544_v43 = vmul.f32 %v8699_v44, %v3339_v4  ;;  %v3531_v56 = vmul.f32 %v3381_v52, %v8707_v26  ;;  %v3545_v59 = vmul.f32 %v8709_v12, %v8707_v26  ;;  %v3413_v11 = vmul.f32 %v8699_v44, %v3352_v7 }
 0x84b   :  { %v3391_v48 = vld.sshfl [vmem:[#allocation1] sm:$0xff pattern:$0x75316420]  ;;  %v3392_v58 = vld.sshfl [vmem:[#allocation1 + $0x8] sm:$0xff pattern:$0x75316420]  ;;  %v3438_v7 = vmul.f32 %v3381_v52, %v8726_v47  ;;  %v3450_v28 = vmul.f32 %v8709_v12, %v8726_v47  ;;  %v3464_v27 = vadd.f32 %v3463_v34, %v3462_v8 }
 0x84c   :  { %v3395_v3 = vsel %vm426_vm5, %v3391_v48, 0.0  ;;  %v3396_v63 = vsel %vm426_vm5, %v3392_v58, 0.0  ;;  %3403 = vst [vmem:[#allocation1] ss:$2 sm:$0xff] %v3401_v40  ;;  %v8718_v61 = vadd.f32 %v3531_v56, %v3530_v41  ;;  %v8720_v25 = vadd.f32 %v3545_v59, %v3544_v43 }
 0x84d   :  { %v3397_v13 = vadd.f32 %v3396_v63, %v3395_v3 }
 0x84f   :  { %3398 = vadd.xlane.f32.xlu2 %v3397_v13  ;;  %v3477_v13 = vmul.f32 %v8699_v44, %v8689_v38 }
 0x853   :  { %v3404_v33 = vld.sshfl [vmem:[#allocation1] sm:$0xff pattern:$0x75316420]  ;;  %v3405_v16 = vld.sshfl [vmem:[#allocation1 + $0x8] sm:$0xff pattern:$0x75316420] }
 0x854   :  { %v3408_v51 = vsel %vm426_vm5, %v3404_v33, 0.0  ;;  %v3409_v49 = vsel %vm426_vm5, %v3405_v16, 0.0  ;;  %3415 = vst [vmem:[#allocation1] ss:$2 sm:$0xff] %v3413_v11  ;;  %v3478_v11 = vmul.f32 %v8709_v12, %v3381_v52 }
 0x855   :  { %v3410_v5 = vadd.f32 %v3409_v49, %v3408_v51 }
 0x856   :  { %v3479_v33 = vadd.f32 %v3478_v11, %v3477_v13 }
 0x857   :  { %3411 = vadd.xlane.f32.xlu1 %v3410_v5 }
 0x85b   :  { %v3416_v53 = vld.sshfl [vmem:[#allocation1] sm:$0xff pattern:$0x75316420]  ;;  %v3417_v14 = vld.sshfl [vmem:[#allocation1 + $0x8] sm:$0xff pattern:$0x75316420] }
 0x85c   :  { %3427 = vst [vmem:[#allocation1] ss:$2 sm:$0xff] %v3425_v20  ;;  %v3420_v43 = vsel %vm426_vm5, %v3416_v53, 0.0  ;;  %v3421_v40 = vsel %vm426_vm5, %v3417_v14, 0.0  ;;  %v3491_v53 = vmul.f32 %v8699_v44, %v8699_v44  ;;  %v3492_v14 = vmul.f32 %v8709_v12, %v8709_v12 }
 0x85d   :  { %v3422_v3 = vadd.f32 %v3421_v40, %v3420_v43 }
 0x85e   :  { %v3493_v38 = vadd.f32 %v3492_v14, %v3491_v53 }
 0x863   :  { %v3428_v60 = vld.sshfl [vmem:[#allocation1] sm:$0xff pattern:$0x75316420]  ;;  %v3429_v37 = vld.sshfl [vmem:[#allocation1 + $0x8] sm:$0xff pattern:$0x75316420] }
 0x864   :  { %v3432_v46 = vsel %vm426_vm5, %v3428_v60, 0.0  ;;  %v3433_v22 = vsel %vm426_vm5, %v3429_v37, 0.0  ;;  %3440 = vst [vmem:[#allocation1] ss:$2 sm:$0xff] %v3438_v7 }
 0x865   :  { %v3434_v4 = vadd.f32 %v3433_v22, %v3432_v46 }
 0x867   :  { %3435 = vadd.xlane.f32.xlu0 %v3434_v4 }
 0x86b   :  { %v3441_v31 = vld.sshfl [vmem:[#allocation1] sm:$0xff pattern:$0x75316420]  ;;  %v3442_v32 = vld.sshfl [vmem:[#allocation1 + $0x8] sm:$0xff pattern:$0x75316420] }
 0x86c   :  { %v3445_v39 = vsel %vm426_vm5, %v3441_v31, 0.0  ;;  %v3446_v10 = vsel %vm426_vm5, %v3442_v32, 0.0  ;;  %3452 = vst [vmem:[#allocation1] ss:$2 sm:$0xff] %v3450_v28  ;;  %v3518_v31 = vmul.f32 %v8726_v47, %v8707_v26 }
 0x86d   :  { %v3447_v41 = vadd.f32 %v3446_v10, %v3445_v39 }
 0x86f   :  { %3448 = vadd.xlane.f32.xlu2 %v3447_v41 }
 0x873   :  { %v3453_v56 = vld.sshfl [vmem:[#allocation1] sm:$0xff pattern:$0x75316420]  ;;  %v3454_v59 = vld.sshfl [vmem:[#allocation1 + $0x8] sm:$0xff pattern:$0x75316420] }
 0x874   :  { %v3457_v48 = vsel %vm426_vm5, %v3453_v56, 0.0  ;;  %v3458_v58 = vsel %vm426_vm5, %v3454_v59, 0.0  ;;  %3466 = vst [vmem:[#allocation1] ss:$2 sm:$0xff] %v3464_v27 }
 0x875   :  { %v3459_v63 = vadd.f32 %v3458_v58, %v3457_v48 }
 0x877   :  { %3423 = vadd.xlane.f32.xlu2 %v3422_v3  ;;  %3460 = vadd.xlane.f32.xlu1 %v3459_v63 }
 0x87b   :  { %v3467_v16 = vld.sshfl [vmem:[#allocation1] sm:$0xff pattern:$0x75316420]  ;;  %v3468_v51 = vld.sshfl [vmem:[#allocation1 + $0x8] sm:$0xff pattern:$0x75316420] }
 0x87c   :  { %v3471_v49 = vsel %vm426_vm5, %v3467_v16, 0.0  ;;  %v3472_v5 = vsel %vm426_vm5, %v3468_v51, 0.0  ;;  %3481 = vst [vmem:[#allocation1] ss:$2 sm:$0xff] %v3479_v33 }
 0x87d   :  { %v3473_v20 = vadd.f32 %v3472_v5, %v3471_v49 }
 0x87f   :  { %3474 = vadd.xlane.f32.xlu0 %v3473_v20 }
 0x883   :  { %v3482_v52 = vld.sshfl [vmem:[#allocation1] sm:$0xff pattern:$0x75316420]  ;;  %v3483_v7 = vld.sshfl [vmem:[#allocation1 + $0x8] sm:$0xff pattern:$0x75316420] }
 0x884   :  { %v3486_v60 = vsel %vm426_vm5, %v3482_v52, 0.0  ;;  %v3487_v37 = vsel %vm426_vm5, %v3483_v7, 0.0  ;;  %3495 = vst [vmem:[#allocation1] ss:$2 sm:$0xff] %v3493_v38 }
 0x885   :  { %v3488_v46 = vadd.f32 %v3487_v37, %v3486_v60 }
 0x887   :  { %3489 = vadd.xlane.f32.xlu0 %v3488_v46 }
 0x88b   :  { %v3496_v22 = vld.sshfl [vmem:[#allocation1] sm:$0xff pattern:$0x75316420]  ;;  %v3497_v4 = vld.sshfl [vmem:[#allocation1 + $0x8] sm:$0xff pattern:$0x75316420] }
 0x88c   :  { %v3500_v28 = vsel %vm426_vm5, %v3496_v22, 0.0  ;;  %v3501_v44 = vsel %vm426_vm5, %v3497_v4, 0.0  ;;  %3508 = vst [vmem:[#allocation1] ss:$2 sm:$0xff] %v8692_v54 }
 0x88d   :  { %v3502_v12 = vadd.f32 %v3501_v44, %v3500_v28 }
 0x88f   :  { %3503 = vadd.xlane.f32.xlu2 %v3502_v12 }
 0x893   :  { %v3509_v32 = vld.sshfl [vmem:[#allocation1] sm:$0xff pattern:$0x75316420]  ;;  %v3510_v39 = vld.sshfl [vmem:[#allocation1 + $0x8] sm:$0xff pattern:$0x75316420] }
 0x894   :  { %v3513_v10 = vsel %vm426_vm5, %v3509_v32, 0.0  ;;  %v3514_v41 = vsel %vm426_vm5, %v3510_v39, 0.0  ;;  %3520 = vst [vmem:[#allocation1] ss:$2 sm:$0xff] %v3518_v31 }
 0x895   :  { %v3515_v34 = vadd.f32 %v3514_v41, %v3513_v10 }
 0x897   :  { %3516 = vadd.xlane.f32.xlu1 %v3515_v34 }
 0x89b   :  { %v3521_v8 = vld.sshfl [vmem:[#allocation1] sm:$0xff pattern:$0x75316420]  ;;  %v3522_v27 = vld.sshfl [vmem:[#allocation1 + $0x8] sm:$0xff pattern:$0x75316420] }
 0x89c   :  { %v3525_v43 = vsel %vm426_vm5, %v3521_v8, 0.0  ;;  %v3526_v54 = vsel %vm426_vm5, %v3522_v27, 0.0  ;;  %3534 = vst [vmem:[#allocation1] ss:$2 sm:$0xff] %v8718_v61 }
 0x89d   :  { %v3527_v40 = vadd.f32 %v3526_v54, %v3525_v43 }
 0x89f   :  { %3528 = vadd.xlane.f32.xlu0 %v3527_v40 }
 0x8a3   :  { %v3535_v26 = vld.sshfl [vmem:[#allocation1] sm:$0xff pattern:$0x75316420]  ;;  %v3536_v47 = vld.sshfl [vmem:[#allocation1 + $0x8] sm:$0xff pattern:$0x75316420] }
 0x8a4   :  { %v3539_v56 = vsel %vm426_vm5, %v3535_v26, 0.0  ;;  %v3540_v59 = vsel %vm426_vm5, %v3536_v47, 0.0  ;;  %3548 = vst [vmem:[#allocation1] ss:$2 sm:$0xff] %v8720_v25 }
 0x8a5   :  { %v3541_v48 = vadd.f32 %v3540_v59, %v3539_v56 }
 0x8a7   :  { %3542 = vadd.xlane.f32.xlu2 %v3541_v48 }
 0x8ab   :  { %v3549_v58 = vld.sshfl [vmem:[#allocation1] sm:$0xff pattern:$0x75316420]  ;;  %v3550_v3 = vld.sshfl [vmem:[#allocation1 + $0x8] sm:$0xff pattern:$0x75316420] }
 0x8ac   :  { %v3553_v63 = vsel %vm426_vm5, %v3549_v58, 0.0  ;;  %v3554_v13 = vsel %vm426_vm5, %v3550_v3, 0.0  ;;  %3979 = vst [vmem:[#allocation1] ss:$2 sm:$0xff] %v7723_v42 }
 0x8ad   :  { %v3555_v61 = vadd.f32 %v3554_v13, %v3553_v63 }
 0x8af   :  { %3556 = vadd.xlane.f32.xlu1 %v3555_v61 }
 0x8c2   :  { %v3399_v11 = vpop.xlane.xlu2 %3398 }
 0x8c3   :  { %v3400_v33 = vadd.f32 1e-05, %v3399_v11 }
 0x8c5   :  { %7493 = vrcp.f32 %v3400_v33  ;;  %v3569_v52 = vand.u32 2147483648, %v3400_v33  ;;  %vm3563_vm4 = vweird.f32 %v3400_v33  ;;  %v3567_v60 = vand.u32 2147483647, %v3400_v33 }
 0x8c7   :  { %v3570_v28 = vor.u32 1.1754944e-38, %v3569_v52  ;;  %vm3568_vm9 = vcmp.eq.f32.partialorder %v3567_v60, 8.507059e+37 }
 0x8ca   :  { %v8772_v39 = vpop.xlane.xlu1 %3411 }
 0x8cb   :  { %v7494_v16 = vpop.eup %7493 }
 0x8cc   :  { %v3559_v51 = vmul.f32 %v7494_v16, %v3400_v33  ;;  %vm3564_vm3 = vweird.f32 %v7494_v16 }
 0x8cd   :  { %vm3565_vm6 = vmor %vm3563_vm4, %vm3564_vm3 }
 0x8ce   :  { %v3560_v25 = vsub.f32 1.0, %v3559_v51 }
 0x8d0   :  { %v3561_v20 = vmul.f32 %v7494_v16, %v3560_v25 }
 0x8d2   :  { %v3562_v38 = vadd.f32 %v7494_v16, %v3561_v20 }
 0x8d4   :  { %v3566_v22 = vsel %vm3565_vm6, %v7494_v16, %v3562_v38 }
 0x8d5   :  { %v8770_v12 = vsel %vm3568_vm9, %v3570_v28, %v3566_v22 }
 0x8d6   :  { %v3573_v41 = vmul.f32 %v8770_v12, %v8772_v39 }
 0x8d8   :  { %v3575_v43 = vmul.f32 %v3573_v41, %v8772_v39 }
 0x8da   :  { %v3436_v49 = vpop.xlane.xlu0 %3435 }
 0x8db   :  { %v3437_v5 = vadd.f32 1e-05, %v3436_v49 }
 0x8dd   :  { %7495 = vrcp.f32 %v3437_v5  ;;  %v3596_v46 = vand.u32 2147483648, %v3437_v5  ;;  %v3594_v4 = vand.u32 2147483647, %v3437_v5  ;;  %vm3590_vm8 = vweird.f32 %v3437_v5 }
 0x8df   :  { %v3597_v32 = vor.u32 1.1754944e-38, %v3596_v46  ;;  %vm3595_vm11 = vcmp.eq.f32.partialorder %v3594_v4, 8.507059e+37 }
 0x8e2   :  { %v8778_v34 = vpop.xlane.xlu2 %3448 }
 0x8e3   :  { %v7496_v53 = vpop.eup %7495 }
 0x8e4   :  { %v3586_v14 = vmul.f32 %v7496_v53, %v3437_v5  ;;  %vm3591_vm7 = vweird.f32 %v7496_v53 }
 0x8e5   :  { %vm3592_vm10 = vmor %vm3590_vm8, %vm3591_vm7 }
 0x8e6   :  { %v3587_v7 = vsub.f32 1.0, %v3586_v14 }
 0x8e8   :  { %v3588_v37 = vmul.f32 %v7496_v53, %v3587_v7 }
 0x8ea   :  { %v3589_v44 = vadd.f32 %v7496_v53, %v3588_v37  ;;  %v8784_v56 = vpop.xlane.xlu2 %3423  ;;  %v3461_v5 = vpop.xlane.xlu1 %3460 }
 0x8eb   :  { %v3574_v58 = vmul.f32 %v8770_v12, %v8784_v56  ;;  %v3577_v13 = vmul.f32 %v3573_v41, %v8784_v56 }
 0x8ec   :  { %v3593_v31 = vsel %vm3592_vm10, %v7496_v53, %v3589_v44 }
 0x8ed   :  { %v8774_v10 = vsel %vm3595_vm11, %v3597_v32, %v3593_v31  ;;  %v3579_v25 = vmul.f32 %v3574_v58, %v8784_v56 }
 0x8ee   :  { %v3600_v8 = vmul.f32 %v8774_v10, %v8778_v34  ;;  %v3601_v20 = vmul.f32 %v8774_v10, %v3461_v5 }
 0x8f0   :  { %v3602_v40 = vmul.f32 %v3600_v8, %v8778_v34  ;;  %v3604_v53 = vmul.f32 %v3600_v8, %v3461_v5  ;;  %v3606_v46 = vmul.f32 %v3601_v20, %v3461_v5 }
 0x8f2   :  { %v3475_v27 = vpop.xlane.xlu0 %3474 }
 0x8f3   :  { %v3476_v54 = vadd.f32 1e-05, %v3475_v27 }
 0x8f5   :  { %v3576_v26 = vsub.f32 %v3476_v54, %v3575_v43 }
 0x8f7   :  { %v3603_v47 = vsub.f32 %v3576_v26, %v3602_v40 }
 0x8f9   :  { %7497 = vrcp.f32 %v3603_v47  ;;  %v3621_v11 = vand.u32 2147483647, %v3603_v47  ;;  %v3623_v33 = vand.u32 2147483648, %v3603_v47  ;;  %vm3617_vm13 = vweird.f32 %v3603_v47 }
 0x8fa   :  { %v3490_v3 = vpop.xlane.xlu0 %3489 }
 0x8fb   :  { %v3578_v16 = vsub.f32 %v3490_v3, %v3577_v13  ;;  %v3624_v38 = vor.u32 1.1754944e-38, %v3623_v33  ;;  %vm3622_vm15 = vcmp.eq.f32.partialorder %v3621_v11, 8.507059e+37 }
 0x8fd   :  { %v3605_v52 = vsub.f32 %v3578_v16, %v3604_v53 }
 0x8ff   :  { %v7498_v59 = vpop.eup %7497 }
 0x900   :  { %v3613_v48 = vmul.f32 %v7498_v59, %v3603_v47  ;;  %vm3618_vm12 = vweird.f32 %v7498_v59 }
 0x901   :  { %vm3619_vm14 = vmor %vm3617_vm13, %vm3618_vm12 }
 0x902   :  { %v3614_v63 = vsub.f32 1.0, %v3613_v48  ;;  %v3504_v61 = vpop.xlane.xlu2 %3503 }
 0x903   :  { %v3505_v49 = vadd.f32 1e-05, %v3504_v61 }
 0x904   :  { %v3615_v51 = vmul.f32 %v7498_v59, %v3614_v63 }
 0x905   :  { %v3580_v60 = vsub.f32 %v3505_v49, %v3579_v25 }
 0x906   :  { %v3616_v14 = vadd.f32 %v7498_v59, %v3615_v51 }
 0x907   :  { %v3607_v28 = vsub.f32 %v3580_v60, %v3606_v46 }
 0x908   :  { %v3620_v7 = vsel %vm3619_vm14, %v7498_v59, %v3616_v14 }
 0x909   :  { %v3625_v37 = vsel %vm3622_vm15, %v3624_v38, %v3620_v7 }
 0x90a   :  { %v3627_v22 = vmul.f32 %v3625_v37, %v3605_v52  ;;  %v3517_v27 = vpop.xlane.xlu1 %3516 }
 0x90b   :  { %v3581_v40 = vmul.f32 %v3573_v41, %v3517_v27  ;;  %v3583_v63 = vmul.f32 %v3574_v58, %v3517_v27 }
 0x90c   :  { %v3628_v4 = vmul.f32 %v3627_v22, %v3605_v52 }
 0x90e   :  { %v3629_v44 = vsub.f32 %v3607_v28, %v3628_v4 }
 0x910   :  { %7499 = vrcp.f32 %v3629_v44  ;;  %v3643_v61 = vand.u32 2147483648, %v3629_v44  ;;  %vm3637_vm1 = vweird.f32 %v3629_v44  ;;  %v3641_v16 = vand.u32 2147483647, %v3629_v44 }
 0x912   :  { %v3529_v26 = vpop.xlane.xlu0 %3528  ;;  %v3644_v14 = vor.u32 1.1754944e-38, %v3643_v61  ;;  %vm3642_vm3 = vcmp.eq.f32.partialorder %v3641_v16, 8.507059e+37 }
 0x913   :  { %v3608_v3 = vmul.f32 %v3600_v8, %v3529_v26  ;;  %v3610_v33 = vmul.f32 %v3601_v20, %v3529_v26 }
 0x916   :  { %v7500_v31 = vpop.eup %7499 }
 0x917   :  { %v3633_v32 = vmul.f32 %v7500_v31, %v3629_v44  ;;  %vm3638_vm0 = vweird.f32 %v7500_v31 }
 0x918   :  { %vm3639_vm2 = vmor %vm3637_vm1, %vm3638_vm0 }
 0x919   :  { %v3634_v43 = vsub.f32 1.0, %v3633_v32 }
 0x91a   :  { %v3543_v54 = vpop.xlane.xlu2 %3542 }
 0x91b   :  { %v3582_v47 = vsub.f32 %v3543_v54, %v3581_v40  ;;  %v3635_v48 = vmul.f32 %v7500_v31, %v3634_v43 }
 0x91d   :  { %v3609_v59 = vsub.f32 %v3582_v47, %v3608_v3  ;;  %v3636_v13 = vadd.f32 %v7500_v31, %v3635_v48 }
 0x91f   :  { %v3630_v49 = vmul.f32 %v3627_v22, %v3609_v59  ;;  %v3640_v25 = vsel %vm3639_vm2, %v7500_v31, %v3636_v13 }
 0x920   :  { %v3645_v38 = vsel %vm3642_vm3, %v3644_v14, %v3640_v25 }
 0x922   :  { %v3557_v11 = vpop.xlane.xlu1 %3556 }
 0x923   :  { %v3584_v51 = vsub.f32 %v3557_v11, %v3583_v63 }
 0x925   :  { %v3611_v53 = vsub.f32 %v3584_v51, %v3610_v33 }
 0x927   :  { %v3631_v41 = vsub.f32 %v3611_v53, %v3630_v49 }
 0x929   :  { %v3647_v7 = vmul.f32 %v3645_v38, %v3631_v41 }
 0x92b   :  { %v8792_v8 = vsub.f32 %v8578_v24, %v3647_v7  ;;  %v3648_v58 = vmul.f32 %v3647_v7, %v3605_v52  ;;  %v3658_v60 = vmul.f32 %v3647_v7, %v8784_v56  ;;  %v3653_v46 = vmul.f32 %v3647_v7, %v3461_v5 }
 0x92d   :  { %v3668_v20 = vand.u32 2139095040, %v8792_v8  ;;  %v3649_v4 = vsub.f32 %v3609_v59, %v3648_v58  ;;  %v3665_v43 = vand.u32 2147483647, %v8792_v8  ;;  %vm3667_vm1 = vcmp.lt.s32.totalorder %v8792_v8, 0 }
 0x92f   :  { %v3669_v28 = vshrl.u32 %v3668_v20, 23  ;;  %v3650_v44 = vmul.f32 %v3649_v4, %v3625_v37  ;;  %v3672_v37 = vand.u32 8388607, %v3665_v43  ;;  %vm3666_vm2 = vcmp.le.f32.partialorder %v3665_v43, 0.7853982 }
 0x930   :  { %v8864_v43 = vld.sshfl [vmem:[#allocation1 + $0x8] sm:$0xff pattern:$0x75316420] }
 0x931   :  { %v7354_v22 = vadd.s32 4294967169, %v3669_v28  ;;  %v8797_v31 = vsub.f32 %v8582_v36, %v3650_v44  ;;  %v3656_v32 = vmul.f32 %v3650_v44, %v8772_v39  ;;  %v3651_v24 = vmul.f32 %v3650_v44, %v8778_v34 }
 0x932   :  { %v3673_v48 = vor.u32 8388608, %v3672_v37 }
 0x933   :  { %v3675_v54 = vadd.s32 1, %v7354_v22  ;;  %4041 = vperm.xlu1 %7419, %v8797_v31   ;;  %v3657_v56 = vsub.f32 %v3517_v27, %v3656_v32  ;;  %v3652_v5 = vsub.f32 %v3529_v26, %v3651_v24 }
 0x934   :  { %v8823_v41 = vshll.u32 %v3673_v48, 8 }
 0x935   :  { %vm3676_vm4 = vcmp.gt.s32.totalorder %v3675_v54, 0  ;;  %v8803_v52 = vsub.f32 %v3657_v56, %v3658_v60  ;;  %v8807_v36 = vsub.f32 %v3652_v5, %v3653_v46 }
 0x936   :  { %v3677_v40 = vsel %vm3676_vm4, %v3675_v54, 0  ;;  %v3714_v44 = vand.u32 65535, %v8823_v41  ;;  %v3715_v22 = vshrl.u32 %v8823_v41, 16 }
 0x937   :  { %v3679_v47 = vand.u32 31, %v3677_v40  ;;  %v8809_v3 = vshrl.u32 %v3677_v40, 5 }
 0x939   :  { %v3680_v39 = vsub.s32 32, %v3679_v47  ;;  %v3682_v34 = vshll.u32 %v7613_v15, %v3679_v47  ;;  %v3685_v59 = vshll.u32 %v7614_v17, %v3679_v47  ;;  %v3688_v63 = vshll.u32 %v7615_v19, %v3679_v47 }
 0x93a   :  { %v3691_v61 = vshll.u32 %v7616_v21, %v3679_v47  ;;  %v3694_v33 = vshll.u32 %v7617_v23, %v3679_v47  ;;  %vm3697_vm6 = vcmp.lt.s32.totalorder %v8809_v3, 1  ;;  %vm3700_vm7 = vcmp.lt.s32.totalorder %v8809_v3, 4 }
 0x93b   :  { %v3683_v27 = vshrl.u32 %v7614_v17, %v3680_v39  ;;  %v3686_v26 = vshrl.u32 %v7615_v19, %v3680_v39  ;;  %v3689_v13 = vshrl.u32 %v7616_v21, %v3680_v39  ;;  %7423 = vset.pattern.permute.xlu1 %v7611_v2  ;;  %v3692_v11 = vshrl.u32 %v7617_v23, %v3680_v39 }
 0x93c   :  { %v3695_v16 = vshrl.u32 %v7618_v29, %v3680_v39  ;;  %vm3699_vm8 = vcmp.lt.s32.totalorder %v8809_v3, 3  ;;  %vm3698_vm9 = vcmp.lt.s32.totalorder %v8809_v3, 2 }
 0x93d   :  { %v3684_v51 = vor.u32 %v3683_v27, %v3682_v34  ;;  %v3687_v49 = vor.u32 %v3686_v26, %v3685_v59  ;;  %v3690_v25 = vor.u32 %v3689_v13, %v3688_v63  ;;  %v3693_v53 = vor.u32 %v3692_v11, %v3691_v61 }
 0x93e   :  { %v3696_v14 = vor.u32 %v3695_v16, %v3694_v33 }
 0x93f   :  { %v3705_v38 = vsel %vm3697_vm6, %v3684_v51, %v3687_v49  ;;  %v3709_v7 = vsel %vm3697_vm6, %v3687_v49, %v3690_v25  ;;  %v3706_v58 = vsel %vm3700_vm7, %v3693_v53, 920167782 }
 0x940   :  { %v3710_v60 = vsel %vm3700_vm7, %v3696_v14, 1326507024  ;;  %v3707_v46 = vsel %vm3699_vm8, %v3690_v25, %v3706_v58 }
 0x941   :  { %v3711_v20 = vsel %vm3699_vm8, %v3693_v53, %v3710_v60  ;;  %v3708_v4 = vsel %vm3698_vm9, %v3705_v38, %v3707_v46  ;;  %v3702_v38 = vsel %vm3700_vm7, %v3690_v25, 2102212464  ;;  %v3681_v60 = vshrl.u32 %v7613_v15, %v3680_v39 }
 0x942   :  { %v3712_v28 = vsel %vm3698_vm9, %v3709_v7, %v3711_v20  ;;  %v3738_v54 = vand.u32 65535, %v3708_v4  ;;  %v3739_v56 = vshrl.u32 %v3708_v4, 16 }
 0x943   :  { %v3716_v32 = vand.u32 65535, %v3712_v28  ;;  %v3717_v24 = vshrl.u32 %v3712_v28, 16 }
 0x944   :  { %v3741_v40 = vmul.u32 %v3739_v56, %v3714_v44  ;;  %v3742_v47 = vmul.u32 %v3738_v54, %v3715_v22  ;;  %v3740_v27 = vmul.u32 %v3738_v54, %v3714_v44  ;;  %v3743_v61 = vmul.u32 %v3739_v56, %v3715_v22 }
 0x945   :  { %v3719_v5 = vmul.u32 %v3717_v24, %v3714_v44  ;;  %v3720_v37 = vmul.u32 %v3716_v32, %v3715_v22  ;;  %v3718_v48 = vmul.u32 %v3716_v32, %v3714_v44  ;;  %v3721_v59 = vmul.u32 %v3717_v24, %v3715_v22 }
 0x946   :  { %v3744_v26 = vshll.u32 %v3741_v40, 16  ;;  %v3746_v33 = vshll.u32 %v3742_v47, 16  ;;  %v3745_v28 = vshrl.u32 %v3741_v40, 16  ;;  %v3701_v22 = vsel %vm3697_vm6, %v3681_v60, %v3684_v51 }
 0x947   :  { %v3722_v34 = vshll.u32 %v3719_v5, 16  ;;  %v3724_v63 = vshll.u32 %v3720_v37, 16  ;;  %v3723_v46 = vshrl.u32 %v3719_v5, 16  ;;  %v3703_v32 = vsel %vm3699_vm8, %v3687_v49, %v3702_v38 }
 0x948   :  { %vm3748_vm11 = vc.u32 %v3740_v27, %v3744_v26  ;;  %v3750_v16 = vadd.s32 %v3744_v26, %v3740_v27  ;;  %v3725_v24 = vshrl.u32 %v3720_v37, 16  ;;  %v3747_v54 = vshrl.u32 %v3742_v47, 16 }
 0x949   :  { %vm3726_vm10 = vc.u32 %v3718_v48, %v3722_v34  ;;  %v3728_v13 = vadd.s32 %v3722_v34, %v3718_v48  ;;  %v3749_v14 = vsel %vm3748_vm11, 1, %v7612_v6  ;;  %v3704_v39 = vsel %vm3698_vm9, %v3701_v22, %v3703_v32 }
 0x94a   :  { %v3727_v11 = vsel %vm3726_vm10, 1, %v7612_v6  ;;  %v3751_v58 = vadd.s32 %v3749_v14, %v3743_v61  ;;  %vm3752_vm13 = vc.u32 %v3750_v16, %v3746_v33  ;;  %v3754_v34 = vadd.s32 %v3750_v16, %v3746_v33 }
 0x94b   :  { %v3729_v53 = vadd.s32 %v3727_v11, %v3721_v59  ;;  %vm3730_vm12 = vc.u32 %v3728_v13, %v3724_v63  ;;  %v3753_v4 = vsel %vm3752_vm13, 1, %v7612_v6  ;;  %v3758_v40 = vmul.u32 %v8823_v41, %v3704_v39 }
 0x94c   :  { %v3731_v7 = vsel %vm3730_vm12, 1, %v7612_v6  ;;  %v3755_v44 = vadd.s32 %v3753_v4, %v3751_v58  ;;  %vm3808_vm10 = vweird.f32 %v8792_v8 }
 0x94d   :  { %v3733_v20 = vadd.s32 %v3731_v7, %v3729_v53 }
 0x94e   :  { %v3756_v56 = vadd.s32 %v3755_v44, %v3745_v28 }
 0x94f   :  { %v3734_v25 = vadd.s32 %v3733_v20, %v3723_v46 }
 0x950   :  { %v3757_v5 = vadd.s32 %v3756_v56, %v3747_v54 }
 0x951   :  { %v3735_v48 = vadd.s32 %v3734_v25, %v3725_v24 }
 0x952   :  { %v3761_v59 = vadd.s32 1, %v3757_v5 }
 0x953   :  { %vm3760_vm14 = vc.u32 %v3735_v48, %v3754_v34  ;;  %v3759_v3 = vadd.s32 %v3754_v34, %v3735_v48 }
 0x954   :  { %v3762_v27 = vsel %vm3760_vm14, %v3761_v59, %v3757_v5 }
 0x955   :  { %v3763_v26 = vadd.s32 %v3762_v27, %v3758_v40 }
 0x957   :  { %v3764_v51 = vadd.s32 536870912, %v3763_v26 }
 0x959   :  { %v3765_v63 = vshrl.u32 %v3764_v51, 30 }
 0x95b   :  { %v3766_v13 = vshll.u32 %v3765_v63, 30  ;;  %v3789_v22 = vsub.s32 4, %v3765_v63 }
 0x95d   :  { %v3767_v49 = vsub.s32 %v3763_v26, %v3766_v13  ;;  %v3790_v56 = vsel %vm3667_vm1, %v3789_v22, %v3765_v63 }
 0x95e   :  { %v3792_v39 = vsel %vm3666_vm2, 0, %v3790_v56 }
 0x95f   :  { %vm3768_vm15 = vcmp.lt.s32.totalorder %v3767_v49, 0  ;;  %v3769_v37 = vsub.s32 0, %v3767_v49  ;;  %v3963_v26 = vadd.s32 3, %v3792_v39 }
 0x961   :  { %v3770_v47 = vsel %vm3768_vm15, %v3769_v37, %v3767_v49 }
 0x962   :  { %v3771_v61 = vclz %v3770_v47 }
 0x964   :  { %v7355_v11 = vadd.s32 4294967294, %v3771_v61  ;;  %v3809_v61 = vand.u32 3, %v3792_v39 }
 0x966   :  { %vm7356_vm0 = vcmp.lt.s32.totalorder %v7355_v11, 0  ;;  %vm3810_vm3 = vcmp.lt.s32.totalorder %v3809_v61, 2  ;;  %vm3811_vm4 = vcmp.eq.s32.totalorder %v3809_v61, 0  ;;  %vm3814_vm6 = vcmp.eq.s32.totalorder %v3809_v61, 2 }
 0x967   :  { %v3774_v33 = vsel %vm7356_vm0, 0, %v7355_v11  ;;  %v3964_v11 = vand.u32 3, %v3963_v26 }
 0x968   :  { %v3775_v16 = vsub.s32 32, %v3774_v33  ;;  %v3779_v53 = vsub.s32 4294967266, %v3774_v33  ;;  %v3776_v14 = vshll.u32 %v3767_v49, %v3774_v33  ;;  %v3980_v49 = vld.sshfl [vmem:[#allocation1] sm:$0xff pattern:$0x75316420] }
 0x969   :  { %3991 = vst [vmem:[#allocation1] ss:$2 sm:$0xff] %v7729_v0  ;;  %vm3965_vm7 = vcmp.lt.s32.totalorder %v3964_v11, 2  ;;  %vm3966_vm8 = vcmp.eq.s32.totalorder %v3964_v11, 0  ;;  %vm3969_vm9 = vcmp.eq.s32.totalorder %v3964_v11, 2 }
 0x96a   :  { %v3777_v38 = vshrl.u32 %v3759_v3, %v3775_v16  ;;  %v3780_v7 = vadd.s32 127, %v3779_v53 }
 0x96c   :  { %v3778_v41 = vor.u32 %v3777_v38, %v3776_v14  ;;  %v3781_v58 = vshll.u32 %v3780_v7, 23 }
 0x96e   :  { %v3782_v60 = vor.u32 4788187, %v3781_v58  ;;  %v3785_v20 = vcvt.s32.f32 %v3778_v41 }
 0x970   :  { %v3783_v46 = vand.u32 2147483647, %v3782_v60  ;;  %v3992_v58 = vld.sshfl [vmem:[#allocation1] sm:$0xff pattern:$0x75316420] }
 0x971   :  { %v3993_v60 = vld.sshfl [vmem:[#allocation1 + $0x8] sm:$0xff pattern:$0x75316420] }
 0x972   :  { %v3786_v4 = vmul.f32 %v3785_v20, %v3783_v46  ;;  %4023 = vst [vmem:[#allocation1] ss:$2 sm:$0xff] %v7723_v42 }
 0x974   :  { %v3787_v28 = vxor.u32 2147483648, %v3786_v4 }
 0x976   :  { %v3788_v44 = vsel %vm3667_vm1, %v3787_v28, %v3786_v4  ;;  %v3660_v28 = vmul.f32 %v8803_v52, %v8770_v12 }
 0x977   :  { %v3791_v32 = vsel %vm3666_vm2, %v8792_v8, %v3788_v44 }
 0x978   :  { %v3793_v24 = vmul.f32 %v3791_v32, %v3791_v32 }
 0x979   :  { %v4024_v44 = vld.sshfl [vmem:[#allocation1] sm:$0xff pattern:$0x75316420]  ;;  %v4025_v22 = vld.sshfl [vmem:[#allocation1 + $0x8] sm:$0xff pattern:$0x75316420] }
 0x97a   :  { %v3794_v25 = vmul.f32 -0.001358992, %v3793_v24  ;;  %v3801_v54 = vmul.f32 -0.00019511016, %v3793_v24  ;;  %4030 = vst [vmem:[#allocation1] ss:$2 sm:$0xff] %v7729_v0 }
 0x97c   :  { %v3795_v48 = vadd.f32 0.041655596, %v3794_v25  ;;  %v3802_v34 = vadd.f32 0.008332121, %v3801_v54 }
 0x97e   :  { %v3796_v5 = vmul.f32 %v3795_v48, %v3793_v24  ;;  %v3803_v59 = vmul.f32 %v3802_v34, %v3793_v24 }
 0x980   :  { %v3797_v40 = vadd.f32 -0.4999988, %v3796_v5  ;;  %v3804_v27 = vadd.f32 -0.16666654, %v3803_v59 }
 0x981   :  { %v4032_v12 = vld.sshfl [vmem:[#allocation1 + $0x8] sm:$0xff pattern:$0x75316420] }
 0x982   :  { %v3798_v51 = vmul.f32 %v3797_v40, %v3793_v24  ;;  %v3805_v13 = vmul.f32 %v3804_v27, %v3793_v24  ;;  %v3655_v24 = vmul.f32 %v8807_v36, %v8774_v10 }
 0x984   :  { %v3799_v37 = vadd.f32 1.0, %v3798_v51  ;;  %v3806_v47 = vadd.f32 1.0, %v3805_v13  ;;  %v8880_v25 = vsub.f32 %v8666_v45, %v3655_v24 }
 0x986   :  { %v3807_v63 = vmul.f32 %v3806_v47, %v3791_v32  ;;  %v3815_v33 = vxor.u32 2147483648, %v3799_v37  ;;  %v8873_v32 = vsub.f32 %v8595_v18, %v3660_v28  ;;  %v4031_v18 = vld.sshfl [vmem:[#allocation1] sm:$0xff pattern:$0x75316420] }
 0x987   :  { %4054 = vst [vmem:[#allocation1] ss:$2 sm:$0xff] %v7737_v50 }
 0x988   :  { %v3812_v3 = vxor.u32 2147483648, %v3807_v63  ;;  %v3816_v53 = vsel %vm3814_vm6, %v3815_v33, %v3807_v63  ;;  %v3971_v38 = vsel %vm3969_vm9, %v3815_v33, %v3807_v63 }
 0x98a   :  { %v3813_v16 = vsel %vm3811_vm4, %v3799_v37, %v3812_v3  ;;  %v3968_v14 = vsel %vm3966_vm8, %v3799_v37, %v3812_v3 }
 0x98b   :  { %v3817_v7 = vsel %vm3810_vm3, %v3813_v16, %v3816_v53  ;;  %v3972_v41 = vsel %vm3965_vm7, %v3968_v14, %v3971_v38 }
 0x98c   :  { %v3818_v46 = vsel %vm3808_vm10, nan, %v3817_v7  ;;  %v3973_v20 = vsel %vm3808_vm10, nan, %v3972_v41 }
 0x98d   :  { %3976 = vperm.xlu0 %7413, %v3818_v46   ;;  %v4017_v4 = vsub.f32 0.0, %v3973_v20 }
 0x98e   :  { %v4055_v7 = vld.sshfl [vmem:[#allocation1] sm:$0xff pattern:$0x75316420]  ;;  %v4056_v41 = vld.sshfl [vmem:[#allocation1 + $0x8] sm:$0xff pattern:$0x75316420] }
 0x98f   :  { %4020 = vperm.xlu2 %7418, %v4017_v4  }
 0x995   :  { %3988 = vperm.xlu0 %7413, %v3973_v20  }
 0x997   :  { %7420 = vset.pattern.permute.xlu2 %v7612_v6 }
 0x998   :  { %4002 = vperm.xlu2 %7420, %v8873_v32  }
 0x99d   :  { %7421 = vset.pattern.permute.xlu0 %v7619_v62 }
 0x99e   :  { %4009 = vperm.xlu0 %7421, %v8880_v25  }
 0x9a0   :  { %7424 = vset.pattern.permute.xlu2 %v7610_v1 }
 0x9a5   :  { %v4042_v39 = vpop.permute.xlu1 %4041 }
 0x9a6   :  { %7422 = vset.pattern.permute.xlu0 %v7611_v2 }
 0x9e9   :  { %v4021_v52 = vpop.permute.xlu2 %4020 }
 0x9ea   :  { %v4028_v56 = vmul.f32 %v4024_v44, %v4021_v52  ;;  %v4029_v48 = vmul.f32 %v4025_v22, %v4021_v52 }
 0x9f2   :  { %v4003_v63 = vpop.permute.xlu2 %4002 }
 0x9ff   :  { %v3977_v54 = vpop.permute.xlu0 %3976 }
 0xa00   :  { %v4035_v10 = vmul.f32 %v4031_v18, %v3977_v54  ;;  %v4036_v36 = vmul.f32 %v4032_v12, %v3977_v54  ;;  %v3984_v26 = vmul.f32 %v3980_v49, %v3977_v54  ;;  %v3985_v13 = vmul.f32 %v8864_v43, %v3977_v54 }
 0xa02   :  { %v4037_v45 = vadd.f32 %v4035_v10, %v4028_v56  ;;  %v4038_v34 = vadd.f32 %v4036_v36, %v4029_v48 }
 0xa04   :  { %v4044_v5 = vadd.f32 %v4042_v39, %v4037_v45  ;;  %v4045_v59 = vadd.f32 %v4042_v39, %v4038_v34 }
 0xa06   :  { %v4046_v40 = vmax.f32 %v4044_v5, 0.1  ;;  %v4047_v27 = vmax.f32 %v4045_v59, 0.1  ;;  %v4075_v38 = vsub.f32 %v4044_v5, %v4042_v39  ;;  %v4076_v20 = vsub.f32 %v4045_v59, %v4042_v39 }
 0xa07   :  { %v3989_v51 = vpop.permute.xlu0 %3988 }
 0xa08   :  { %7501 = vrcp.f32 %v4046_v40  ;;  %v3996_v37 = vmul.f32 %v3992_v58, %v3989_v51  ;;  %v3997_v47 = vmul.f32 %v3993_v60, %v3989_v51 }
 0xa09   :  { %7503 = vrcp.f32 %v4047_v27  ;;  %v8897_v27 = vld [vmem:[%s9865_s0 + $0x8] sm:$0xff] }
 0xa0a   :  { %v3998_v61 = vadd.f32 %v3996_v37, %v3984_v26  ;;  %v3999_v11 = vadd.f32 %v3997_v47, %v3985_v13 }
 0xa0c   :  { %v4005_v33 = vadd.f32 %v4003_v63, %v3998_v61  ;;  %v4006_v3 = vadd.f32 %v4003_v63, %v3999_v11 }
 0xa0e   :  { %v7502_v16 = vpop.eup %7501  ;;  %v4082_v53 = vrot.slane %v4006_v3, 4  ;;  %v4077_v43 = vsub.f32 %v4003_v63, %v4005_v33  ;;  %v4078_v60 = vsub.f32 %v4003_v63, %v4006_v3 }
 0xa0f   :  { %v7504_v14 = vpop.eup %7503  ;;  %v4052_v46 = vmul.f32 %v7502_v16, %v4005_v33  ;;  %v4050_v49 = vmul.f32 %v7502_v16, %v7502_v16  ;;  %v4092_v59 = vmul.f32 %v7502_v16, %v4075_v38  ;;  %v8911_v38 = vld [vmem:[%s9866_s1 + $0x8] sm:$0xff] }
 0xa10   :  { %v4051_v4 = vmul.f32 %v7504_v14, %v7504_v14  ;;  %v4053_v28 = vmul.f32 %v7504_v14, %v4006_v3  ;;  %v4010_v58 = vpop.permute.xlu0 %4009  ;;  %v4069_v44 = vrot.slane %v7504_v14, 4  ;;  %v4083_v22 = vsel %vm426_vm5, %v4005_v33, %v4082_v53 }
 0xa11   :  { %v4094_v24 = vmul.f32 %v4050_v49, %v4005_v33  ;;  %v4093_v18 = vmul.f32 %v7504_v14, %v4076_v20  ;;  %v4059_v12 = vsub.f32 %v4052_v46, %v4055_v7  ;;  %v4085_v48 = vmul.f32 %v4083_v22, %v7761_v35 }
 0xa12   :  { %v4060_v52 = vsub.f32 %v4053_v28, %v4056_v41  ;;  %v4095_v54 = vmul.f32 %v4051_v4, %v4006_v3  ;;  %v4070_v56 = vsel %vm426_vm5, %v7502_v16, %v4069_v44  ;;  %v4088_v10 = vrot.slane %v4051_v4, 4 }
 0xa13   :  { %v4014_v36 = vperm.slane %v4010_v58, %v7742_v9  ;;  %v4079_v39 = vmul.f32 %v8682_v57, %v4070_v56  ;;  %v4096_v5 = vmul.f32 %v4094_v24, %v4077_v43  ;;  %v4111_v37 = vrot.slane %v4078_v60, 4 }
 0xa14   :  { %v4063_v45 = vrot.slane %v4060_v52, 4  ;;  %v4097_v34 = vmul.f32 %v4095_v54, %v4078_v60  ;;  %v4089_v40 = vsel %vm426_vm5, %v4050_v49, %v4088_v10  ;;  %v8919_v49 = vld [vmem:[%s9867_s2] sm:$0xff] }
 0xa15   :  { %v4016_v26 = vadd.f32 %v8897_v27, %v4014_v36  ;;  %v4115_v47 = vmul.f32 %v4079_v39, %v4079_v39  ;;  %v8902_v11 = vmul.f32 %v4089_v40, %v4085_v48  ;;  %v4098_v16 = vsub.f32 %v4092_v59, %v4096_v5  ;;  %v8946_v59 = vld [vmem:[%s9867_s2 + $0x8] sm:$0xff] }
 0xa16   :  { %v4064_v51 = vsel %vm426_vm5, %v4059_v12, %v4063_v45  ;;  %v4099_v13 = vsub.f32 %v4093_v18, %v4097_v34  ;;  %v4112_v41 = vsel %vm426_vm5, %v4077_v43, %v4111_v37 }
 0xa17   :  { %v4066_v61 = vmul.f32 %v8682_v57, %v4064_v51  ;;  %v4072_v63 = vmul.f32 %v4070_v56, %v4016_v26  ;;  %v4107_v33 = vmul.f32 %v4016_v26, %v7759_v30  ;;  %4117 = vst [vmem:[#allocation1] ss:$2 sm:$0xff] %v4115_v47  ;;  %v4128_v60 = vmul.f32 %v8902_v11, %v4079_v39 }
 0xa18   :  { %v4102_v3 = vrot.slane %v4099_v13, 4 }
 0xa19   :  { %v8905_v53 = vmul.f32 %v4079_v39, %v4066_v61  ;;  %v4257_v14 = vmul.f32 %v8902_v11, %v4066_v61  ;;  %v4073_v7 = vsub.f32 %v4072_v63, %v8911_v38  ;;  %v4108_v57 = vmul.f32 %v4107_v33, %v4089_v40 }
 0xa1a   :  { %v4103_v46 = vsel %vm426_vm5, %v4098_v16, %v4102_v3  ;;  %v8949_v40 = vmul.f32 %v8946_v59, %v4070_v56 }
 0xa1b   :  { %v8922_v20 = vmul.f32 %v8919_v49, %v4103_v46  ;;  %v8925_v4 = vmul.f32 %v8704_v55, %v4073_v7  ;;  %v8927_v28 = vmul.f32 %v4112_v41, %v4108_v57  ;;  %v4190_v46 = vmul.f32 %v4108_v57, %v4108_v57 }
 0xa1c   :  { %v4165_v13 = vmul.f32 %v4108_v57, %v8949_v40 }
 0xa1d   :  { %v4271_v58 = vmul.f32 %v8922_v20, %v4066_v61  ;;  %v4258_v43 = vmul.f32 %v4108_v57, %v8925_v4  ;;  %v4272_v44 = vmul.f32 %v8927_v28, %v8925_v4  ;;  %v4140_v48 = vmul.f32 %v8922_v20, %v4079_v39 }
 0xa1e   :  { %v4118_v22 = vld.sshfl [vmem:[#allocation1] sm:$0xff pattern:$0x75316420]  ;;  %v4119_v24 = vld.sshfl [vmem:[#allocation1 + $0x8] sm:$0xff pattern:$0x75316420]  ;;  %v4152_v39 = vmul.f32 %v8949_v40, %v8949_v40  ;;  %v4177_v56 = vmul.f32 %v8927_v28, %v8949_v40 }
 0xa1f   :  { %v4122_v18 = vsel %vm426_vm5, %v4118_v22, 0.0  ;;  %v4123_v12 = vsel %vm426_vm5, %v4119_v24, 0.0  ;;  %4130 = vst [vmem:[#allocation1] ss:$2 sm:$0xff] %v4128_v60  ;;  %v8936_v55 = vadd.f32 %v4258_v43, %v4257_v14  ;;  %v8938_v52 = vadd.f32 %v4272_v44, %v4271_v58 }
 0xa20   :  { %v4124_v54 = vadd.f32 %v4123_v12, %v4122_v18  ;;  %v4189_v58 = vmul.f32 %v8902_v11, %v8902_v11  ;;  %v4204_v12 = vmul.f32 %v8922_v20, %v8902_v11 }
 0xa22   :  { %4125 = vadd.xlane.f32.xlu1 %v4124_v54  ;;  %v4191_v60 = vadd.f32 %v4190_v46, %v4189_v58  ;;  %v4205_v54 = vmul.f32 %v8927_v28, %v4108_v57 }
 0xa26   :  { %v4131_v10 = vld.sshfl [vmem:[#allocation1] sm:$0xff pattern:$0x75316420]  ;;  %v4132_v36 = vld.sshfl [vmem:[#allocation1 + $0x8] sm:$0xff pattern:$0x75316420] }
 0xa27   :  { %v4135_v45 = vsel %vm426_vm5, %v4131_v10, 0.0  ;;  %v4136_v34 = vsel %vm426_vm5, %v4132_v36, 0.0  ;;  %4142 = vst [vmem:[#allocation1] ss:$2 sm:$0xff] %v4140_v48  ;;  %v4206_v48 = vadd.f32 %v4205_v54, %v4204_v12 }
 0xa28   :  { %v4137_v5 = vadd.f32 %v4136_v34, %v4135_v45 }
 0xa2a   :  { %4138 = vadd.xlane.f32.xlu0 %v4137_v5 }
 0xa2e   :  { %v4143_v26 = vld.sshfl [vmem:[#allocation1] sm:$0xff pattern:$0x75316420]  ;;  %v4144_v51 = vld.sshfl [vmem:[#allocation1 + $0x8] sm:$0xff pattern:$0x75316420] }
 0xa2f   :  { %4154 = vst [vmem:[#allocation1] ss:$2 sm:$0xff] %v4152_v39  ;;  %v4147_v43 = vsel %vm426_vm5, %v4143_v26, 0.0  ;;  %v4148_v44 = vsel %vm426_vm5, %v4144_v51, 0.0  ;;  %v4218_v39 = vmul.f32 %v8922_v20, %v8922_v20  ;;  %v4219_v26 = vmul.f32 %v8927_v28, %v8927_v28 }
 0xa30   :  { %v4149_v18 = vadd.f32 %v4148_v44, %v4147_v43 }
 0xa31   :  { %v4220_v11 = vadd.f32 %v4219_v26, %v4218_v39 }
 0xa36   :  { %v4155_v37 = vld.sshfl [vmem:[#allocation1] sm:$0xff pattern:$0x75316420]  ;;  %v4156_v47 = vld.sshfl [vmem:[#allocation1 + $0x8] sm:$0xff pattern:$0x75316420] }
 0xa37   :  { %v4159_v61 = vsel %vm426_vm5, %v4155_v37, 0.0  ;;  %v4160_v63 = vsel %vm426_vm5, %v4156_v47, 0.0  ;;  %4167 = vst [vmem:[#allocation1] ss:$2 sm:$0xff] %v4165_v13 }
 0xa38   :  { %v4161_v33 = vadd.f32 %v4160_v63, %v4159_v61 }
 0xa3a   :  { %4162 = vadd.xlane.f32.xlu2 %v4161_v33 }
 0xa3e   :  { %v4168_v3 = vld.sshfl [vmem:[#allocation1] sm:$0xff pattern:$0x75316420]  ;;  %v4169_v16 = vld.sshfl [vmem:[#allocation1 + $0x8] sm:$0xff pattern:$0x75316420] }
 0xa3f   :  { %v4172_v14 = vsel %vm426_vm5, %v4168_v3, 0.0  ;;  %v4173_v7 = vsel %vm426_vm5, %v4169_v16, 0.0  ;;  %4179 = vst [vmem:[#allocation1] ss:$2 sm:$0xff] %v4177_v56 }
 0xa40   :  { %v4174_v41 = vadd.f32 %v4173_v7, %v4172_v14  ;;  %v4245_v14 = vmul.f32 %v8949_v40, %v8925_v4 }
 0xa42   :  { %4175 = vadd.xlane.f32.xlu1 %v4174_v41 }
 0xa46   :  { %v4180_v22 = vld.sshfl [vmem:[#allocation1] sm:$0xff pattern:$0x75316420]  ;;  %v4181_v24 = vld.sshfl [vmem:[#allocation1 + $0x8] sm:$0xff pattern:$0x75316420] }
 0xa47   :  { %4193 = vst [vmem:[#allocation1] ss:$2 sm:$0xff] %v4191_v60  ;;  %v4184_v57 = vsel %vm426_vm5, %v4180_v22, 0.0  ;;  %v4185_v51 = vsel %vm426_vm5, %v4181_v24, 0.0 }
 0xa48   :  { %v4186_v33 = vadd.f32 %v4185_v51, %v4184_v57 }
 0xa4a   :  { %4150 = vadd.xlane.f32.xlu1 %v4149_v18 }
 0xa4e   :  { %v4194_v10 = vld.sshfl [vmem:[#allocation1] sm:$0xff pattern:$0x75316420]  ;;  %v4195_v36 = vld.sshfl [vmem:[#allocation1 + $0x8] sm:$0xff pattern:$0x75316420] }
 0xa4f   :  { %v4198_v45 = vsel %vm426_vm5, %v4194_v10, 0.0  ;;  %v4199_v34 = vsel %vm426_vm5, %v4195_v36, 0.0  ;;  %4208 = vst [vmem:[#allocation1] ss:$2 sm:$0xff] %v4206_v48 }
 0xa50   :  { %v4200_v5 = vadd.f32 %v4199_v34, %v4198_v45 }
 0xa52   :  { %4201 = vadd.xlane.f32.xlu2 %v4200_v5 }
 0xa56   :  { %v4209_v13 = vld.sshfl [vmem:[#allocation1] sm:$0xff pattern:$0x75316420]  ;;  %v4210_v37 = vld.sshfl [vmem:[#allocation1 + $0x8] sm:$0xff pattern:$0x75316420] }
 0xa57   :  { %v4213_v47 = vsel %vm426_vm5, %v4209_v13, 0.0  ;;  %v4214_v61 = vsel %vm426_vm5, %v4210_v37, 0.0  ;;  %4222 = vst [vmem:[#allocation1] ss:$2 sm:$0xff] %v4220_v11 }
 0xa58   :  { %v4215_v63 = vadd.f32 %v4214_v61, %v4213_v47 }
 0xa5a   :  { %4216 = vadd.xlane.f32.xlu0 %v4215_v63  ;;  %4187 = vadd.xlane.f32.xlu2 %v4186_v33 }
 0xa5e   :  { %v4223_v20 = vld.sshfl [vmem:[#allocation1] sm:$0xff pattern:$0x75316420]  ;;  %v4224_v56 = vld.sshfl [vmem:[#allocation1 + $0x8] sm:$0xff pattern:$0x75316420] }
 0xa5f   :  { %v4227_v28 = vsel %vm426_vm5, %v4223_v20, 0.0  ;;  %v4228_v3 = vsel %vm426_vm5, %v4224_v56, 0.0  ;;  %4235 = vst [vmem:[#allocation1] ss:$2 sm:$0xff] %v8905_v53 }
 0xa60   :  { %v4229_v16 = vadd.f32 %v4228_v3, %v4227_v28 }
 0xa62   :  { %4230 = vadd.xlane.f32.xlu1 %v4229_v16 }
 0xa66   :  { %v4236_v7 = vld.sshfl [vmem:[#allocation1] sm:$0xff pattern:$0x75316420]  ;;  %v4237_v41 = vld.sshfl [vmem:[#allocation1 + $0x8] sm:$0xff pattern:$0x75316420] }
 0xa67   :  { %v4240_v46 = vsel %vm426_vm5, %v4236_v7, 0.0  ;;  %v4241_v58 = vsel %vm426_vm5, %v4237_v41, 0.0  ;;  %4247 = vst [vmem:[#allocation1] ss:$2 sm:$0xff] %v4245_v14 }
 0xa68   :  { %v4242_v60 = vadd.f32 %v4241_v58, %v4240_v46 }
 0xa6a   :  { %4243 = vadd.xlane.f32.xlu2 %v4242_v60 }
 0xa6e   :  { %v4248_v43 = vld.sshfl [vmem:[#allocation1] sm:$0xff pattern:$0x75316420]  ;;  %v4249_v44 = vld.sshfl [vmem:[#allocation1 + $0x8] sm:$0xff pattern:$0x75316420] }
 0xa6f   :  { %v4252_v22 = vsel %vm426_vm5, %v4248_v43, 0.0  ;;  %v4253_v53 = vsel %vm426_vm5, %v4249_v44, 0.0  ;;  %4261 = vst [vmem:[#allocation1] ss:$2 sm:$0xff] %v8936_v55 }
 0xa70   :  { %v4254_v24 = vadd.f32 %v4253_v53, %v4252_v22 }
 0xa72   :  { %4255 = vadd.xlane.f32.xlu0 %v4254_v24 }
 0xa76   :  { %v4262_v4 = vld.sshfl [vmem:[#allocation1] sm:$0xff pattern:$0x75316420]  ;;  %v4263_v40 = vld.sshfl [vmem:[#allocation1 + $0x8] sm:$0xff pattern:$0x75316420] }
 0xa77   :  { %v4266_v18 = vsel %vm426_vm5, %v4262_v4, 0.0  ;;  %v4267_v12 = vsel %vm426_vm5, %v4263_v40, 0.0  ;;  %4275 = vst [vmem:[#allocation1] ss:$2 sm:$0xff] %v8938_v52 }
 0xa78   :  { %v4268_v54 = vadd.f32 %v4267_v12, %v4266_v18 }
 0xa7a   :  { %4269 = vadd.xlane.f32.xlu1 %v4268_v54 }
 0xa7e   :  { %v4276_v48 = vld.sshfl [vmem:[#allocation1] sm:$0xff pattern:$0x75316420]  ;;  %v4277_v10 = vld.sshfl [vmem:[#allocation1 + $0x8] sm:$0xff pattern:$0x75316420] }
 0xa7f   :  { %v4280_v36 = vsel %vm426_vm5, %v4276_v48, 0.0  ;;  %v4281_v45 = vsel %vm426_vm5, %v4277_v10, 0.0  ;;  %4706 = vst [vmem:[#allocation1] ss:$2 sm:$0xff] %v7723_v42 }
 0xa80   :  { %v4282_v55 = vadd.f32 %v4281_v45, %v4280_v36 }
 0xa82   :  { %4283 = vadd.xlane.f32.xlu2 %v4282_v55 }
 0xa95   :  { %v4126_v34 = vpop.xlane.xlu1 %4125 }
 0xa96   :  { %v4127_v5 = vadd.f32 1e-05, %v4126_v34 }
 0xa98   :  { %7505 = vrcp.f32 %v4127_v5  ;;  %v4296_v61 = vand.u32 2147483648, %v4127_v5  ;;  %vm4290_vm12 = vweird.f32 %v4127_v5  ;;  %v4294_v33 = vand.u32 2147483647, %v4127_v5 }
 0xa9a   :  { %v4297_v16 = vor.u32 1.1754944e-38, %v4296_v61  ;;  %vm4295_vm0 = vcmp.eq.f32.partialorder %v4294_v33, 8.507059e+37 }
 0xa9d   :  { %v8995_v58 = vpop.xlane.xlu0 %4138 }
 0xa9e   :  { %v7506_v39 = vpop.eup %7505 }
 0xa9f   :  { %v4286_v26 = vmul.f32 %v7506_v39, %v4127_v5  ;;  %vm4291_vm11 = vweird.f32 %v7506_v39 }
 0xaa0   :  { %vm4292_vm13 = vmor %vm4290_vm12, %vm4291_vm11 }
 0xaa1   :  { %v4287_v52 = vsub.f32 1.0, %v4286_v26 }
 0xaa3   :  { %v4288_v51 = vmul.f32 %v7506_v39, %v4287_v52 }
 0xaa5   :  { %v4289_v47 = vadd.f32 %v7506_v39, %v4288_v51 }
 0xaa7   :  { %v4293_v28 = vsel %vm4292_vm13, %v7506_v39, %v4289_v47 }
 0xaa8   :  { %v8993_v7 = vsel %vm4295_vm0, %v4297_v16, %v4293_v28 }
 0xaa9   :  { %v4300_v43 = vmul.f32 %v8993_v7, %v8995_v58 }
 0xaab   :  { %v4302_v24 = vmul.f32 %v4300_v43, %v8995_v58 }
 0xaad   :  { %v4163_v11 = vpop.xlane.xlu2 %4162 }
 0xaae   :  { %v4164_v57 = vadd.f32 1e-05, %v4163_v11 }
 0xab0   :  { %7507 = vrcp.f32 %v4164_v57  ;;  %v4323_v56 = vand.u32 2147483648, %v4164_v57  ;;  %v4321_v3 = vand.u32 2147483647, %v4164_v57  ;;  %vm4317_vm15 = vweird.f32 %v4164_v57 }
 0xab2   :  { %v4324_v46 = vor.u32 1.1754944e-38, %v4323_v56  ;;  %vm4322_vm2 = vcmp.eq.f32.partialorder %v4321_v3, 8.507059e+37 }
 0xab5   :  { %v9001_v44 = vpop.xlane.xlu1 %4175 }
 0xab6   :  { %v7508_v13 = vpop.eup %7507 }
 0xab7   :  { %v4313_v37 = vmul.f32 %v7508_v13, %v4164_v57  ;;  %vm4318_vm14 = vweird.f32 %v7508_v13 }
 0xab8   :  { %vm4319_vm1 = vmor %vm4317_vm15, %vm4318_vm14 }
 0xab9   :  { %v4314_v63 = vsub.f32 1.0, %v4313_v37 }
 0xabb   :  { %v4315_v20 = vmul.f32 %v7508_v13, %v4314_v63 }
 0xabd   :  { %v4316_v14 = vadd.f32 %v7508_v13, %v4315_v20  ;;  %v9007_v54 = vpop.xlane.xlu1 %4150 }
 0xabe   :  { %v4301_v55 = vmul.f32 %v8993_v7, %v9007_v54  ;;  %v4304_v5 = vmul.f32 %v4300_v43, %v9007_v54 }
 0xabf   :  { %v4320_v41 = vsel %vm4319_vm1, %v7508_v13, %v4316_v14 }
 0xac0   :  { %v8997_v60 = vsel %vm4322_vm2, %v4324_v46, %v4320_v41  ;;  %v4306_v61 = vmul.f32 %v4301_v55, %v9007_v54 }
 0xac1   :  { %v4327_v22 = vmul.f32 %v8997_v60, %v9001_v44 }
 0xac3   :  { %v4329_v40 = vmul.f32 %v4327_v22, %v9001_v44 }
 0xac5   :  { %v4202_v53 = vpop.xlane.xlu2 %4201 }
 0xac6   :  { %v4203_v4 = vadd.f32 1e-05, %v4202_v53 }
 0xac8   :  { %v4303_v18 = vsub.f32 %v4203_v4, %v4302_v24 }
 0xaca   :  { %v4330_v12 = vsub.f32 %v4303_v18, %v4329_v40 }
 0xacc   :  { %7509 = vrcp.f32 %v4330_v12  ;;  %v4348_v11 = vand.u32 2147483647, %v4330_v12  ;;  %v4350_v57 = vand.u32 2147483648, %v4330_v12  ;;  %vm4344_vm4 = vweird.f32 %v4330_v12 }
 0xacd   :  { %v4188_v36 = vpop.xlane.xlu2 %4187  ;;  %v4217_v45 = vpop.xlane.xlu0 %4216 }
 0xace   :  { %v4331_v26 = vmul.f32 %v4327_v22, %v4188_v36  ;;  %v4305_v51 = vsub.f32 %v4217_v45, %v4304_v5  ;;  %v4328_v37 = vmul.f32 %v8997_v60, %v4188_v36  ;;  %v4351_v63 = vor.u32 1.1754944e-38, %v4350_v57 }
 0xacf   :  { %vm4349_vm7 = vcmp.eq.f32.partialorder %v4348_v11, 8.507059e+37 }
 0xad0   :  { %v4332_v20 = vsub.f32 %v4305_v51, %v4331_v26  ;;  %v4333_v3 = vmul.f32 %v4328_v37, %v4188_v36 }
 0xad2   :  { %v7510_v48 = vpop.eup %7509 }
 0xad3   :  { %v4340_v10 = vmul.f32 %v7510_v48, %v4330_v12  ;;  %vm4345_vm3 = vweird.f32 %v7510_v48 }
 0xad4   :  { %vm4346_vm6 = vmor %vm4344_vm4, %vm4345_vm3 }
 0xad5   :  { %v4341_v34 = vsub.f32 1.0, %v4340_v10  ;;  %v4231_v39 = vpop.xlane.xlu1 %4230 }
 0xad6   :  { %v4232_v13 = vadd.f32 1e-05, %v4231_v39 }
 0xad7   :  { %v4342_v52 = vmul.f32 %v7510_v48, %v4341_v34 }
 0xad8   :  { %v4307_v56 = vsub.f32 %v4232_v13, %v4306_v61 }
 0xad9   :  { %v4343_v47 = vadd.f32 %v7510_v48, %v4342_v52 }
 0xada   :  { %v4334_v41 = vsub.f32 %v4307_v56, %v4333_v3 }
 0xadb   :  { %v4347_v33 = vsel %vm4346_vm6, %v7510_v48, %v4343_v47 }
 0xadc   :  { %v4352_v28 = vsel %vm4349_vm7, %v4351_v63, %v4347_v33 }
 0xadd   :  { %v4354_v16 = vmul.f32 %v4352_v28, %v4332_v20  ;;  %v4244_v4 = vpop.xlane.xlu2 %4243 }
 0xade   :  { %v4308_v12 = vmul.f32 %v4300_v43, %v4244_v4  ;;  %v4310_v39 = vmul.f32 %v4301_v55, %v4244_v4 }
 0xadf   :  { %v4355_v14 = vmul.f32 %v4354_v16, %v4332_v20 }
 0xae1   :  { %v4356_v46 = vsub.f32 %v4334_v41, %v4355_v14 }
 0xae3   :  { %7511 = vrcp.f32 %v4356_v46  ;;  %v4370_v57 = vand.u32 2147483648, %v4356_v46  ;;  %vm4364_vm9 = vweird.f32 %v4356_v46  ;;  %v4368_v13 = vand.u32 2147483647, %v4356_v46 }
 0xae5   :  { %v4256_v10 = vpop.xlane.xlu0 %4255  ;;  %v4371_v33 = vor.u32 1.1754944e-38, %v4370_v57  ;;  %vm4369_vm11 = vcmp.eq.f32.partialorder %v4368_v13, 8.507059e+37 }
 0xae6   :  { %v4335_v48 = vmul.f32 %v4327_v22, %v4256_v10  ;;  %v4337_v52 = vmul.f32 %v4328_v37, %v4256_v10 }
 0xae9   :  { %v7512_v53 = vpop.eup %7511 }
 0xaea   :  { %v4360_v24 = vmul.f32 %v7512_v53, %v4356_v46  ;;  %vm4365_vm8 = vweird.f32 %v7512_v53 }
 0xaeb   :  { %vm4366_vm10 = vmor %vm4364_vm9, %vm4365_vm8 }
 0xaec   :  { %v4361_v40 = vsub.f32 1.0, %v4360_v24 }
 0xaed   :  { %v4270_v18 = vpop.xlane.xlu1 %4269 }
 0xaee   :  { %v4309_v45 = vsub.f32 %v4270_v18, %v4308_v12  ;;  %v4362_v34 = vmul.f32 %v7512_v53, %v4361_v40 }
 0xaf0   :  { %v4336_v5 = vsub.f32 %v4309_v45, %v4335_v48  ;;  %v4363_v26 = vadd.f32 %v7512_v53, %v4362_v34 }
 0xaf2   :  { %v4357_v47 = vmul.f32 %v4354_v16, %v4336_v5  ;;  %v4367_v63 = vsel %vm4366_vm10, %v7512_v53, %v4363_v26 }
 0xaf3   :  { %v4372_v56 = vsel %vm4369_vm11, %v4371_v33, %v4367_v63 }
 0xaf5   :  { %v4284_v11 = vpop.xlane.xlu2 %4283 }
 0xaf6   :  { %v4311_v51 = vsub.f32 %v4284_v11, %v4310_v39 }
 0xaf8   :  { %v4338_v61 = vsub.f32 %v4311_v51, %v4337_v52 }
 0xafa   :  { %v4358_v43 = vsub.f32 %v4338_v61, %v4357_v47 }
 0xafc   :  { %v4374_v3 = vmul.f32 %v4372_v56, %v4358_v43 }
 0xafe   :  { %v9015_v22 = vsub.f32 %v8792_v8, %v4374_v3  ;;  %v4375_v55 = vmul.f32 %v4374_v3, %v4332_v20  ;;  %v4380_v14 = vmul.f32 %v4374_v3, %v4188_v36  ;;  %v4385_v36 = vmul.f32 %v4374_v3, %v9007_v54 }
 0xb00   :  { %v4395_v41 = vand.u32 2139095040, %v9015_v22  ;;  %v4376_v37 = vsub.f32 %v4336_v5, %v4375_v55  ;;  %v4392_v18 = vand.u32 2147483647, %v9015_v22  ;;  %vm4394_vm9 = vcmp.lt.s32.totalorder %v9015_v22, 0 }
 0xb02   :  { %v4396_v24 = vshrl.u32 %v4395_v41, 23  ;;  %v4377_v40 = vmul.f32 %v4376_v37, %v4352_v28  ;;  %v4399_v28 = vand.u32 8388607, %v4392_v18  ;;  %vm4393_vm10 = vcmp.le.f32.partialorder %v4392_v18, 0.7853982 }
 0xb04   :  { %v7360_v46 = vadd.s32 4294967169, %v4396_v24  ;;  %v9019_v16 = vsub.f32 %v8797_v31, %v4377_v40  ;;  %v4383_v53 = vmul.f32 %v4377_v40, %v8995_v58  ;;  %v4378_v12 = vmul.f32 %v4377_v40, %v9001_v44 }
 0xb06   :  { %v4402_v45 = vadd.s32 1, %v7360_v46  ;;  %4768 = vperm.xlu2 %7424, %v9019_v16   ;;  %v4384_v8 = vsub.f32 %v4244_v4, %v4383_v53  ;;  %v4379_v20 = vsub.f32 %v4256_v10, %v4378_v12  ;;  %v4400_v4 = vor.u32 8388608, %v4399_v28 }
 0xb08   :  { %v4386_v34 = vsub.f32 %v4384_v8, %v4385_v36  ;;  %vm4403_vm12 = vcmp.gt.s32.totalorder %v4402_v45, 0  ;;  %v9028_v48 = vsub.f32 %v4379_v20, %v4380_v14  ;;  %v9056_v3 = vshll.u32 %v4400_v4, 8 }
 0xb09   :  { %v4404_v31 = vsel %vm4403_vm12, %v4402_v45, 0 }
 0xb0a   :  { %v4387_v58 = vmul.f32 %v4386_v34, %v8993_v7  ;;  %v4406_v5 = vand.u32 31, %v4404_v31  ;;  %v9036_v26 = vshrl.u32 %v4404_v31, 5  ;;  %v4441_v12 = vand.u32 65535, %v9056_v3 }
 0xb0b   :  { %v4442_v45 = vshrl.u32 %v9056_v3, 16 }
 0xb0c   :  { %v9032_v44 = vsub.f32 %v8873_v32, %v4387_v58  ;;  %v9034_v39 = vsub.s32 32, %v4406_v5  ;;  %v4409_v54 = vshll.u32 %v7613_v15, %v4406_v5  ;;  %v4412_v10 = vshll.u32 %v7614_v17, %v4406_v5 }
 0xb0d   :  { %v4415_v32 = vshll.u32 %v7615_v19, %v4406_v5  ;;  %v4418_v52 = vshll.u32 %v7616_v21, %v4406_v5  ;;  %v4421_v13 = vshll.u32 %v7617_v23, %v4406_v5  ;;  %vm4424_vm13 = vcmp.lt.s32.totalorder %v9036_v26, 1 }
 0xb0e   :  { %7425 = vset.pattern.permute.xlu2 %v7612_v6  ;;  %v4410_v11 = vshrl.u32 %v7614_v17, %v9034_v39  ;;  %v4413_v7 = vshrl.u32 %v7615_v19, %v9034_v39  ;;  %v4416_v57 = vshrl.u32 %v7616_v21, %v9034_v39  ;;  %v4419_v51 = vshrl.u32 %v7617_v23, %v9034_v39 }
 0xb0f   :  { %4729 = vperm.xlu2 %7425, %v9032_v44   ;;  %v4422_v47 = vshrl.u32 %v7618_v29, %v9034_v39  ;;  %vm4427_vm14 = vcmp.lt.s32.totalorder %v9036_v26, 4  ;;  %vm4426_vm15 = vcmp.lt.s32.totalorder %v9036_v26, 3  ;;  %vm4425_vm0 = vcmp.lt.s32.totalorder %v9036_v26, 2 }
 0xb10   :  { %v4411_v61 = vor.u32 %v4410_v11, %v4409_v54  ;;  %v4414_v63 = vor.u32 %v4413_v7, %v4412_v10  ;;  %v4417_v33 = vor.u32 %v4416_v57, %v4415_v32  ;;  %v4420_v43 = vor.u32 %v4419_v51, %v4418_v52 }
 0xb11   :  { %v4423_v56 = vor.u32 %v4422_v47, %v4421_v13 }
 0xb12   :  { %v4432_v55 = vsel %vm4424_vm13, %v4411_v61, %v4414_v63  ;;  %v4436_v14 = vsel %vm4424_vm13, %v4414_v63, %v4417_v33  ;;  %v4433_v41 = vsel %vm4427_vm14, %v4420_v43, 920167782 }
 0xb13   :  { %v4437_v37 = vsel %vm4427_vm14, %v4423_v56, 1326507024  ;;  %v4434_v24 = vsel %vm4426_vm15, %v4417_v33, %v4433_v41 }
 0xb14   :  { %v4438_v40 = vsel %vm4426_vm15, %v4420_v43, %v4437_v37  ;;  %v4435_v46 = vsel %vm4425_vm0, %v4432_v55, %v4434_v24  ;;  %v4429_v55 = vsel %vm4427_vm14, %v4417_v33, 2102212464  ;;  %v4408_v37 = vshrl.u32 %v7613_v15, %v9034_v39 }
 0xb15   :  { %v4439_v53 = vsel %vm4425_vm0, %v4436_v14, %v4438_v40  ;;  %v4465_v20 = vand.u32 65535, %v4435_v46  ;;  %v4466_v34 = vshrl.u32 %v4435_v46, 16 }
 0xb16   :  { %v4443_v8 = vand.u32 65535, %v4439_v53  ;;  %v4444_v36 = vshrl.u32 %v4439_v53, 16 }
 0xb17   :  { %7428 = vset.pattern.permute.xlu2 %v7610_v1  ;;  %v4468_v58 = vmul.u32 %v4466_v34, %v4441_v12  ;;  %v4469_v5 = vmul.u32 %v4465_v20, %v4442_v45  ;;  %v4467_v11 = vmul.u32 %v4465_v20, %v4441_v12  ;;  %v4470_v52 = vmul.u32 %v4466_v34, %v4442_v45 }
 0xb18   :  { %v4446_v28 = vmul.u32 %v4444_v36, %v4441_v12  ;;  %v4447_v31 = vmul.u32 %v4443_v8, %v4442_v45  ;;  %v4445_v4 = vmul.u32 %v4443_v8, %v4441_v12  ;;  %v4448_v10 = vmul.u32 %v4444_v36, %v4442_v45 }
 0xb19   :  { %v4471_v7 = vshll.u32 %v4468_v58, 16  ;;  %v4473_v13 = vshll.u32 %v4469_v5, 16  ;;  %v4472_v53 = vshrl.u32 %v4468_v58, 16  ;;  %v4428_v45 = vsel %vm4424_vm13, %v4408_v37, %v4411_v61 }
 0xb1a   :  { %v4449_v54 = vshll.u32 %v4446_v28, 16  ;;  %v4451_v32 = vshll.u32 %v4447_v31, 16  ;;  %v4450_v24 = vshrl.u32 %v4446_v28, 16  ;;  %v4430_v8 = vsel %vm4426_vm15, %v4414_v63, %v4429_v55 }
 0xb1b   :  { %vm4475_vm2 = vc.u32 %v4467_v11, %v4471_v7  ;;  %v4477_v47 = vadd.s32 %v4471_v7, %v4467_v11  ;;  %v4452_v33 = vshrl.u32 %v4447_v31, 16  ;;  %v4474_v20 = vshrl.u32 %v4469_v5, 16 }
 0xb1c   :  { %vm4453_vm1 = vc.u32 %v4445_v4, %v4449_v54  ;;  %v4455_v57 = vadd.s32 %v4449_v54, %v4445_v4  ;;  %v4476_v56 = vsel %vm4475_vm2, 1, %v7612_v6  ;;  %v4431_v39 = vsel %vm4425_vm0, %v4428_v45, %v4430_v8 }
 0xb1d   :  { %v4454_v51 = vsel %vm4453_vm1, 1, %v7612_v6  ;;  %v4478_v41 = vadd.s32 %v4476_v56, %v4470_v52  ;;  %vm4479_vm4 = vc.u32 %v4477_v47, %v4473_v13  ;;  %v4481_v54 = vadd.s32 %v4477_v47, %v4473_v13 }
 0xb1e   :  { %v4456_v43 = vadd.s32 %v4454_v51, %v4448_v10  ;;  %vm4457_vm3 = vc.u32 %v4455_v57, %v4451_v32  ;;  %v4480_v46 = vsel %vm4479_vm4, 1, %v7612_v6  ;;  %v4485_v58 = vmul.u32 %v9056_v3, %v4431_v39 }
 0xb1f   :  { %v4458_v14 = vsel %vm4457_vm3, 1, %v7612_v6  ;;  %v4482_v12 = vadd.s32 %v4480_v46, %v4478_v41  ;;  %vm4535_vm1 = vweird.f32 %v9015_v22 }
 0xb20   :  { %v4460_v40 = vadd.s32 %v4458_v14, %v4456_v43 }
 0xb21   :  { %v4483_v34 = vadd.s32 %v4482_v12, %v4472_v53 }
 0xb22   :  { %v4461_v36 = vadd.s32 %v4460_v40, %v4450_v24 }
 0xb23   :  { %v4484_v28 = vadd.s32 %v4483_v34, %v4474_v20 }
 0xb24   :  { %v4462_v4 = vadd.s32 %v4461_v36, %v4452_v33 }
 0xb25   :  { %v4488_v10 = vadd.s32 1, %v4484_v28 }
 0xb26   :  { %vm4487_vm6 = vc.u32 %v4462_v4, %v4481_v54  ;;  %v4486_v26 = vadd.s32 %v4481_v54, %v4462_v4 }
 0xb27   :  { %v4489_v11 = vsel %vm4487_vm6, %v4488_v10, %v4484_v28 }
 0xb28   :  { %v4490_v7 = vadd.s32 %v4489_v11, %v4485_v58 }
 0xb2a   :  { %v4491_v61 = vadd.s32 536870912, %v4490_v7 }
 0xb2c   :  { %v4492_v32 = vshrl.u32 %v4491_v61, 30 }
 0xb2e   :  { %v4493_v57 = vshll.u32 %v4492_v32, 30  ;;  %v4516_v45 = vsub.s32 4, %v4492_v32 }
 0xb30   :  { %v4494_v63 = vsub.s32 %v4490_v7, %v4493_v57  ;;  %v4517_v34 = vsel %vm4394_vm9, %v4516_v45, %v4492_v32 }
 0xb31   :  { %v4519_v39 = vsel %vm4393_vm10, 0, %v4517_v34 }
 0xb32   :  { %vm4495_vm7 = vcmp.lt.s32.totalorder %v4494_v63, 0  ;;  %v4496_v31 = vsub.s32 0, %v4494_v63  ;;  %v4690_v7 = vadd.s32 3, %v4519_v39 }
 0xb34   :  { %v4497_v5 = vsel %vm4495_vm7, %v4496_v31, %v4494_v63  ;;  %v4536_v31 = vand.u32 3, %v4519_v39 }
 0xb35   :  { %v4498_v52 = vclz %v4497_v5  ;;  %v4691_v5 = vand.u32 3, %v4690_v7 }
 0xb36   :  { %vm4537_vm11 = vcmp.lt.s32.totalorder %v4536_v31, 2  ;;  %vm4538_vm12 = vcmp.eq.s32.totalorder %v4536_v31, 0  ;;  %vm4541_vm13 = vcmp.eq.s32.totalorder %v4536_v31, 2 }
 0xb37   :  { %v7361_v51 = vadd.s32 4294967294, %v4498_v52  ;;  %vm4692_vm14 = vcmp.lt.s32.totalorder %v4691_v5, 2  ;;  %vm4693_vm15 = vcmp.eq.s32.totalorder %v4691_v5, 0  ;;  %vm4696_vm0 = vcmp.eq.s32.totalorder %v4691_v5, 2 }
 0xb39   :  { %vm7362_vm8 = vcmp.lt.s32.totalorder %v7361_v51, 0 }
 0xb3a   :  { %v4501_v13 = vsel %vm7362_vm8, 0, %v7361_v51 }
 0xb3b   :  { %v4502_v47 = vsub.s32 32, %v4501_v13  ;;  %v4506_v43 = vsub.s32 4294967266, %v4501_v13  ;;  %v4503_v56 = vshll.u32 %v4494_v63, %v4501_v13 }
 0xb3d   :  { %v4504_v55 = vshrl.u32 %v4486_v26, %v4502_v47  ;;  %v4507_v14 = vadd.s32 127, %v4506_v43 }
 0xb3f   :  { %v4505_v3 = vor.u32 %v4504_v55, %v4503_v56  ;;  %v4508_v41 = vshll.u32 %v4507_v14, 23 }
 0xb41   :  { %v4509_v37 = vor.u32 4788187, %v4508_v41  ;;  %v4512_v40 = vcvt.s32.f32 %v4505_v3 }
 0xb43   :  { %v4510_v24 = vand.u32 2147483647, %v4509_v37  ;;  %v4382_v37 = vmul.f32 %v9028_v48, %v8997_v60 }
 0xb45   :  { %v4513_v46 = vmul.f32 %v4512_v40, %v4510_v24  ;;  %v9103_v24 = vsub.f32 %v8880_v25, %v4382_v37  ;;  %v4707_v40 = vld.sshfl [vmem:[#allocation1] sm:$0xff pattern:$0x75316420] }
 0xb47   :  { %v4514_v53 = vxor.u32 2147483648, %v4513_v46 }
 0xb49   :  { %v4515_v12 = vsel %vm4394_vm9, %v4514_v53, %v4513_v46  ;;  %v4708_v46 = vld.sshfl [vmem:[#allocation1 + $0x8] sm:$0xff pattern:$0x75316420] }
 0xb4a   :  { %v4518_v8 = vsel %vm4393_vm10, %v9015_v22, %v4515_v12  ;;  %4718 = vst [vmem:[#allocation1] ss:$2 sm:$0xff] %v7729_v0 }
 0xb4b   :  { %v4520_v33 = vmul.f32 %v4518_v8, %v4518_v8 }
 0xb4d   :  { %v4521_v36 = vmul.f32 -0.001358992, %v4520_v33  ;;  %v4528_v20 = vmul.f32 -0.00019511016, %v4520_v33 }
 0xb4f   :  { %v4522_v4 = vadd.f32 0.041655596, %v4521_v36  ;;  %v4529_v54 = vadd.f32 0.008332121, %v4528_v20 }
 0xb51   :  { %v4523_v28 = vmul.f32 %v4522_v4, %v4520_v33  ;;  %v4530_v10 = vmul.f32 %v4529_v54, %v4520_v33  ;;  %v4719_v53 = vld.sshfl [vmem:[#allocation1] sm:$0xff pattern:$0x75316420]  ;;  %v4720_v12 = vld.sshfl [vmem:[#allocation1 + $0x8] sm:$0xff pattern:$0x75316420] }
 0xb52   :  { %4750 = vst [vmem:[#allocation1] ss:$2 sm:$0xff] %v7723_v42 }
 0xb53   :  { %v4524_v58 = vadd.f32 -0.4999988, %v4523_v28  ;;  %v4531_v11 = vadd.f32 -0.16666654, %v4530_v10 }
 0xb55   :  { %v4525_v61 = vmul.f32 %v4524_v58, %v4520_v33  ;;  %v4532_v57 = vmul.f32 %v4531_v11, %v4520_v33 }
 0xb57   :  { %v4526_v63 = vadd.f32 1.0, %v4525_v61  ;;  %v4533_v18 = vadd.f32 1.0, %v4532_v57 }
 0xb59   :  { %v4534_v52 = vmul.f32 %v4533_v18, %v4518_v8  ;;  %v4542_v51 = vxor.u32 2147483648, %v4526_v63  ;;  %v4751_v45 = vld.sshfl [vmem:[#allocation1] sm:$0xff pattern:$0x75316420] }
 0xb5a   :  { %v4752_v8 = vld.sshfl [vmem:[#allocation1 + $0x8] sm:$0xff pattern:$0x75316420] }
 0xb5b   :  { %v4539_v13 = vxor.u32 2147483648, %v4534_v52  ;;  %v4543_v26 = vsel %vm4541_vm13, %v4542_v51, %v4534_v52  ;;  %v4698_v43 = vsel %vm4696_vm0, %v4542_v51, %v4534_v52  ;;  %4757 = vst [vmem:[#allocation1] ss:$2 sm:$0xff] %v7729_v0 }
 0xb5d   :  { %v4540_v32 = vsel %vm4538_vm12, %v4526_v63, %v4539_v13  ;;  %v4695_v47 = vsel %vm4693_vm15, %v4526_v63, %v4539_v13 }
 0xb5e   :  { %v4544_v56 = vsel %vm4537_vm11, %v4540_v32, %v4543_v26  ;;  %v4699_v55 = vsel %vm4692_vm14, %v4695_v47, %v4698_v43 }
 0xb5f   :  { %v4545_v14 = vsel %vm4535_vm1, nan, %v4544_v56  ;;  %v4700_v3 = vsel %vm4535_vm1, nan, %v4699_v55 }
 0xb60   :  { %4703 = vperm.xlu0 %7422, %v4545_v14   ;;  %v4744_v41 = vsub.f32 0.0, %v4700_v3  ;;  %v4769_v54 = vpop.permute.xlu2 %4768 }
 0xb62   :  { %4747 = vperm.xlu1 %7423, %v4744_v41   ;;  %v4758_v25 = vld.sshfl [vmem:[#allocation1] sm:$0xff pattern:$0x75316420]  ;;  %v4759_v60 = vld.sshfl [vmem:[#allocation1 + $0x8] sm:$0xff pattern:$0x75316420] }
 0xb63   :  { %4781 = vst [vmem:[#allocation1] ss:$2 sm:$0xff] %v7737_v50 }
 0xb69   :  { %v4730_v51 = vpop.permute.xlu2 %4729 }
 0xb6a   :  { %4715 = vperm.xlu1 %7423, %v4700_v3   ;;  %v4782_v55 = vld.sshfl [vmem:[#allocation1] sm:$0xff pattern:$0x75316420]  ;;  %v4783_v14 = vld.sshfl [vmem:[#allocation1 + $0x8] sm:$0xff pattern:$0x75316420] }
 0xb72   :  { %7426 = vset.pattern.permute.xlu1 %v7619_v62 }
 0xb73   :  { %4736 = vperm.xlu1 %7426, %v9103_v24  }
 0xb7b   :  { %7427 = vset.pattern.permute.xlu1 %v7611_v2 }
 0xbd2   :  { %v4704_v48 = vpop.permute.xlu0 %4703 }
 0xbd3   :  { %v4762_v34 = vmul.f32 %v4758_v25, %v4704_v48  ;;  %v4763_v4 = vmul.f32 %v4759_v60, %v4704_v48  ;;  %v4711_v57 = vmul.f32 %v4707_v40, %v4704_v48  ;;  %v4712_v63 = vmul.f32 %v4708_v46, %v4704_v48 }
 0xbd4   :  { %v4748_v33 = vpop.permute.xlu1 %4747 }
 0xbd5   :  { %v4755_v36 = vmul.f32 %v4751_v45, %v4748_v33  ;;  %v4756_v20 = vmul.f32 %v4752_v8, %v4748_v33 }
 0xbd7   :  { %v4764_v39 = vadd.f32 %v4762_v34, %v4755_v36  ;;  %v4765_v28 = vadd.f32 %v4763_v4, %v4756_v20 }
 0xbd9   :  { %v4771_v10 = vadd.f32 %v4769_v54, %v4764_v39  ;;  %v4772_v58 = vadd.f32 %v4769_v54, %v4765_v28 }
 0xbdb   :  { %v4773_v11 = vmax.f32 %v4771_v10, 0.1  ;;  %v4774_v7 = vmax.f32 %v4772_v58, 0.1  ;;  %v4802_v56 = vsub.f32 %v4771_v10, %v4769_v54  ;;  %v4803_v37 = vsub.f32 %v4772_v58, %v4769_v54 }
 0xbdc   :  { %v4716_v61 = vpop.permute.xlu1 %4715 }
 0xbdd   :  { %7513 = vrcp.f32 %v4773_v11  ;;  %v4723_v18 = vmul.f32 %v4719_v53, %v4716_v61  ;;  %v4724_v31 = vmul.f32 %v4720_v12, %v4716_v61 }
 0xbde   :  { %7515 = vrcp.f32 %v4774_v7 }
 0xbdf   :  { %v4725_v5 = vadd.f32 %v4723_v18, %v4711_v57  ;;  %v4726_v52 = vadd.f32 %v4724_v31, %v4712_v63 }
 0xbe1   :  { %v4732_v13 = vadd.f32 %v4730_v51, %v4725_v5  ;;  %v4733_v32 = vadd.f32 %v4730_v51, %v4726_v52 }
 0xbe3   :  { %v7514_v26 = vpop.eup %7513  ;;  %v4809_v47 = vrot.slane %v4733_v32, 4  ;;  %v4804_v46 = vsub.f32 %v4730_v51, %v4732_v13  ;;  %v4805_v12 = vsub.f32 %v4730_v51, %v4733_v32 }
 0xbe4   :  { %v7516_v43 = vpop.eup %7515  ;;  %v4779_v3 = vmul.f32 %v7514_v26, %v4732_v13  ;;  %v4777_v41 = vmul.f32 %v7514_v26, %v7514_v26  ;;  %v4819_v7 = vmul.f32 %v7514_v26, %v4802_v56 }
 0xbe5   :  { %v4778_v40 = vmul.f32 %v7516_v43, %v7516_v43  ;;  %v4780_v45 = vmul.f32 %v7516_v43, %v4733_v32  ;;  %v4737_v53 = vpop.permute.xlu1 %4736  ;;  %v4796_v8 = vrot.slane %v7516_v43, 4  ;;  %v4810_v25 = vsel %vm426_vm5, %v4732_v13, %v4809_v47 }
 0xbe6   :  { %v4821_v60 = vmul.f32 %v4777_v41, %v4732_v13  ;;  %v4820_v48 = vmul.f32 %v7516_v43, %v4803_v37  ;;  %v4786_v33 = vsub.f32 %v4779_v3, %v4782_v55  ;;  %v4812_v4 = vmul.f32 %v4810_v25, %v7761_v35 }
 0xbe7   :  { %v4787_v36 = vsub.f32 %v4780_v45, %v4783_v14  ;;  %v4822_v20 = vmul.f32 %v4778_v40, %v4733_v32  ;;  %v4797_v34 = vsel %vm426_vm5, %v7514_v26, %v4796_v8  ;;  %v4815_v39 = vrot.slane %v4778_v40, 4 }
 0xbe8   :  { %v4741_v54 = vperm.slane %v4737_v53, %v7742_v9  ;;  %v4806_v58 = vmul.f32 %v8919_v49, %v4797_v34  ;;  %v4823_v11 = vmul.f32 %v4821_v60, %v4804_v46  ;;  %v4838_v31 = vrot.slane %v4805_v12, 4 }
 0xbe9   :  { %v4790_v28 = vrot.slane %v4787_v36, 4  ;;  %v4824_v10 = vmul.f32 %v4822_v20, %v4805_v12  ;;  %v4816_v61 = vsel %vm426_vm5, %v4777_v41, %v4815_v39 }
 0xbea   :  { %v4743_v57 = vadd.f32 %v8897_v27, %v4741_v54  ;;  %v4842_v5 = vmul.f32 %v4806_v58, %v4806_v58  ;;  %v9121_v51 = vmul.f32 %v4816_v61, %v4812_v4  ;;  %v4825_v43 = vsub.f32 %v4819_v7, %v4823_v11 }
 0xbeb   :  { %v4791_v63 = vsel %vm426_vm5, %v4786_v33, %v4790_v28  ;;  %v4826_v18 = vsub.f32 %v4820_v48, %v4824_v10  ;;  %v4839_v14 = vsel %vm426_vm5, %v4804_v46, %v4838_v31  ;;  %v9153_v10 = vmul.f32 %v8946_v59, %v4797_v34 }
 0xbec   :  { %v4793_v52 = vmul.f32 %v8919_v49, %v4791_v63  ;;  %v4799_v13 = vmul.f32 %v4797_v34, %v4743_v57  ;;  %v4834_v32 = vmul.f32 %v4743_v57, %v7759_v30  ;;  %4844 = vst [vmem:[#allocation1] ss:$2 sm:$0xff] %v4842_v5  ;;  %v4855_v53 = vmul.f32 %v9121_v51, %v4806_v58 }
 0xbed   :  { %v4829_v47 = vrot.slane %v4826_v18, 4  ;;  %v4879_v11 = vmul.f32 %v9153_v10, %v9153_v10 }
 0xbee   :  { %v9124_v26 = vmul.f32 %v4806_v58, %v4793_v52  ;;  %v4984_v56 = vmul.f32 %v9121_v51, %v4793_v52  ;;  %v4800_v27 = vsub.f32 %v4799_v13, %v8911_v38  ;;  %v4835_v55 = vmul.f32 %v4834_v32, %v4816_v61 }
 0xbef   :  { %v4830_v3 = vsel %vm426_vm5, %v4825_v43, %v4829_v47 }
 0xbf0   :  { %v9131_v41 = vmul.f32 %v8919_v49, %v4830_v3  ;;  %v9134_v37 = vmul.f32 %v8946_v59, %v4800_v27  ;;  %v9136_v40 = vmul.f32 %v4839_v14, %v4835_v55  ;;  %v4892_v18 = vmul.f32 %v4835_v55, %v9153_v10 }
 0xbf1   :  { %v4917_v14 = vmul.f32 %v4835_v55, %v4835_v55  ;;  %v4916_v3 = vmul.f32 %v9121_v51, %v9121_v51 }
 0xbf2   :  { %v4998_v45 = vmul.f32 %v9131_v41, %v4793_v52  ;;  %v4985_v12 = vmul.f32 %v4835_v55, %v9134_v37  ;;  %v4999_v38 = vmul.f32 %v9136_v40, %v9134_v37  ;;  %v4867_v36 = vmul.f32 %v9131_v41, %v4806_v58 }
 0xbf3   :  { %v4845_v46 = vld.sshfl [vmem:[#allocation1] sm:$0xff pattern:$0x75316420]  ;;  %v4846_v8 = vld.sshfl [vmem:[#allocation1 + $0x8] sm:$0xff pattern:$0x75316420]  ;;  %v4904_v13 = vmul.f32 %v9136_v40, %v9153_v10 }
 0xbf4   :  { %v4849_v25 = vsel %vm426_vm5, %v4845_v46, 0.0  ;;  %v4850_v49 = vsel %vm426_vm5, %v4846_v8, 0.0  ;;  %4857 = vst [vmem:[#allocation1] ss:$2 sm:$0xff] %v4855_v53  ;;  %v9145_v60 = vadd.f32 %v4985_v12, %v4984_v56  ;;  %v9147_v48 = vadd.f32 %v4999_v38, %v4998_v45 }
 0xbf5   :  { %v4851_v33 = vadd.f32 %v4850_v49, %v4849_v25  ;;  %v4918_v45 = vadd.f32 %v4917_v14, %v4916_v3  ;;  %v4931_v25 = vmul.f32 %v9131_v41, %v9121_v51  ;;  %v4932_v49 = vmul.f32 %v9136_v40, %v4835_v55 }
 0xbf7   :  { %4852 = vadd.xlane.f32.xlu2 %v4851_v33  ;;  %v4933_v33 = vadd.f32 %v4932_v49, %v4931_v25 }
 0xbfb   :  { %v4858_v20 = vld.sshfl [vmem:[#allocation1] sm:$0xff pattern:$0x75316420]  ;;  %v4859_v4 = vld.sshfl [vmem:[#allocation1 + $0x8] sm:$0xff pattern:$0x75316420] }
 0xbfc   :  { %v4862_v39 = vsel %vm426_vm5, %v4858_v20, 0.0  ;;  %v4863_v54 = vsel %vm426_vm5, %v4859_v4, 0.0  ;;  %4869 = vst [vmem:[#allocation1] ss:$2 sm:$0xff] %v4867_v36 }
 0xbfd   :  { %v4864_v28 = vadd.f32 %v4863_v54, %v4862_v39 }
 0xbff   :  { %4865 = vadd.xlane.f32.xlu1 %v4864_v28  ;;  %v4945_v28 = vmul.f32 %v9131_v41, %v9131_v41 }
 0xc03   :  { %v4870_v7 = vld.sshfl [vmem:[#allocation1] sm:$0xff pattern:$0x75316420]  ;;  %v4871_v61 = vld.sshfl [vmem:[#allocation1 + $0x8] sm:$0xff pattern:$0x75316420] }
 0xc04   :  { %v4874_v57 = vsel %vm426_vm5, %v4870_v7, 0.0  ;;  %v4875_v58 = vsel %vm426_vm5, %v4871_v61, 0.0  ;;  %4881 = vst [vmem:[#allocation1] ss:$2 sm:$0xff] %v4879_v11  ;;  %v4946_v11 = vmul.f32 %v9136_v40, %v9136_v40 }
 0xc05   :  { %v4876_v63 = vadd.f32 %v4875_v58, %v4874_v57 }
 0xc06   :  { %v4947_v51 = vadd.f32 %v4946_v11, %v4945_v28 }
 0xc07   :  { %4877 = vadd.xlane.f32.xlu1 %v4876_v63 }
 0xc0b   :  { %v4882_v31 = vld.sshfl [vmem:[#allocation1] sm:$0xff pattern:$0x75316420]  ;;  %v4883_v5 = vld.sshfl [vmem:[#allocation1 + $0x8] sm:$0xff pattern:$0x75316420] }
 0xc0c   :  { %v4886_v59 = vsel %vm426_vm5, %v4882_v31, 0.0  ;;  %v4887_v34 = vsel %vm426_vm5, %v4883_v5, 0.0  ;;  %4894 = vst [vmem:[#allocation1] ss:$2 sm:$0xff] %v4892_v18  ;;  %v4972_v5 = vmul.f32 %v9153_v10, %v9134_v37 }
 0xc0d   :  { %v4888_v52 = vadd.f32 %v4887_v34, %v4886_v59 }
 0xc0f   :  { %4889 = vadd.xlane.f32.xlu0 %v4888_v52 }
 0xc13   :  { %v4895_v32 = vld.sshfl [vmem:[#allocation1] sm:$0xff pattern:$0x75316420]  ;;  %v4896_v47 = vld.sshfl [vmem:[#allocation1 + $0x8] sm:$0xff pattern:$0x75316420] }
 0xc14   :  { %v4899_v43 = vsel %vm426_vm5, %v4895_v32, 0.0  ;;  %v4900_v56 = vsel %vm426_vm5, %v4896_v47, 0.0  ;;  %4906 = vst [vmem:[#allocation1] ss:$2 sm:$0xff] %v4904_v13 }
 0xc15   :  { %v4901_v27 = vadd.f32 %v4900_v56, %v4899_v43 }
 0xc17   :  { %4902 = vadd.xlane.f32.xlu2 %v4901_v27 }
 0xc1b   :  { %v4907_v53 = vld.sshfl [vmem:[#allocation1] sm:$0xff pattern:$0x75316420]  ;;  %v4908_v12 = vld.sshfl [vmem:[#allocation1 + $0x8] sm:$0xff pattern:$0x75316420] }
 0xc1c   :  { %v4911_v38 = vsel %vm426_vm5, %v4907_v53, 0.0  ;;  %v4912_v46 = vsel %vm426_vm5, %v4908_v12, 0.0  ;;  %4920 = vst [vmem:[#allocation1] ss:$2 sm:$0xff] %v4918_v45 }
 0xc1d   :  { %v4913_v8 = vadd.f32 %v4912_v46, %v4911_v38 }
 0xc1f   :  { %4914 = vadd.xlane.f32.xlu2 %v4913_v8 }
 0xc23   :  { %v4921_v36 = vld.sshfl [vmem:[#allocation1] sm:$0xff pattern:$0x75316420]  ;;  %v4922_v20 = vld.sshfl [vmem:[#allocation1 + $0x8] sm:$0xff pattern:$0x75316420] }
 0xc24   :  { %v4925_v4 = vsel %vm426_vm5, %v4921_v36, 0.0  ;;  %v4926_v39 = vsel %vm426_vm5, %v4922_v20, 0.0  ;;  %4935 = vst [vmem:[#allocation1] ss:$2 sm:$0xff] %v4933_v33 }
 0xc25   :  { %v4927_v54 = vadd.f32 %v4926_v39, %v4925_v4 }
 0xc27   :  { %4928 = vadd.xlane.f32.xlu0 %v4927_v54 }
 0xc2b   :  { %v4936_v7 = vld.sshfl [vmem:[#allocation1] sm:$0xff pattern:$0x75316420]  ;;  %v4937_v55 = vld.sshfl [vmem:[#allocation1 + $0x8] sm:$0xff pattern:$0x75316420] }
 0xc2c   :  { %v4940_v61 = vsel %vm426_vm5, %v4936_v7, 0.0  ;;  %v4941_v57 = vsel %vm426_vm5, %v4937_v55, 0.0  ;;  %4949 = vst [vmem:[#allocation1] ss:$2 sm:$0xff] %v4947_v51 }
 0xc2d   :  { %v4942_v58 = vadd.f32 %v4941_v57, %v4940_v61 }
 0xc2f   :  { %4943 = vadd.xlane.f32.xlu0 %v4942_v58 }
 0xc33   :  { %v4950_v63 = vld.sshfl [vmem:[#allocation1] sm:$0xff pattern:$0x75316420]  ;;  %v4951_v18 = vld.sshfl [vmem:[#allocation1 + $0x8] sm:$0xff pattern:$0x75316420] }
 0xc34   :  { %v4954_v31 = vsel %vm426_vm5, %v4950_v63, 0.0  ;;  %v4955_v41 = vsel %vm426_vm5, %v4951_v18, 0.0  ;;  %4962 = vst [vmem:[#allocation1] ss:$2 sm:$0xff] %v9124_v26 }
 0xc35   :  { %v4956_v40 = vadd.f32 %v4955_v41, %v4954_v31 }
 0xc37   :  { %4957 = vadd.xlane.f32.xlu1 %v4956_v40 }
 0xc3b   :  { %v4963_v59 = vld.sshfl [vmem:[#allocation1] sm:$0xff pattern:$0x75316420]  ;;  %v4964_v34 = vld.sshfl [vmem:[#allocation1 + $0x8] sm:$0xff pattern:$0x75316420] }
 0xc3c   :  { %v4967_v52 = vsel %vm426_vm5, %v4963_v59, 0.0  ;;  %v4968_v13 = vsel %vm426_vm5, %v4964_v34, 0.0  ;;  %4974 = vst [vmem:[#allocation1] ss:$2 sm:$0xff] %v4972_v5 }
 0xc3d   :  { %v4969_v32 = vadd.f32 %v4968_v13, %v4967_v52 }
 0xc3f   :  { %4970 = vadd.xlane.f32.xlu2 %v4969_v32 }
 0xc43   :  { %v4975_v47 = vld.sshfl [vmem:[#allocation1] sm:$0xff pattern:$0x75316420]  ;;  %v4976_v43 = vld.sshfl [vmem:[#allocation1 + $0x8] sm:$0xff pattern:$0x75316420] }
 0xc44   :  { %v4979_v56 = vsel %vm426_vm5, %v4975_v47, 0.0  ;;  %v4980_v26 = vsel %vm426_vm5, %v4976_v43, 0.0  ;;  %4988 = vst [vmem:[#allocation1] ss:$2 sm:$0xff] %v9145_v60 }
 0xc45   :  { %v4981_v27 = vadd.f32 %v4980_v26, %v4979_v56 }
 0xc47   :  { %4982 = vadd.xlane.f32.xlu0 %v4981_v27 }
 0xc4b   :  { %v4989_v37 = vld.sshfl [vmem:[#allocation1] sm:$0xff pattern:$0x75316420]  ;;  %v4990_v10 = vld.sshfl [vmem:[#allocation1 + $0x8] sm:$0xff pattern:$0x75316420] }
 0xc4c   :  { %v4993_v14 = vsel %vm426_vm5, %v4989_v37, 0.0  ;;  %v4994_v3 = vsel %vm426_vm5, %v4990_v10, 0.0  ;;  %5002 = vst [vmem:[#allocation1] ss:$2 sm:$0xff] %v9147_v48 }
 0xc4d   :  { %v4995_v45 = vadd.f32 %v4994_v3, %v4993_v14 }
 0xc4f   :  { %4996 = vadd.xlane.f32.xlu1 %v4995_v45 }
 0xc53   :  { %v5003_v53 = vld.sshfl [vmem:[#allocation1] sm:$0xff pattern:$0x75316420]  ;;  %v5004_v12 = vld.sshfl [vmem:[#allocation1 + $0x8] sm:$0xff pattern:$0x75316420] }
 0xc54   :  { %v5007_v38 = vsel %vm426_vm5, %v5003_v53, 0.0  ;;  %v5008_v46 = vsel %vm426_vm5, %v5004_v12, 0.0  ;;  %5433 = vst [vmem:[#allocation1] ss:$2 sm:$0xff] %v7723_v42 }
 0xc55   :  { %v5009_v60 = vadd.f32 %v5008_v46, %v5007_v38 }
 0xc57   :  { %5010 = vadd.xlane.f32.xlu2 %v5009_v60 }
 0xc6a   :  { %v4853_v8 = vpop.xlane.xlu2 %4852 }
 0xc6b   :  { %v4854_v25 = vadd.f32 1e-05, %v4853_v8 }
 0xc6d   :  { %7517 = vrcp.f32 %v4854_v25  ;;  %v5023_v11 = vand.u32 2147483648, %v4854_v25  ;;  %vm5017_vm3 = vweird.f32 %v4854_v25  ;;  %v5021_v7 = vand.u32 2147483647, %v4854_v25 }
 0xc6f   :  { %v5024_v63 = vor.u32 1.1754944e-38, %v5023_v11  ;;  %vm5022_vm8 = vcmp.eq.f32.partialorder %v5021_v7, 8.507059e+37 }
 0xc72   :  { %v9199_v5 = vpop.xlane.xlu1 %4865 }
 0xc73   :  { %v7518_v49 = vpop.eup %7517 }
 0xc74   :  { %v5013_v33 = vmul.f32 %v7518_v49, %v4854_v25  ;;  %vm5018_vm2 = vweird.f32 %v7518_v49 }
 0xc75   :  { %vm5019_vm4 = vmor %vm5017_vm3, %vm5018_vm2 }
 0xc76   :  { %v5014_v48 = vsub.f32 1.0, %v5013_v33 }
 0xc78   :  { %v5015_v4 = vmul.f32 %v7518_v49, %v5014_v48 }
 0xc7a   :  { %v5016_v28 = vadd.f32 %v7518_v49, %v5015_v4  ;;  %v9211_v37 = vpop.xlane.xlu1 %4877 }
 0xc7c   :  { %v5020_v57 = vsel %vm5019_vm4, %v7518_v49, %v5016_v28 }
 0xc7d   :  { %v9197_v31 = vsel %vm5022_vm8, %v5024_v63, %v5020_v57 }
 0xc7e   :  { %v5027_v34 = vmul.f32 %v9197_v31, %v9199_v5  ;;  %v5028_v3 = vmul.f32 %v9197_v31, %v9211_v37 }
 0xc80   :  { %v5029_v47 = vmul.f32 %v5027_v34, %v9199_v5  ;;  %v5031_v12 = vmul.f32 %v5027_v34, %v9211_v37 }
 0xc82   :  { %v4890_v36 = vpop.xlane.xlu0 %4889 }
 0xc83   :  { %v4891_v20 = vadd.f32 1e-05, %v4890_v36  ;;  %v5033_v36 = vmul.f32 %v5028_v3, %v9211_v37 }
 0xc85   :  { %7519 = vrcp.f32 %v4891_v20  ;;  %v5050_v61 = vand.u32 2147483648, %v4891_v20  ;;  %v5048_v58 = vand.u32 2147483647, %v4891_v20  ;;  %vm5044_vm7 = vweird.f32 %v4891_v20 }
 0xc87   :  { %v5051_v40 = vor.u32 1.1754944e-38, %v5050_v61  ;;  %vm5049_vm10 = vcmp.eq.f32.partialorder %v5048_v58, 8.507059e+37 }
 0xc8a   :  { %v9205_v52 = vpop.xlane.xlu2 %4902 }
 0xc8b   :  { %v7520_v39 = vpop.eup %7519 }
 0xc8c   :  { %v5040_v54 = vmul.f32 %v7520_v39, %v4891_v20  ;;  %vm5045_vm6 = vweird.f32 %v7520_v39 }
 0xc8d   :  { %vm5046_vm9 = vmor %vm5044_vm7, %vm5045_vm6 }
 0xc8e   :  { %v5041_v51 = vsub.f32 1.0, %v5040_v54 }
 0xc90   :  { %v5042_v55 = vmul.f32 %v7520_v39, %v5041_v51 }
 0xc92   :  { %v5043_v18 = vadd.f32 %v7520_v39, %v5042_v55  ;;  %v4915_v33 = vpop.xlane.xlu2 %4914 }
 0xc94   :  { %v5047_v41 = vsel %vm5046_vm9, %v7520_v39, %v5043_v18 }
 0xc95   :  { %v9201_v59 = vsel %vm5049_vm10, %v5051_v40, %v5047_v41 }
 0xc96   :  { %v5054_v13 = vmul.f32 %v9201_v59, %v9205_v52  ;;  %v5055_v20 = vmul.f32 %v9201_v59, %v4915_v33 }
 0xc98   :  { %v5056_v56 = vmul.f32 %v5054_v13, %v9205_v52  ;;  %v5058_v48 = vmul.f32 %v5054_v13, %v4915_v33  ;;  %v5060_v7 = vmul.f32 %v5055_v20, %v4915_v33 }
 0xc9a   :  { %v4929_v32 = vpop.xlane.xlu0 %4928 }
 0xc9b   :  { %v4930_v43 = vadd.f32 1e-05, %v4929_v32 }
 0xc9d   :  { %v5030_v26 = vsub.f32 %v4930_v43, %v5029_v47 }
 0xc9f   :  { %v5057_v27 = vsub.f32 %v5030_v26, %v5056_v56 }
 0xca1   :  { %7521 = vrcp.f32 %v5057_v27  ;;  %v5075_v46 = vand.u32 2147483647, %v5057_v27  ;;  %v5077_v60 = vand.u32 2147483648, %v5057_v27  ;;  %vm5071_vm12 = vweird.f32 %v5057_v27 }
 0xca2   :  { %v4944_v45 = vpop.xlane.xlu0 %4943 }
 0xca3   :  { %v5032_v8 = vsub.f32 %v4944_v45, %v5031_v12  ;;  %v5078_v39 = vor.u32 1.1754944e-38, %v5077_v60  ;;  %vm5076_vm14 = vcmp.eq.f32.partialorder %v5075_v46, 8.507059e+37 }
 0xca5   :  { %v5059_v54 = vsub.f32 %v5032_v8, %v5058_v48 }
 0xca7   :  { %v7522_v10 = vpop.eup %7521 }
 0xca8   :  { %v5067_v14 = vmul.f32 %v7522_v10, %v5057_v27  ;;  %vm5072_vm11 = vweird.f32 %v7522_v10 }
 0xca9   :  { %vm5073_vm13 = vmor %vm5071_vm12, %vm5072_vm11 }
 0xcaa   :  { %v5068_v53 = vsub.f32 1.0, %v5067_v14  ;;  %v4958_v38 = vpop.xlane.xlu1 %4957 }
 0xcab   :  { %v4959_v49 = vadd.f32 1e-05, %v4958_v38 }
 0xcac   :  { %v5069_v25 = vmul.f32 %v7522_v10, %v5068_v53 }
 0xcad   :  { %v5034_v11 = vsub.f32 %v4959_v49, %v5033_v36 }
 0xcae   :  { %v5070_v4 = vadd.f32 %v7522_v10, %v5069_v25 }
 0xcaf   :  { %v5061_v57 = vsub.f32 %v5034_v11, %v5060_v7 }
 0xcb0   :  { %v5074_v28 = vsel %vm5073_vm13, %v7522_v10, %v5070_v4 }
 0xcb1   :  { %v5079_v51 = vsel %vm5076_vm14, %v5078_v39, %v5074_v28 }
 0xcb2   :  { %v5081_v55 = vmul.f32 %v5079_v51, %v5059_v54  ;;  %v4971_v41 = vpop.xlane.xlu2 %4970 }
 0xcb3   :  { %v5035_v47 = vmul.f32 %v5027_v34, %v4971_v41  ;;  %v5037_v14 = vmul.f32 %v5028_v3, %v4971_v41 }
 0xcb4   :  { %v5082_v61 = vmul.f32 %v5081_v55, %v5059_v54 }
 0xcb6   :  { %v5083_v58 = vsub.f32 %v5061_v57, %v5082_v61 }
 0xcb8   :  { %7523 = vrcp.f32 %v5083_v58  ;;  %v5097_v12 = vand.u32 2147483648, %v5083_v58  ;;  %vm5091_vm0 = vweird.f32 %v5083_v58  ;;  %v5095_v60 = vand.u32 2147483647, %v5083_v58 }
 0xcba   :  { %v4983_v43 = vpop.xlane.xlu0 %4982  ;;  %v5098_v36 = vor.u32 1.1754944e-38, %v5097_v12  ;;  %vm5096_vm2 = vcmp.eq.f32.partialorder %v5095_v60, 8.507059e+37 }
 0xcbb   :  { %v5062_v27 = vmul.f32 %v5054_v13, %v4983_v43  ;;  %v5064_v38 = vmul.f32 %v5055_v20, %v4983_v43 }
 0xcbe   :  { %v7524_v63 = vpop.eup %7523 }
 0xcbf   :  { %v5087_v18 = vmul.f32 %v7524_v63, %v5083_v58  ;;  %vm5092_vm15 = vweird.f32 %v7524_v63 }
 0xcc0   :  { %vm5093_vm1 = vmor %vm5091_vm0, %vm5092_vm15 }
 0xcc1   :  { %v5088_v40 = vsub.f32 1.0, %v5087_v18 }
 0xcc2   :  { %v4997_v32 = vpop.xlane.xlu1 %4996 }
 0xcc3   :  { %v5036_v56 = vsub.f32 %v4997_v32, %v5035_v47  ;;  %v5089_v26 = vmul.f32 %v7524_v63, %v5088_v40 }
 0xcc5   :  { %v5063_v10 = vsub.f32 %v5036_v56, %v5062_v27  ;;  %v5090_v45 = vadd.f32 %v7524_v63, %v5089_v26 }
 0xcc7   :  { %v5084_v8 = vmul.f32 %v5081_v55, %v5063_v10  ;;  %v5094_v49 = vsel %vm5093_vm1, %v7524_v63, %v5090_v45 }
 0xcc8   :  { %v5099_v48 = vsel %vm5096_vm2, %v5098_v36, %v5094_v49 }
 0xcca   :  { %v5011_v53 = vpop.xlane.xlu2 %5010 }
 0xccb   :  { %v5038_v46 = vsub.f32 %v5011_v53, %v5037_v14 }
 0xccd   :  { %v5065_v25 = vsub.f32 %v5038_v46, %v5064_v38 }
 0xccf   :  { %v5085_v34 = vsub.f32 %v5065_v25, %v5084_v8 }
 0xcd1   :  { %v5101_v4 = vmul.f32 %v5099_v48, %v5085_v34 }
 0xcd3   :  { %v9219_v13 = vsub.f32 %v9015_v22, %v5101_v4  ;;  %v5102_v3 = vmul.f32 %v5101_v4, %v5059_v54  ;;  %v5107_v39 = vmul.f32 %v5101_v4, %v4915_v33  ;;  %v5112_v33 = vmul.f32 %v5101_v4, %v9211_v37 }
 0xcd5   :  { %v5122_v28 = vand.u32 2139095040, %v9219_v13  ;;  %v5103_v20 = vsub.f32 %v5063_v10, %v5102_v3  ;;  %v5119_v58 = vand.u32 2147483647, %v9219_v13  ;;  %vm5121_vm0 = vcmp.lt.s32.totalorder %v9219_v13, 0 }
 0xcd7   :  { %v5123_v11 = vshrl.u32 %v5122_v28, 23  ;;  %v5104_v7 = vmul.f32 %v5103_v20, %v5079_v51  ;;  %vm5120_vm1 = vcmp.le.f32.partialorder %v5119_v58, 0.7853982 }
 0xcd9   :  { %v7366_v61 = vadd.s32 4294967169, %v5123_v11  ;;  %v9223_v55 = vsub.f32 %v9019_v16, %v5104_v7  ;;  %v5110_v57 = vmul.f32 %v5104_v7, %v9199_v5  ;;  %v5105_v63 = vmul.f32 %v5104_v7, %v9205_v52 }
 0xcda   :  { %v5126_v16 = vand.u32 8388607, %v5119_v58 }
 0xcdb   :  { %v5129_v18 = vadd.s32 1, %v7366_v61  ;;  %5495 = vperm.xlu2 %7428, %v9223_v55   ;;  %v5111_v22 = vsub.f32 %v4971_v41, %v5110_v57  ;;  %v5106_v54 = vsub.f32 %v4983_v43, %v5105_v63 }
 0xcdc   :  { %v5127_v56 = vor.u32 8388608, %v5126_v16 }
 0xcdd   :  { %vm5130_vm3 = vcmp.gt.s32.totalorder %v5129_v18, 0  ;;  %v9230_v40 = vsub.f32 %v5111_v22, %v5112_v33  ;;  %v9234_v32 = vsub.f32 %v5106_v54, %v5107_v39 }
 0xcde   :  { %v5131_v51 = vsel %vm5130_vm3, %v5129_v18, 0  ;;  %v9250_v49 = vshll.u32 %v5127_v56, 8 }
 0xcdf   :  { %v5133_v5 = vand.u32 31, %v5131_v51  ;;  %v9236_v52 = vshrl.u32 %v5131_v51, 5 }
 0xce0   :  { %v5168_v11 = vand.u32 65535, %v9250_v49  ;;  %v5169_v7 = vshrl.u32 %v9250_v49, 16 }
 0xce1   :  { %v5134_v47 = vsub.s32 32, %v5133_v5  ;;  %v5136_v26 = vshll.u32 %v7613_v15, %v5133_v5  ;;  %v5139_v41 = vshll.u32 %v7614_v17, %v5133_v5  ;;  %v5142_v27 = vshll.u32 %v7615_v19, %v5133_v5 }
 0xce2   :  { %v5145_v14 = vshll.u32 %v7616_v21, %v5133_v5  ;;  %v5148_v53 = vshll.u32 %v7617_v23, %v5133_v5  ;;  %vm5151_vm4 = vcmp.lt.s32.totalorder %v9236_v52, 1  ;;  %vm5154_vm6 = vcmp.lt.s32.totalorder %v9236_v52, 4 }
 0xce3   :  { %v5137_v37 = vshrl.u32 %v7614_v17, %v5134_v47  ;;  %v5140_v43 = vshrl.u32 %v7615_v19, %v5134_v47  ;;  %v5143_v10 = vshrl.u32 %v7616_v21, %v5134_v47  ;;  %7432 = vset.pattern.permute.xlu2 %v7611_v2  ;;  %v5146_v45 = vshrl.u32 %v7617_v23, %v5134_v47 }
 0xce4   :  { %v5149_v12 = vshrl.u32 %v7618_v29, %v5134_v47  ;;  %vm5153_vm7 = vcmp.lt.s32.totalorder %v9236_v52, 3  ;;  %vm5152_vm8 = vcmp.lt.s32.totalorder %v9236_v52, 2 }
 0xce5   :  { %v5138_v38 = vor.u32 %v5137_v37, %v5136_v26  ;;  %v5141_v46 = vor.u32 %v5140_v43, %v5139_v41  ;;  %v5144_v60 = vor.u32 %v5143_v10, %v5142_v27  ;;  %v5147_v8 = vor.u32 %v5146_v45, %v5145_v14 }
 0xce6   :  { %v5150_v25 = vor.u32 %v5149_v12, %v5148_v53 }
 0xce7   :  { %v5159_v36 = vsel %vm5151_vm4, %v5138_v38, %v5141_v46  ;;  %v5163_v34 = vsel %vm5151_vm4, %v5141_v46, %v5144_v60  ;;  %v5160_v48 = vsel %vm5154_vm6, %v5147_v8, 920167782 }
 0xce8   :  { %v5164_v4 = vsel %vm5154_vm6, %v5150_v25, 1326507024  ;;  %v5161_v3 = vsel %vm5153_vm7, %v5144_v60, %v5160_v48 }
 0xce9   :  { %v5165_v39 = vsel %vm5153_vm7, %v5147_v8, %v5164_v4  ;;  %v5162_v28 = vsel %vm5152_vm8, %v5159_v36, %v5161_v3  ;;  %v5156_v8 = vsel %vm5154_vm6, %v5144_v60, 2102212464 }
 0xcea   :  { %v5166_v20 = vsel %vm5152_vm8, %v5163_v34, %v5165_v39  ;;  %v5192_v63 = vand.u32 65535, %v5162_v28  ;;  %v5193_v18 = vshrl.u32 %v5162_v28, 16  ;;  %v5135_v34 = vshrl.u32 %v7613_v15, %v5134_v47 }
 0xceb   :  { %v5170_v61 = vand.u32 65535, %v5166_v20  ;;  %v5171_v57 = vshrl.u32 %v5166_v20, 16 }
 0xcec   :  { %v5195_v54 = vmul.u32 %v5193_v18, %v5168_v11  ;;  %v5196_v16 = vmul.u32 %v5192_v63, %v5169_v7  ;;  %v5194_v26 = vmul.u32 %v5192_v63, %v5168_v11  ;;  %v5197_v27 = vmul.u32 %v5193_v18, %v5169_v7 }
 0xced   :  { %v5173_v22 = vmul.u32 %v5171_v57, %v5168_v11  ;;  %v5174_v33 = vmul.u32 %v5170_v61, %v5169_v7  ;;  %v5172_v51 = vmul.u32 %v5170_v61, %v5168_v11  ;;  %v5175_v56 = vmul.u32 %v5171_v57, %v5169_v7 }
 0xcee   :  { %v5198_v41 = vshll.u32 %v5195_v54, 16  ;;  %v5200_v14 = vshll.u32 %v5196_v16, 16  ;;  %v5199_v39 = vshrl.u32 %v5195_v54, 16  ;;  %v5155_v20 = vsel %vm5151_vm4, %v5135_v34, %v5138_v38 }
 0xcef   :  { %v5176_v5 = vshll.u32 %v5173_v22, 16  ;;  %v5178_v37 = vshll.u32 %v5174_v33, 16  ;;  %v5177_v48 = vshrl.u32 %v5173_v22, 16  ;;  %v5157_v11 = vsel %vm5153_vm7, %v5141_v46, %v5156_v8 }
 0xcf0   :  { %vm5202_vm10 = vc.u32 %v5194_v26, %v5198_v41  ;;  %v5204_v45 = vadd.s32 %v5198_v41, %v5194_v26  ;;  %v5179_v7 = vshrl.u32 %v5174_v33, 16  ;;  %v5201_v61 = vshrl.u32 %v5196_v16, 16 }
 0xcf1   :  { %vm5180_vm9 = vc.u32 %v5172_v51, %v5176_v5  ;;  %v5182_v43 = vadd.s32 %v5176_v5, %v5172_v51  ;;  %v5203_v12 = vsel %vm5202_vm10, 1, %v7612_v6  ;;  %v5158_v47 = vsel %vm5152_vm8, %v5155_v20, %v5157_v11 }
 0xcf2   :  { %v5181_v10 = vsel %vm5180_vm9, 1, %v7612_v6  ;;  %v5205_v36 = vadd.s32 %v5203_v12, %v5197_v27  ;;  %vm5206_vm12 = vc.u32 %v5204_v45, %v5200_v14  ;;  %v5208_v18 = vadd.s32 %v5204_v45, %v5200_v14 }
 0xcf3   :  { %v5183_v53 = vadd.s32 %v5181_v10, %v5175_v56  ;;  %vm5184_vm11 = vc.u32 %v5182_v43, %v5178_v37  ;;  %v5207_v3 = vsel %vm5206_vm12, 1, %v7612_v6  ;;  %v5212_v54 = vmul.u32 %v9250_v49, %v5158_v47 }
 0xcf4   :  { %v5185_v25 = vsel %vm5184_vm11, 1, %v7612_v6  ;;  %v5209_v28 = vadd.s32 %v5207_v3, %v5205_v36  ;;  %vm5262_vm9 = vweird.f32 %v9219_v13 }
 0xcf5   :  { %v5187_v4 = vadd.s32 %v5185_v25, %v5183_v53 }
 0xcf6   :  { %v5210_v57 = vadd.s32 %v5209_v28, %v5199_v39 }
 0xcf7   :  { %v5188_v60 = vadd.s32 %v5187_v4, %v5177_v48 }
 0xcf8   :  { %v5211_v22 = vadd.s32 %v5210_v57, %v5201_v61 }
 0xcf9   :  { %v5189_v63 = vadd.s32 %v5188_v60, %v5179_v7 }
 0xcfa   :  { %v5215_v51 = vadd.s32 1, %v5211_v22 }
 0xcfb   :  { %vm5214_vm13 = vc.u32 %v5189_v63, %v5208_v18  ;;  %v5213_v52 = vadd.s32 %v5208_v18, %v5189_v63 }
 0xcfc   :  { %v5216_v5 = vsel %vm5214_vm13, %v5215_v51, %v5211_v22 }
 0xcfd   :  { %v5217_v56 = vadd.s32 %v5216_v5, %v5212_v54 }
 0xcff   :  { %v5218_v38 = vadd.s32 536870912, %v5217_v56 }
 0xd01   :  { %v5219_v26 = vshrl.u32 %v5218_v38, 30 }
 0xd03   :  { %v5220_v41 = vshll.u32 %v5219_v26, 30  ;;  %v5243_v39 = vsub.s32 4, %v5219_v26 }
 0xd05   :  { %v5221_v46 = vsub.s32 %v5217_v56, %v5220_v41  ;;  %v5244_v60 = vsel %vm5121_vm0, %v5243_v39, %v5219_v26 }
 0xd06   :  { %v5246_v63 = vsel %vm5120_vm1, 0, %v5244_v60 }
 0xd07   :  { %vm5222_vm14 = vcmp.lt.s32.totalorder %v5221_v46, 0  ;;  %v5223_v33 = vsub.s32 0, %v5221_v46  ;;  %v5417_v54 = vadd.s32 3, %v5246_v63  ;;  %v5263_v41 = vand.u32 3, %v5246_v63 }
 0xd09   :  { %v5224_v16 = vsel %vm5222_vm14, %v5223_v33, %v5221_v46  ;;  %vm5264_vm2 = vcmp.lt.s32.totalorder %v5263_v41, 2  ;;  %vm5265_vm3 = vcmp.eq.s32.totalorder %v5263_v41, 0  ;;  %vm5268_vm4 = vcmp.eq.s32.totalorder %v5263_v41, 2 }
 0xd0a   :  { %v5225_v37 = vclz %v5224_v16 }
 0xd0c   :  { %v7367_v43 = vadd.s32 4294967294, %v5225_v37 }
 0xd0e   :  { %vm7368_vm15 = vcmp.lt.s32.totalorder %v7367_v43, 0 }
 0xd0f   :  { %v5228_v27 = vsel %vm7368_vm15, 0, %v7367_v43 }
 0xd10   :  { %v5229_v10 = vsub.s32 32, %v5228_v27  ;;  %v5233_v14 = vsub.s32 4294967266, %v5228_v27  ;;  %v5230_v45 = vshll.u32 %v5221_v46, %v5228_v27  ;;  %v5418_v46 = vand.u32 3, %v5417_v54 }
 0xd12   :  { %v5231_v53 = vshrl.u32 %v5213_v52, %v5229_v10  ;;  %v5234_v12 = vadd.s32 127, %v5233_v14  ;;  %vm5419_vm6 = vcmp.lt.s32.totalorder %v5418_v46, 2  ;;  %vm5420_vm7 = vcmp.eq.s32.totalorder %v5418_v46, 0 }
 0xd13   :  { %vm5423_vm8 = vcmp.eq.s32.totalorder %v5418_v46, 2 }
 0xd14   :  { %v5232_v49 = vor.u32 %v5231_v53, %v5230_v45  ;;  %v5235_v8 = vshll.u32 %v5234_v12, 23 }
 0xd16   :  { %v5236_v25 = vor.u32 4788187, %v5235_v8  ;;  %v5239_v34 = vcvt.s32.f32 %v5232_v49  ;;  %v5114_v49 = vmul.f32 %v9230_v40, %v9197_v31  ;;  %v5435_v31 = vld.sshfl [vmem:[#allocation1 + $0x8] sm:$0xff pattern:$0x75316420] }
 0xd18   :  { %v5237_v36 = vand.u32 2147483647, %v5236_v25  ;;  %v9295_v8 = vsub.f32 %v9032_v44, %v5114_v49  ;;  %v5109_v25 = vmul.f32 %v9234_v32, %v9201_v59  ;;  %v5434_v44 = vld.sshfl [vmem:[#allocation1] sm:$0xff pattern:$0x75316420] }
 0xd19   :  { %5445 = vst [vmem:[#allocation1] ss:$2 sm:$0xff] %v7729_v0 }
 0xd1a   :  { %v5240_v48 = vmul.f32 %v5239_v34, %v5237_v36  ;;  %v9302_v36 = vsub.f32 %v9103_v24, %v5109_v25 }
 0xd1c   :  { %v5241_v4 = vxor.u32 2147483648, %v5240_v48 }
 0xd1e   :  { %v5242_v3 = vsel %vm5121_vm0, %v5241_v4, %v5240_v48 }
 0xd1f   :  { %v5245_v28 = vsel %vm5120_vm1, %v9219_v13, %v5242_v3 }
 0xd20   :  { %v5247_v20 = vmul.f32 %v5245_v28, %v5245_v28  ;;  %v5446_v40 = vld.sshfl [vmem:[#allocation1] sm:$0xff pattern:$0x75316420]  ;;  %v5447_v34 = vld.sshfl [vmem:[#allocation1 + $0x8] sm:$0xff pattern:$0x75316420] }
 0xd21   :  { %5477 = vst [vmem:[#allocation1] ss:$2 sm:$0xff] %v7723_v42 }
 0xd22   :  { %v5248_v11 = vmul.f32 -0.001358992, %v5247_v20  ;;  %v5255_v7 = vmul.f32 -0.00019511016, %v5247_v20 }
 0xd24   :  { %v5249_v61 = vadd.f32 0.041655596, %v5248_v11  ;;  %v5256_v57 = vadd.f32 0.008332121, %v5255_v7 }
 0xd26   :  { %v5250_v18 = vmul.f32 %v5249_v61, %v5247_v20  ;;  %v5257_v47 = vmul.f32 %v5256_v57, %v5247_v20 }
 0xd28   :  { %v5251_v22 = vadd.f32 -0.4999988, %v5250_v18  ;;  %v5258_v51 = vadd.f32 -0.16666654, %v5257_v47 }
 0xd29   :  { %v5478_v59 = vld.sshfl [vmem:[#allocation1] sm:$0xff pattern:$0x75316420]  ;;  %v5479_v32 = vld.sshfl [vmem:[#allocation1 + $0x8] sm:$0xff pattern:$0x75316420] }
 0xd2a   :  { %v5252_v5 = vmul.f32 %v5251_v22, %v5247_v20  ;;  %v5259_v56 = vmul.f32 %v5258_v51, %v5247_v20  ;;  %5484 = vst [vmem:[#allocation1] ss:$2 sm:$0xff] %v7729_v0 }
 0xd2c   :  { %v5253_v38 = vadd.f32 1.0, %v5252_v5  ;;  %v5260_v58 = vadd.f32 1.0, %v5259_v56 }
 0xd2e   :  { %v5261_v33 = vmul.f32 %v5260_v58, %v5245_v28  ;;  %v5269_v16 = vxor.u32 2147483648, %v5253_v38 }
 0xd30   :  { %v5266_v37 = vxor.u32 2147483648, %v5261_v33  ;;  %v5270_v43 = vsel %vm5268_vm4, %v5269_v16, %v5261_v33  ;;  %v5425_v52 = vsel %vm5423_vm8, %v5269_v16, %v5261_v33 }
 0xd31   :  { %v5485_v24 = vld.sshfl [vmem:[#allocation1] sm:$0xff pattern:$0x75316420]  ;;  %v5486_v48 = vld.sshfl [vmem:[#allocation1 + $0x8] sm:$0xff pattern:$0x75316420] }
 0xd32   :  { %v5267_v26 = vsel %vm5265_vm3, %v5253_v38, %v5266_v37  ;;  %v5422_v27 = vsel %vm5420_vm7, %v5253_v38, %v5266_v37  ;;  %5508 = vst [vmem:[#allocation1] ss:$2 sm:$0xff] %v7737_v50 }
 0xd33   :  { %v5271_v10 = vsel %vm5264_vm2, %v5267_v26, %v5270_v43  ;;  %v5426_v14 = vsel %vm5419_vm6, %v5422_v27, %v5425_v52 }
 0xd34   :  { %v5272_v45 = vsel %vm5262_vm9, nan, %v5271_v10  ;;  %v5427_v53 = vsel %vm5262_vm9, nan, %v5426_v14 }
 0xd35   :  { %5430 = vperm.xlu0 %7422, %v5272_v45   ;;  %v5471_v12 = vsub.f32 0.0, %v5427_v53  ;;  %v5496_v61 = vpop.permute.xlu2 %5495 }
 0xd37   :  { %5474 = vperm.xlu1 %7427, %v5471_v12  }
 0xd39   :  { %v5510_v27 = vld.sshfl [vmem:[#allocation1 + $0x8] sm:$0xff pattern:$0x75316420]  ;;  %v5509_v45 = vld.sshfl [vmem:[#allocation1] sm:$0xff pattern:$0x75316420] }
 0xd3d   :  { %5442 = vperm.xlu0 %7422, %v5427_v53  }
 0xd3f   :  { %7429 = vset.pattern.permute.xlu1 %v7612_v6 }
 0xd40   :  { %5456 = vperm.xlu1 %7429, %v9295_v8  }
 0xd45   :  { %7430 = vset.pattern.permute.xlu0 %v7619_v62 }
 0xd46   :  { %5463 = vperm.xlu0 %7430, %v9302_v36  }
 0xd48   :  { %7433 = vset.pattern.permute.xlu1 %v7610_v1 }
 0xd4e   :  { %7431 = vset.pattern.permute.xlu0 %v7611_v2 }
 0xda7   :  { %v5431_v4 = vpop.permute.xlu0 %5430 }
 0xda8   :  { %v5489_v20 = vmul.f32 %v5485_v24, %v5431_v4  ;;  %v5490_v11 = vmul.f32 %v5486_v48, %v5431_v4  ;;  %v5438_v51 = vmul.f32 %v5434_v44, %v5431_v4  ;;  %v5439_v54 = vmul.f32 %v5435_v31, %v5431_v4 }
 0xda9   :  { %v5475_v3 = vpop.permute.xlu1 %5474 }
 0xdaa   :  { %v5482_v39 = vmul.f32 %v5478_v59, %v5475_v3  ;;  %v5483_v28 = vmul.f32 %v5479_v32, %v5475_v3  ;;  %v9317_v3 = vld [vmem:[%s9867_s2] sm:$0xff] }
 0xdac   :  { %v5491_v7 = vadd.f32 %v5489_v20, %v5482_v39  ;;  %v5492_v60 = vadd.f32 %v5490_v11, %v5483_v28 }
 0xdae   :  { %v5498_v57 = vadd.f32 %v5496_v61, %v5491_v7  ;;  %v5499_v63 = vadd.f32 %v5496_v61, %v5492_v60 }
 0xdaf   :  { %v5443_v18 = vpop.permute.xlu0 %5442 }
 0xdb0   :  { %v5500_v47 = vmax.f32 %v5498_v57, 0.1  ;;  %v5501_v22 = vmax.f32 %v5499_v63, 0.1  ;;  %v5450_v5 = vmul.f32 %v5446_v40, %v5443_v18  ;;  %v5451_v56 = vmul.f32 %v5447_v34, %v5443_v18 }
 0xdb1   :  { %v5529_v10 = vsub.f32 %v5498_v57, %v5496_v61  ;;  %v5530_v49 = vsub.f32 %v5499_v63, %v5496_v61 }
 0xdb2   :  { %7525 = vrcp.f32 %v5500_v47  ;;  %v5457_v38 = vpop.permute.xlu1 %5456  ;;  %v5452_v58 = vadd.f32 %v5450_v5, %v5438_v51  ;;  %v5453_v41 = vadd.f32 %v5451_v56, %v5439_v54  ;;  %v9327_v51 = vld [vmem:[%s9865_s0 + $0x8] sm:$0xff] }
 0xdb3   :  { %7527 = vrcp.f32 %v5501_v22 }
 0xdb4   :  { %v5460_v46 = vadd.f32 %v5457_v38, %v5453_v41  ;;  %v5459_v33 = vadd.f32 %v5457_v38, %v5452_v58 }
 0xdb6   :  { %v5536_v37 = vrot.slane %v5460_v46, 4  ;;  %v5531_v25 = vsub.f32 %v5457_v38, %v5459_v33  ;;  %v5532_v44 = vsub.f32 %v5457_v38, %v5460_v46 }
 0xdb8   :  { %v7526_v16 = vpop.eup %7525  ;;  %v5464_v40 = vpop.permute.xlu0 %5463  ;;  %v5537_v24 = vsel %vm426_vm5, %v5459_v33, %v5536_v37 }
 0xdb9   :  { %v7528_v26 = vpop.eup %7527  ;;  %v5504_v43 = vmul.f32 %v7526_v16, %v7526_v16  ;;  %v5506_v52 = vmul.f32 %v7526_v16, %v5459_v33  ;;  %v5468_v60 = vperm.slane %v5464_v40, %v7742_v9  ;;  %v5539_v61 = vmul.f32 %v5537_v24, %v7761_v35 }
 0xdba   :  { %v5505_v14 = vmul.f32 %v7528_v26, %v7528_v26  ;;  %v5507_v53 = vmul.f32 %v7528_v26, %v5460_v46  ;;  %v5523_v12 = vrot.slane %v7528_v26, 4  ;;  %v5547_v48 = vmul.f32 %v7528_v26, %v5530_v49 }
 0xdbb   :  { %v5548_v31 = vmul.f32 %v5504_v43, %v5459_v33  ;;  %v5513_v4 = vsub.f32 %v5506_v52, %v5509_v45  ;;  %v5546_v18 = vmul.f32 %v7526_v16, %v5529_v10  ;;  %v5470_v54 = vadd.f32 %v9327_v51, %v5468_v60 }
 0xdbc   :  { %v5514_v34 = vsub.f32 %v5507_v53, %v5510_v27  ;;  %v5549_v59 = vmul.f32 %v5505_v14, %v5460_v46  ;;  %v5524_v32 = vsel %vm426_vm5, %v7526_v16, %v5523_v12  ;;  %v5542_v28 = vrot.slane %v5505_v14, 4  ;;  %v9350_v14 = vld [vmem:[%s9867_s2 + $0x8] sm:$0xff] }
 0xdbd   :  { %v5533_v39 = vmul.f32 %v9317_v3, %v5524_v32  ;;  %v5550_v11 = vmul.f32 %v5548_v31, %v5531_v25  ;;  %v5526_v41 = vmul.f32 %v5524_v32, %v5470_v54  ;;  %v5565_v46 = vrot.slane %v5532_v44, 4 }
 0xdbe   :  { %v5517_v20 = vrot.slane %v5514_v34, 4  ;;  %v5551_v7 = vmul.f32 %v5549_v59, %v5532_v44  ;;  %v5543_v57 = vsel %vm426_vm5, %v5504_v43, %v5542_v28  ;;  %v5561_v37 = vmul.f32 %v5470_v54, %v7759_v30  ;;  %v9341_v43 = vld [vmem:[%s9866_s1 + $0x8] sm:$0xff] }
 0xdbf   :  { %v5569_v63 = vmul.f32 %v5533_v39, %v5533_v39  ;;  %v9331_v56 = vmul.f32 %v5543_v57, %v5539_v61  ;;  %v5552_v38 = vsub.f32 %v5546_v18, %v5550_v11  ;;  %v5527_v27 = vsub.f32 %v5526_v41, %v9341_v43 }
 0xdc0   :  { %v5518_v47 = vsel %vm426_vm5, %v5513_v4, %v5517_v20  ;;  %v5553_v22 = vsub.f32 %v5547_v48, %v5551_v7  ;;  %v5562_v10 = vmul.f32 %v5561_v37, %v5543_v57  ;;  %v5566_v53 = vsel %vm426_vm5, %v5531_v25, %v5565_v46 }
 0xdc1   :  { %v5520_v5 = vmul.f32 %v9317_v3, %v5518_v47  ;;  %5571 = vst [vmem:[#allocation1] ss:$2 sm:$0xff] %v5569_v63  ;;  %v9353_v45 = vmul.f32 %v9350_v14, %v5527_v27  ;;  %v5582_v12 = vmul.f32 %v9331_v56, %v5533_v39  ;;  %v9370_v63 = vmul.f32 %v9350_v14, %v5524_v32 }
 0xdc2   :  { %v5556_v58 = vrot.slane %v5553_v22, 4  ;;  %v5568_v44 = vmul.f32 %v5566_v53, %v5562_v10  ;;  %v5643_v53 = vmul.f32 %v9331_v56, %v9331_v56 }
 0xdc3   :  { %v9333_v33 = vmul.f32 %v5533_v39, %v5520_v5  ;;  %v5711_v16 = vmul.f32 %v9331_v56, %v5520_v5  ;;  %v5712_v34 = vmul.f32 %v5562_v10, %v9353_v45  ;;  %v5606_v18 = vmul.f32 %v9370_v63, %v9370_v63 }
 0xdc4   :  { %v5557_v26 = vsel %vm426_vm5, %v5552_v38, %v5556_v58  ;;  %v5726_v4 = vmul.f32 %v5568_v44, %v9353_v45  ;;  %v5631_v32 = vmul.f32 %v5568_v44, %v9370_v63 }
 0xdc5   :  { %v9345_v52 = vmul.f32 %v9317_v3, %v5557_v26  ;;  %v9361_v48 = vadd.f32 %v5712_v34, %v5711_v16 }
 0xdc7   :  { %v5725_v49 = vmul.f32 %v9345_v52, %v5520_v5  ;;  %v5594_v20 = vmul.f32 %v9345_v52, %v5533_v39  ;;  %v5619_v39 = vmul.f32 %v5562_v10, %v9370_v63 }
 0xdc8   :  { %v5572_v31 = vld.sshfl [vmem:[#allocation1] sm:$0xff pattern:$0x75316420]  ;;  %v5573_v40 = vld.sshfl [vmem:[#allocation1 + $0x8] sm:$0xff pattern:$0x75316420] }
 0xdc9   :  { %v5576_v59 = vsel %vm426_vm5, %v5572_v31, 0.0  ;;  %v5577_v24 = vsel %vm426_vm5, %v5573_v40, 0.0  ;;  %5584 = vst [vmem:[#allocation1] ss:$2 sm:$0xff] %v5582_v12  ;;  %v9364_v25 = vadd.f32 %v5726_v4, %v5725_v49  ;;  %v5644_v12 = vmul.f32 %v5562_v10, %v5562_v10 }
 0xdca   :  { %v5578_v28 = vadd.f32 %v5577_v24, %v5576_v59  ;;  %v5658_v4 = vmul.f32 %v9345_v52, %v9331_v56 }
 0xdcb   :  { %v5645_v49 = vadd.f32 %v5644_v12, %v5643_v53 }
 0xdcc   :  { %5579 = vadd.xlane.f32.xlu2 %v5578_v28  ;;  %v5659_v28 = vmul.f32 %v5568_v44, %v5562_v10 }
 0xdd0   :  { %v5585_v11 = vld.sshfl [vmem:[#allocation1] sm:$0xff pattern:$0x75316420]  ;;  %v5586_v7 = vld.sshfl [vmem:[#allocation1 + $0x8] sm:$0xff pattern:$0x75316420] }
 0xdd1   :  { %v5589_v60 = vsel %vm426_vm5, %v5585_v11, 0.0  ;;  %v5590_v61 = vsel %vm426_vm5, %v5586_v7, 0.0  ;;  %5596 = vst [vmem:[#allocation1] ss:$2 sm:$0xff] %v5594_v20  ;;  %v5660_v20 = vadd.f32 %v5659_v28, %v5658_v4 }
 0xdd2   :  { %v5591_v57 = vadd.f32 %v5590_v61, %v5589_v60 }
 0xdd4   :  { %5592 = vadd.xlane.f32.xlu0 %v5591_v57 }
 0xdd8   :  { %v5597_v47 = vld.sshfl [vmem:[#allocation1] sm:$0xff pattern:$0x75316420]  ;;  %v5598_v22 = vld.sshfl [vmem:[#allocation1 + $0x8] sm:$0xff pattern:$0x75316420] }
 0xdd9   :  { %5608 = vst [vmem:[#allocation1] ss:$2 sm:$0xff] %v5606_v18  ;;  %v5601_v31 = vsel %vm426_vm5, %v5597_v47, 0.0  ;;  %v5602_v40 = vsel %vm426_vm5, %v5598_v22, 0.0  ;;  %v5672_v18 = vmul.f32 %v9345_v52, %v9345_v52  ;;  %v5673_v47 = vmul.f32 %v5568_v44, %v5568_v44 }
 0xdda   :  { %v5603_v24 = vadd.f32 %v5602_v40, %v5601_v31 }
 0xddb   :  { %v5674_v22 = vadd.f32 %v5673_v47, %v5672_v18 }
 0xde0   :  { %v5609_v54 = vld.sshfl [vmem:[#allocation1] sm:$0xff pattern:$0x75316420]  ;;  %v5610_v5 = vld.sshfl [vmem:[#allocation1 + $0x8] sm:$0xff pattern:$0x75316420] }
 0xde1   :  { %v5613_v38 = vsel %vm426_vm5, %v5609_v54, 0.0  ;;  %v5614_v58 = vsel %vm426_vm5, %v5610_v5, 0.0  ;;  %5621 = vst [vmem:[#allocation1] ss:$2 sm:$0xff] %v5619_v39 }
 0xde2   :  { %v5615_v41 = vadd.f32 %v5614_v58, %v5613_v38 }
 0xde4   :  { %5616 = vadd.xlane.f32.xlu1 %v5615_v41 }
 0xde8   :  { %v5622_v46 = vld.sshfl [vmem:[#allocation1] sm:$0xff pattern:$0x75316420]  ;;  %v5623_v16 = vld.sshfl [vmem:[#allocation1 + $0x8] sm:$0xff pattern:$0x75316420] }
 0xde9   :  { %v5626_v37 = vsel %vm426_vm5, %v5622_v46, 0.0  ;;  %v5627_v26 = vsel %vm426_vm5, %v5623_v16, 0.0  ;;  %5633 = vst [vmem:[#allocation1] ss:$2 sm:$0xff] %v5631_v32 }
 0xdea   :  { %v5628_v27 = vadd.f32 %v5627_v26, %v5626_v37  ;;  %v5699_v37 = vmul.f32 %v9370_v63, %v9353_v45 }
 0xdec   :  { %5629 = vadd.xlane.f32.xlu2 %v5628_v27 }
 0xdf0   :  { %v5634_v34 = vld.sshfl [vmem:[#allocation1] sm:$0xff pattern:$0x75316420]  ;;  %v5635_v59 = vld.sshfl [vmem:[#allocation1 + $0x8] sm:$0xff pattern:$0x75316420] }
 0xdf1   :  { %5647 = vst [vmem:[#allocation1] ss:$2 sm:$0xff] %v5645_v49  ;;  %v5638_v39 = vsel %vm426_vm5, %v5634_v34, 0.0  ;;  %v5639_v56 = vsel %vm426_vm5, %v5635_v59, 0.0 }
 0xdf2   :  { %v5640_v41 = vadd.f32 %v5639_v56, %v5638_v39 }
 0xdf4   :  { %5604 = vadd.xlane.f32.xlu2 %v5603_v24 }
 0xdf8   :  { %v5648_v11 = vld.sshfl [vmem:[#allocation1] sm:$0xff pattern:$0x75316420]  ;;  %v5649_v7 = vld.sshfl [vmem:[#allocation1 + $0x8] sm:$0xff pattern:$0x75316420] }
 0xdf9   :  { %v5652_v60 = vsel %vm426_vm5, %v5648_v11, 0.0  ;;  %v5653_v61 = vsel %vm426_vm5, %v5649_v7, 0.0  ;;  %5662 = vst [vmem:[#allocation1] ss:$2 sm:$0xff] %v5660_v20 }
 0xdfa   :  { %v5654_v57 = vadd.f32 %v5653_v61, %v5652_v60 }
 0xdfc   :  { %5655 = vadd.xlane.f32.xlu1 %v5654_v57 }
 0xe00   :  { %v5663_v10 = vld.sshfl [vmem:[#allocation1] sm:$0xff pattern:$0x75316420]  ;;  %v5664_v54 = vld.sshfl [vmem:[#allocation1 + $0x8] sm:$0xff pattern:$0x75316420] }
 0xe01   :  { %v5667_v5 = vsel %vm426_vm5, %v5663_v10, 0.0  ;;  %v5668_v38 = vsel %vm426_vm5, %v5664_v54, 0.0  ;;  %5676 = vst [vmem:[#allocation1] ss:$2 sm:$0xff] %v5674_v22 }
 0xe02   :  { %v5669_v58 = vadd.f32 %v5668_v38, %v5667_v5 }
 0xe04   :  { %5670 = vadd.xlane.f32.xlu0 %v5669_v58  ;;  %5641 = vadd.xlane.f32.xlu1 %v5640_v41 }
 0xe08   :  { %v5677_v32 = vld.sshfl [vmem:[#allocation1] sm:$0xff pattern:$0x75316420]  ;;  %v5678_v52 = vld.sshfl [vmem:[#allocation1 + $0x8] sm:$0xff pattern:$0x75316420] }
 0xe09   :  { %v5681_v44 = vsel %vm426_vm5, %v5677_v32, 0.0  ;;  %v5682_v46 = vsel %vm426_vm5, %v5678_v52, 0.0  ;;  %5689 = vst [vmem:[#allocation1] ss:$2 sm:$0xff] %v9333_v33 }
 0xe0a   :  { %v5683_v16 = vadd.f32 %v5682_v46, %v5681_v44 }
 0xe0c   :  { %5684 = vadd.xlane.f32.xlu2 %v5683_v16 }
 0xe10   :  { %v5690_v26 = vld.sshfl [vmem:[#allocation1] sm:$0xff pattern:$0x75316420]  ;;  %v5691_v27 = vld.sshfl [vmem:[#allocation1 + $0x8] sm:$0xff pattern:$0x75316420] }
 0xe11   :  { %v5694_v53 = vsel %vm426_vm5, %v5690_v26, 0.0  ;;  %v5695_v12 = vsel %vm426_vm5, %v5691_v27, 0.0  ;;  %5701 = vst [vmem:[#allocation1] ss:$2 sm:$0xff] %v5699_v37 }
 0xe12   :  { %v5696_v49 = vadd.f32 %v5695_v12, %v5694_v53 }
 0xe14   :  { %5697 = vadd.xlane.f32.xlu1 %v5696_v49 }
 0xe18   :  { %v5702_v31 = vld.sshfl [vmem:[#allocation1] sm:$0xff pattern:$0x75316420]  ;;  %v5703_v40 = vld.sshfl [vmem:[#allocation1 + $0x8] sm:$0xff pattern:$0x75316420] }
 0xe19   :  { %v5706_v34 = vsel %vm426_vm5, %v5702_v31, 0.0  ;;  %v5707_v33 = vsel %vm426_vm5, %v5703_v40, 0.0  ;;  %5715 = vst [vmem:[#allocation1] ss:$2 sm:$0xff] %v9361_v48 }
 0xe1a   :  { %v5708_v59 = vadd.f32 %v5707_v33, %v5706_v34 }
 0xe1c   :  { %5709 = vadd.xlane.f32.xlu0 %v5708_v59 }
 0xe20   :  { %v5716_v45 = vld.sshfl [vmem:[#allocation1] sm:$0xff pattern:$0x75316420]  ;;  %v5717_v63 = vld.sshfl [vmem:[#allocation1 + $0x8] sm:$0xff pattern:$0x75316420] }
 0xe21   :  { %v5720_v24 = vsel %vm426_vm5, %v5716_v45, 0.0  ;;  %v5721_v4 = vsel %vm426_vm5, %v5717_v63, 0.0  ;;  %5729 = vst [vmem:[#allocation1] ss:$2 sm:$0xff] %v9364_v25 }
 0xe22   :  { %v5722_v28 = vadd.f32 %v5721_v4, %v5720_v24 }
 0xe24   :  { %5723 = vadd.xlane.f32.xlu2 %v5722_v28 }
 0xe28   :  { %v5730_v20 = vld.sshfl [vmem:[#allocation1] sm:$0xff pattern:$0x75316420]  ;;  %v5731_v11 = vld.sshfl [vmem:[#allocation1 + $0x8] sm:$0xff pattern:$0x75316420] }
 0xe29   :  { %v5734_v7 = vsel %vm426_vm5, %v5730_v20, 0.0  ;;  %v5735_v60 = vsel %vm426_vm5, %v5731_v11, 0.0  ;;  %6160 = vst [vmem:[#allocation1] ss:$2 sm:$0xff] %v7723_v42 }
 0xe2a   :  { %v5736_v48 = vadd.f32 %v5735_v60, %v5734_v7 }
 0xe2c   :  { %5737 = vadd.xlane.f32.xlu1 %v5736_v48 }
 0xe3f   :  { %v5580_v61 = vpop.xlane.xlu2 %5579 }
 0xe40   :  { %v5581_v57 = vadd.f32 1e-05, %v5580_v61 }
 0xe42   :  { %7529 = vrcp.f32 %v5581_v57  ;;  %v5750_v38 = vand.u32 2147483648, %v5581_v57  ;;  %vm5744_vm11 = vweird.f32 %v5581_v57  ;;  %v5748_v41 = vand.u32 2147483647, %v5581_v57 }
 0xe44   :  { %v5751_v16 = vor.u32 1.1754944e-38, %v5750_v38  ;;  %vm5749_vm15 = vcmp.eq.f32.partialorder %v5748_v41, 8.507059e+37 }
 0xe47   :  { %v9412_v12 = vpop.xlane.xlu0 %5592 }
 0xe48   :  { %v7530_v18 = vpop.eup %7529 }
 0xe49   :  { %v5740_v47 = vmul.f32 %v7530_v18, %v5581_v57  ;;  %vm5745_vm10 = vweird.f32 %v7530_v18 }
 0xe4a   :  { %vm5746_vm12 = vmor %vm5744_vm11, %vm5745_vm10 }
 0xe4b   :  { %v5741_v25 = vsub.f32 1.0, %v5740_v47 }
 0xe4d   :  { %v5742_v56 = vmul.f32 %v7530_v18, %v5741_v25 }
 0xe4f   :  { %v5743_v5 = vadd.f32 %v7530_v18, %v5742_v56 }
 0xe51   :  { %v5747_v44 = vsel %vm5746_vm12, %v7530_v18, %v5743_v5 }
 0xe52   :  { %v9410_v26 = vsel %vm5749_vm15, %v5751_v16, %v5747_v44 }
 0xe53   :  { %v5754_v31 = vmul.f32 %v9410_v26, %v9412_v12 }
 0xe55   :  { %v5756_v59 = vmul.f32 %v5754_v31, %v9412_v12 }
 0xe57   :  { %v5617_v22 = vpop.xlane.xlu1 %5616 }
 0xe58   :  { %v5618_v39 = vadd.f32 1e-05, %v5617_v22 }
 0xe5a   :  { %7531 = vrcp.f32 %v5618_v39  ;;  %v5777_v52 = vand.u32 2147483648, %v5618_v39  ;;  %v5775_v46 = vand.u32 2147483647, %v5618_v39  ;;  %vm5771_vm14 = vweird.f32 %v5618_v39 }
 0xe5c   :  { %v5778_v53 = vor.u32 1.1754944e-38, %v5777_v52  ;;  %vm5776_vm1 = vcmp.eq.f32.partialorder %v5775_v46, 8.507059e+37 }
 0xe5f   :  { %v9418_v40 = vpop.xlane.xlu2 %5629 }
 0xe60   :  { %v7532_v10 = vpop.eup %7531 }
 0xe61   :  { %v5767_v54 = vmul.f32 %v7532_v10, %v5618_v39  ;;  %vm5772_vm13 = vweird.f32 %v7532_v10 }
 0xe62   :  { %vm5773_vm0 = vmor %vm5771_vm14, %vm5772_vm13 }
 0xe63   :  { %v5768_v58 = vsub.f32 1.0, %v5767_v54 }
 0xe65   :  { %v5769_v32 = vmul.f32 %v7532_v10, %v5768_v58 }
 0xe67   :  { %v5770_v37 = vadd.f32 %v7532_v10, %v5769_v32  ;;  %v9424_v28 = vpop.xlane.xlu2 %5604 }
 0xe68   :  { %v5755_v48 = vmul.f32 %v9410_v26, %v9424_v28  ;;  %v5758_v57 = vmul.f32 %v5754_v31, %v9424_v28 }
 0xe69   :  { %v5774_v27 = vsel %vm5773_vm0, %v7532_v10, %v5770_v37 }
 0xe6a   :  { %v9414_v49 = vsel %vm5776_vm1, %v5778_v53, %v5774_v27  ;;  %v5760_v38 = vmul.f32 %v5755_v48, %v9424_v28 }
 0xe6b   :  { %v5781_v34 = vmul.f32 %v9414_v49, %v9418_v40 }
 0xe6d   :  { %v5783_v63 = vmul.f32 %v5781_v34, %v9418_v40 }
 0xe6f   :  { %v5656_v33 = vpop.xlane.xlu1 %5655 }
 0xe70   :  { %v5657_v45 = vadd.f32 1e-05, %v5656_v33 }
 0xe72   :  { %v5757_v24 = vsub.f32 %v5657_v45, %v5756_v59 }
 0xe74   :  { %v5784_v4 = vsub.f32 %v5757_v24, %v5783_v63 }
 0xe76   :  { %7533 = vrcp.f32 %v5784_v4  ;;  %v5802_v22 = vand.u32 2147483647, %v5784_v4  ;;  %v5804_v39 = vand.u32 2147483648, %v5784_v4  ;;  %vm5798_vm3 = vweird.f32 %v5784_v4 }
 0xe77   :  { %v5642_v7 = vpop.xlane.xlu1 %5641  ;;  %v5671_v60 = vpop.xlane.xlu0 %5670 }
 0xe78   :  { %v5785_v47 = vmul.f32 %v5781_v34, %v5642_v7  ;;  %v5759_v56 = vsub.f32 %v5671_v60, %v5758_v57  ;;  %v5782_v54 = vmul.f32 %v9414_v49, %v5642_v7  ;;  %v5805_v58 = vor.u32 1.1754944e-38, %v5804_v39 }
 0xe79   :  { %vm5803_vm6 = vcmp.eq.f32.partialorder %v5802_v22, 8.507059e+37 }
 0xe7a   :  { %v5786_v32 = vsub.f32 %v5759_v56, %v5785_v47  ;;  %v5787_v46 = vmul.f32 %v5782_v54, %v5642_v7 }
 0xe7c   :  { %v7534_v20 = vpop.eup %7533 }
 0xe7d   :  { %v5794_v11 = vmul.f32 %v7534_v20, %v5784_v4  ;;  %vm5799_vm2 = vweird.f32 %v7534_v20 }
 0xe7e   :  { %vm5800_vm4 = vmor %vm5798_vm3, %vm5799_vm2 }
 0xe7f   :  { %v5795_v61 = vsub.f32 1.0, %v5794_v11  ;;  %v5685_v18 = vpop.xlane.xlu2 %5684 }
 0xe80   :  { %v5686_v10 = vadd.f32 1e-05, %v5685_v18 }
 0xe81   :  { %v5796_v25 = vmul.f32 %v7534_v20, %v5795_v61 }
 0xe82   :  { %v5761_v52 = vsub.f32 %v5686_v10, %v5760_v38 }
 0xe83   :  { %v5797_v5 = vadd.f32 %v7534_v20, %v5796_v25 }
 0xe84   :  { %v5788_v27 = vsub.f32 %v5761_v52, %v5787_v46 }
 0xe85   :  { %v5801_v41 = vsel %vm5800_vm4, %v7534_v20, %v5797_v5 }
 0xe86   :  { %v5806_v44 = vsel %vm5803_vm6, %v5805_v58, %v5801_v41 }
 0xe87   :  { %v5808_v16 = vmul.f32 %v5806_v44, %v5786_v32  ;;  %v5698_v45 = vpop.xlane.xlu1 %5697 }
 0xe88   :  { %v5762_v4 = vmul.f32 %v5754_v31, %v5698_v45  ;;  %v5764_v18 = vmul.f32 %v5755_v48, %v5698_v45 }
 0xe89   :  { %v5809_v37 = vmul.f32 %v5808_v16, %v5786_v32 }
 0xe8b   :  { %v5810_v53 = vsub.f32 %v5788_v27, %v5809_v37 }
 0xe8d   :  { %7535 = vrcp.f32 %v5810_v53  ;;  %v5824_v39 = vand.u32 2147483648, %v5810_v53  ;;  %vm5818_vm8 = vweird.f32 %v5810_v53  ;;  %v5822_v10 = vand.u32 2147483647, %v5810_v53 }
 0xe8f   :  { %v5710_v11 = vpop.xlane.xlu0 %5709  ;;  %v5825_v41 = vor.u32 1.1754944e-38, %v5824_v39  ;;  %vm5823_vm10 = vcmp.eq.f32.partialorder %v5822_v10, 8.507059e+37 }
 0xe90   :  { %v5789_v20 = vmul.f32 %v5781_v34, %v5710_v11  ;;  %v5791_v25 = vmul.f32 %v5782_v54, %v5710_v11 }
 0xe93   :  { %v7536_v33 = vpop.eup %7535 }
 0xe94   :  { %v5814_v59 = vmul.f32 %v7536_v33, %v5810_v53  ;;  %vm5819_vm7 = vweird.f32 %v7536_v33 }
 0xe95   :  { %vm5820_vm9 = vmor %vm5818_vm8, %vm5819_vm7 }
 0xe96   :  { %v5815_v63 = vsub.f32 1.0, %v5814_v59 }
 0xe97   :  { %v5724_v24 = vpop.xlane.xlu2 %5723 }
 0xe98   :  { %v5763_v60 = vsub.f32 %v5724_v24, %v5762_v4  ;;  %v5816_v61 = vmul.f32 %v7536_v33, %v5815_v63 }
 0xe9a   :  { %v5790_v57 = vsub.f32 %v5763_v60, %v5789_v20  ;;  %v5817_v47 = vadd.f32 %v7536_v33, %v5816_v61 }
 0xe9c   :  { %v5811_v5 = vmul.f32 %v5808_v16, %v5790_v57  ;;  %v5821_v58 = vsel %vm5820_vm9, %v7536_v33, %v5817_v47 }
 0xe9d   :  { %v5826_v52 = vsel %vm5823_vm10, %v5825_v41, %v5821_v58 }
 0xe9f   :  { %v5738_v22 = vpop.xlane.xlu1 %5737 }
 0xea0   :  { %v5765_v56 = vsub.f32 %v5738_v22, %v5764_v18 }
 0xea2   :  { %v5792_v38 = vsub.f32 %v5765_v56, %v5791_v25 }
 0xea4   :  { %v5812_v31 = vsub.f32 %v5792_v38, %v5811_v5 }
 0xea6   :  { %v5828_v46 = vmul.f32 %v5826_v52, %v5812_v31 }
 0xea8   :  { %v5829_v34 = vmul.f32 %v5828_v46, %v5786_v32  ;;  %v9432_v48 = vsub.f32 %v9219_v13, %v5828_v46  ;;  %v5834_v37 = vmul.f32 %v5828_v46, %v5642_v7  ;;  %v5839_v7 = vmul.f32 %v5828_v46, %v9424_v28 }
 0xeaa   :  { %v5849_v27 = vand.u32 2139095040, %v9432_v48  ;;  %v5830_v54 = vsub.f32 %v5790_v57, %v5829_v34  ;;  %v5846_v24 = vand.u32 2147483647, %v9432_v48  ;;  %vm5848_vm8 = vcmp.lt.s32.totalorder %v9432_v48, 0 }
 0xeac   :  { %v5850_v59 = vshrl.u32 %v5849_v27, 23  ;;  %v5831_v63 = vmul.f32 %v5830_v54, %v5806_v44  ;;  %v5853_v44 = vand.u32 8388607, %v5846_v24  ;;  %vm5847_vm9 = vcmp.le.f32.partialorder %v5846_v24, 0.7853982 }
 0xeae   :  { %v7372_v53 = vadd.s32 4294967169, %v5850_v59  ;;  %v9436_v16 = vsub.f32 %v9223_v55, %v5831_v63  ;;  %v5837_v33 = vmul.f32 %v5831_v63, %v9412_v12  ;;  %v5832_v4 = vmul.f32 %v5831_v63, %v9418_v40 }
 0xeb0   :  { %v5856_v32 = vadd.s32 1, %v7372_v53  ;;  %6222 = vperm.xlu1 %7433, %v9436_v16   ;;  %v5838_v13 = vsub.f32 %v5698_v45, %v5837_v33  ;;  %v5833_v60 = vsub.f32 %v5710_v11, %v5832_v4  ;;  %v5854_v45 = vor.u32 8388608, %v5853_v44 }
 0xeb2   :  { %v5840_v61 = vsub.f32 %v5838_v13, %v5839_v7  ;;  %vm5857_vm11 = vcmp.gt.s32.totalorder %v5856_v32, 0  ;;  %v9445_v20 = vsub.f32 %v5833_v60, %v5834_v37  ;;  %v9473_v46 = vshll.u32 %v5854_v45, 8 }
 0xeb3   :  { %v5858_v55 = vsel %vm5857_vm11, %v5856_v32, 0 }
 0xeb4   :  { %v5841_v12 = vmul.f32 %v5840_v61, %v9410_v26  ;;  %v5860_v57 = vand.u32 31, %v5858_v55  ;;  %v9453_v47 = vshrl.u32 %v5858_v55, 5  ;;  %v5895_v4 = vand.u32 65535, %v9473_v46 }
 0xeb5   :  { %v5896_v32 = vshrl.u32 %v9473_v46, 16 }
 0xeb6   :  { %v9449_v40 = vsub.f32 %v9295_v8, %v5841_v12  ;;  %v9451_v18 = vsub.s32 32, %v5860_v57  ;;  %v5863_v28 = vshll.u32 %v7613_v15, %v5860_v57  ;;  %v5866_v11 = vshll.u32 %v7614_v17, %v5860_v57 }
 0xeb7   :  { %v5869_v8 = vshll.u32 %v7615_v19, %v5860_v57  ;;  %v5872_v25 = vshll.u32 %v7616_v21, %v5860_v57  ;;  %v5875_v10 = vshll.u32 %v7617_v23, %v5860_v57  ;;  %vm5878_vm12 = vcmp.lt.s32.totalorder %v9453_v47, 1 }
 0xeb8   :  { %7434 = vset.pattern.permute.xlu1 %v7612_v6  ;;  %v5864_v22 = vshrl.u32 %v7614_v17, %v9451_v18  ;;  %v5867_v26 = vshrl.u32 %v7615_v19, %v9451_v18  ;;  %v5870_v39 = vshrl.u32 %v7616_v21, %v9451_v18  ;;  %v5873_v56 = vshrl.u32 %v7617_v23, %v9451_v18 }
 0xeb9   :  { %6183 = vperm.xlu1 %7434, %v9449_v40   ;;  %v5876_v5 = vshrl.u32 %v7618_v29, %v9451_v18  ;;  %vm5881_vm13 = vcmp.lt.s32.totalorder %v9453_v47, 4  ;;  %vm5880_vm14 = vcmp.lt.s32.totalorder %v9453_v47, 3  ;;  %vm5879_vm15 = vcmp.lt.s32.totalorder %v9453_v47, 2 }
 0xeba   :  { %v5865_v38 = vor.u32 %v5864_v22, %v5863_v28  ;;  %v5868_v58 = vor.u32 %v5867_v26, %v5866_v11  ;;  %v5871_v41 = vor.u32 %v5870_v39, %v5869_v8  ;;  %v5874_v31 = vor.u32 %v5873_v56, %v5872_v25 }
 0xebb   :  { %v5877_v52 = vor.u32 %v5876_v5, %v5875_v10 }
 0xebc   :  { %v5886_v34 = vsel %vm5878_vm12, %v5865_v38, %v5868_v58  ;;  %v5890_v37 = vsel %vm5878_vm12, %v5868_v58, %v5871_v41  ;;  %v5887_v27 = vsel %vm5881_vm13, %v5874_v31, 920167782 }
 0xebd   :  { %v5891_v54 = vsel %vm5881_vm13, %v5877_v52, 1326507024  ;;  %v5888_v59 = vsel %vm5880_vm14, %v5871_v41, %v5887_v27  ;;  %v5883_v52 = vsel %vm5881_vm13, %v5871_v41, 2102212464  ;;  %v5862_v27 = vshrl.u32 %v7613_v15, %v9451_v18 }
 0xebe   :  { %v5892_v63 = vsel %vm5880_vm14, %v5874_v31, %v5891_v54  ;;  %v5889_v53 = vsel %vm5879_vm15, %v5886_v34, %v5888_v59 }
 0xebf   :  { %v5893_v33 = vsel %vm5879_vm15, %v5890_v37, %v5892_v63  ;;  %v5919_v60 = vand.u32 65535, %v5889_v53  ;;  %v5920_v61 = vshrl.u32 %v5889_v53, 16 }
 0xec0   :  { %v5897_v13 = vand.u32 65535, %v5893_v33  ;;  %v5898_v7 = vshrl.u32 %v5893_v33, 16 }
 0xec1   :  { %7436 = vset.pattern.permute.xlu1 %v7611_v2  ;;  %v5922_v12 = vmul.u32 %v5920_v61, %v5895_v4  ;;  %v5923_v57 = vmul.u32 %v5919_v60, %v5896_v32  ;;  %v5921_v22 = vmul.u32 %v5919_v60, %v5895_v4  ;;  %v5924_v25 = vmul.u32 %v5920_v61, %v5896_v32 }
 0xec2   :  { %v5900_v44 = vmul.u32 %v5898_v7, %v5895_v4  ;;  %v5901_v55 = vmul.u32 %v5897_v13, %v5896_v32  ;;  %v5899_v45 = vmul.u32 %v5897_v13, %v5895_v4  ;;  %v5902_v11 = vmul.u32 %v5898_v7, %v5896_v32 }
 0xec3   :  { %v5925_v26 = vshll.u32 %v5922_v12, 16  ;;  %v5927_v10 = vshll.u32 %v5923_v57, 16  ;;  %v5926_v53 = vshrl.u32 %v5922_v12, 16  ;;  %v5882_v4 = vsel %vm5878_vm12, %v5862_v27, %v5865_v38 }
 0xec4   :  { %v5903_v28 = vshll.u32 %v5900_v44, 16  ;;  %v5905_v8 = vshll.u32 %v5901_v55, 16  ;;  %v5904_v54 = vshrl.u32 %v5900_v44, 16  ;;  %v5884_v32 = vsel %vm5880_vm14, %v5868_v58, %v5883_v52 }
 0xec5   :  { %vm5929_vm1 = vc.u32 %v5921_v22, %v5925_v26  ;;  %v5931_v5 = vadd.s32 %v5925_v26, %v5921_v22  ;;  %v5906_v41 = vshrl.u32 %v5901_v55, 16  ;;  %v5928_v7 = vshrl.u32 %v5923_v57, 16 }
 0xec6   :  { %vm5907_vm0 = vc.u32 %v5899_v45, %v5903_v28  ;;  %v5909_v39 = vadd.s32 %v5903_v28, %v5899_v45  ;;  %v5930_v2 = vsel %vm5929_vm1, 1, %v7612_v6  ;;  %v5885_v18 = vsel %vm5879_vm15, %v5882_v4, %v5884_v32 }
 0xec7   :  { %v5908_v56 = vsel %vm5907_vm0, 1, %v7612_v6  ;;  %v5932_v37 = vadd.s32 %v5930_v2, %v5924_v25  ;;  %vm5933_vm3 = vc.u32 %v5931_v5, %v5927_v10  ;;  %v5935_v45 = vadd.s32 %v5931_v5, %v5927_v10 }
 0xec8   :  { %v5910_v31 = vadd.s32 %v5908_v56, %v5902_v11  ;;  %vm5911_vm2 = vc.u32 %v5909_v39, %v5905_v8  ;;  %v5934_v63 = vsel %vm5933_vm3, 1, %v7612_v6  ;;  %v5939_v12 = vmul.u32 %v9473_v46, %v5885_v18 }
 0xec9   :  { %v5912_v34 = vsel %vm5911_vm2, 1, %v7612_v6  ;;  %v5936_v33 = vadd.s32 %v5934_v63, %v5932_v37  ;;  %vm5989_vm0 = vweird.f32 %v9432_v48 }
 0xeca   :  { %v5914_v59 = vadd.s32 %v5912_v34, %v5910_v31 }
 0xecb   :  { %v5937_v60 = vadd.s32 %v5936_v33, %v5926_v53 }
 0xecc   :  { %v5915_v13 = vadd.s32 %v5914_v59, %v5904_v54 }
 0xecd   :  { %v5938_v44 = vadd.s32 %v5937_v60, %v5928_v7 }
 0xece   :  { %v5916_v61 = vadd.s32 %v5915_v13, %v5906_v41 }
 0xecf   :  { %v5942_v28 = vadd.s32 1, %v5938_v44 }
 0xed0   :  { %vm5941_vm4 = vc.u32 %v5916_v61, %v5935_v45  ;;  %v5940_v47 = vadd.s32 %v5935_v45, %v5916_v61 }
 0xed1   :  { %v5943_v11 = vsel %vm5941_vm4, %v5942_v28, %v5938_v44 }
 0xed2   :  { %v5944_v22 = vadd.s32 %v5943_v11, %v5939_v12 }
 0xed4   :  { %v5945_v38 = vadd.s32 536870912, %v5944_v22 }
 0xed6   :  { %v5946_v26 = vshrl.u32 %v5945_v38, 30 }
 0xed8   :  { %v5947_v8 = vshll.u32 %v5946_v26, 30  ;;  %v5970_v33 = vsub.s32 4, %v5946_v26 }
 0xeda   :  { %v5948_v58 = vsub.s32 %v5944_v22, %v5947_v8  ;;  %v5971_v7 = vsel %vm5848_vm8, %v5970_v33, %v5946_v26 }
 0xedb   :  { %v5973_v45 = vsel %vm5847_vm9, 0, %v5971_v7 }
 0xedc   :  { %vm5949_vm6 = vcmp.lt.s32.totalorder %v5948_v58, 0  ;;  %v5950_v55 = vsub.s32 0, %v5948_v58  ;;  %v6144_v11 = vadd.s32 3, %v5973_v45 }
 0xede   :  { %v5951_v57 = vsel %vm5949_vm6, %v5950_v55, %v5948_v58  ;;  %v6145_v55 = vand.u32 3, %v6144_v11 }
 0xedf   :  { %v5952_v39 = vclz %v5951_v57 }
 0xee0   :  { %vm6146_vm13 = vcmp.lt.s32.totalorder %v6145_v55, 2  ;;  %vm6147_vm14 = vcmp.eq.s32.totalorder %v6145_v55, 0  ;;  %vm6150_vm15 = vcmp.eq.s32.totalorder %v6145_v55, 2 }
 0xee1   :  { %v7373_v25 = vadd.s32 4294967294, %v5952_v39 }
 0xee3   :  { %vm7374_vm7 = vcmp.lt.s32.totalorder %v7373_v25, 0 }
 0xee4   :  { %v5955_v56 = vsel %vm7374_vm7, 0, %v7373_v25 }
 0xee5   :  { %v5956_v10 = vsub.s32 32, %v5955_v56  ;;  %v5960_v5 = vsub.s32 4294967266, %v5955_v56  ;;  %v5957_v31 = vshll.u32 %v5948_v58, %v5955_v56  ;;  %v5990_v58 = vand.u32 3, %v5973_v45 }
 0xee7   :  { %v5958_v2 = vshrl.u32 %v5940_v47, %v5956_v10  ;;  %v5961_v52 = vadd.s32 127, %v5960_v5  ;;  %vm5991_vm10 = vcmp.lt.s32.totalorder %v5990_v58, 2  ;;  %vm5992_vm11 = vcmp.eq.s32.totalorder %v5990_v58, 0 }
 0xee8   :  { %vm5995_vm12 = vcmp.eq.s32.totalorder %v5990_v58, 2 }
 0xee9   :  { %v5959_v46 = vor.u32 %v5958_v2, %v5957_v31  ;;  %v5962_v34 = vshll.u32 %v5961_v52, 23 }
 0xeeb   :  { %v5963_v37 = vor.u32 4788187, %v5962_v34  ;;  %v5966_v54 = vcvt.s32.f32 %v5959_v46  ;;  %v6161_v46 = vld.sshfl [vmem:[#allocation1] sm:$0xff pattern:$0x75316420] }
 0xeed   :  { %v5964_v27 = vand.u32 2147483647, %v5963_v37  ;;  %v6162_v37 = vld.sshfl [vmem:[#allocation1 + $0x8] sm:$0xff pattern:$0x75316420] }
 0xeee   :  { %6172 = vst [vmem:[#allocation1] ss:$2 sm:$0xff] %v7729_v0 }
 0xeef   :  { %v5967_v59 = vmul.f32 %v5966_v54, %v5964_v27 }
 0xef1   :  { %v5968_v63 = vxor.u32 2147483648, %v5967_v59 }
 0xef3   :  { %v5969_v53 = vsel %vm5848_vm8, %v5968_v63, %v5967_v59  ;;  %v5836_v59 = vmul.f32 %v9445_v20, %v9414_v49 }
 0xef4   :  { %v5972_v4 = vsel %vm5847_vm9, %v9432_v48, %v5969_v53 }
 0xef5   :  { %v5974_v32 = vmul.f32 %v5972_v4, %v5972_v4  ;;  %v6173_v27 = vld.sshfl [vmem:[#allocation1] sm:$0xff pattern:$0x75316420]  ;;  %v6174_v54 = vld.sshfl [vmem:[#allocation1 + $0x8] sm:$0xff pattern:$0x75316420]  ;;  %v9522_v33 = vsub.f32 %v9302_v36, %v5836_v59 }
 0xef6   :  { %6204 = vst [vmem:[#allocation1] ss:$2 sm:$0xff] %v7723_v42 }
 0xef7   :  { %v5975_v41 = vmul.f32 -0.001358992, %v5974_v32  ;;  %v5982_v13 = vmul.f32 -0.00019511016, %v5974_v32 }
 0xef9   :  { %v5976_v60 = vadd.f32 0.041655596, %v5975_v41  ;;  %v5983_v61 = vadd.f32 0.008332121, %v5982_v13 }
 0xefb   :  { %v5977_v18 = vmul.f32 %v5976_v60, %v5974_v32  ;;  %v5984_v44 = vmul.f32 %v5983_v61, %v5974_v32 }
 0xefd   :  { %v5978_v28 = vadd.f32 -0.4999988, %v5977_v18  ;;  %v5985_v12 = vadd.f32 -0.16666654, %v5984_v44 }
 0xefe   :  { %v6205_v63 = vld.sshfl [vmem:[#allocation1] sm:$0xff pattern:$0x75316420]  ;;  %v6206_v53 = vld.sshfl [vmem:[#allocation1 + $0x8] sm:$0xff pattern:$0x75316420] }
 0xeff   :  { %v5979_v22 = vmul.f32 %v5978_v28, %v5974_v32  ;;  %v5986_v38 = vmul.f32 %v5985_v12, %v5974_v32  ;;  %6211 = vst [vmem:[#allocation1] ss:$2 sm:$0xff] %v7729_v0 }
 0xf01   :  { %v5980_v8 = vadd.f32 1.0, %v5979_v22  ;;  %v5987_v24 = vadd.f32 1.0, %v5986_v38 }
 0xf03   :  { %v5988_v57 = vmul.f32 %v5987_v24, %v5972_v4  ;;  %v5996_v39 = vxor.u32 2147483648, %v5980_v8 }
 0xf05   :  { %v5993_v25 = vxor.u32 2147483648, %v5988_v57  ;;  %v5997_v56 = vsel %vm5995_vm12, %v5996_v39, %v5988_v57  ;;  %v6152_v10 = vsel %vm6150_vm15, %v5996_v39, %v5988_v57 }
 0xf06   :  { %v6212_v4 = vld.sshfl [vmem:[#allocation1] sm:$0xff pattern:$0x75316420]  ;;  %v6213_v32 = vld.sshfl [vmem:[#allocation1 + $0x8] sm:$0xff pattern:$0x75316420] }
 0xf07   :  { %v5994_v26 = vsel %vm5992_vm11, %v5980_v8, %v5993_v25  ;;  %v6149_v47 = vsel %vm6147_vm14, %v5980_v8, %v5993_v25  ;;  %6235 = vst [vmem:[#allocation1] ss:$2 sm:$0xff] %v7737_v50 }
 0xf08   :  { %v5998_v5 = vsel %vm5991_vm10, %v5994_v26, %v5997_v56  ;;  %v6153_v31 = vsel %vm6146_vm13, %v6149_v47, %v6152_v10 }
 0xf09   :  { %v5999_v2 = vsel %vm5989_vm0, nan, %v5998_v5  ;;  %v6154_v52 = vsel %vm5989_vm0, nan, %v6153_v31 }
 0xf0a   :  { %v6198_v34 = vsub.f32 0.0, %v6154_v52  ;;  %6157 = vperm.xlu0 %7431, %v5999_v2  }
 0xf0c   :  { %6201 = vperm.xlu2 %7432, %v6198_v34  }
 0xf14   :  { %6169 = vperm.xlu2 %7432, %v6154_v52   ;;  %v6237_v52 = vld.sshfl [vmem:[#allocation1 + $0x8] sm:$0xff pattern:$0x75316420] }
 0xf1c   :  { %7435 = vset.pattern.permute.xlu2 %v7619_v62 }
 0xf1d   :  { %6190 = vperm.xlu2 %7435, %v9522_v33  }
 0xf22   :  { %v6223_v49 = vpop.permute.xlu1 %6222 }
 0xf25   :  { %7437 = vset.pattern.permute.xlu2 %v7610_v1 }
 0xf2b   :  { %v6184_v39 = vpop.permute.xlu1 %6183 }
 0xf66   :  { %v6202_v41 = vpop.permute.xlu2 %6201 }
 0xf67   :  { %v6209_v7 = vmul.f32 %v6205_v63, %v6202_v41  ;;  %v6210_v60 = vmul.f32 %v6206_v53, %v6202_v41 }
 0xf6e   :  { %v6170_v13 = vpop.permute.xlu2 %6169 }
 0xf6f   :  { %v6178_v28 = vmul.f32 %v6174_v54, %v6170_v13  ;;  %v6177_v55 = vmul.f32 %v6173_v27, %v6170_v13  ;;  %v6236_v27 = vld.sshfl [vmem:[#allocation1] sm:$0xff pattern:$0x75316420] }
 0xf77   :  { %v6191_v12 = vpop.permute.xlu2 %6190 }
 0xf78   :  { %v6195_v57 = vperm.slane %v6191_v12, %v7742_v9 }
 0xf7a   :  { %v6197_v56 = vadd.f32 %v9327_v51, %v6195_v57 }
 0xf7c   :  { %v6158_v20 = vpop.permute.xlu0 %6157  ;;  %v6288_v2 = vmul.f32 %v6197_v56, %v7759_v30 }
 0xf7d   :  { %v6216_v36 = vmul.f32 %v6212_v4, %v6158_v20  ;;  %v6217_v61 = vmul.f32 %v6213_v32, %v6158_v20  ;;  %v6166_v45 = vmul.f32 %v6162_v37, %v6158_v20  ;;  %v6165_v38 = vmul.f32 %v6161_v46, %v6158_v20 }
 0xf7f   :  { %v6218_v18 = vadd.f32 %v6216_v36, %v6209_v7  ;;  %v6219_v44 = vadd.f32 %v6217_v61, %v6210_v60  ;;  %v6180_v8 = vadd.f32 %v6178_v28, %v6166_v45  ;;  %v6179_v25 = vadd.f32 %v6177_v55, %v6165_v38 }
 0xf81   :  { %v6225_v11 = vadd.f32 %v6223_v49, %v6218_v18  ;;  %v6226_v22 = vadd.f32 %v6223_v49, %v6219_v44  ;;  %v6187_v26 = vadd.f32 %v6184_v39, %v6180_v8  ;;  %v6186_v47 = vadd.f32 %v6184_v39, %v6179_v25 }
 0xf83   :  { %v6227_v24 = vmax.f32 %v6225_v11, 0.1  ;;  %v6228_v58 = vmax.f32 %v6226_v22, 0.1  ;;  %v6263_v10 = vrot.slane %v6187_v26, 4  ;;  %v6256_v37 = vsub.f32 %v6225_v11, %v6223_v49 }
 0xf84   :  { %v6257_v53 = vsub.f32 %v6226_v22, %v6223_v49  ;;  %v6258_v4 = vsub.f32 %v6184_v39, %v6186_v47  ;;  %v6259_v32 = vsub.f32 %v6184_v39, %v6187_v26 }
 0xf85   :  { %7537 = vrcp.f32 %v6227_v24  ;;  %v6264_v41 = vsel %vm426_vm5, %v6186_v47, %v6263_v10 }
 0xf86   :  { %7539 = vrcp.f32 %v6228_v58  ;;  %v6266_v22 = vmul.f32 %v6264_v41, %v7761_v35  ;;  %v6292_v8 = vrot.slane %v6259_v32, 4 }
 0xf8b   :  { %v7538_v5 = vpop.eup %7537 }
 0xf8c   :  { %v7540_v31 = vpop.eup %7539  ;;  %v6231_v46 = vmul.f32 %v7538_v5, %v7538_v5  ;;  %v6233_v34 = vmul.f32 %v7538_v5, %v6186_v47  ;;  %v6273_v38 = vmul.f32 %v7538_v5, %v6256_v37 }
 0xf8d   :  { %v6232_v54 = vmul.f32 %v7540_v31, %v7540_v31  ;;  %v6234_v59 = vmul.f32 %v7540_v31, %v6187_v26  ;;  %v6250_v63 = vrot.slane %v7540_v31, 4  ;;  %v6274_v18 = vmul.f32 %v7540_v31, %v6257_v53 }
 0xf8e   :  { %v6275_v51 = vmul.f32 %v6231_v46, %v6186_v47  ;;  %v6240_v36 = vsub.f32 %v6233_v34, %v6236_v27 }
 0xf8f   :  { %v6241_v13 = vsub.f32 %v6234_v59, %v6237_v52  ;;  %v6251_v20 = vsel %vm426_vm5, %v7538_v5, %v6250_v63  ;;  %v6269_v7 = vrot.slane %v6232_v54, 4  ;;  %v6276_v60 = vmul.f32 %v6232_v54, %v6187_v26 }
 0xf90   :  { %v6253_v61 = vmul.f32 %v6251_v20, %v6197_v56  ;;  %v6260_v45 = vmul.f32 %v9317_v3, %v6251_v20  ;;  %v6277_v12 = vmul.f32 %v6275_v51, %v6258_v4 }
 0xf91   :  { %v6244_v44 = vrot.slane %v6241_v13, 4  ;;  %v6270_v28 = vsel %vm426_vm5, %v6231_v46, %v6269_v7  ;;  %v6278_v49 = vmul.f32 %v6276_v60, %v6259_v32 }
 0xf92   :  { %v6254_v11 = vsub.f32 %v6253_v61, %v9341_v43  ;;  %v9539_v55 = vmul.f32 %v6288_v2, %v6270_v28  ;;  %v6296_v57 = vmul.f32 %v6260_v45, %v6260_v45  ;;  %v9545_v26 = vmul.f32 %v6270_v28, %v6266_v22  ;;  %v9581_v61 = vld [vmem:[%s9867_s2 + $0x8] sm:$0xff] }
 0xf93   :  { %v6245_v24 = vsel %vm426_vm5, %v6240_v36, %v6244_v44  ;;  %v6280_v58 = vsub.f32 %v6274_v18, %v6278_v49  ;;  %v6279_v56 = vsub.f32 %v6273_v38, %v6277_v12  ;;  %v6293_v43 = vsel %vm426_vm5, %v6258_v4, %v6292_v8 }
 0xf94   :  { %v6247_v39 = vmul.f32 %v9317_v3, %v6245_v24  ;;  %v9543_v25 = vmul.f32 %v9350_v14, %v6254_v11  ;;  %6298 = vst [vmem:[#allocation1] ss:$2 sm:$0xff] %v6296_v57  ;;  %v9552_v31 = vmul.f32 %v6293_v43, %v9539_v55  ;;  %v9558_v3 = vld [vmem:[%s9867_s2] sm:$0xff]  ;;  %v6309_v34 = vmul.f32 %v9545_v26, %v6260_v45 }
 0xf95   :  { %v6283_v47 = vrot.slane %v6280_v58, 4  ;;  %v9584_v18 = vmul.f32 %v9581_v61, %v6251_v20 }
 0xf96   :  { %v9548_v10 = vmul.f32 %v6260_v45, %v6247_v39  ;;  %v6438_v2 = vmul.f32 %v9545_v26, %v6247_v39  ;;  %v6439_v52 = vmul.f32 %v9539_v55, %v9543_v25  ;;  %v6453_v27 = vmul.f32 %v9552_v31, %v9543_v25 }
 0xf97   :  { %v6284_v5 = vsel %vm426_vm5, %v6279_v56, %v6283_v47  ;;  %v6346_v12 = vmul.f32 %v9539_v55, %v9584_v18  ;;  %v6358_v20 = vmul.f32 %v9552_v31, %v9584_v18 }
 0xf98   :  { %v9561_v14 = vmul.f32 %v9558_v3, %v6284_v5  ;;  %v9565_v46 = vadd.f32 %v6439_v52, %v6438_v2  ;;  %v6370_v2 = vmul.f32 %v9545_v26, %v9545_v26  ;;  %v6371_v52 = vmul.f32 %v9539_v55, %v9539_v55 }
 0xf9a   :  { %v6452_v37 = vmul.f32 %v9561_v14, %v6247_v39  ;;  %v6321_v41 = vmul.f32 %v9561_v14, %v6260_v45  ;;  %v6333_v45 = vmul.f32 %v9584_v18, %v9584_v18 }
 0xf9b   :  { %v6299_v54 = vld.sshfl [vmem:[#allocation1] sm:$0xff pattern:$0x75316420]  ;;  %v6300_v59 = vld.sshfl [vmem:[#allocation1 + $0x8] sm:$0xff pattern:$0x75316420] }
 0xf9c   :  { %v9571_v63 = vadd.f32 %v6453_v27, %v6452_v37  ;;  %v6303_v53 = vsel %vm426_vm5, %v6299_v54, 0.0  ;;  %v6304_v4 = vsel %vm426_vm5, %v6300_v59, 0.0  ;;  %6311 = vst [vmem:[#allocation1] ss:$2 sm:$0xff] %v6309_v34  ;;  %v6372_v34 = vadd.f32 %v6371_v52, %v6370_v2 }
 0xf9d   :  { %v6305_v32 = vadd.f32 %v6304_v4, %v6303_v53  ;;  %v6385_v4 = vmul.f32 %v9561_v14, %v9545_v26  ;;  %v6400_v26 = vmul.f32 %v9552_v31, %v9552_v31 }
 0xf9f   :  { %6306 = vadd.xlane.f32.xlu0 %v6305_v32  ;;  %v6386_v32 = vmul.f32 %v9552_v31, %v9539_v55  ;;  %v6426_v31 = vmul.f32 %v9584_v18, %v9543_v25 }
 0xfa3   :  { %v6312_v51 = vld.sshfl [vmem:[#allocation1] sm:$0xff pattern:$0x75316420]  ;;  %v6313_v13 = vld.sshfl [vmem:[#allocation1 + $0x8] sm:$0xff pattern:$0x75316420] }
 0xfa4   :  { %v6316_v7 = vsel %vm426_vm5, %v6312_v51, 0.0  ;;  %v6317_v60 = vsel %vm426_vm5, %v6313_v13, 0.0  ;;  %6323 = vst [vmem:[#allocation1] ss:$2 sm:$0xff] %v6321_v41  ;;  %v6387_v41 = vadd.f32 %v6386_v32, %v6385_v4 }
 0xfa5   :  { %v6318_v36 = vadd.f32 %v6317_v60, %v6316_v7 }
 0xfa7   :  { %6319 = vadd.xlane.f32.xlu2 %v6318_v36 }
 0xfab   :  { %v6324_v44 = vld.sshfl [vmem:[#allocation1] sm:$0xff pattern:$0x75316420]  ;;  %v6325_v28 = vld.sshfl [vmem:[#allocation1 + $0x8] sm:$0xff pattern:$0x75316420] }
 0xfac   :  { %6335 = vst [vmem:[#allocation1] ss:$2 sm:$0xff] %v6333_v45  ;;  %v6328_v24 = vsel %vm426_vm5, %v6324_v44, 0.0  ;;  %v6329_v58 = vsel %vm426_vm5, %v6325_v28, 0.0  ;;  %v6399_v45 = vmul.f32 %v9561_v14, %v9561_v14 }
 0xfad   :  { %v6330_v43 = vadd.f32 %v6329_v58, %v6328_v24 }
 0xfae   :  { %v6401_v44 = vadd.f32 %v6400_v26, %v6399_v45 }
 0xfb3   :  { %v6336_v49 = vld.sshfl [vmem:[#allocation1] sm:$0xff pattern:$0x75316420]  ;;  %v6337_v11 = vld.sshfl [vmem:[#allocation1 + $0x8] sm:$0xff pattern:$0x75316420] }
 0xfb4   :  { %v6340_v22 = vsel %vm426_vm5, %v6336_v49, 0.0  ;;  %v6341_v38 = vsel %vm426_vm5, %v6337_v11, 0.0  ;;  %6348 = vst [vmem:[#allocation1] ss:$2 sm:$0xff] %v6346_v12 }
 0xfb5   :  { %v6342_v8 = vadd.f32 %v6341_v38, %v6340_v22 }
 0xfb7   :  { %6343 = vadd.xlane.f32.xlu1 %v6342_v8 }
 0xfbb   :  { %v6349_v57 = vld.sshfl [vmem:[#allocation1] sm:$0xff pattern:$0x75316420]  ;;  %v6350_v39 = vld.sshfl [vmem:[#allocation1 + $0x8] sm:$0xff pattern:$0x75316420] }
 0xfbc   :  { %v6353_v56 = vsel %vm426_vm5, %v6349_v57, 0.0  ;;  %v6354_v47 = vsel %vm426_vm5, %v6350_v39, 0.0  ;;  %6360 = vst [vmem:[#allocation1] ss:$2 sm:$0xff] %v6358_v20 }
 0xfbd   :  { %v6355_v5 = vadd.f32 %v6354_v47, %v6353_v56 }
 0xfbf   :  { %6331 = vadd.xlane.f32.xlu1 %v6330_v43  ;;  %6356 = vadd.xlane.f32.xlu2 %v6355_v5 }
 0xfc3   :  { %v6361_v37 = vld.sshfl [vmem:[#allocation1] sm:$0xff pattern:$0x75316420]  ;;  %v6362_v27 = vld.sshfl [vmem:[#allocation1 + $0x8] sm:$0xff pattern:$0x75316420] }
 0xfc4   :  { %v6365_v54 = vsel %vm426_vm5, %v6361_v37, 0.0  ;;  %v6366_v59 = vsel %vm426_vm5, %v6362_v27, 0.0  ;;  %6374 = vst [vmem:[#allocation1] ss:$2 sm:$0xff] %v6372_v34 }
 0xfc5   :  { %v6367_v53 = vadd.f32 %v6366_v59, %v6365_v54 }
 0xfc7   :  { %6368 = vadd.xlane.f32.xlu2 %v6367_v53 }
 0xfcb   :  { %v6375_v51 = vld.sshfl [vmem:[#allocation1] sm:$0xff pattern:$0x75316420]  ;;  %v6376_v13 = vld.sshfl [vmem:[#allocation1 + $0x8] sm:$0xff pattern:$0x75316420] }
 0xfcc   :  { %v6379_v7 = vsel %vm426_vm5, %v6375_v51, 0.0  ;;  %v6380_v60 = vsel %vm426_vm5, %v6376_v13, 0.0  ;;  %6389 = vst [vmem:[#allocation1] ss:$2 sm:$0xff] %v6387_v41 }
 0xfcd   :  { %v6381_v36 = vadd.f32 %v6380_v60, %v6379_v7 }
 0xfcf   :  { %6382 = vadd.xlane.f32.xlu0 %v6381_v36 }
 0xfd3   :  { %v6390_v28 = vld.sshfl [vmem:[#allocation1] sm:$0xff pattern:$0x75316420]  ;;  %v6391_v12 = vld.sshfl [vmem:[#allocation1 + $0x8] sm:$0xff pattern:$0x75316420] }
 0xfd4   :  { %v6394_v55 = vsel %vm426_vm5, %v6390_v28, 0.0  ;;  %v6395_v49 = vsel %vm426_vm5, %v6391_v12, 0.0  ;;  %6403 = vst [vmem:[#allocation1] ss:$2 sm:$0xff] %v6401_v44 }
 0xfd5   :  { %v6396_v11 = vadd.f32 %v6395_v49, %v6394_v55 }
 0xfd7   :  { %6397 = vadd.xlane.f32.xlu0 %v6396_v11 }
 0xfdb   :  { %v6404_v22 = vld.sshfl [vmem:[#allocation1] sm:$0xff pattern:$0x75316420]  ;;  %v6405_v38 = vld.sshfl [vmem:[#allocation1 + $0x8] sm:$0xff pattern:$0x75316420] }
 0xfdc   :  { %v6408_v8 = vsel %vm426_vm5, %v6404_v22, 0.0  ;;  %v6409_v14 = vsel %vm426_vm5, %v6405_v38, 0.0  ;;  %6416 = vst [vmem:[#allocation1] ss:$2 sm:$0xff] %v9548_v10 }
 0xfdd   :  { %v6410_v20 = vadd.f32 %v6409_v14, %v6408_v8 }
 0xfdf   :  { %6411 = vadd.xlane.f32.xlu1 %v6410_v20 }
 0xfe3   :  { %v6417_v24 = vld.sshfl [vmem:[#allocation1] sm:$0xff pattern:$0x75316420]  ;;  %v6418_v58 = vld.sshfl [vmem:[#allocation1 + $0x8] sm:$0xff pattern:$0x75316420] }
 0xfe4   :  { %v6421_v57 = vsel %vm426_vm5, %v6417_v24, 0.0  ;;  %v6422_v39 = vsel %vm426_vm5, %v6418_v58, 0.0  ;;  %6428 = vst [vmem:[#allocation1] ss:$2 sm:$0xff] %v6426_v31 }
 0xfe5   :  { %v6423_v56 = vadd.f32 %v6422_v39, %v6421_v57 }
 0xfe7   :  { %6424 = vadd.xlane.f32.xlu2 %v6423_v56 }
 0xfeb   :  { %v6429_v47 = vld.sshfl [vmem:[#allocation1] sm:$0xff pattern:$0x75316420]  ;;  %v6430_v43 = vld.sshfl [vmem:[#allocation1 + $0x8] sm:$0xff pattern:$0x75316420] }
 0xfec   :  { %v6433_v5 = vsel %vm426_vm5, %v6429_v47, 0.0  ;;  %v6434_v10 = vsel %vm426_vm5, %v6430_v43, 0.0  ;;  %6442 = vst [vmem:[#allocation1] ss:$2 sm:$0xff] %v9565_v46 }
 0xfed   :  { %v6435_v2 = vadd.f32 %v6434_v10, %v6433_v5 }
 0xfef   :  { %6436 = vadd.xlane.f32.xlu0 %v6435_v2 }
 0xff3   :  { %v6443_v25 = vld.sshfl [vmem:[#allocation1] sm:$0xff pattern:$0x75316420]  ;;  %v6444_v18 = vld.sshfl [vmem:[#allocation1 + $0x8] sm:$0xff pattern:$0x75316420] }
 0xff4   :  { %v6447_v52 = vsel %vm426_vm5, %v6443_v25, 0.0  ;;  %v6448_v34 = vsel %vm426_vm5, %v6444_v18, 0.0  ;;  %6456 = vst [vmem:[#allocation1] ss:$2 sm:$0xff] %v9571_v63 }
 0xff5   :  { %v6449_v37 = vadd.f32 %v6448_v34, %v6447_v52 }
 0xff7   :  { %6450 = vadd.xlane.f32.xlu1 %v6449_v37 }
 0xffb   :  { %v6457_v27 = vld.sshfl [vmem:[#allocation1] sm:$0xff pattern:$0x75316420]  ;;  %v6458_v54 = vld.sshfl [vmem:[#allocation1 + $0x8] sm:$0xff pattern:$0x75316420] }
 0xffc   :  { %v6461_v59 = vsel %vm426_vm5, %v6457_v27, 0.0  ;;  %v6462_v53 = vsel %vm426_vm5, %v6458_v54, 0.0  ;;  %6887 = vst [vmem:[#allocation1] ss:$2 sm:$0xff] %v7723_v42 }
 0xffd   :  { %v6463_v46 = vadd.f32 %v6462_v53, %v6461_v59 }
 0xfff   :  { %6464 = vadd.xlane.f32.xlu2 %v6463_v46 }
0x1012   :  { %v6307_v4 = vpop.xlane.xlu0 %6306 }
0x1013   :  { %v6308_v32 = vadd.f32 1e-05, %v6307_v4 }
0x1015   :  { %7541 = vrcp.f32 %v6308_v32  ;;  %v6477_v44 = vand.u32 2147483648, %v6308_v32  ;;  %vm6471_vm2 = vweird.f32 %v6308_v32  ;;  %v6475_v12 = vand.u32 2147483647, %v6308_v32 }
0x1017   :  { %v6478_v8 = vor.u32 1.1754944e-38, %v6477_v44  ;;  %vm6476_vm7 = vcmp.eq.f32.partialorder %v6475_v12, 8.507059e+37 }
0x101a   :  { %v9632_v55 = vpop.xlane.xlu2 %6319 }
0x101b   :  { %v7542_v41 = vpop.eup %7541 }
0x101c   :  { %v6467_v51 = vmul.f32 %v7542_v41, %v6308_v32  ;;  %vm6472_vm1 = vweird.f32 %v7542_v41 }
0x101d   :  { %vm6473_vm3 = vmor %vm6471_vm2, %vm6472_vm1 }
0x101e   :  { %v6468_v63 = vsub.f32 1.0, %v6467_v51 }
0x1020   :  { %v6469_v60 = vmul.f32 %v7542_v41, %v6468_v63 }
0x1022   :  { %v6470_v26 = vadd.f32 %v7542_v41, %v6469_v60 }
0x1024   :  { %v6474_v22 = vsel %vm6473_vm3, %v7542_v41, %v6470_v26 }
0x1025   :  { %v9634_v20 = vsel %vm6476_vm7, %v6478_v8, %v6474_v22 }
0x1026   :  { %v6481_v57 = vmul.f32 %v9634_v20, %v9632_v55 }
0x1028   :  { %v6483_v43 = vmul.f32 %v6481_v57, %v9632_v55 }
0x102a   :  { %v6344_v13 = vpop.xlane.xlu1 %6343 }
0x102b   :  { %v6345_v7 = vadd.f32 1e-05, %v6344_v13 }
0x102d   :  { %7543 = vrcp.f32 %v6345_v7  ;;  %v6504_v11 = vand.u32 2147483648, %v6345_v7  ;;  %v6502_v38 = vand.u32 2147483647, %v6345_v7  ;;  %vm6498_vm6 = vweird.f32 %v6345_v7 }
0x102f   :  { %v6505_v24 = vor.u32 1.1754944e-38, %v6504_v11  ;;  %vm6503_vm9 = vcmp.eq.f32.partialorder %v6502_v38, 8.507059e+37 }
0x1032   :  { %v9640_v39 = vpop.xlane.xlu2 %6356  ;;  %v9646_v18 = vpop.xlane.xlu1 %6331 }
0x1033   :  { %v7544_v36 = vpop.eup %7543  ;;  %v6482_v37 = vmul.f32 %v9634_v20, %v9646_v18  ;;  %v6485_v59 = vmul.f32 %v6481_v57, %v9646_v18 }
0x1034   :  { %v6494_v45 = vmul.f32 %v7544_v36, %v6345_v7  ;;  %vm6499_vm4 = vweird.f32 %v7544_v36 }
0x1035   :  { %vm6500_vm8 = vmor %vm6498_vm6, %vm6499_vm4  ;;  %v6487_v7 = vmul.f32 %v6482_v37, %v9646_v18 }
0x1036   :  { %v6495_v28 = vsub.f32 1.0, %v6494_v45 }
0x1038   :  { %v6496_v49 = vmul.f32 %v7544_v36, %v6495_v28 }
0x103a   :  { %v6497_v14 = vadd.f32 %v7544_v36, %v6496_v49  ;;  %v6369_v13 = vpop.xlane.xlu2 %6368 }
0x103c   :  { %v6501_v31 = vsel %vm6500_vm8, %v7544_v36, %v6497_v14 }
0x103d   :  { %v9636_v58 = vsel %vm6503_vm9, %v6505_v24, %v6501_v31 }
0x103e   :  { %v6508_v56 = vmul.f32 %v9636_v58, %v9640_v39  ;;  %v6509_v63 = vmul.f32 %v9636_v58, %v6369_v13 }
0x1040   :  { %v6510_v10 = vmul.f32 %v6508_v56, %v9640_v39  ;;  %v6512_v60 = vmul.f32 %v6508_v56, %v6369_v13  ;;  %v6514_v49 = vmul.f32 %v6509_v63, %v6369_v13 }
0x1042   :  { %v6383_v47 = vpop.xlane.xlu0 %6382 }
0x1043   :  { %v6384_v5 = vadd.f32 1e-05, %v6383_v47 }
0x1045   :  { %v6484_v2 = vsub.f32 %v6384_v5, %v6483_v43 }
0x1047   :  { %v6511_v25 = vsub.f32 %v6484_v2, %v6510_v10 }
0x1049   :  { %7545 = vrcp.f32 %v6511_v25  ;;  %v6529_v46 = vand.u32 2147483647, %v6511_v25  ;;  %v6531_v4 = vand.u32 2147483648, %v6511_v25  ;;  %vm6525_vm11 = vweird.f32 %v6511_v25 }
0x104a   :  { %v6398_v27 = vpop.xlane.xlu0 %6397 }
0x104b   :  { %v6486_v32 = vsub.f32 %v6398_v27, %v6485_v59  ;;  %v6532_v45 = vor.u32 1.1754944e-38, %v6531_v4  ;;  %vm6530_vm13 = vcmp.eq.f32.partialorder %v6529_v46, 8.507059e+37 }
0x104d   :  { %v6513_v26 = vsub.f32 %v6486_v32, %v6512_v60 }
0x104f   :  { %v7546_v52 = vpop.eup %7545 }
0x1050   :  { %v6521_v34 = vmul.f32 %v7546_v52, %v6511_v25  ;;  %vm6526_vm10 = vweird.f32 %v7546_v52 }
0x1051   :  { %vm6527_vm12 = vmor %vm6525_vm11, %vm6526_vm10 }
0x1052   :  { %v6522_v54 = vsub.f32 1.0, %v6521_v34  ;;  %v6412_v53 = vpop.xlane.xlu1 %6411 }
0x1053   :  { %v6413_v51 = vadd.f32 1e-05, %v6412_v53 }
0x1054   :  { %v6523_v41 = vmul.f32 %v7546_v52, %v6522_v54 }
0x1055   :  { %v6488_v28 = vsub.f32 %v6413_v51, %v6487_v7 }
0x1056   :  { %v6524_v36 = vadd.f32 %v7546_v52, %v6523_v41 }
0x1057   :  { %v6515_v38 = vsub.f32 %v6488_v28, %v6514_v49 }
0x1058   :  { %v6528_v44 = vsel %vm6527_vm12, %v7546_v52, %v6524_v36 }
0x1059   :  { %v6533_v12 = vsel %vm6530_vm13, %v6532_v45, %v6528_v44 }
0x105a   :  { %v6535_v11 = vmul.f32 %v6533_v12, %v6513_v26  ;;  %v6425_v24 = vpop.xlane.xlu2 %6424 }
0x105b   :  { %v6489_v5 = vmul.f32 %v6481_v57, %v6425_v24  ;;  %v6491_v27 = vmul.f32 %v6482_v37, %v6425_v24 }
0x105c   :  { %v6536_v22 = vmul.f32 %v6535_v11, %v6513_v26 }
0x105e   :  { %v6537_v8 = vsub.f32 %v6515_v38, %v6536_v22 }
0x1060   :  { %7547 = vrcp.f32 %v6537_v8  ;;  %v6551_v59 = vand.u32 2147483648, %v6537_v8  ;;  %vm6545_vm15 = vweird.f32 %v6537_v8  ;;  %v6549_v4 = vand.u32 2147483647, %v6537_v8 }
0x1062   :  { %v6437_v10 = vpop.xlane.xlu0 %6436  ;;  %v6552_v60 = vor.u32 1.1754944e-38, %v6551_v59  ;;  %vm6550_vm1 = vcmp.eq.f32.partialorder %v6549_v4, 8.507059e+37 }
0x1063   :  { %v6516_v34 = vmul.f32 %v6508_v56, %v6437_v10  ;;  %v6518_v46 = vmul.f32 %v6509_v63, %v6437_v10 }
0x1066   :  { %v7548_v14 = vpop.eup %7547 }
0x1067   :  { %v6541_v31 = vmul.f32 %v7548_v14, %v6537_v8  ;;  %vm6546_vm14 = vweird.f32 %v7548_v14 }
0x1068   :  { %vm6547_vm0 = vmor %vm6545_vm15, %vm6546_vm14 }
0x1069   :  { %v6542_v47 = vsub.f32 1.0, %v6541_v31 }
0x106a   :  { %v6451_v43 = vpop.xlane.xlu1 %6450 }
0x106b   :  { %v6490_v2 = vsub.f32 %v6451_v43, %v6489_v5  ;;  %v6543_v25 = vmul.f32 %v7548_v14, %v6542_v47 }
0x106d   :  { %v6517_v52 = vsub.f32 %v6490_v2, %v6516_v34  ;;  %v6544_v54 = vadd.f32 %v7548_v14, %v6543_v25 }
0x106f   :  { %v6538_v41 = vmul.f32 %v6535_v11, %v6517_v52  ;;  %v6548_v51 = vsel %vm6547_vm0, %v7548_v14, %v6544_v54 }
0x1070   :  { %v6553_v36 = vsel %vm6550_vm1, %v6552_v60, %v6548_v51 }
0x1072   :  { %v6465_v53 = vpop.xlane.xlu2 %6464 }
0x1073   :  { %v6492_v32 = vsub.f32 %v6465_v53, %v6491_v27 }
0x1075   :  { %v6519_v7 = vsub.f32 %v6492_v32, %v6518_v46 }
0x1077   :  { %v6539_v57 = vsub.f32 %v6519_v7, %v6538_v41 }
0x1079   :  { %v6555_v45 = vmul.f32 %v6553_v36, %v6539_v57 }
0x107b   :  { %v6556_v56 = vmul.f32 %v6555_v45, %v6513_v26  ;;  %v9654_v37 = vsub.f32 %v9432_v48, %v6555_v45  ;;  %v6561_v44 = vmul.f32 %v6555_v45, %v6369_v13  ;;  %v6566_v13 = vmul.f32 %v6555_v45, %v9646_v18 }
0x107d   :  { %v6576_v28 = vand.u32 2139095040, %v9654_v37  ;;  %v6557_v63 = vsub.f32 %v6517_v52, %v6556_v56  ;;  %v6573_v14 = vand.u32 2147483647, %v9654_v37  ;;  %vm6575_vm15 = vcmp.lt.s32.totalorder %v9654_v37, 0 }
0x107f   :  { %v6577_v49 = vshrl.u32 %v6576_v28, 23  ;;  %v6558_v22 = vmul.f32 %v6557_v63, %v6533_v12  ;;  %vm6574_vm0 = vcmp.le.f32.partialorder %v6573_v14, 0.7853982 }
0x1081   :  { %v7378_v38 = vadd.s32 4294967169, %v6577_v49  ;;  %v9658_v11 = vsub.f32 %v9436_v16, %v6558_v22  ;;  %v6564_v8 = vmul.f32 %v6558_v22, %v9632_v55  ;;  %v6559_v31 = vmul.f32 %v6558_v22, %v9640_v39 }
0x1082   :  { %v6580_v16 = vand.u32 8388607, %v6573_v14 }
0x1083   :  { %v6583_v26 = vadd.s32 1, %v7378_v38  ;;  %6949 = vperm.xlu2 %7437, %v9658_v11   ;;  %v6565_v48 = vsub.f32 %v6425_v24, %v6564_v8  ;;  %v6560_v47 = vsub.f32 %v6437_v10, %v6559_v31 }
0x1084   :  { %v6581_v25 = vor.u32 8388608, %v6580_v16 }
0x1085   :  { %vm6584_vm2 = vcmp.gt.s32.totalorder %v6583_v26, 0  ;;  %v9665_v43 = vsub.f32 %v6565_v48, %v6566_v13  ;;  %v9669_v5 = vsub.f32 %v6560_v47, %v6561_v44 }
0x1086   :  { %v6585_v12 = vsel %vm6584_vm2, %v6583_v26, 0 }
0x1087   :  { %v6587_v55 = vand.u32 31, %v6585_v12  ;;  %v9671_v39 = vshrl.u32 %v6585_v12, 5 }
0x1089   :  { %v6588_v2 = vsub.s32 32, %v6587_v55  ;;  %v6590_v34 = vshll.u32 %v7613_v15, %v6587_v55  ;;  %v6593_v24 = vshll.u32 %v7614_v17, %v6587_v55  ;;  %v6596_v52 = vshll.u32 %v7615_v19, %v6587_v55 }
0x108a   :  { %v6599_v54 = vshll.u32 %v7616_v21, %v6587_v55  ;;  %v6602_v53 = vshll.u32 %v7617_v23, %v6587_v55  ;;  %vm6605_vm3 = vcmp.lt.s32.totalorder %v9671_v39, 1  ;;  %vm6608_vm4 = vcmp.lt.s32.totalorder %v9671_v39, 4 }
0x108b   :  { %v6591_v18 = vshrl.u32 %v7614_v17, %v6588_v2  ;;  %v6594_v10 = vshrl.u32 %v7615_v19, %v6588_v2  ;;  %v6597_v27 = vshrl.u32 %v7616_v21, %v6588_v2  ;;  %v6600_v59 = vshrl.u32 %v7617_v23, %v6588_v2 }
0x108c   :  { %v6603_v46 = vshrl.u32 %v7618_v29, %v6588_v2  ;;  %v9684_v17 = vshll.u32 %v6581_v25, 8  ;;  %vm6607_vm6 = vcmp.lt.s32.totalorder %v9671_v39, 3  ;;  %vm6606_vm7 = vcmp.lt.s32.totalorder %v9671_v39, 2 }
0x108d   :  { %v6592_v4 = vor.u32 %v6591_v18, %v6590_v34  ;;  %v6595_v32 = vor.u32 %v6594_v10, %v6593_v24  ;;  %v6598_v41 = vor.u32 %v6597_v27, %v6596_v52  ;;  %v6601_v51 = vor.u32 %v6600_v59, %v6599_v54 }
0x108e   :  { %v6604_v7 = vor.u32 %v6603_v46, %v6602_v53  ;;  %v6622_v56 = vand.u32 65535, %v9684_v17  ;;  %v6623_v44 = vshrl.u32 %v9684_v17, 16  ;;  %v6589_v46 = vshrl.u32 %v7613_v15, %v6588_v2 }
0x108f   :  { %v6613_v19 = vsel %vm6605_vm3, %v6592_v4, %v6595_v32  ;;  %v6617_v21 = vsel %vm6605_vm3, %v6595_v32, %v6598_v41  ;;  %v6614_v23 = vsel %vm6608_vm4, %v6601_v51, 920167782  ;;  %v6610_v54 = vsel %vm6608_vm4, %v6598_v41, 2102212464 }
0x1090   :  { %v6618_v29 = vsel %vm6608_vm4, %v6604_v7, 1326507024  ;;  %v6615_v60 = vsel %vm6607_vm6, %v6598_v41, %v6614_v23 }
0x1091   :  { %v6619_v57 = vsel %vm6607_vm6, %v6601_v51, %v6618_v29  ;;  %v6616_v36 = vsel %vm6606_vm7, %v6613_v19, %v6615_v60  ;;  %v6609_v29 = vsel %vm6605_vm3, %v6589_v46, %v6592_v4  ;;  %v6611_v60 = vsel %vm6607_vm6, %v6595_v32, %v6610_v54 }
0x1092   :  { %v6620_v45 = vsel %vm6606_vm7, %v6617_v21, %v6619_v57  ;;  %v6646_v49 = vand.u32 65535, %v6616_v36  ;;  %v6647_v22 = vshrl.u32 %v6616_v36, 16  ;;  %v6612_v15 = vsel %vm6606_vm7, %v6609_v29, %v6611_v60 }
0x1093   :  { %v6624_v28 = vand.u32 65535, %v6620_v45  ;;  %v6625_v63 = vshrl.u32 %v6620_v45, 16 }
0x1094   :  { %v6649_v31 = vmul.u32 %v6647_v22, %v6622_v56  ;;  %v6650_v26 = vmul.u32 %v6646_v49, %v6623_v44  ;;  %v6648_v16 = vmul.u32 %v6646_v49, %v6622_v56  ;;  %v6651_v34 = vmul.u32 %v6647_v22, %v6623_v44 }
0x1095   :  { %v6627_v38 = vmul.u32 %v6625_v63, %v6622_v56  ;;  %v6628_v8 = vmul.u32 %v6624_v28, %v6623_v44  ;;  %v6626_v48 = vmul.u32 %v6624_v28, %v6622_v56  ;;  %v6629_v47 = vmul.u32 %v6625_v63, %v6623_v44 }
0x1096   :  { %v6652_v12 = vshll.u32 %v6649_v31, 16  ;;  %v6654_v18 = vshll.u32 %v6650_v26, 16  ;;  %v6653_v21 = vshrl.u32 %v6649_v31, 16  ;;  %v6655_v36 = vshrl.u32 %v6650_v26, 16 }
0x1097   :  { %v6630_v13 = vshll.u32 %v6627_v38, 16  ;;  %v6632_v55 = vshll.u32 %v6628_v8, 16  ;;  %v6631_v51 = vshrl.u32 %v6627_v38, 16  ;;  %v6633_v57 = vshrl.u32 %v6628_v8, 16 }
0x1098   :  { %vm6656_vm9 = vc.u32 %v6648_v16, %v6652_v12  ;;  %v6658_v10 = vadd.s32 %v6652_v12, %v6648_v16  ;;  %v6666_v63 = vmul.u32 %v9684_v17, %v6612_v15 }
0x1099   :  { %vm6634_vm8 = vc.u32 %v6626_v48, %v6630_v13  ;;  %v6636_v25 = vadd.s32 %v6630_v13, %v6626_v48  ;;  %v6657_v27 = vsel %vm6656_vm9, 1, %v7612_v6 }
0x109a   :  { %v6635_v24 = vsel %vm6634_vm8, 1, %v7612_v6  ;;  %v6659_v53 = vadd.s32 %v6657_v27, %v6651_v34  ;;  %vm6660_vm11 = vc.u32 %v6658_v10, %v6654_v18  ;;  %v6662_v44 = vadd.s32 %v6658_v10, %v6654_v18 }
0x109b   :  { %v6637_v52 = vadd.s32 %v6635_v24, %v6629_v47  ;;  %vm6638_vm10 = vc.u32 %v6636_v25, %v6632_v55  ;;  %v6661_v19 = vsel %vm6660_vm11, 1, %v7612_v6  ;;  %vm6716_vm8 = vweird.f32 %v9654_v37 }
0x109c   :  { %v6639_v59 = vsel %vm6638_vm10, 1, %v7612_v6  ;;  %v6663_v23 = vadd.s32 %v6661_v19, %v6659_v53 }
0x109d   :  { %v6641_v7 = vadd.s32 %v6639_v59, %v6637_v52 }
0x109e   :  { %v6664_v45 = vadd.s32 %v6663_v23, %v6653_v21 }
0x109f   :  { %v6642_v41 = vadd.s32 %v6641_v7, %v6631_v51 }
0x10a0   :  { %v6665_v2 = vadd.s32 %v6664_v45, %v6655_v36 }
0x10a1   :  { %v6643_v56 = vadd.s32 %v6642_v41, %v6633_v57 }
0x10a2   :  { %v6669_v28 = vadd.s32 1, %v6665_v2 }
0x10a3   :  { %vm6668_vm12 = vc.u32 %v6643_v56, %v6662_v44  ;;  %v6667_v39 = vadd.s32 %v6662_v44, %v6643_v56 }
0x10a4   :  { %v6670_v49 = vsel %vm6668_vm12, %v6669_v28, %v6665_v2 }
0x10a5   :  { %v6671_v22 = vadd.s32 %v6670_v49, %v6666_v63 }
0x10a7   :  { %v6672_v4 = vadd.s32 536870912, %v6671_v22 }
0x10a9   :  { %v6673_v38 = vshrl.u32 %v6672_v4, 30 }
0x10ab   :  { %v6674_v31 = vshll.u32 %v6673_v38, 30  ;;  %v6697_v53 = vsub.s32 4, %v6673_v38 }
0x10ad   :  { %v6675_v32 = vsub.s32 %v6671_v22, %v6674_v31  ;;  %v6698_v21 = vsel %vm6575_vm15, %v6697_v53, %v6673_v38 }
0x10ae   :  { %v6700_v60 = vsel %vm6574_vm0, 0, %v6698_v21 }
0x10af   :  { %vm6676_vm13 = vcmp.lt.s32.totalorder %v6675_v32, 0  ;;  %v6677_v8 = vsub.s32 0, %v6675_v32  ;;  %v6871_v56 = vadd.s32 3, %v6700_v60  ;;  %v6717_v28 = vand.u32 3, %v6700_v60 }
0x10b1   :  { %v6678_v26 = vsel %vm6676_vm13, %v6677_v8, %v6675_v32  ;;  %v6872_v63 = vand.u32 3, %v6871_v56  ;;  %vm6718_vm1 = vcmp.lt.s32.totalorder %v6717_v28, 2  ;;  %vm6719_vm2 = vcmp.eq.s32.totalorder %v6717_v28, 0 }
0x10b2   :  { %v6679_v48 = vclz %v6678_v26  ;;  %vm6722_vm3 = vcmp.eq.s32.totalorder %v6717_v28, 2 }
0x10b3   :  { %vm6873_vm4 = vcmp.lt.s32.totalorder %v6872_v63, 2  ;;  %vm6874_vm6 = vcmp.eq.s32.totalorder %v6872_v63, 0  ;;  %vm6877_vm7 = vcmp.eq.s32.totalorder %v6872_v63, 2 }
0x10b4   :  { %v7379_v13 = vadd.s32 4294967294, %v6679_v48 }
0x10b6   :  { %vm7380_vm14 = vcmp.lt.s32.totalorder %v7379_v13, 0 }
0x10b7   :  { %v6682_v47 = vsel %vm7380_vm14, 0, %v7379_v13 }
0x10b8   :  { %v6683_v16 = vsub.s32 32, %v6682_v47  ;;  %v6687_v12 = vsub.s32 4294967266, %v6682_v47  ;;  %v6684_v55 = vshll.u32 %v6675_v32, %v6682_v47 }
0x10ba   :  { %v6685_v25 = vshrl.u32 %v6667_v39, %v6683_v16  ;;  %v6688_v34 = vadd.s32 127, %v6687_v12  ;;  %v6568_v16 = vmul.f32 %v9665_v43, %v9634_v20  ;;  %v6888_v20 = vld.sshfl [vmem:[#allocation1] sm:$0xff pattern:$0x75316420] }
0x10bb   :  { %v6889_v43 = vld.sshfl [vmem:[#allocation1 + $0x8] sm:$0xff pattern:$0x75316420] }
0x10bc   :  { %v6686_v17 = vor.u32 %v6685_v25, %v6684_v55  ;;  %v6689_v24 = vshll.u32 %v6688_v34, 23  ;;  %v9729_v12 = vsub.f32 %v9449_v40, %v6568_v16  ;;  %v6563_v55 = vmul.f32 %v9669_v5, %v9636_v58  ;;  %6899 = vst [vmem:[#allocation1] ss:$2 sm:$0xff] %v7729_v0 }
0x10be   :  { %v6690_v18 = vor.u32 4788187, %v6689_v24  ;;  %v6693_v52 = vcvt.s32.f32 %v6686_v17  ;;  %v9736_v25 = vsub.f32 %v9522_v33, %v6563_v55 }
0x10c0   :  { %v6691_v10 = vand.u32 2147483647, %v6690_v18 }
0x10c2   :  { %v6694_v27 = vmul.f32 %v6693_v52, %v6691_v10 }
0x10c3   :  { %v6900_v40 = vld.sshfl [vmem:[#allocation1] sm:$0xff pattern:$0x75316420] }
0x10c4   :  { %v6695_v54 = vxor.u32 2147483648, %v6694_v27 }
0x10c6   :  { %v6696_v59 = vsel %vm6575_vm15, %v6695_v54, %v6694_v27 }
0x10c7   :  { %v6699_v46 = vsel %vm6574_vm0, %v9654_v37, %v6696_v59 }
0x10c8   :  { %v6701_v51 = vmul.f32 %v6699_v46, %v6699_v46 }
0x10ca   :  { %v6702_v7 = vmul.f32 -0.001358992, %v6701_v51  ;;  %v6709_v19 = vmul.f32 -0.00019511016, %v6701_v51 }
0x10cc   :  { %v6703_v23 = vadd.f32 0.041655596, %v6702_v7  ;;  %v6710_v29 = vadd.f32 0.008332121, %v6709_v19 }
0x10ce   :  { %v6704_v57 = vmul.f32 %v6703_v23, %v6701_v51  ;;  %v6711_v41 = vmul.f32 %v6710_v29, %v6701_v51 }
0x10d0   :  { %v6705_v36 = vadd.f32 -0.4999988, %v6704_v57  ;;  %v6712_v45 = vadd.f32 -0.16666654, %v6711_v41 }
0x10d2   :  { %v6706_v44 = vmul.f32 %v6705_v36, %v6701_v51  ;;  %v6713_v15 = vmul.f32 %v6712_v45, %v6701_v51 }
0x10d4   :  { %v6707_v2 = vadd.f32 1.0, %v6706_v44  ;;  %v6714_v14 = vadd.f32 1.0, %v6713_v15 }
0x10d6   :  { %v6715_v49 = vmul.f32 %v6714_v14, %v6699_v46  ;;  %v6723_v22 = vxor.u32 2147483648, %v6707_v2 }
0x10d8   :  { %v6720_v4 = vxor.u32 2147483648, %v6715_v49  ;;  %v6724_v31 = vsel %vm6722_vm3, %v6723_v22, %v6715_v49  ;;  %v6879_v8 = vsel %vm6877_vm7, %v6723_v22, %v6715_v49 }
0x10da   :  { %v6721_v38 = vsel %vm6719_vm2, %v6707_v2, %v6720_v4  ;;  %v6876_v32 = vsel %vm6874_vm6, %v6707_v2, %v6720_v4 }
0x10db   :  { %v6725_v26 = vsel %vm6718_vm1, %v6721_v38, %v6724_v31  ;;  %v6880_v48 = vsel %vm6873_vm4, %v6876_v32, %v6879_v8 }
0x10dc   :  { %v6726_v13 = vsel %vm6716_vm8, nan, %v6725_v26  ;;  %v6881_v47 = vsel %vm6716_vm8, nan, %v6880_v48 }
0x10dd   :  { %v6925_v39 = vsub.f32 0.0, %v6881_v47  ;;  %6884 = vperm.xlu0 %7431, %v6726_v13   ;;  %v6950_v54 = vpop.permute.xlu2 %6949 }
0x10df   :  { %6928 = vperm.xlu1 %7436, %v6925_v39  }
0x10e5   :  { %6896 = vperm.xlu0 %7431, %v6881_v47  }
0x10e7   :  { %7438 = vset.pattern.permute.xlu1 %v7612_v6  ;;  %v6901_v6 = vld.sshfl [vmem:[#allocation1 + $0x8] sm:$0xff pattern:$0x75316420] }
0x10e8   :  { %6910 = vperm.xlu1 %7438, %v9729_v12   ;;  %6931 = vst [vmem:[#allocation1] ss:$2 sm:$0xff] %v7723_v42 }
0x10ed   :  { %7439 = vset.pattern.permute.xlu0 %v7619_v62 }
0x10ee   :  { %6917 = vperm.xlu0 %7439, %v9736_v25  }
0x10ef   :  { %v6932_v34 = vld.sshfl [vmem:[#allocation1] sm:$0xff pattern:$0x75316420]  ;;  %v6933_v17 = vld.sshfl [vmem:[#allocation1 + $0x8] sm:$0xff pattern:$0x75316420] }
0x10f0   :  { %6938 = vst [vmem:[#allocation1] ss:$2 sm:$0xff] %v7729_v0 }
0x10f6   :  { %7440 = vset.pattern.permute.xlu0 %v7610_v1 }
0x10f7   :  { %v6939_v33 = vld.sshfl [vmem:[#allocation1] sm:$0xff pattern:$0x75316420]  ;;  %v6940_v58 = vld.sshfl [vmem:[#allocation1 + $0x8] sm:$0xff pattern:$0x75316420] }
0x10f8   :  { %6962 = vst [vmem:[#allocation1] ss:$2 sm:$0xff] %v7737_v50 }
0x10ff   :  { %v6964_v44 = vld.sshfl [vmem:[#allocation1 + $0x8] sm:$0xff pattern:$0x75316420]  ;;  %v6963_v28 = vld.sshfl [vmem:[#allocation1] sm:$0xff pattern:$0x75316420] }
0x114f   :  { %v6885_v62 = vpop.permute.xlu0 %6884 }
0x1150   :  { %v6943_v18 = vmul.f32 %v6939_v33, %v6885_v62  ;;  %v6944_v10 = vmul.f32 %v6940_v58, %v6885_v62  ;;  %v6892_v7 = vmul.f32 %v6888_v20, %v6885_v62  ;;  %v6893_v0 = vmul.f32 %v6889_v43, %v6885_v62 }
0x1151   :  { %v6929_v5 = vpop.permute.xlu1 %6928 }
0x1152   :  { %v6936_v24 = vmul.f32 %v6932_v34, %v6929_v5  ;;  %v6937_v1 = vmul.f32 %v6933_v17, %v6929_v5 }
0x1154   :  { %v6945_v52 = vadd.f32 %v6943_v18, %v6936_v24  ;;  %v6946_v27 = vadd.f32 %v6944_v10, %v6937_v1  ;;  %v7582_v24 = vld [vmem:[%s9865_s0 + $0x8] sm:$0xff] }
0x1156   :  { %v6952_v59 = vadd.f32 %v6950_v54, %v6945_v52  ;;  %v6953_v53 = vadd.f32 %v6950_v54, %v6946_v27 }
0x1157   :  { %v6897_v42 = vpop.permute.xlu0 %6896 }
0x1158   :  { %v6954_v46 = vmax.f32 %v6952_v59, 0.1  ;;  %v6955_v51 = vmax.f32 %v6953_v53, 0.1  ;;  %v6904_v19 = vmul.f32 %v6900_v40, %v6897_v42  ;;  %v6905_v21 = vmul.f32 %v6901_v6, %v6897_v42 }
0x1159   :  { %v6983_v2 = vsub.f32 %v6952_v59, %v6950_v54  ;;  %v6984_v22 = vsub.f32 %v6953_v53, %v6950_v54 }
0x115a   :  { %7549 = vrcp.f32 %v6954_v46  ;;  %v6911_v50 = vpop.permute.xlu1 %6910  ;;  %v6906_v23 = vadd.f32 %v6904_v19, %v6892_v7  ;;  %v6907_v29 = vadd.f32 %v6905_v21, %v6893_v0  ;;  %v7583_v46 = vld [vmem:[%s9866_s1 + $0x8] sm:$0xff]  ;;  %s7621_s1 = smov [#allocation2]  }
0x115b   :  { %7551 = vrcp.f32 %v6955_v51  ;;  %s7313_s21 = sshll.u32 %s7621_s1, 4  ;;  %s7314_s21 = int_to_ptr.vmem [resolvable:$true] %s7313_s21 }
0x115c   :  { %v6914_v60 = vadd.f32 %v6911_v50, %v6907_v29  ;;  %v6913_v57 = vadd.f32 %v6911_v50, %v6906_v23 }
0x115e   :  { %v6990_v36 = vrot.slane %v6914_v60, 4  ;;  %v6985_v4 = vsub.f32 %v6911_v50, %v6913_v57  ;;  %v6986_v38 = vsub.f32 %v6911_v50, %v6914_v60 }
0x1160   :  { %v7550_v41 = vpop.eup %7549  ;;  %v6918_v32 = vpop.permute.xlu0 %6917  ;;  %v6991_v13 = vsel %vm426_vm5, %v6913_v57, %v6990_v36  ;;  %v7019_v27 = vrot.slane %v6986_v38, 4 }
0x1161   :  { %v7552_v45 = vpop.eup %7551  ;;  %v6958_v56 = vmul.f32 %v7550_v41, %v7550_v41  ;;  %v6960_v15 = vmul.f32 %v7550_v41, %v6913_v57  ;;  %v6922_v6 = vperm.slane %v6918_v32, %v7742_v9  ;;  %v6993_v34 = vmul.f32 %v6991_v13, %v7761_v35 }
0x1162   :  { %v6959_v14 = vmul.f32 %v7552_v45, %v7552_v45  ;;  %v6961_v63 = vmul.f32 %v7552_v45, %v6914_v60  ;;  %v6977_v49 = vrot.slane %v7552_v45, 4  ;;  %v7001_v47 = vmul.f32 %v7552_v45, %v6984_v22 }
0x1163   :  { %v7002_v31 = vmul.f32 %v6958_v56, %v6913_v57  ;;  %v6967_v39 = vsub.f32 %v6960_v15, %v6963_v28  ;;  %v7000_v58 = vmul.f32 %v7550_v41, %v6983_v2  ;;  %v6924_v1 = vadd.f32 %v7582_v24, %v6922_v6 }
0x1164   :  { %v6968_v8 = vsub.f32 %v6961_v63, %v6964_v44  ;;  %v7003_v26 = vmul.f32 %v6959_v14, %v6914_v60  ;;  %v6978_v48 = vsel %vm426_vm5, %v7550_v41, %v6977_v49  ;;  %v6996_v55 = vrot.slane %v6959_v14, 4 }
0x1165   :  { %v6987_v16 = vmul.f32 %v9558_v3, %v6978_v48  ;;  %v7004_v43 = vmul.f32 %v7002_v31, %v6985_v4  ;;  %v6980_v35 = vmul.f32 %v6978_v48, %v6924_v1  ;;  %v7015_v53 = vmul.f32 %v6924_v1, %v7759_v30 }
0x1166   :  { %v6971_v20 = vrot.slane %v6968_v8, 4  ;;  %v7005_v40 = vmul.f32 %v7003_v26, %v6986_v38  ;;  %v6997_v17 = vsel %vm426_vm5, %v6958_v56, %v6996_v55  ;;  %v7020_v21 = vsel %vm426_vm5, %v6985_v4, %v7019_v27 }
0x1167   :  { %v7023_v33 = vmul.f32 %v6987_v16, %v6987_v16  ;;  %v9756_v10 = vmul.f32 %v6997_v17, %v6993_v34  ;;  %v7006_v9 = vsub.f32 %v7000_v58, %v7004_v43  ;;  %v6981_v51 = vsub.f32 %v6980_v35, %v7583_v46 }
0x1168   :  { %v6972_v62 = vsel %vm426_vm5, %v6967_v39, %v6971_v20  ;;  %v7007_v5 = vsub.f32 %v7001_v47, %v7005_v40  ;;  %v7016_v0 = vmul.f32 %v7015_v53, %v6997_v17  ;;  %v9787_v22 = vmul.f32 %v9581_v61, %v6978_v48 }
0x1169   :  { %v6974_v18 = vmul.f32 %v9558_v3, %v6972_v62  ;;  %7025 = vst [vmem:[#allocation1] ss:$2 sm:$0xff] %v7023_v33  ;;  %v9770_v19 = vmul.f32 %v9581_v61, %v6981_v51  ;;  %v7036_v50 = vmul.f32 %v9756_v10, %v6987_v16  ;;  %v7097_v40 = vmul.f32 %v9756_v10, %v9756_v10 }
0x116a   :  { %v7010_v52 = vrot.slane %v7007_v5, 4  ;;  %v7022_v23 = vmul.f32 %v7020_v21, %v7016_v0  ;;  %v7060_v4 = vmul.f32 %v9787_v22, %v9787_v22  ;;  %v7073_v32 = vmul.f32 %v7016_v0, %v9787_v22 }
0x116b   :  { %v9758_v54 = vmul.f32 %v6987_v16, %v6974_v18  ;;  %v7165_v59 = vmul.f32 %v9756_v10, %v6974_v18  ;;  %v7166_v57 = vmul.f32 %v7016_v0, %v9770_v19  ;;  %v7098_v6 = vmul.f32 %v7016_v0, %v7016_v0 }
0x116c   :  { %v7011_v42 = vsel %vm426_vm5, %v7006_v9, %v7010_v52  ;;  %v7180_v45 = vmul.f32 %v7022_v23, %v9770_v19  ;;  %v7085_v61 = vmul.f32 %v7022_v23, %v9787_v22  ;;  %v7113_v1 = vmul.f32 %v7022_v23, %v7016_v0 }
0x116d   :  { %v9767_v7 = vmul.f32 %v9558_v3, %v7011_v42  ;;  %v9778_v36 = vadd.f32 %v7166_v57, %v7165_v59  ;;  %v7099_v34 = vadd.f32 %v7098_v6, %v7097_v40  ;;  %v7127_v42 = vmul.f32 %v7022_v23, %v7022_v23 }
0x116f   :  { %v7179_v30 = vmul.f32 %v9767_v7, %v6974_v18  ;;  %v7048_v15 = vmul.f32 %v9767_v7, %v6987_v16  ;;  %v7112_v24 = vmul.f32 %v9767_v7, %v9756_v10  ;;  %v7126_v53 = vmul.f32 %v9767_v7, %v9767_v7 }
0x1170   :  { %v7026_v29 = vld.sshfl [vmem:[#allocation1] sm:$0xff pattern:$0x75316420]  ;;  %v7027_v60 = vld.sshfl [vmem:[#allocation1 + $0x8] sm:$0xff pattern:$0x75316420] }
0x1171   :  { %v7030_v41 = vsel %vm426_vm5, %v7026_v29, 0.0  ;;  %v7031_v3 = vsel %vm426_vm5, %v7027_v60, 0.0  ;;  %7038 = vst [vmem:[#allocation1] ss:$2 sm:$0xff] %v7036_v50  ;;  %v9781_v44 = vadd.f32 %v7180_v45, %v7179_v30  ;;  %v7114_v18 = vadd.f32 %v7113_v1, %v7112_v24 }
0x1172   :  { %v7032_v56 = vadd.f32 %v7031_v3, %v7030_v41  ;;  %v7128_v46 = vadd.f32 %v7127_v42, %v7126_v53  ;;  %v7153_v45 = vmul.f32 %v9787_v22, %v9770_v19 }
0x1174   :  { %7033 = vadd.xlane.f32.xlu2 %v7032_v56 }
0x1178   :  { %v7039_v2 = vld.sshfl [vmem:[#allocation1] sm:$0xff pattern:$0x75316420]  ;;  %v7040_v14 = vld.sshfl [vmem:[#allocation1 + $0x8] sm:$0xff pattern:$0x75316420] }
0x1179   :  { %v7043_v28 = vsel %vm426_vm5, %v7039_v2, 0.0  ;;  %v7044_v63 = vsel %vm426_vm5, %v7040_v14, 0.0  ;;  %7050 = vst [vmem:[#allocation1] ss:$2 sm:$0xff] %v7048_v15 }
0x117a   :  { %v7045_v49 = vadd.f32 %v7044_v63, %v7043_v28 }
0x117c   :  { %7046 = vadd.xlane.f32.xlu0 %v7045_v49 }
0x1180   :  { %v7051_v38 = vld.sshfl [vmem:[#allocation1] sm:$0xff pattern:$0x75316420]  ;;  %v7052_v31 = vld.sshfl [vmem:[#allocation1 + $0x8] sm:$0xff pattern:$0x75316420] }
0x1181   :  { %7062 = vst [vmem:[#allocation1] ss:$2 sm:$0xff] %v7060_v4  ;;  %v7055_v17 = vsel %vm426_vm5, %v7051_v38, 0.0  ;;  %v7056_v33 = vsel %vm426_vm5, %v7052_v31, 0.0 }
0x1182   :  { %v7057_v5 = vadd.f32 %v7056_v33, %v7055_v17 }
0x1188   :  { %v7063_v8 = vld.sshfl [vmem:[#allocation1] sm:$0xff pattern:$0x75316420]  ;;  %v7064_v26 = vld.sshfl [vmem:[#allocation1 + $0x8] sm:$0xff pattern:$0x75316420] }
0x1189   :  { %v7067_v13 = vsel %vm426_vm5, %v7063_v8, 0.0  ;;  %v7068_v47 = vsel %vm426_vm5, %v7064_v26, 0.0  ;;  %7075 = vst [vmem:[#allocation1] ss:$2 sm:$0xff] %v7073_v32 }
0x118a   :  { %v7069_v39 = vadd.f32 %v7068_v47, %v7067_v13 }
0x118c   :  { %7070 = vadd.xlane.f32.xlu1 %v7069_v39 }
0x1190   :  { %v7076_v48 = vld.sshfl [vmem:[#allocation1] sm:$0xff pattern:$0x75316420]  ;;  %v7077_v16 = vld.sshfl [vmem:[#allocation1 + $0x8] sm:$0xff pattern:$0x75316420] }
0x1191   :  { %v7080_v55 = vsel %vm426_vm5, %v7076_v48, 0.0  ;;  %v7081_v20 = vsel %vm426_vm5, %v7077_v16, 0.0  ;;  %7087 = vst [vmem:[#allocation1] ss:$2 sm:$0xff] %v7085_v61 }
0x1192   :  { %v7082_v43 = vadd.f32 %v7081_v20, %v7080_v55 }
0x1194   :  { %7083 = vadd.xlane.f32.xlu2 %v7082_v43 }
0x1198   :  { %v7088_v58 = vld.sshfl [vmem:[#allocation1] sm:$0xff pattern:$0x75316420]  ;;  %v7089_v62 = vld.sshfl [vmem:[#allocation1 + $0x8] sm:$0xff pattern:$0x75316420] }
0x1199   :  { %7101 = vst [vmem:[#allocation1] ss:$2 sm:$0xff] %v7099_v34  ;;  %v7092_v51 = vsel %vm426_vm5, %v7088_v58, 0.0  ;;  %v7093_v10 = vsel %vm426_vm5, %v7089_v62, 0.0 }
0x119a   :  { %v7094_v60 = vadd.f32 %v7093_v10, %v7092_v51 }
0x119c   :  { %7058 = vadd.xlane.f32.xlu2 %v7057_v5 }
0x11a0   :  { %v7102_v9 = vld.sshfl [vmem:[#allocation1] sm:$0xff pattern:$0x75316420]  ;;  %v7103_v52 = vld.sshfl [vmem:[#allocation1 + $0x8] sm:$0xff pattern:$0x75316420] }
0x11a1   :  { %v7106_v35 = vsel %vm426_vm5, %v7102_v9, 0.0  ;;  %v7107_v27 = vsel %vm426_vm5, %v7103_v52, 0.0  ;;  %7116 = vst [vmem:[#allocation1] ss:$2 sm:$0xff] %v7114_v18 }
0x11a2   :  { %v7108_v59 = vadd.f32 %v7107_v27, %v7106_v35 }
0x11a4   :  { %7109 = vadd.xlane.f32.xlu1 %v7108_v59 }
0x11a8   :  { %v7117_v0 = vld.sshfl [vmem:[#allocation1] sm:$0xff pattern:$0x75316420]  ;;  %v7118_v21 = vld.sshfl [vmem:[#allocation1 + $0x8] sm:$0xff pattern:$0x75316420] }
0x11a9   :  { %v7121_v50 = vsel %vm426_vm5, %v7117_v0, 0.0  ;;  %v7122_v30 = vsel %vm426_vm5, %v7118_v21, 0.0  ;;  %7130 = vst [vmem:[#allocation1] ss:$2 sm:$0xff] %v7128_v46 }
0x11aa   :  { %v7123_v29 = vadd.f32 %v7122_v30, %v7121_v50 }
0x11ac   :  { %7124 = vadd.xlane.f32.xlu0 %v7123_v29  ;;  %7095 = vadd.xlane.f32.xlu1 %v7094_v60 }
0x11b0   :  { %v7131_v57 = vld.sshfl [vmem:[#allocation1] sm:$0xff pattern:$0x75316420]  ;;  %v7132_v7 = vld.sshfl [vmem:[#allocation1 + $0x8] sm:$0xff pattern:$0x75316420] }
0x11b1   :  { %v7135_v23 = vsel %vm426_vm5, %v7131_v57, 0.0  ;;  %v7136_v41 = vsel %vm426_vm5, %v7132_v7, 0.0  ;;  %7143 = vst [vmem:[#allocation1] ss:$2 sm:$0xff] %v9758_v54 }
0x11b2   :  { %v7137_v3 = vadd.f32 %v7136_v41, %v7135_v23 }
0x11b4   :  { %7138 = vadd.xlane.f32.xlu2 %v7137_v3 }
0x11b8   :  { %v7144_v56 = vld.sshfl [vmem:[#allocation1] sm:$0xff pattern:$0x75316420]  ;;  %v7145_v15 = vld.sshfl [vmem:[#allocation1 + $0x8] sm:$0xff pattern:$0x75316420] }
0x11b9   :  { %v7148_v2 = vsel %vm426_vm5, %v7144_v56, 0.0  ;;  %v7149_v14 = vsel %vm426_vm5, %v7145_v15, 0.0  ;;  %7155 = vst [vmem:[#allocation1] ss:$2 sm:$0xff] %v7153_v45 }
0x11ba   :  { %v7150_v28 = vadd.f32 %v7149_v14, %v7148_v2 }
0x11bc   :  { %7151 = vadd.xlane.f32.xlu1 %v7150_v28 }
0x11c0   :  { %v7156_v63 = vld.sshfl [vmem:[#allocation1] sm:$0xff pattern:$0x75316420]  ;;  %v7157_v49 = vld.sshfl [vmem:[#allocation1 + $0x8] sm:$0xff pattern:$0x75316420] }
0x11c1   :  { %v7160_v4 = vsel %vm426_vm5, %v7156_v63, 0.0  ;;  %v7161_v54 = vsel %vm426_vm5, %v7157_v49, 0.0  ;;  %7169 = vst [vmem:[#allocation1] ss:$2 sm:$0xff] %v9778_v36 }
0x11c2   :  { %v7162_v38 = vadd.f32 %v7161_v54, %v7160_v4 }
0x11c4   :  { %7163 = vadd.xlane.f32.xlu0 %v7162_v38 }
0x11c8   :  { %v7170_v19 = vld.sshfl [vmem:[#allocation1] sm:$0xff pattern:$0x75316420]  ;;  %v7171_v22 = vld.sshfl [vmem:[#allocation1 + $0x8] sm:$0xff pattern:$0x75316420] }
0x11c9   :  { %v7174_v31 = vsel %vm426_vm5, %v7170_v19, 0.0  ;;  %v7175_v32 = vsel %vm426_vm5, %v7171_v22, 0.0  ;;  %7183 = vst [vmem:[#allocation1] ss:$2 sm:$0xff] %v9781_v44 }
0x11ca   :  { %v7176_v8 = vadd.f32 %v7175_v32, %v7174_v31 }
0x11cc   :  { %7177 = vadd.xlane.f32.xlu2 %v7176_v8 }
0x11d0   :  { %v7184_v26 = vld.sshfl [vmem:[#allocation1] sm:$0xff pattern:$0x75316420]  ;;  %v7185_v13 = vld.sshfl [vmem:[#allocation1 + $0x8] sm:$0xff pattern:$0x75316420] }
0x11d1   :  { %v7188_v47 = vsel %vm426_vm5, %v7184_v26, 0.0  ;;  %v7189_v39 = vsel %vm426_vm5, %v7185_v13, 0.0 }
0x11d2   :  { %v7190_v61 = vadd.f32 %v7189_v39, %v7188_v47 }
0x11d4   :  { %7191 = vadd.xlane.f32.xlu1 %v7190_v61 }
0x11e7   :  { %v7034_v36 = vpop.xlane.xlu2 %7033 }
0x11e8   :  { %v7035_v48 = vadd.f32 1e-05, %v7034_v36 }
0x11ea   :  { %7553 = vrcp.f32 %v7035_v48  ;;  %v7204_v33 = vand.u32 2147483648, %v7035_v48  ;;  %vm7198_vm10 = vweird.f32 %v7035_v48  ;;  %v7202_v62 = vand.u32 2147483647, %v7035_v48 }
0x11ec   :  { %v7205_v9 = vor.u32 1.1754944e-38, %v7204_v33  ;;  %vm7203_vm13 = vcmp.eq.f32.partialorder %v7202_v62, 8.507059e+37 }
0x11ef   :  { %v9828_v53 = vpop.xlane.xlu0 %7046 }
0x11f0   :  { %v7554_v16 = vpop.eup %7553 }
0x11f1   :  { %v7194_v55 = vmul.f32 %v7554_v16, %v7035_v48  ;;  %vm7199_vm9 = vweird.f32 %v7554_v16 }
0x11f2   :  { %vm7200_vm5 = vmor %vm7198_vm10, %vm7199_vm9  ;;  %vm7300_vm9 = vcmask 7168   ;;  %vm7302_vm10 = vcmask 15360  }
0x11f3   :  { %v7195_v40 = vsub.f32 1.0, %v7194_v55 }
0x11f5   :  { %v7196_v44 = vmul.f32 %v7554_v16, %v7195_v40 }
0x11f7   :  { %v7197_v17 = vadd.f32 %v7554_v16, %v7196_v44 }
0x11f9   :  { %v7201_v1 = vsel %vm7200_vm5, %v7554_v16, %v7197_v17  ;;  %vm7304_vm5 = vcmask 23552  }
0x11fa   :  { %v9826_v35 = vsel %vm7203_vm13, %v7205_v9, %v7201_v1 }
0x11fb   :  { %v7208_v46 = vmul.f32 %v9826_v35, %v9828_v53 }
0x11fd   :  { %v7210_v21 = vmul.f32 %v7208_v46, %v9828_v53 }
0x11ff   :  { %v7071_v20 = vpop.xlane.xlu1 %7070 }
0x1200   :  { %v7072_v43 = vadd.f32 1e-05, %v7071_v20 }
0x1202   :  { %7555 = vrcp.f32 %v7072_v43  ;;  %v7231_v24 = vand.u32 2147483648, %v7072_v43  ;;  %v7229_v18 = vand.u32 2147483647, %v7072_v43  ;;  %vm7225_vm12 = vweird.f32 %v7072_v43 }
0x1204   :  { %v7232_v59 = vor.u32 1.1754944e-38, %v7231_v24  ;;  %vm7230_vm15 = vcmp.eq.f32.partialorder %v7229_v18, 8.507059e+37 }
0x1207   :  { %v9834_v51 = vpop.xlane.xlu2 %7083 }
0x1208   :  { %v7556_v6 = vpop.eup %7555 }
0x1209   :  { %v7221_v34 = vmul.f32 %v7556_v6, %v7072_v43  ;;  %vm7226_vm11 = vweird.f32 %v7556_v6 }
0x120a   :  { %vm7227_vm14 = vmor %vm7225_vm12, %vm7226_vm11  ;;  %vm7306_vm11 = vcmask 27648  }
0x120b   :  { %v7222_v58 = vsub.f32 1.0, %v7221_v34 }
0x120d   :  { %v7223_v5 = vmul.f32 %v7556_v6, %v7222_v58 }
0x120f   :  { %v7224_v52 = vadd.f32 %v7556_v6, %v7223_v5  ;;  %v9840_v57 = vpop.xlane.xlu2 %7058 }
0x1210   :  { %v7209_v45 = vmul.f32 %v9826_v35, %v9840_v57  ;;  %v7212_v15 = vmul.f32 %v7208_v46, %v9840_v57 }
0x1211   :  { %v7228_v27 = vsel %vm7227_vm14, %v7556_v6, %v7224_v52 }
0x1212   :  { %v9830_v42 = vsel %vm7230_vm15, %v7232_v59, %v7228_v27  ;;  %v7214_v19 = vmul.f32 %v7209_v45, %v9840_v57 }
0x1213   :  { %v7235_v10 = vmul.f32 %v9830_v42, %v9834_v51 }
0x1215   :  { %v7237_v30 = vmul.f32 %v7235_v10, %v9834_v51 }
0x1217   :  { %v7110_v0 = vpop.xlane.xlu1 %7109 }
0x1218   :  { %v7111_v50 = vadd.f32 1e-05, %v7110_v0 }
0x121a   :  { %v7211_v29 = vsub.f32 %v7111_v50, %v7210_v21 }
0x121c   :  { %v7238_v60 = vsub.f32 %v7211_v29, %v7237_v30 }
0x121e   :  { %7557 = vrcp.f32 %v7238_v60  ;;  %v7256_v28 = vand.u32 2147483647, %v7238_v60  ;;  %v7258_v63 = vand.u32 2147483648, %v7238_v60  ;;  %vm7252_vm1 = vweird.f32 %v7238_v60 }
0x121f   :  { %v9842_v41 = vpop.xlane.xlu1 %7095  ;;  %v7125_v3 = vpop.xlane.xlu0 %7124 }
0x1220   :  { %v7239_v14 = vmul.f32 %v7235_v10, %v9842_v41  ;;  %v7213_v4 = vsub.f32 %v7125_v3, %v7212_v15  ;;  %v7236_v22 = vmul.f32 %v9830_v42, %v9842_v41  ;;  %v7259_v31 = vor.u32 1.1754944e-38, %v7258_v63 }
0x1221   :  { %vm7257_vm3 = vcmp.eq.f32.partialorder %v7256_v28, 8.507059e+37 }
0x1222   :  { %v7240_v8 = vsub.f32 %v7213_v4, %v7239_v14  ;;  %v7241_v39 = vmul.f32 %v7236_v22, %v9842_v41 }
0x1224   :  { %v7558_v7 = vpop.eup %7557 }
0x1225   :  { %v7248_v23 = vmul.f32 %v7558_v7, %v7238_v60  ;;  %vm7253_vm0 = vweird.f32 %v7558_v7 }
0x1226   :  { %vm7254_vm2 = vmor %vm7252_vm1, %vm7253_vm0 }
0x1227   :  { %v7249_v56 = vsub.f32 1.0, %v7248_v23  ;;  %v7139_v2 = vpop.xlane.xlu2 %7138 }
0x1228   :  { %v7140_v54 = vadd.f32 1e-05, %v7139_v2 }
0x1229   :  { %v7250_v49 = vmul.f32 %v7558_v7, %v7249_v56 }
0x122a   :  { %v7215_v26 = vsub.f32 %v7140_v54, %v7214_v19 }
0x122b   :  { %v7251_v38 = vadd.f32 %v7558_v7, %v7250_v49 }
0x122c   :  { %v7242_v36 = vsub.f32 %v7215_v26, %v7241_v39 }
0x122d   :  { %v7255_v32 = vsel %vm7254_vm2, %v7558_v7, %v7251_v38 }
0x122e   :  { %v7260_v13 = vsel %vm7257_vm3, %v7259_v31, %v7255_v32 }
0x122f   :  { %v7262_v47 = vmul.f32 %v7260_v13, %v7240_v8  ;;  %v7152_v20 = vpop.xlane.xlu1 %7151 }
0x1230   :  { %v7216_v44 = vmul.f32 %v7208_v46, %v7152_v20  ;;  %v7218_v62 = vmul.f32 %v7209_v45, %v7152_v20 }
0x1231   :  { %v7263_v61 = vmul.f32 %v7262_v47, %v7240_v8 }
0x1233   :  { %v7264_v48 = vsub.f32 %v7242_v36, %v7263_v61 }
0x1235   :  { %7559 = vrcp.f32 %v7264_v48  ;;  %v7278_v1 = vand.u32 2147483648, %v7264_v48  ;;  %vm7272_vm6 = vweird.f32 %v7264_v48  ;;  %v7276_v52 = vand.u32 2147483647, %v7264_v48 }
0x1237   :  { %v7164_v6 = vpop.xlane.xlu0 %7163  ;;  %v7279_v21 = vor.u32 1.1754944e-38, %v7278_v1  ;;  %vm7277_vm8 = vcmp.eq.f32.partialorder %v7276_v52, 8.507059e+37 }
0x1238   :  { %v7243_v33 = vmul.f32 %v7235_v10, %v7164_v6  ;;  %v7245_v18 = vmul.f32 %v7236_v22, %v7164_v6 }
0x123b   :  { %v7560_v16 = vpop.eup %7559 }
0x123c   :  { %v7268_v55 = vmul.f32 %v7560_v16, %v7264_v48  ;;  %vm7273_vm4 = vweird.f32 %v7560_v16 }
0x123d   :  { %vm7274_vm7 = vmor %vm7272_vm6, %vm7273_vm4 }
0x123e   :  { %v7269_v43 = vsub.f32 1.0, %v7268_v55 }
0x123f   :  { %v7178_v40 = vpop.xlane.xlu2 %7177 }
0x1240   :  { %v7217_v34 = vsub.f32 %v7178_v40, %v7216_v44  ;;  %v7270_v17 = vmul.f32 %v7560_v16, %v7269_v43 }
0x1242   :  { %v7244_v58 = vsub.f32 %v7217_v34, %v7243_v33  ;;  %v7271_v5 = vadd.f32 %v7560_v16, %v7270_v17 }
0x1244   :  { %v7265_v27 = vmul.f32 %v7262_v47, %v7244_v58  ;;  %v7275_v0 = vsel %vm7274_vm7, %v7560_v16, %v7271_v5 }
0x1245   :  { %v7280_v50 = vsel %vm7277_vm8, %v7279_v21, %v7275_v0 }
0x1247   :  { %v7192_v24 = vpop.xlane.xlu1 %7191 }
0x1248   :  { %v7219_v9 = vsub.f32 %v7192_v24, %v7218_v62 }
0x124a   :  { %v7246_v59 = vsub.f32 %v7219_v9, %v7245_v18 }
0x124c   :  { %v7266_v46 = vsub.f32 %v7246_v59, %v7265_v27 }
0x124e   :  { %v7282_v30 = vmul.f32 %v7280_v50, %v7266_v46 }
0x1250   :  { %v7283_v10 = vmul.f32 %v7282_v30, %v7240_v8  ;;  %v7288_v3 = vmul.f32 %v7282_v30, %v9842_v41  ;;  %v7293_v45 = vmul.f32 %v7282_v30, %v9840_v57 }
0x1252   :  { %v7284_v29 = vsub.f32 %v7244_v58, %v7283_v10 }
0x1254   :  { %v7285_v60 = vmul.f32 %v7284_v29, %v7260_v13 }
0x1256   :  { %v7286_v7 = vmul.f32 %v7285_v60, %v9834_v51  ;;  %v7291_v23 = vmul.f32 %v7285_v60, %v9828_v53  ;;  %v7298_v53 = vsub.f32 %v9658_v11, %v7285_v60  ;;  %v7299_v51 = vsub.f32 %v9654_v37, %v7282_v30 }
0x1258   :  { %v7287_v56 = vsub.f32 %v7164_v6, %v7286_v7  ;;  %v7292_v15 = vsub.f32 %v7152_v20, %v7291_v23 }
0x125a   :  { %v7289_v2 = vsub.f32 %v7287_v56, %v7288_v3  ;;  %v7294_v14 = vsub.f32 %v7292_v15, %v7293_v45 }
0x125c   :  { %v7290_v28 = vmul.f32 %v7289_v2, %v9830_v42  ;;  %v7295_v63 = vmul.f32 %v7294_v14, %v9826_v35 }
0x125e   :  { %v7296_v49 = vsub.f32 %v9729_v12, %v7295_v63  ;;  %v7297_v4 = vsub.f32 %v9736_v25, %v7290_v28 }
0x1260   :  { %v7301_v42 = vsel %vm7300_vm9, %v7296_v49, %v7297_v4 }
0x1261   :  { %v7303_v35 = vsel %vm7302_vm10, %v7301_v42, %v7298_v53 }
0x1262   :  { %v7305_v12 = vsel %vm7304_vm5, %v7303_v35, %v7299_v51 }
0x1263   :  { %7307 = vst.msk [vmem:[#allocation2] sm:$0xf] %vm7306_vm11, %v7305_v12 }
0x1264   :  { %7318 = dma.vmem_to_hbm [thread:$0]  %s7314_s21, 64, %s7316_s24, [#allocation3]  }
0x1265   :  { %7608 = dma.done.wait [#allocation3], 64  }
0x1266   :  { %7609 = vsyncadd [#allocation3], 4294967232 }
0x1267   :  { %7323 = vsyncpa [#allocation3], 1 }

</bundles_post_ra>
